<compile_context>
chip_gen: v5e
topology: v5e:2x2
jax: 0.10.0
libtpu: 0.0.40
codegen_flags: <defaults>
</compile_context>

<pallas_src>
import jax
import jax.numpy as jnp
from jax.experimental import pallas as pl
from jax.experimental.pallas import tpu as pltpu


def _generator_kernel(x_ref,
                      w1_ref, b1_ref,
                      w2_ref, b2_ref,
                      w3_ref, b3_ref,
                      w4_ref, b4_ref,
                      o_ref):
    """All four Linear layers + activations fused, VMEM-resident per tile.

    Matmuls run in bf16 on the MXU with f32 accumulation; bias/ReLU/tanh stay
    in f32 on the VPU/EUP.
    """
    h = jnp.dot(x_ref[...].astype(jnp.bfloat16), w1_ref[...],
                preferred_element_type=jnp.float32)
    h = jnp.maximum(h + b1_ref[...], 0.0)                         # ReLU (f32)
    h = jnp.dot(h.astype(jnp.bfloat16), w2_ref[...],
                preferred_element_type=jnp.float32)
    h = jnp.maximum(h + b2_ref[...], 0.0)                         # ReLU (f32)
    h = jnp.dot(h.astype(jnp.bfloat16), w3_ref[...],
                preferred_element_type=jnp.float32)
    h = jnp.maximum(h + b3_ref[...], 0.0)                         # ReLU (f32)
    h = jnp.dot(h.astype(jnp.bfloat16), w4_ref[...],
                preferred_element_type=jnp.float32)
    o_ref[...] = jnp.tanh(h + b4_ref[...])                        # Tanh (f32)


def _pick_batch_tile(B, requested):
    """Large MXU-friendly tile, but keep >=2 grid steps (v7x has 2 TCs)."""
    tb = min(requested, B)
    if B // tb < 2 and B % 16 == 0:
        tb = B // 2
    # sublane constraint: tile must be a multiple of 8 or the full batch.
    if B % tb != 0 or (tb != B and tb % 8 != 0):
        tb = B
    return tb


def generator_forward(x, kparams, *, batch_tile=256):
    """Run the generator MLP as one Pallas kernel.

    x: (B, input_dim) float32
    kparams: dict with bf16 weights w1..w4 shaped (in, out) (w1 zero-padded to
             a 128-multiple input dim) and f32 biases b1..b4 shaped (1, out).
    """
    B, in_dim = x.shape
    k_in = kparams["w1"].shape[0]
    if in_dim != k_in:
        # zero-pad latent dim to the padded-K of w1 (lane-dense first matmul)
        x = jnp.pad(x, ((0, 0), (0, k_in - in_dim)))

    out_dim = kparams["w4"].shape[1]
    tb = _pick_batch_tile(B, batch_tile)

    # Weights/biases: same full block for every grid step (constant index_map
    # => no re-DMA) and single-buffered to save VMEM.
    def rep(shape):
        return pl.BlockSpec(shape, lambda i: (0, 0),
                            pipeline_mode=pl.Buffered(1))

    in_specs = [
        pl.BlockSpec((tb, k_in), lambda i: (i, 0)),   # x, tiled over batch
        rep(kparams["w1"].shape), rep(kparams["b1"].shape),
        rep(kparams["w2"].shape), rep(kparams["b2"].shape),
        rep(kparams["w3"].shape), rep(kparams["b3"].shape),
        rep(kparams["w4"].shape), rep(kparams["b4"].shape),
    ]
    out_spec = pl.BlockSpec((tb, out_dim), lambda i: (i, 0))

    return pl.pallas_call(
        _generator_kernel,
        out_shape=jax.ShapeDtypeStruct((B, out_dim), jnp.float32),
        grid=(B // tb,),
        in_specs=in_specs,
        out_specs=out_spec,
        compiler_params=pltpu.CompilerParams(
            dimension_semantics=("parallel",)),
    )(x,
      kparams["w1"], kparams["b1"],
      kparams["w2"], kparams["b2"],
      kparams["w3"], kparams["b3"],
      kparams["w4"], kparams["b4"])


def init_generator_params(key, input_dim, output_dim):
    """Deterministic synthetic parameters with nn.Linear-like init (f32).

    PyTorch stores weight as (out, in); we transpose to (in, out) for x @ W.
    """
    dims = [(input_dim, 256), (256, 512), (512, 1024), (1024, output_dim)]
    params = {}
    for idx, (fan_in, fan_out) in enumerate(dims, start=1):
        key, kw, kb = jax.random.split(key, 3)
        bound = 1.0 / jnp.sqrt(fan_in)
        w = jax.random.uniform(kw, (fan_out, fan_in), jnp.float32, -bound, bound)
        b = jax.random.uniform(kb, (fan_out,), jnp.float32, -bound, bound)
        params[f"w{idx}"] = w.T                      # (in, out)
        params[f"b{idx}"] = b.reshape(1, fan_out)    # 2-D for TPU broadcast
    return params


def prepare_kernel_params(params, *, lane=128):
    """Cast weights to bf16 (f32 biases) and zero-pad w1 rows to a lane multiple."""
    in_dim = params["w1"].shape[0]
    pad = (-in_dim) % lane
    kparams = {}
    for idx in range(1, 5):
        w = params[f"w{idx}"].astype(jnp.bfloat16)
        if idx == 1 and pad:
            w = jnp.pad(w, ((0, pad), (0, 0)))       # zero rows: no-op math
        kparams[f"w{idx}"] = w
        kparams[f"b{idx}"] = params[f"b{idx}"].astype(jnp.float32)
    return kparams


def generator_reference(x, params):
    """Pure-JAX f32 reference matching the PyTorch module's forward."""
    h = jnp.maximum(x @ params["w1"] + params["b1"], 0.0)
    h = jnp.maximum(h @ params["w2"] + params["b2"], 0.0)
    h = jnp.maximum(h @ params["w3"] + params["b3"], 0.0)
    return jnp.tanh(h @ params["w4"] + params["b4"])


if __name__ == "__main__":
    input_dim = 64     # latent/noise dimension
    output_dim = 128   # generated sample dimension
    batch = 512        # tiled 256 rows/step -> 2 grid steps (both v7x TCs busy)

    key = jax.random.PRNGKey(0)
    key, kx = jax.random.split(key)
    x = jax.random.normal(kx, (batch, input_dim), jnp.float32)

    params = init_generator_params(key, input_dim, output_dim)
    kparams = prepare_kernel_params(params)

    out = generator_forward(x, kparams)
    out = jax.block_until_ready(out)

    ref = generator_reference(x, params)
    assert out.shape == (batch, output_dim)
    # tolerance loosened vs the f32 reference because weights/matmul inputs
    # are bf16 in the kernel (f32 accumulation).
    assert jnp.allclose(out, ref, atol=2e-2, rtol=2e-2), "mismatch vs reference"

    print("KERNEL_OK")
</pallas_src>

<mosaic_0001>
module attributes {stable_mosaic.version = 11 : i64} {
  func.func @_generator_kernel(%arg0: i32, %arg1: memref<256x128xf32, #tpu.memory_space<vmem>>, %arg2: memref<128x256xbf16, #tpu.memory_space<vmem>>, %arg3: memref<1x256xf32, #tpu.memory_space<vmem>>, %arg4: memref<256x512xbf16, #tpu.memory_space<vmem>>, %arg5: memref<1x512xf32, #tpu.memory_space<vmem>>, %arg6: memref<512x1024xbf16, #tpu.memory_space<vmem>>, %arg7: memref<1x1024xf32, #tpu.memory_space<vmem>>, %arg8: memref<1024x128xbf16, #tpu.memory_space<vmem>>, %arg9: memref<1x128xf32, #tpu.memory_space<vmem>>, %arg10: memref<256x128xf32, #tpu.memory_space<vmem>>) attributes {dimension_semantics = [#tpu.dimension_semantics<parallel>], iteration_bounds = array<i64: 2>, scalar_prefetch = 0 : i64, scratch_operands = 0 : i64, tpu.core_type = #tpu.core_type<tc>, window_params = [{transform_indices = @transform_0, window_bounds = array<i64: 256, 128>}, {pipeline_mode = #tpu.pipeline_mode<synchronous>, transform_indices = @transform_1, window_bounds = array<i64: 128, 256>}, {pipeline_mode = #tpu.pipeline_mode<synchronous>, transform_indices = @transform_2, window_bounds = array<i64: 1, 256>}, {pipeline_mode = #tpu.pipeline_mode<synchronous>, transform_indices = @transform_3, window_bounds = array<i64: 256, 512>}, {pipeline_mode = #tpu.pipeline_mode<synchronous>, transform_indices = @transform_4, window_bounds = array<i64: 1, 512>}, {pipeline_mode = #tpu.pipeline_mode<synchronous>, transform_indices = @transform_5, window_bounds = array<i64: 512, 1024>}, {pipeline_mode = #tpu.pipeline_mode<synchronous>, transform_indices = @transform_6, window_bounds = array<i64: 1, 1024>}, {pipeline_mode = #tpu.pipeline_mode<synchronous>, transform_indices = @transform_7, window_bounds = array<i64: 1024, 128>}, {pipeline_mode = #tpu.pipeline_mode<synchronous>, transform_indices = @transform_8, window_bounds = array<i64: 1, 128>}, {transform_indices = @transform_9, window_bounds = array<i64: 256, 128>}]} {
    %c0 = arith.constant 0 : index
    %c0_0 = arith.constant 0 : index
    %0 = vector.load %arg1[%c0, %c0_0] : memref<256x128xf32, #tpu.memory_space<vmem>>, vector<256x128xf32>
    %1 = arith.truncf %0 : vector<256x128xf32> to vector<256x128xbf16>
    %c0_1 = arith.constant 0 : index
    %c0_2 = arith.constant 0 : index
    %2 = vector.load %arg2[%c0_1, %c0_2] : memref<128x256xbf16, #tpu.memory_space<vmem>>, vector<128x256xbf16>
    %cst = arith.constant dense<0.000000e+00> : vector<256x256xf32>
    %3 = tpu.matmul %1, %2, %cst {dimension_numbers = #tpu.dot_dimension_numbers<[1], [0], [0], [1], [0, 0, 1, 1], [], []>} : vector<256x128xbf16>, vector<128x256xbf16>, vector<256x256xf32> -> vector<256x256xf32>
    %c0_3 = arith.constant 0 : index
    %c0_4 = arith.constant 0 : index
    %4 = vector.load %arg3[%c0_3, %c0_4] : memref<1x256xf32, #tpu.memory_space<vmem>>, vector<1x256xf32>
    %5 = vector.broadcast %4 : vector<1x256xf32> to vector<256x256xf32>
    %6 = arith.addf %3, %5 : vector<256x256xf32>
    %cst_5 = arith.constant 0.000000e+00 : f32
    %7 = vector.broadcast %cst_5 : f32 to vector<256x256xf32>
    %8 = arith.maximumf %6, %7 : vector<256x256xf32>
    %9 = arith.truncf %8 : vector<256x256xf32> to vector<256x256xbf16>
    %c0_6 = arith.constant 0 : index
    %c0_7 = arith.constant 0 : index
    %10 = vector.load %arg4[%c0_6, %c0_7] : memref<256x512xbf16, #tpu.memory_space<vmem>>, vector<256x512xbf16>
    %cst_8 = arith.constant dense<0.000000e+00> : vector<256x512xf32>
    %11 = tpu.matmul %9, %10, %cst_8 {dimension_numbers = #tpu.dot_dimension_numbers<[1], [0], [0], [1], [0, 0, 1, 1], [], []>} : vector<256x256xbf16>, vector<256x512xbf16>, vector<256x512xf32> -> vector<256x512xf32>
    %c0_9 = arith.constant 0 : index
    %c0_10 = arith.constant 0 : index
    %12 = vector.load %arg5[%c0_9, %c0_10] : memref<1x512xf32, #tpu.memory_space<vmem>>, vector<1x512xf32>
    %13 = vector.broadcast %12 : vector<1x512xf32> to vector<256x512xf32>
    %14 = arith.addf %11, %13 : vector<256x512xf32>
    %cst_11 = arith.constant 0.000000e+00 : f32
    %15 = vector.broadcast %cst_11 : f32 to vector<256x512xf32>
    %16 = arith.maximumf %14, %15 : vector<256x512xf32>
    %17 = arith.truncf %16 : vector<256x512xf32> to vector<256x512xbf16>
    %c0_12 = arith.constant 0 : index
    %c0_13 = arith.constant 0 : index
    %18 = vector.load %arg6[%c0_12, %c0_13] : memref<512x1024xbf16, #tpu.memory_space<vmem>>, vector<512x1024xbf16>
    %cst_14 = arith.constant dense<0.000000e+00> : vector<256x1024xf32>
    %19 = tpu.matmul %17, %18, %cst_14 {dimension_numbers = #tpu.dot_dimension_numbers<[1], [0], [0], [1], [0, 0, 1, 1], [], []>} : vector<256x512xbf16>, vector<512x1024xbf16>, vector<256x1024xf32> -> vector<256x1024xf32>
    %c0_15 = arith.constant 0 : index
    %c0_16 = arith.constant 0 : index
    %20 = vector.load %arg7[%c0_15, %c0_16] : memref<1x1024xf32, #tpu.memory_space<vmem>>, vector<1x1024xf32>
    %21 = vector.broadcast %20 : vector<1x1024xf32> to vector<256x1024xf32>
    %22 = arith.addf %19, %21 : vector<256x1024xf32>
    %cst_17 = arith.constant 0.000000e+00 : f32
    %23 = vector.broadcast %cst_17 : f32 to vector<256x1024xf32>
    %24 = arith.maximumf %22, %23 : vector<256x1024xf32>
    %25 = arith.truncf %24 : vector<256x1024xf32> to vector<256x1024xbf16>
    %c0_18 = arith.constant 0 : index
    %c0_19 = arith.constant 0 : index
    %26 = vector.load %arg8[%c0_18, %c0_19] : memref<1024x128xbf16, #tpu.memory_space<vmem>>, vector<1024x128xbf16>
    %cst_20 = arith.constant dense<0.000000e+00> : vector<256x128xf32>
    %27 = tpu.matmul %25, %26, %cst_20 {dimension_numbers = #tpu.dot_dimension_numbers<[1], [0], [0], [1], [0, 0, 1, 1], [], []>} : vector<256x1024xbf16>, vector<1024x128xbf16>, vector<256x128xf32> -> vector<256x128xf32>
    %c0_21 = arith.constant 0 : index
    %c0_22 = arith.constant 0 : index
    %28 = vector.load %arg9[%c0_21, %c0_22] : memref<1x128xf32, #tpu.memory_space<vmem>>, vector<1x128xf32>
    %29 = vector.broadcast %28 : vector<1x128xf32> to vector<256x128xf32>
    %30 = arith.addf %27, %29 : vector<256x128xf32>
    %31 = math.tanh %30 : vector<256x128xf32>
    %c0_23 = arith.constant 0 : index
    %c0_24 = arith.constant 0 : index
    %32 = vector.load %arg10[%c0_23, %c0_24] : memref<256x128xf32, #tpu.memory_space<vmem>>, vector<256x128xf32>
    tpu.vector_store %arg10[%c0_23, %c0_24], %31 {strides = array<i32>} : memref<256x128xf32, #tpu.memory_space<vmem>>, vector<256x128xf32>,
    return
  }
  func.func @transform_0(%arg0: i32) -> (i32, i32) {
    %c0_i32 = arith.constant 0 : i32
    %c0_i32_0 = arith.constant 0 : i32
    return %arg0, %c0_i32 : i32, i32
  }
  func.func @transform_1(%arg0: i32) -> (i32, i32) {
    %c0_i32 = arith.constant 0 : i32
    %c0_i32_0 = arith.constant 0 : i32
    %c0_i32_1 = arith.constant 0 : i32
    return %c0_i32, %c0_i32_0 : i32, i32
  }
  func.func @transform_2(%arg0: i32) -> (i32, i32) {
    %c0_i32 = arith.constant 0 : i32
    %c0_i32_0 = arith.constant 0 : i32
    %c0_i32_1 = arith.constant 0 : i32
    return %c0_i32, %c0_i32_0 : i32, i32
  }
  func.func @transform_3(%arg0: i32) -> (i32, i32) {
    %c0_i32 = arith.constant 0 : i32
    %c0_i32_0 = arith.constant 0 : i32
    %c0_i32_1 = arith.constant 0 : i32
    return %c0_i32, %c0_i32_0 : i32, i32
  }
  func.func @transform_4(%arg0: i32) -> (i32, i32) {
    %c0_i32 = arith.constant 0 : i32
    %c0_i32_0 = arith.constant 0 : i32
    %c0_i32_1 = arith.constant 0 : i32
    return %c0_i32, %c0_i32_0 : i32, i32
  }
  func.func @transform_5(%arg0: i32) -> (i32, i32) {
    %c0_i32 = arith.constant 0 : i32
    %c0_i32_0 = arith.constant 0 : i32
    %c0_i32_1 = arith.constant 0 : i32
    return %c0_i32, %c0_i32_0 : i32, i32
  }
  func.func @transform_6(%arg0: i32) -> (i32, i32) {
    %c0_i32 = arith.constant 0 : i32
    %c0_i32_0 = arith.constant 0 : i32
    %c0_i32_1 = arith.constant 0 : i32
    return %c0_i32, %c0_i32_0 : i32, i32
  }
  func.func @transform_7(%arg0: i32) -> (i32, i32) {
    %c0_i32 = arith.constant 0 : i32
    %c0_i32_0 = arith.constant 0 : i32
    %c0_i32_1 = arith.constant 0 : i32
    return %c0_i32, %c0_i32_0 : i32, i32
  }
  func.func @transform_8(%arg0: i32) -> (i32, i32) {
    %c0_i32 = arith.constant 0 : i32
    %c0_i32_0 = arith.constant 0 : i32
    %c0_i32_1 = arith.constant 0 : i32
    return %c0_i32, %c0_i32_0 : i32, i32
  }
  func.func @transform_9(%arg0: i32) -> (i32, i32) {
    %c0_i32 = arith.constant 0 : i32
    %c0_i32_0 = arith.constant 0 : i32
    return %arg0, %c0_i32 : i32, i32
  }
}

</mosaic_0001>

<bundles_post_ra>
// kernel: tpu_custom_call.1
= control target key start
LH: loop header
LB: loop body
LE: loop exit
PB: predicated region body
PF: predicated region fallthrough
CT: control target
= control target key end

     0   :  { %s13158_s0 = inlined_call_operand.hbm [shape: f32[512,128], index: 0, kind: input, shape index: {}]   ;;  %s13159_s1 = inlined_call_operand.hbm [shape: bf16[128,256], index: 1, kind: input, shape index: {}]   ;;  %s13160_s2 = inlined_call_operand.hbm [shape: f32[1,256], index: 2, kind: input, shape index: {}]   ;;  %s13161_s3 = inlined_call_operand.hbm [shape: bf16[256,512], index: 3, kind: input, shape index: {}]   ;;  %s13162_s4 = inlined_call_operand.hbm [shape: f32[1,512], index: 4, kind: input, shape index: {}]   ;;  %s13163_s5 = inlined_call_operand.hbm [shape: bf16[512,1024], index: 5, kind: input, shape index: {}]   ;;  %s13164_s6 = inlined_call_operand.hbm [shape: f32[1,1024], index: 6, kind: input, shape index: {}]   ;;  %s13165_s7 = inlined_call_operand.hbm [shape: bf16[1024,128], index: 7, kind: input, shape index: {}]   ;;  %s13166_s8 = inlined_call_operand.vmem [shape: f32[1,128], index: 8, kind: input, shape index: {}]   ;;  %s13167_s9 = inlined_call_operand.hbm [shape: f32[512,128], index: 9, kind: output, shape index: {}]  }
   0x1   :  { %13225 = sst [smem:[#allocation149_spill]] %s13159_s1 }
   0x2   :  { %13226 = sst [smem:[#allocation150_spill]] %s13160_s2 }
   0x3   :  { %13227 = sst [smem:[#allocation151_spill]] %s13161_s3 }
   0x4   :  { %14 = vsyncpa [#allocation3], 0 }
   0x5   :  { %16 = vsyncpa [#allocation3 + $0x1], 0 }
   0x6   :  { %17 = vsyncpa [#allocation6], 0 }
   0x7   :  { %18 = vsyncpa [#allocation9], 0 }
   0x8   :  { %19 = vsyncpa [#allocation12], 0 }
   0x9   :  { %20 = vsyncpa [#allocation15], 0 }
   0xa   :  { %21 = vsyncpa [#allocation4], 0 }
   0xb   :  { %23 = vsyncpa [#allocation4 + $0x1], 0  ;;  %s11054_s30 = smov 0   ;;  %s11056_s10 = smov 0  }
   0xc   :  { %s11058_s11 = smov 0   ;;  %s11060_s12 = smov 0  }
   0xd LB: > { %s13228_s1 = sld [smem:[#allocation149_spill]]  ;;  %s11078_s16 = sadd.s32 4294967295, %s10985_s12   ;;  %s10985_s12 = sphi %s11060_s12, %s13668_s12   ;;  %s10981_s11 = sphi %s11058_s11, %s13667_s11   ;;  %s10977_s10 = sphi %s11056_s10, %s13666_s10   ;;  %s10973_s30 = sphi %s11054_s30, %s13665_s30  }
   0xe   : > { %p8422_p0 = scmp.ge.s32.totalorder %s10985_s12, 1  ;;  %p50_p1 = scmp.eq.s32.totalorder %s11078_s16, 0 }
   0xf   : > { %p254_p2 = scmp.lt.s32.totalorder %s10985_s12, 3  ;;  %s10987_s18 = smov [#allocation5]  }
  0x10   : > { %s267_s19 = sshll.u32 %s10987_s18, 4  ;;  %s13230_s3 = sld [smem:[#allocation151_spill]]  ;;  %s268_s19 = int_to_ptr.vmem [resolvable:$true] %s267_s19 }
  0x11   : > { %p11083_p3 = pnand %p8422_p0, %p254_p2  ;;  %s10988_s24 = smov [#allocation8]  }
  0x12   : > { %s293_s25 = sshll.u32 %s10988_s24, 4  ;;  %s13168_s26 = smov 128   ;;  %s294_s25 = int_to_ptr.vmem [resolvable:$true] %s293_s25 }
  0x13   : > { %s265_s15 = sshll.u32 %s13228_s1, 4  ;;  %p10499_p4 = pneg %p11083_p3  ;;  %s266_s15 = int_to_ptr.hbm [resolvable:$true] %s265_s15 }
  0x14   : > { %s13169_s27 = smov 8   ;;  %s10991_s28 = smov 256  }
  0x15   : > { %p11095_p6 = pnand %p10499_p4, %p50_p1  ;;  %s10992_s29 = smov 16  }
  0x16   : > { %s291_s22 = sshll.u32 %s13230_s3, 4  ;;  %s317_s18 = sshll.u32 %s13163_s5, 4  ;;  %s292_s22 = int_to_ptr.hbm [resolvable:$true] %s291_s22  ;;  %s318_s18 = int_to_ptr.hbm [resolvable:$true] %s317_s18 }
  0x17   : > { %10502 = dma.hbm_to_vmem [thread:$0]  (!%p11095_p6), %s266_s15, 2048, %s268_s19, [#allocation6], %s13168_s26, %s13168_s26, %s13169_s27  }
  0x18   : > { %10508 = dma.hbm_to_vmem [thread:$0]  (!%p11095_p6), %s292_s22, 8192, %s294_s25, [#allocation9], %s10991_s28, %s10991_s28, %s10992_s29  }
  0x19   : > { %s10993_s20 = smov [#allocation11]   ;;  %s13232_s2 = sld [smem:[#allocation150_spill]] }
  0x1a   : > { %s319_s21 = sshll.u32 %s10993_s20, 4  ;;  %s10994_s15 = smov 512   ;;  %s320_s21 = int_to_ptr.vmem [resolvable:$true] %s319_s21 }
  0x1b   : > { %s10995_s19 = smov 32   ;;  %s10996_s22 = smov [#allocation7]  }
  0x1c   : > { %10514 = dma.hbm_to_vmem [thread:$0]  (!%p11095_p6), %s318_s18, 32768, %s320_s21, [#allocation12], %s10994_s15, %s10994_s15, %s10995_s19  }
  0x1d   : > { %s282_s25 = sshll.u32 %s10996_s22, 4  ;;  %s306_s13 = sshll.u32 %s13162_s4, 4  ;;  %s283_s25 = int_to_ptr.vmem [resolvable:$true] %s282_s25  ;;  %s307_s13 = int_to_ptr.hbm [resolvable:$true] %s306_s13 }
  0x1e   : > { %s332_s20 = sshll.u32 %s13164_s6, 4  ;;  %s10997_s24 = smov [#allocation10]   ;;  %s333_s20 = int_to_ptr.hbm [resolvable:$true] %s332_s20 }
  0x1f   : > { %s280_s3 = sshll.u32 %s13232_s2, 4  ;;  %s308_s26 = sshll.u32 %s10997_s24, 4  ;;  %s281_s3 = int_to_ptr.hbm [resolvable:$true] %s280_s3  ;;  %s309_s26 = int_to_ptr.vmem [resolvable:$true] %s308_s26 }
  0x20   : > { %10505 = dma.hbm_to_vmem [thread:$0]  (!%p11095_p6), %s281_s3, 32, %s283_s25, [#allocation6]  }
  0x21   : > { %10511 = dma.hbm_to_vmem [thread:$0]  (!%p11095_p6), %s307_s13, 64, %s309_s26, [#allocation9]  }
  0x22   : > { %s10998_s18 = smov [#allocation13]   ;;  %s343_s19 = sshll.u32 %s13165_s7, 4  ;;  %s344_s19 = int_to_ptr.hbm [resolvable:$true] %s343_s19 }
  0x23   : > { %s334_s21 = sshll.u32 %s10998_s18, 4  ;;  %s10999_s22 = smov [#allocation14]   ;;  %s335_s21 = int_to_ptr.vmem [resolvable:$true] %s334_s21 }
  0x24   : > { %10517 = dma.hbm_to_vmem [thread:$0]  (!%p11095_p6), %s333_s20, 128, %s335_s21, [#allocation12]  }
  0x25   : > { %s345_s26 = sshll.u32 %s10999_s22, 4  ;;  %s11000_s25 = smov 64   ;;  %s346_s26 = int_to_ptr.vmem [resolvable:$true] %s345_s26 }
  0x26   : > { %s11001_s28 = smov 4   ;;  %s8421_s29 = sadd.s32 4294967294, %s10985_s12  }
  0x27   : > { %10520 = dma.hbm_to_vmem [thread:$0]  (!%p11095_p6), %s344_s19, 8192, %s346_s26, [#allocation15], %s11000_s25, %s11000_s25, %s11001_s28  }
  0x28   : > { %s11133_s13 = sadd.s32 1, %s10985_s12   ;;  %s36_s14 = sadd.s32 1, %s10981_s11 }
  0x29   : > { %s33_s1 = ssub.s32 %s10985_s12, %s11133_s13  ;;  %p43_p7 = scmp.ne.s32.totalorder %s10981_s11, %s10977_s10 }
  0x2a   : > { %p34_p8 = scmp.eq.s32.totalorder %s33_s1, 0  ;;  %p44_p9 = scmp.eq.s32.totalorder %s10985_s12, 0 }
  0x2b   : > { %p49_p10 = scmp.ne.s32.totalorder %s10977_s10, %s10973_s30  ;;  %p241_p11 = scmp.eq.s32.totalorder %s11078_s16, 1 }
  0x2c   : > { %s11145_s20 = scalar_select %p34_p8, %s10981_s11, %s36_s14  }
  0x2d   : > { %p11149_p12 = por %p50_p1, %p49_p10  ;;  %p11153_p13 = por %p241_p11, %p43_p7 }
  0x2e   : > { %p247_p0 = scmp.eq.s32.totalorder %s8421_s29, 1  ;;  %p45_p2 = por %p44_p9, %p43_p7 }
  0x2f   : > { %s362_s18 = sand.u32 1, %s10981_s11   ;;  %p10536_p6 = scmp.lt.s32.totalorder %s10985_s12, 2 }
  0x30   : > { %p11158_p4 = por %p247_p0, %p49_p10  ;;  %s8431_s3 = sshll.u32 %s362_s18, 8 }
  0x31   : > { %s10049_s15 = sshll.u32 %s10985_s12, 8  ;;  %s366_s28 = scalar_lea.vmem [#allocation2], %s8431_s3 }
  0x32   : > { %s371_s26 = scalar_lea.hbm %s13158_s0, %s10049_s15  ;;  %s374_s14 = sshll.u32 %s366_s28, 4  ;;  %s375_s14 = int_to_ptr.vmem [resolvable:$true] %s374_s14 }
  0x33   : > { %s372_s25 = sshll.u32 %s371_s26, 4  ;;  %p11167_p8 = pnand %p10536_p6, %p45_p2  ;;  %s373_s25 = int_to_ptr.hbm [resolvable:$true] %s372_s25 }
  0x34   : > { %s363_s1 = scalar_lea.sflag [#allocation3], %s362_s18  ;;  %s10873_s27 = sshra.s32 %s373_s25, 4  ;;  %s10874_s27 = int_to_ptr.hbm [resolvable:$true] %s10873_s27 }
  0x35   : > { %s10875_s2 = scalar_lea.hbm %s10874_s27, 256  ;;  %p10877_p9 = pneg %p11167_p8 }
  0x36   : > { %p10876_p7 = scmp.ne.s32.totalorder %s10874_s27, %s10875_s2  ;;  %s10880_s3 = scalar_lea.hbm %s13158_s0, 512 }
  0x37   : > { %p10881_p0 = scmp.lt.s32.totalorder %s10874_s27, %s13158_s0  ;;  %p10882_p2 = scmp.lt.s32.totalorder %s10880_s3, %s10875_s2 }
  0x38   : > { %p10878_p10 = pnand %p10877_p9, %p10876_p7 }
  0x39   : > { %p10883_p6 = por %p10882_p2, %p10881_p0 }
  0x3a   : > { %p10879_p11 = pneg %p10878_p10 }
  0x3c   : > { %p10884_p5 = pnand %p10883_p6, %p10879_p11 }
  0x3e   : > { %10887 = shalt.err (!%p10884_p5)
}
  0x3f   : > { %s13237_s18 = smov 8   ;;  %s13238_s28 = smov 128  }
  0x40   : > { %10524 = dma.hbm_to_vmem [thread:$0]  (!%p11167_p8), %s373_s25, 4096, %s375_s14, %s363_s1, %s13238_s28, %s13238_s28, %s13237_s18  }
  0x41   : > { %386 = sbr.rel (%p11083_p3) target bundleno = 3471 (0xd8f), region = 56 }
  0x46   : > { %s11187_s15 = sand.u32 1, %s10977_s10  }
  0x47   : > { %s8435_s2 = sshll.u32 %s11187_s15, 8  ;;  %s389_s27 = scalar_lea.sflag [#allocation3], %s11187_s15 }
  0x48   : > { %s11193_s19 = scalar_lea.vmem [#allocation2], %s8435_s2 }
  0x49   : > { %10948 = dma.done.wait (%p11149_p12), %s389_s27, 4096  }
  0x4a   : > { %10950 = vsyncadd (%p11149_p12), %s389_s27, 4294963200 }
  0x4b   : > { %10952 = dma.done.wait (%p50_p1), [#allocation6], 2080  }
  0x4c   : > { %10954 = vsyncadd (%p50_p1), [#allocation6], 4294965216 }
  0x4d   : > { %10956 = dma.done.wait (%p50_p1), [#allocation9], 8256  }
  0x4e   : > { %10958 = vsyncadd (%p50_p1), [#allocation9], 4294959040 }
  0x4f   : > { %10960 = dma.done.wait (%p50_p1), [#allocation12], 32896  }
  0x50   : > { %10962 = vsyncadd (%p50_p1), [#allocation12], 4294934400 }
  0x51   : > { %10964 = dma.done.wait (%p50_p1), [#allocation15], 8192  }
  0x52   : > { %10966 = vsyncadd (%p50_p1), [#allocation15], 4294959104  ;;  %v8502_v0 = vld [vmem:[#allocation5 + $0x70] sm:$0xf]  ;;  %v10065_v1 = vld [vmem:[#allocation5 + $0x74] sm:$0xf0] }
  0x53   : > { %v10064_v2 = vld [vmem:[#allocation5 + $0x74] sm:$0xf]  ;;  %v8503_v3 = vor.u32 %v10065_v1, %v8502_v0  ;;  %v8504_v4 = vld [vmem:[#allocation5 + $0x78] sm:$0xf0]  ;;  %v8494_v5 = vld [vmem:[#allocation5 + $0x60] sm:$0xf] }
  0x54   : > { %v10063_v6 = vld [vmem:[#allocation5 + $0x64] sm:$0xf0]  ;;  %v8507_v7 = vor.u32 %v10064_v2, %v8504_v4  ;;  %v10062_v8 = vld [vmem:[#allocation5 + $0x64] sm:$0xf]  ;;  %v8496_v9 = vld [vmem:[#allocation5 + $0x68] sm:$0xf0] }
  0x55   : > { %615 = vmatpush.bf16.msra.mxu0 %v8503_v3  ;;  %10451 = vmatpush.bf16.msra.mxu2 %v8503_v3  ;;  %v8495_v10 = vor.u32 %v10063_v6, %v8494_v5  ;;  %v8499_v11 = vor.u32 %v10062_v8, %v8496_v9  ;;  %v8486_v12 = vld [vmem:[#allocation5 + $0x50] sm:$0xf]  ;;  %v10061_v13 = vld [vmem:[#allocation5 + $0x54] sm:$0xf0]  ;;  %v10060_v14 = vld [vmem:[#allocation5 + $0x54] sm:$0xf] }
  0x56   : > { %704 = vmatpush.bf16.msra.mxu1 %v8507_v7  ;;  %10459 = vmatpush.bf16.msra.mxu3 %v8507_v7  ;;  %v8488_v15 = vld [vmem:[#allocation5 + $0x58] sm:$0xf0]  ;;  %v8487_v16 = vor.u32 %v10061_v13, %v8486_v12  ;;  %v8478_v18 = vld [vmem:[#allocation5 + $0x40] sm:$0xf]  ;;  %v10059_v19 = vld [vmem:[#allocation5 + $0x44] sm:$0xf0] }
  0x57   : > { %v8491_v17 = vor.u32 %v10060_v14, %v8488_v15  ;;  %v10058_v20 = vld [vmem:[#allocation5 + $0x44] sm:$0xf]  ;;  %v8480_v21 = vld [vmem:[#allocation5 + $0x48] sm:$0xf0]  ;;  %v8479_v22 = vor.u32 %v10059_v19, %v8478_v18  ;;  %v8470_v24 = vld [vmem:[#allocation5 + $0x30] sm:$0xf] }
  0x58   : > { %v8483_v23 = vor.u32 %v10058_v20, %v8480_v21  ;;  %v10057_v25 = vld [vmem:[#allocation5 + $0x34] sm:$0xf0]  ;;  %v10056_v26 = vld [vmem:[#allocation5 + $0x34] sm:$0xf]  ;;  %v8472_v27 = vld [vmem:[#allocation5 + $0x38] sm:$0xf0] }
  0x59   : > { %616 = vmatpush.bf16.msra.mxu0 %v8495_v10  ;;  %10452 = vmatpush.bf16.msra.mxu2 %v8495_v10  ;;  %v8471_v28 = vor.u32 %v10057_v25, %v8470_v24  ;;  %v8475_v29 = vor.u32 %v10056_v26, %v8472_v27  ;;  %v8462_v30 = vld [vmem:[#allocation5 + $0x20] sm:$0xf]  ;;  %v10055_v31 = vld [vmem:[#allocation5 + $0x24] sm:$0xf0]  ;;  %v10054_v32 = vld [vmem:[#allocation5 + $0x24] sm:$0xf] }
  0x5a   : > { %705 = vmatpush.bf16.msra.mxu1 %v8499_v11  ;;  %10460 = vmatpush.bf16.msra.mxu3 %v8499_v11  ;;  %v8464_v33 = vld [vmem:[#allocation5 + $0x28] sm:$0xf0]  ;;  %v8463_v34 = vor.u32 %v10055_v31, %v8462_v30  ;;  %v8454_v36 = vld [vmem:[#allocation5 + $0x10] sm:$0xf]  ;;  %v10053_v37 = vld [vmem:[#allocation5 + $0x14] sm:$0xf0] }
  0x5b   : > { %v8467_v35 = vor.u32 %v10054_v32, %v8464_v33  ;;  %v10052_v38 = vld [vmem:[#allocation5 + $0x14] sm:$0xf]  ;;  %v8456_v39 = vld [vmem:[#allocation5 + $0x18] sm:$0xf0]  ;;  %v8455_v40 = vor.u32 %v10053_v37, %v8454_v36  ;;  %v8446_v42 = vld [vmem:[#allocation5] sm:$0xf] }
  0x5c   : > { %v8459_v41 = vor.u32 %v10052_v38, %v8456_v39  ;;  %v10051_v43 = vld [vmem:[#allocation5 + $0x4] sm:$0xf0]  ;;  %v10050_v44 = vld [vmem:[#allocation5 + $0x4] sm:$0xf]  ;;  %v8448_v45 = vld [vmem:[#allocation5 + $0x8] sm:$0xf0] }
  0x5d   : > { %617 = vmatpush.bf16.msra.mxu0 %v8487_v16  ;;  %10453 = vmatpush.bf16.msra.mxu2 %v8487_v16  ;;  %v465_v46 = vld [vmem:[%s11193_s19] sm:$0xff]  ;;  %v10096_v48 = vld [vmem:[#allocation8 + $0xec] sm:$0xf0]  ;;  %v8447_v51 = vor.u32 %v10051_v43, %v8446_v42  ;;  %v466_v52 = vld [vmem:[%s11193_s19 + $0x8] sm:$0xff]  ;;  %v8451_v55 = vor.u32 %v10050_v44, %v8448_v45  ;;  %s13036_s25 = scalar_lea.vmem [#allocation16], %s8435_s2  ;;  %s10450_s14 = sshll.u32 %s11078_s16, 8 }
  0x5e   : > { %706 = vmatpush.bf16.msra.mxu1 %v8491_v17  ;;  %10461 = vmatpush.bf16.msra.mxu3 %v8491_v17  ;;  %v8622_v47 = vld [vmem:[#allocation8 + $0xe0] sm:$0xf]  ;;  %v10128_v50 = vld [vmem:[#allocation8 + $0x1ec] sm:$0xf0]  ;;  %v482_v54 = vld [vmem:[%s11193_s19 + $0x88] sm:$0xff]  ;;  %v497_v63 = vpack.c.bf16 %v466_v52, %v465_v46  ;;  %s8277_s3 = scalar_lea.hbm %s13167_s9, %s10450_s14  ;;  %s8278_s22 = sshll.u32 %s13036_s25, 4  ;;  %s8279_s22 = int_to_ptr.vmem [resolvable:$true] %s8278_s22 }
  0x5f   : > { %v8750_v49 = vld [vmem:[#allocation8 + $0x1e0] sm:$0xf]  ;;  %v10094_v56 = vld [vmem:[#allocation8 + $0xe4] sm:$0xf]  ;;  %v8624_v57 = vld [vmem:[#allocation8 + $0xf0] sm:$0xf0]  ;;  %v8623_v58 = vor.u32 %v10096_v48, %v8622_v47 }
  0x60   : > { %v481_v53 = vld [vmem:[%s11193_s19 + $0x80] sm:$0xff]  ;;  %v8751_v59 = vor.u32 %v10128_v50, %v8750_v49  ;;  %v8752_v61 = vld [vmem:[#allocation8 + $0x1f0] sm:$0xf0]  ;;  %v10092_v1 = vld [vmem:[#allocation8 + $0xcc] sm:$0xf0]  ;;  %v8627_v4 = vor.u32 %v10094_v56, %v8624_v57  ;;  %s8280_s26 = sshll.u32 %s8277_s3, 4  ;;  %s8281_s26 = int_to_ptr.hbm [resolvable:$true] %s8280_s26 }
  0x61   : > { %618 = vmatpush.bf16.msra.mxu0 %v8479_v22  ;;  %10454 = vmatpush.bf16.msra.mxu2 %v8479_v22  ;;  %v10126_v60 = vld [vmem:[#allocation8 + $0x1e4] sm:$0xf]  ;;  %v8606_v62 = vld [vmem:[#allocation8 + $0xc0] sm:$0xf]  ;;  %v505_v0 = vpack.c.bf16 %v482_v54, %v481_v53  ;;  %v10124_v3 = vld [vmem:[#allocation8 + $0x1cc] sm:$0xf0] }
  0x62   : > { %707 = vmatpush.bf16.msra.mxu1 %v8483_v23  ;;  %10462 = vmatpush.bf16.msra.mxu3 %v8483_v23  ;;  %v8734_v2 = vld [vmem:[#allocation8 + $0x1c0] sm:$0xf]  ;;  %v8755_v5 = vor.u32 %v10126_v60, %v8752_v61  ;;  %v8607_v6 = vor.u32 %v10092_v1, %v8606_v62  ;;  %v10090_v8 = vld [vmem:[#allocation8 + $0xc4] sm:$0xf]  ;;  %v8608_v9 = vld [vmem:[#allocation8 + $0xd0] sm:$0xf0] }
  0x63   : > { %v8735_v7 = vor.u32 %v10124_v3, %v8734_v2  ;;  %v10122_v10 = vld [vmem:[#allocation8 + $0x1c4] sm:$0xf]  ;;  %v8736_v11 = vld [vmem:[#allocation8 + $0x1d0] sm:$0xf0]  ;;  %v8611_v12 = vor.u32 %v10090_v8, %v8608_v9  ;;  %v8590_v14 = vld [vmem:[#allocation8 + $0xa0] sm:$0xf] }
  0x64   : > { %v8739_v13 = vor.u32 %v10122_v10, %v8736_v11  ;;  %v10088_v15 = vld [vmem:[#allocation8 + $0xac] sm:$0xf0]  ;;  %v8718_v16 = vld [vmem:[#allocation8 + $0x1a0] sm:$0xf]  ;;  %v468_v21 = vld [vmem:[%s11193_s19 + $0x18] sm:$0xff]  ;;  %s8266_s18 = scalar_lea.sflag [#allocation4], %s11187_s15 }
  0x65   : > { %619 = vmatpush.bf16.msra.mxu0 %v8471_v28  ;;  %10455 = vmatpush.bf16.msra.mxu2 %v8471_v28  ;;  %v8591_v17 = vor.u32 %v10088_v15, %v8590_v14  ;;  %v10120_v18 = vld [vmem:[#allocation8 + $0x1ac] sm:$0xf0]  ;;  %v484_v23 = vld [vmem:[%s11193_s19 + $0x98] sm:$0xff]  ;;  %v10086_v26 = vld [vmem:[#allocation8 + $0xa4] sm:$0xf]  ;;  %s10917_s28 = sshra.s32 %s8281_s26, 4  ;;  %s10918_s28 = int_to_ptr.hbm [resolvable:$true] %s10917_s28 }
  0x66   : > { %708 = vmatpush.bf16.msra.mxu1 %v8475_v29  ;;  %10463 = vmatpush.bf16.msra.mxu3 %v8475_v29  ;;  %v8719_v19 = vor.u32 %v10120_v18, %v8718_v16  ;;  %v467_v20 = vld [vmem:[%s11193_s19 + $0x10] sm:$0xff]  ;;  %v10118_v28 = vld [vmem:[#allocation8 + $0x1a4] sm:$0xf]  ;;  %v8574_v32 = vld [vmem:[#allocation8 + $0x80] sm:$0xf]  ;;  %s10919_s16 = scalar_lea.hbm %s10918_s28, 256  ;;  %p10924_p12 = scmp.lt.s32.totalorder %s10918_s28, %s13167_s9 }
  0x67   : > { %v483_v22 = vld [vmem:[%s11193_s19 + $0x90] sm:$0xff]  ;;  %v498_v24 = vpack.c.bf16 %v468_v21, %v467_v20  ;;  %v469_v38 = vld [vmem:[%s11193_s19 + $0x20] sm:$0xff]  ;;  %v470_v39 = vld [vmem:[%s11193_s19 + $0x28] sm:$0xff]  ;;  %p10920_p1 = scmp.ne.s32.totalorder %s10918_s28, %s10919_s16 }
  0x68   : > { %v506_v25 = vpack.c.bf16 %v484_v23, %v483_v22  ;;  %v8592_v27 = vld [vmem:[#allocation8 + $0xb0] sm:$0xf0]  ;;  %v10084_v33 = vld [vmem:[#allocation8 + $0x8c] sm:$0xf0]  ;;  %v499_v42 = vpack.c.bf16 %v470_v39, %v469_v38  ;;  %v10082_v44 = vld [vmem:[#allocation8 + $0x84] sm:$0xf] }
  0x69   : > { %620 = vmatpush.bf16.msra.mxu0 %v8463_v34  ;;  %10456 = vmatpush.bf16.msra.mxu2 %v8463_v34  ;;  %v8720_v29 = vld [vmem:[#allocation8 + $0x1b0] sm:$0xf0]  ;;  %v8595_v30 = vor.u32 %v10086_v26, %v8592_v27  ;;  %v8702_v34 = vld [vmem:[#allocation8 + $0x180] sm:$0xf]  ;;  %v10116_v36 = vld [vmem:[#allocation8 + $0x18c] sm:$0xf0]  ;;  %p10921_p3 = pnand %p10920_p1, %p11153_p13 }
  0x6a   : > { %709 = vmatpush.bf16.msra.mxu1 %v8467_v35  ;;  %10464 = vmatpush.bf16.msra.mxu3 %v8467_v35  ;;  %v8723_v31 = vor.u32 %v10118_v28, %v8720_v29  ;;  %v8575_v35 = vor.u32 %v10084_v33, %v8574_v32  ;;  %v8703_v37 = vor.u32 %v10116_v36, %v8702_v34  ;;  %v8576_v45 = vld [vmem:[#allocation8 + $0x90] sm:$0xf0]  ;;  %v10114_v46 = vld [vmem:[#allocation8 + $0x184] sm:$0xf]  ;;  %v8558_v50 = vld [vmem:[#allocation8 + $0x60] sm:$0xf] }
  0x6b   : > { %v8704_v47 = vld [vmem:[#allocation8 + $0x190] sm:$0xf0]  ;;  %v8579_v48 = vor.u32 %v10082_v44, %v8576_v45  ;;  %v8686_v52 = vld [vmem:[#allocation8 + $0x160] sm:$0xf]  ;;  %v10112_v54 = vld [vmem:[#allocation8 + $0x16c] sm:$0xf0]  ;;  %p10922_p5 = pneg %p10921_p3 }
  0x6c   : > { %v8707_v49 = vor.u32 %v10114_v46, %v8704_v47  ;;  %v471_v56 = vld [vmem:[%s11193_s19 + $0x30] sm:$0xff]  ;;  %v472_v57 = vld [vmem:[%s11193_s19 + $0x38] sm:$0xff]  ;;  %v10078_v62 = vld [vmem:[#allocation8 + $0x64] sm:$0xf] }
  0x6d   : > { %621 = vmatpush.bf16.msra.mxu0 %v8455_v40  ;;  %10457 = vmatpush.bf16.msra.mxu2 %v8455_v40  ;;  %v485_v40 = vld [vmem:[%s11193_s19 + $0xa0] sm:$0xff]  ;;  %v500_v60 = vpack.c.bf16 %v472_v57, %v471_v56  ;;  %v8688_v1 = vld [vmem:[#allocation8 + $0x170] sm:$0xf0]  ;;  %v10108_v8 = vld [vmem:[#allocation8 + $0x14c] sm:$0xf0] }
  0x6e   : > { %710 = vmatpush.bf16.msra.mxu1 %v8459_v41  ;;  %10465 = vmatpush.bf16.msra.mxu3 %v8459_v41  ;;  %v486_v41 = vld [vmem:[%s11193_s19 + $0xa8] sm:$0xff]  ;;  %v473_v10 = vld [vmem:[%s11193_s19 + $0x40] sm:$0xff]  ;;  %v10072_v23 = vld [vmem:[#allocation8 + $0x2c] sm:$0xf0] }
  0x6f   : > { %v507_v43 = vpack.c.bf16 %v486_v41, %v485_v40  ;;  %v474_v11 = vld [vmem:[%s11193_s19 + $0x48] sm:$0xff]  ;;  %v8526_v22 = vld [vmem:[#allocation8 + $0x20] sm:$0xf]  ;;  %v10104_v26 = vld [vmem:[#allocation8 + $0x12c] sm:$0xf0] }
  0x70   : > { %v501_v14 = vpack.c.bf16 %v474_v11, %v473_v10  ;;  %v10074_v16 = vld [vmem:[#allocation8 + $0x44] sm:$0xf]  ;;  %v475_v28 = vld [vmem:[%s11193_s19 + $0x50] sm:$0xff]  ;;  %v476_v29 = vld [vmem:[%s11193_s19 + $0x58] sm:$0xff] }
  0x71   : > { %622 = vmatpush.bf16.msra.mxu0 %v8447_v51  ;;  %10458 = vmatpush.bf16.msra.mxu2 %v8447_v51  ;;  %v10080_v51 = vld [vmem:[#allocation8 + $0x6c] sm:$0xf0]  ;;  %v10106_v18 = vld [vmem:[#allocation8 + $0x144] sm:$0xf]  ;;  %v502_v32 = vpack.c.bf16 %v476_v29, %v475_v28  ;;  %v8510_v40 = vld [vmem:[#allocation8] sm:$0xf] }
  0x72   : > { %711 = vmatpush.bf16.msra.mxu1 %v8451_v55  ;;  %10466 = vmatpush.bf16.msra.mxu3 %v8451_v55  ;;  %v8559_v53 = vor.u32 %v10080_v51, %v8558_v50  ;;  %v8687_v55 = vor.u32 %v10112_v54, %v8686_v52  ;;  %v10070_v34 = vld [vmem:[#allocation8 + $0x24] sm:$0xf]  ;;  %v10068_v41 = vld [vmem:[#allocation8 + $0xc] sm:$0xf0]  ;;  %v8640_v57 = vld [vmem:[#allocation8 + $0x110] sm:$0xf0] }
  0x73   : > { %v10102_v36 = vld [vmem:[#allocation8 + $0x124] sm:$0xf]  ;;  %v10100_v50 = vld [vmem:[#allocation8 + $0x10c] sm:$0xf0]  ;;  %v8760_v10 = vld [vmem:[#allocation8 + $0x1f8] sm:$0xf0] }
  0x74   : > { %623 = vmatmul.bf16.vlgmr.msra.gmra.mxu0 %v497_v63  ;;  %663 = vmatmul.bf16.vlgmr.msra.gmra.mxu2 %v505_v0  ;;  %v478_v44 = vld [vmem:[%s11193_s19 + $0x68] sm:$0xff]  ;;  %v493_v45 = vld [vmem:[%s11193_s19 + $0xe0] sm:$0xff] }
  0x75   : > { %1283 = vmatpush.bf16.msrb.mxu2 %v8623_v58  ;;  %712 = vmatmul.bf16.vlgmr.msra.gmra.mxu1 %v497_v63  ;;  %v487_v58 = vld [vmem:[%s11193_s19 + $0xb0] sm:$0xff]  ;;  %v494_v46 = vld [vmem:[%s11193_s19 + $0xe8] sm:$0xff]  ;;  %v529_v11 = vld [vmem:[#allocation7] sm:$0x3] }
  0x76   : > { %1372 = vmatpush.bf16.msrb.mxu3 %v8751_v59  ;;  %1461 = vmatpush.bf16.msrb.mxu0 %v8627_v4  ;;  %v488_v59 = vld [vmem:[%s11193_s19 + $0xb8] sm:$0xff]  ;;  %v8542_v4 = vld [vmem:[#allocation8 + $0x40] sm:$0xf]  ;;  %v10066_v52 = vld [vmem:[#allocation8 + $0x4] sm:$0xf] }
  0x77   : > { %752 = vmatmul.bf16.vlgmr.msra.gmra.mxu3 %v505_v0  ;;  %1550 = vmatpush.bf16.msrb.mxu1 %v8755_v5  ;;  %v508_v61 = vpack.c.bf16 %v488_v59, %v487_v58  ;;  %v8560_v63 = vld [vmem:[#allocation8 + $0x70] sm:$0xf0]  ;;  %v10110_v0 = vld [vmem:[#allocation8 + $0x164] sm:$0xf]  ;;  %v10076_v5 = vld [vmem:[#allocation8 + $0x4c] sm:$0xf0] }
  0x78   : > { %v8563_v2 = vor.u32 %v10078_v62, %v8560_v63  ;;  %v8691_v3 = vor.u32 %v10110_v0, %v8688_v1  ;;  %v10098_v54 = vld [vmem:[#allocation8 + $0x104] sm:$0xf]  ;;  %v480_v58 = vld [vmem:[%s11193_s19 + $0x78] sm:$0xff]  ;;  %v495_v59 = vld [vmem:[%s11193_s19 + $0xf0] sm:$0xff] }
  0x79   : > { %1284 = vmatpush.bf16.msrb.mxu2 %v8607_v6  ;;  %v8670_v6 = vld [vmem:[#allocation8 + $0x140] sm:$0xf]  ;;  %v8630_v0 = vld [vmem:[#allocation8 + $0xe8] sm:$0xf]  ;;  %v10097_v1 = vld [vmem:[#allocation8 + $0xf4] sm:$0xf0] }
  0x7a   : > { %1373 = vmatpush.bf16.msrb.mxu3 %v8735_v7  ;;  %1462 = vmatpush.bf16.msrb.mxu0 %v8611_v12  ;;  %v8543_v7 = vor.u32 %v10076_v5, %v8542_v4  ;;  %v8671_v9 = vor.u32 %v10108_v8, %v8670_v6  ;;  %v489_v12 = vld [vmem:[%s11193_s19 + $0xc0] sm:$0xff]  ;;  %v10129_v4 = vld [vmem:[#allocation8 + $0x1f4] sm:$0xf0]  ;;  %v10095_v6 = vld [vmem:[#allocation8 + $0xec] sm:$0xf] }
  0x7b   : > { %1551 = vmatpush.bf16.msrb.mxu1 %v8739_v13  ;;  %v490_v13 = vld [vmem:[%s11193_s19 + $0xc8] sm:$0xff] }
  0x7c   : > { %v509_v15 = vpack.c.bf16 %v490_v13, %v489_v12  ;;  %v10127_v8 = vld [vmem:[#allocation8 + $0x1ec] sm:$0xf] }
  0x7d   : > { %1285 = vmatpush.bf16.msrb.mxu2 %v8591_v17  ;;  %v8544_v17 = vld [vmem:[#allocation8 + $0x50] sm:$0xf0]  ;;  %v8763_v13 = vor.u32 %v10127_v8, %v8760_v10 }
  0x7e   : > { %1374 = vmatpush.bf16.msrb.mxu3 %v8719_v19  ;;  %1463 = vmatpush.bf16.msrb.mxu0 %v8595_v30  ;;  %v8672_v19 = vld [vmem:[#allocation8 + $0x150] sm:$0xf0]  ;;  %v8547_v20 = vor.u32 %v10074_v16, %v8544_v17  ;;  %v11249_v16 = vperm.slane %v529_v11, 1 }
  0x7f   : > { %1552 = vmatpush.bf16.msrb.mxu1 %v8723_v31  ;;  %v8675_v21 = vor.u32 %v10106_v18, %v8672_v19  ;;  %v491_v30 = vld [vmem:[%s11193_s19 + $0xd0] sm:$0xff]  ;;  %v492_v31 = vld [vmem:[%s11193_s19 + $0xd8] sm:$0xff] }
  0x80   : > { %v510_v33 = vpack.c.bf16 %v492_v31, %v491_v30 }
  0x81   : > { %1286 = vmatpush.bf16.msrb.mxu2 %v8575_v35  ;;  %v8528_v35 = vld [vmem:[#allocation8 + $0x30] sm:$0xf0] }
  0x82   : > { %1375 = vmatpush.bf16.msrb.mxu3 %v8703_v37  ;;  %1464 = vmatpush.bf16.msrb.mxu0 %v8579_v48  ;;  %v8656_v37 = vld [vmem:[#allocation8 + $0x130] sm:$0xf0]  ;;  %v8531_v38 = vor.u32 %v10070_v34, %v8528_v35  ;;  %v511_v48 = vpack.c.bf16 %v494_v46, %v493_v45 }
  0x83   : > { %1553 = vmatpush.bf16.msrb.mxu1 %v8707_v49  ;;  %v8659_v39 = vor.u32 %v10102_v36, %v8656_v37  ;;  %v8638_v49 = vld [vmem:[#allocation8 + $0x100] sm:$0xf] }
  0x84   : > { %628 = vmatmul.bf16.gmra.mxu0 %v498_v24  ;;  %668 = vmatmul.bf16.gmra.mxu2 %v506_v25  ;;  %v8639_v51 = vor.u32 %v10100_v50, %v8638_v49  ;;  %v10125_v49 = vld [vmem:[#allocation8 + $0x1d4] sm:$0xf0] }
  0x85   : > { %717 = vmatmul.bf16.gmra.mxu1 %v498_v24  ;;  %1287 = vmatpush.bf16.msrb.mxu2 %v8559_v53  ;;  %v8654_v24 = vld [vmem:[#allocation8 + $0x120] sm:$0xf]  ;;  %v8512_v53 = vld [vmem:[#allocation8 + $0x10] sm:$0xf0] }
  0x86   : > { %1376 = vmatpush.bf16.msrb.mxu3 %v8687_v55  ;;  %1465 = vmatpush.bf16.msrb.mxu0 %v8563_v2  ;;  %v8655_v27 = vor.u32 %v10104_v26, %v8654_v24  ;;  %v479_v55 = vld [vmem:[%s11193_s19 + $0x70] sm:$0xff]  ;;  %v8515_v56 = vor.u32 %v10066_v52, %v8512_v53  ;;  %v8631_v2 = vor.u32 %v10097_v1, %v8630_v0 }
  0x87   : > { %757 = vmatmul.bf16.gmra.mxu3 %v506_v25  ;;  %1554 = vmatpush.bf16.msrb.mxu1 %v8691_v3  ;;  %v8527_v25 = vor.u32 %v10072_v23, %v8526_v22  ;;  %v504_v62 = vpack.c.bf16 %v480_v58, %v479_v55  ;;  %v8758_v3 = vld [vmem:[#allocation8 + $0x1e8] sm:$0xf] }
  0x88   : > { %v8759_v5 = vor.u32 %v10129_v4, %v8758_v3  ;;  %v10091_v4 = vld [vmem:[#allocation8 + $0xcc] sm:$0xf] }
  0x89   : > { %1288 = vmatpush.bf16.msrb.mxu2 %v8543_v7  ;;  %v8632_v7 = vld [vmem:[#allocation8 + $0xf8] sm:$0xf0] }
  0x8a   : > { %1377 = vmatpush.bf16.msrb.mxu3 %v8671_v9  ;;  %1466 = vmatpush.bf16.msrb.mxu0 %v8547_v20  ;;  %v8635_v9 = vor.u32 %v10095_v6, %v8632_v7  ;;  %v10123_v6 = vld [vmem:[#allocation8 + $0x1cc] sm:$0xf] }
  0x8b   : > { %1555 = vmatpush.bf16.msrb.mxu1 %v8675_v21 }
  0x8d   : > { %1289 = vmatpush.bf16.msrb.mxu2 %v8527_v25 }
  0x8e   : > { %1378 = vmatpush.bf16.msrb.mxu3 %v8655_v27  ;;  %1467 = vmatpush.bf16.msrb.mxu0 %v8531_v38 }
  0x8f   : > { %1556 = vmatpush.bf16.msrb.mxu1 %v8659_v39 }
  0x92   : > { %1379 = vmatpush.bf16.msrb.mxu3 %v8639_v51  ;;  %1468 = vmatpush.bf16.msrb.mxu0 %v8515_v56 }
  0x94   : > { %633 = vmatmul.bf16.gmra.mxu0 %v499_v42  ;;  %673 = vmatmul.bf16.gmra.mxu2 %v507_v43 }
  0x95   : > { %722 = vmatmul.bf16.gmra.mxu1 %v499_v42  ;;  %v8511_v42 = vor.u32 %v10068_v41, %v8510_v40  ;;  %v8614_v40 = vld [vmem:[#allocation8 + $0xc8] sm:$0xf]  ;;  %v10093_v41 = vld [vmem:[#allocation8 + $0xd4] sm:$0xf0] }
  0x96   : > { %1728 = vmatpush.bf16.msra.mxu3 %v8759_v5  ;;  %1817 = vmatpush.bf16.msra.mxu0 %v8635_v9  ;;  %v8616_v5 = vld [vmem:[#allocation8 + $0xd8] sm:$0xf0] }
  0x97   : > { %762 = vmatmul.bf16.gmra.mxu3 %v507_v43  ;;  %1290 = vmatpush.bf16.msrb.mxu2 %v8511_v42  ;;  %v477_v43 = vld [vmem:[%s11193_s19 + $0x60] sm:$0xff]  ;;  %v8619_v10 = vor.u32 %v10091_v4, %v8616_v5 }
  0x98   : > { %v503_v47 = vpack.c.bf16 %v478_v44, %v477_v43  ;;  %v8615_v44 = vor.u32 %v10093_v41, %v8614_v40 }
  0x9a   : > { %1818 = vmatpush.bf16.msra.mxu0 %v8619_v10 }
  0x9b   : > { %1639 = vmatpush.bf16.msra.mxu2 %v8631_v2 }
  0x9f   : > { %1640 = vmatpush.bf16.msra.mxu2 %v8615_v44 }
  0xa4   : > { %638 = vmatmul.bf16.gmra.mxu0 %v500_v60  ;;  %678 = vmatmul.bf16.gmra.mxu2 %v508_v61 }
  0xa5   : > { %727 = vmatmul.bf16.gmra.mxu1 %v500_v60  ;;  %v496_v60 = vld [vmem:[%s11193_s19 + $0xf8] sm:$0xff]  ;;  %s10923_s19 = scalar_lea.hbm %s13167_s9, 512 }
  0xa6   : > { %v512_v63 = vpack.c.bf16 %v496_v60, %v495_v59  ;;  %p10925_p8 = scmp.lt.s32.totalorder %s10923_s19, %s10919_s16 }
  0xa7   : > { %767 = vmatmul.bf16.gmra.mxu3 %v508_v61  ;;  %v8643_v61 = vor.u32 %v10098_v54, %v8640_v57 }
  0xa8   : > { %p10926_p7 = por %p10925_p8, %p10924_p12 }
  0xa9   : > { %1557 = vmatpush.bf16.msrb.mxu1 %v8643_v61 }
  0xaa   : > { %p10927_p9 = pnand %p10926_p7, %p10922_p5 }
  0xad   : > { %1906 = vmatpush.bf16.msra.mxu1 %v8763_v13 }
  0xb4   : > { %643 = vmatmul.bf16.gmra.mxu0 %v501_v14  ;;  %683 = vmatmul.bf16.gmra.mxu2 %v509_v15 }
  0xb5   : > { %732 = vmatmul.bf16.gmra.mxu1 %v501_v14 }
  0xb7   : > { %772 = vmatmul.bf16.gmra.mxu3 %v509_v15  ;;  %v11247_v15 = vperm.slane %v529_v11, 0  ;;  %v8744_v11 = vld [vmem:[#allocation8 + $0x1d8] sm:$0xf0] }
  0xc4   : > { %648 = vmatmul.bf16.gmra.mxu0 %v502_v32  ;;  %688 = vmatmul.bf16.gmra.mxu2 %v510_v33 }
  0xc5   : > { %737 = vmatmul.bf16.gmra.mxu1 %v502_v32 }
  0xc7   : > { %777 = vmatmul.bf16.gmra.mxu3 %v510_v33 }
  0xd4   : > { %653 = vmatmul.bf16.gmra.mxu0 %v503_v47  ;;  %693 = vmatmul.bf16.gmra.mxu2 %v511_v48 }
  0xd5   : > { %742 = vmatmul.bf16.gmra.mxu1 %v503_v47 }
  0xd7   : > { %782 = vmatmul.bf16.gmra.mxu3 %v511_v48  ;;  %v8742_v48 = vld [vmem:[#allocation8 + $0x1c8] sm:$0xf] }
  0xd8   : > { %v8743_v50 = vor.u32 %v10125_v49, %v8742_v48 }
  0xda   : > { %1729 = vmatpush.bf16.msra.mxu3 %v8743_v50  ;;  %v8598_v50 = vld [vmem:[#allocation8 + $0xa8] sm:$0xf] }
  0xe4   : > { %658 = vmatmul.bf16.gmra.mxu0 %v504_v62  ;;  %698 = vmatmul.bf16.gmra.mxu2 %v512_v63 }
  0xe5   : > { %747 = vmatmul.bf16.gmra.mxu1 %v504_v62 }
  0xe7   : > { %787 = vmatmul.bf16.gmra.mxu3 %v512_v63 }
  0xf1   : > { %v624_v12 = vpop.f32.mrf.mxu0 }
  0xf2   : > { %v713_v14 = vpop.f32.mrf.mxu1  ;;  %v625_v18 = vadd.f32 %v624_v12, %v11247_v15 }
  0xf3   : > { %v714_v20 = vadd.f32 %v713_v14, %v11249_v16 }
  0xf4   : > { %v793_v25 = vmax.f32 %v625_v18, 0.0 }
  0xf5   : > { %v794_v28 = vmax.f32 %v714_v20, 0.0 }
  0xf7   : > { %v664_v17 = vpop.f32.mrf.mxu2 }
  0xf8   : > { %v665_v27 = vadd.f32 %v664_v17, %v11247_v15  ;;  %v8747_v17 = vor.u32 %v10123_v6, %v8744_v11 }
  0xf9   : > { %v626_v21 = vpop.f32.mrf.mxu0 }
  0xfa   : > { %v753_v19 = vpop.f32.mrf.mxu3  ;;  %v627_v22 = vadd.f32 %v626_v21, %v11247_v15  ;;  %v715_v23 = vpop.f32.mrf.mxu1  ;;  %v825_v34 = vmax.f32 %v665_v27, 0.0  ;;  %1907 = vmatpush.bf16.msra.mxu1 %v8747_v17 }
  0xfb   : > { %v716_v24 = vadd.f32 %v715_v23, %v11249_v16  ;;  %v754_v30 = vadd.f32 %v753_v19, %v11249_v16 }
  0xfc   : > { %v795_v26 = vmax.f32 %v627_v22, 0.0 }
  0xfd   : > { %v796_v29 = vmax.f32 %v716_v24, 0.0  ;;  %v826_v37 = vmax.f32 %v754_v30, 0.0 }
  0xfe   : > { %v11257_v31 = vpack.c.bf16 %v795_v26, %v793_v25 }
  0xff   : > { %v11259_v32 = vpack.c.bf16 %v796_v29, %v794_v28  ;;  %v666_v33 = vpop.f32.mrf.mxu2 }
 0x100   : > { %1291 = vmatmul.bf16.vlgmr.msrb.gmra.mxu2 %v11257_v31  ;;  %1469 = vmatmul.bf16.vlgmr.msrb.gmra.mxu0 %v11257_v31  ;;  %v667_v35 = vadd.f32 %v666_v33, %v11247_v15 }
 0x101   : > { %1380 = vmatmul.bf16.vlgmr.msrb.gmra.mxu3 %v11259_v32  ;;  %1558 = vmatmul.bf16.vlgmr.msrb.gmra.mxu1 %v11259_v32  ;;  %v629_v38 = vpop.f32.mrf.mxu0 }
 0x102   : > { %v755_v36 = vpop.f32.mrf.mxu3  ;;  %v718_v42 = vpop.f32.mrf.mxu1  ;;  %v827_v43 = vmax.f32 %v667_v35, 0.0  ;;  %v630_v52 = vadd.f32 %v629_v38, %v11247_v15 }
 0x103   : > { %v756_v39 = vadd.f32 %v755_v36, %v11249_v16  ;;  %v719_v54 = vadd.f32 %v718_v42, %v11249_v16 }
 0x104   : > { %v11267_v46 = vpack.c.bf16 %v827_v43, %v825_v34  ;;  %v797_v59 = vmax.f32 %v630_v52, 0.0 }
 0x105   : > { %v828_v45 = vmax.f32 %v756_v39, 0.0  ;;  %v798_v62 = vmax.f32 %v719_v54, 0.0 }
 0x107   : > { %v11269_v47 = vpack.c.bf16 %v828_v45, %v826_v37  ;;  %v669_v51 = vpop.f32.mrf.mxu2 }
 0x108   : > { %v670_v61 = vadd.f32 %v669_v51, %v11247_v15  ;;  %v10089_v51 = vld [vmem:[#allocation8 + $0xb4] sm:$0xf0] }
 0x109   : > { %v631_v55 = vpop.f32.mrf.mxu0  ;;  %v8599_v54 = vor.u32 %v10089_v51, %v8598_v50 }
 0x10a   : > { %v758_v53 = vpop.f32.mrf.mxu3  ;;  %v632_v56 = vadd.f32 %v631_v55, %v11247_v15  ;;  %v720_v57 = vpop.f32.mrf.mxu1  ;;  %v829_v7 = vmax.f32 %v670_v61, 0.0 }
 0x10b   : > { %v721_v58 = vadd.f32 %v720_v57, %v11249_v16  ;;  %v759_v0 = vadd.f32 %v758_v53, %v11249_v16  ;;  %1641 = vmatpush.bf16.msra.mxu2 %v8599_v54 }
 0x10c   : > { %v799_v60 = vmax.f32 %v632_v56, 0.0 }
 0x10d   : > { %v800_v63 = vmax.f32 %v721_v58, 0.0  ;;  %v830_v12 = vmax.f32 %v759_v0, 0.0  ;;  %v8726_v58 = vld [vmem:[#allocation8 + $0x1a8] sm:$0xf] }
 0x10e   : > { %v11277_v1 = vpack.c.bf16 %v799_v60, %v797_v59  ;;  %v10121_v59 = vld [vmem:[#allocation8 + $0x1b4] sm:$0xf0] }
 0x10f   : > { %v11279_v2 = vpack.c.bf16 %v800_v63, %v798_v62  ;;  %v671_v3 = vpop.f32.mrf.mxu2  ;;  %v8727_v60 = vor.u32 %v10121_v59, %v8726_v58 }
 0x110   : > { %1296 = vmatmul.bf16.gmra.mxu2 %v11277_v1  ;;  %1474 = vmatmul.bf16.gmra.mxu0 %v11277_v1  ;;  %v672_v8 = vadd.f32 %v671_v3, %v11247_v15 }
 0x111   : > { %1385 = vmatmul.bf16.gmra.mxu3 %v11279_v2  ;;  %1563 = vmatmul.bf16.gmra.mxu1 %v11279_v2  ;;  %v634_v13 = vpop.f32.mrf.mxu0 }
 0x112   : > { %v760_v9 = vpop.f32.mrf.mxu3  ;;  %v723_v18 = vpop.f32.mrf.mxu1  ;;  %v831_v19 = vmax.f32 %v672_v8, 0.0  ;;  %v635_v24 = vadd.f32 %v634_v13, %v11247_v15  ;;  %1730 = vmatpush.bf16.msra.mxu3 %v8727_v60 }
 0x113   : > { %v761_v14 = vadd.f32 %v760_v9, %v11249_v16  ;;  %v724_v26 = vadd.f32 %v723_v18, %v11249_v16  ;;  %v10087_v18 = vld [vmem:[#allocation8 + $0xac] sm:$0xf] }
 0x114   : > { %v11287_v21 = vpack.c.bf16 %v831_v19, %v829_v7  ;;  %v801_v33 = vmax.f32 %v635_v24, 0.0  ;;  %v8600_v19 = vld [vmem:[#allocation8 + $0xb8] sm:$0xf0] }
 0x115   : > { %v832_v20 = vmax.f32 %v761_v14, 0.0  ;;  %v802_v36 = vmax.f32 %v724_v26, 0.0  ;;  %v8603_v26 = vor.u32 %v10087_v18, %v8600_v19  ;;  %v8710_v18 = vld [vmem:[#allocation8 + $0x188] sm:$0xf]  ;;  %v10117_v19 = vld [vmem:[#allocation8 + $0x194] sm:$0xf0] }
 0x117   : > { %v11289_v22 = vpack.c.bf16 %v832_v20, %v830_v12  ;;  %v674_v23 = vpop.f32.mrf.mxu2  ;;  %v10119_v20 = vld [vmem:[#allocation8 + $0x1ac] sm:$0xf]  ;;  %1819 = vmatpush.bf16.msra.mxu0 %v8603_v26 }
 0x118   : > { %v675_v35 = vadd.f32 %v674_v23, %v11247_v15 }
 0x119   : > { %v636_v27 = vpop.f32.mrf.mxu0 }
 0x11a   : > { %v763_v25 = vpop.f32.mrf.mxu3  ;;  %v637_v28 = vadd.f32 %v636_v27, %v11247_v15  ;;  %v725_v29 = vpop.f32.mrf.mxu1  ;;  %v833_v42 = vmax.f32 %v675_v35, 0.0  ;;  %v8728_v27 = vld [vmem:[#allocation8 + $0x1b8] sm:$0xf0] }
 0x11b   : > { %v726_v30 = vadd.f32 %v725_v29, %v11249_v16  ;;  %v764_v38 = vadd.f32 %v763_v25, %v11249_v16 }
 0x11c   : > { %v803_v34 = vmax.f32 %v637_v28, 0.0 }
 0x11d   : > { %v804_v37 = vmax.f32 %v726_v30, 0.0  ;;  %v834_v45 = vmax.f32 %v764_v38, 0.0 }
 0x11e   : > { %v11297_v39 = vpack.c.bf16 %v803_v34, %v801_v33  ;;  %v8731_v33 = vor.u32 %v10119_v20, %v8728_v27  ;;  %v8711_v20 = vor.u32 %v10117_v19, %v8710_v18 }
 0x11f   : > { %v11299_v40 = vpack.c.bf16 %v804_v37, %v802_v36  ;;  %v676_v41 = vpop.f32.mrf.mxu2 }
 0x120   : > { %1301 = vmatmul.bf16.gmra.mxu2 %v11297_v39  ;;  %1479 = vmatmul.bf16.gmra.mxu0 %v11297_v39  ;;  %v677_v43 = vadd.f32 %v676_v41, %v11247_v15 }
 0x121   : > { %1390 = vmatmul.bf16.gmra.mxu3 %v11299_v40  ;;  %1568 = vmatmul.bf16.gmra.mxu1 %v11299_v40  ;;  %v639_v48 = vpop.f32.mrf.mxu0 }
 0x122   : > { %v765_v44 = vpop.f32.mrf.mxu3  ;;  %v728_v52 = vpop.f32.mrf.mxu1  ;;  %v835_v53 = vmax.f32 %v677_v43, 0.0  ;;  %v640_v62 = vadd.f32 %v639_v48, %v11247_v15  ;;  %1908 = vmatpush.bf16.msra.mxu1 %v8731_v33  ;;  %1731 = vmatpush.bf16.msra.mxu3 %v8711_v20 }
 0x123   : > { %v766_v49 = vadd.f32 %v765_v44, %v11249_v16  ;;  %v729_v0 = vadd.f32 %v728_v52, %v11249_v16 }
 0x124   : > { %v11307_v56 = vpack.c.bf16 %v835_v53, %v833_v42  ;;  %v805_v7 = vmax.f32 %v640_v62, 0.0 }
 0x125   : > { %v836_v55 = vmax.f32 %v766_v49, 0.0  ;;  %v806_v10 = vmax.f32 %v729_v0, 0.0 }
 0x127   : > { %v11309_v57 = vpack.c.bf16 %v836_v55, %v834_v45  ;;  %v679_v61 = vpop.f32.mrf.mxu2 }
 0x128   : > { %v680_v9 = vadd.f32 %v679_v61, %v11247_v15 }
 0x129   : > { %v641_v3 = vpop.f32.mrf.mxu0 }
 0x12a   : > { %v768_v63 = vpop.f32.mrf.mxu3  ;;  %v642_v4 = vadd.f32 %v641_v3, %v11247_v15  ;;  %v730_v5 = vpop.f32.mrf.mxu1  ;;  %v837_v23 = vmax.f32 %v680_v9, 0.0 }
 0x12b   : > { %v731_v6 = vadd.f32 %v730_v5, %v11249_v16  ;;  %v769_v12 = vadd.f32 %v768_v63, %v11249_v16 }
 0x12c   : > { %v807_v8 = vmax.f32 %v642_v4, 0.0 }
 0x12d   : > { %v808_v11 = vmax.f32 %v731_v6, 0.0  ;;  %v838_v28 = vmax.f32 %v769_v12, 0.0  ;;  %v8582_v6 = vld [vmem:[#allocation8 + $0x88] sm:$0xf] }
 0x12e   : > { %v11317_v13 = vpack.c.bf16 %v807_v8, %v805_v7  ;;  %v10085_v7 = vld [vmem:[#allocation8 + $0x94] sm:$0xf0] }
 0x12f   : > { %v11319_v14 = vpack.c.bf16 %v808_v11, %v806_v10  ;;  %v681_v17 = vpop.f32.mrf.mxu2  ;;  %v8583_v10 = vor.u32 %v10085_v7, %v8582_v6 }
 0x130   : > { %1306 = vmatmul.bf16.gmra.mxu2 %v11317_v13  ;;  %1484 = vmatmul.bf16.gmra.mxu0 %v11317_v13  ;;  %v682_v24 = vadd.f32 %v681_v17, %v11247_v15 }
 0x131   : > { %1395 = vmatmul.bf16.gmra.mxu3 %v11319_v14  ;;  %1573 = vmatmul.bf16.gmra.mxu1 %v11319_v14  ;;  %v644_v29 = vpop.f32.mrf.mxu0 }
 0x132   : > { %v770_v25 = vpop.f32.mrf.mxu3  ;;  %v733_v34 = vpop.f32.mrf.mxu1  ;;  %v839_v35 = vmax.f32 %v682_v24, 0.0  ;;  %v645_v42 = vadd.f32 %v644_v29, %v11247_v15  ;;  %1642 = vmatpush.bf16.msra.mxu2 %v8583_v10 }
 0x133   : > { %v771_v30 = vadd.f32 %v770_v25, %v11249_v16  ;;  %v734_v44 = vadd.f32 %v733_v34, %v11249_v16 }
 0x134   : > { %v11327_v37 = vpack.c.bf16 %v839_v35, %v837_v23  ;;  %v809_v51 = vmax.f32 %v645_v42, 0.0 }
 0x135   : > { %v840_v36 = vmax.f32 %v771_v30, 0.0  ;;  %v810_v54 = vmax.f32 %v734_v44, 0.0 }
 0x137   : > { %v11329_v38 = vpack.c.bf16 %v840_v36, %v838_v28  ;;  %v684_v41 = vpop.f32.mrf.mxu2 }
 0x138   : > { %v685_v53 = vadd.f32 %v684_v41, %v11247_v15 }
 0x139   : > { %v646_v45 = vpop.f32.mrf.mxu0 }
 0x13a   : > { %v773_v43 = vpop.f32.mrf.mxu3  ;;  %v647_v48 = vadd.f32 %v646_v45, %v11247_v15  ;;  %v735_v49 = vpop.f32.mrf.mxu1  ;;  %v841_v62 = vmax.f32 %v685_v53, 0.0 }
 0x13b   : > { %v736_v50 = vadd.f32 %v735_v49, %v11249_v16  ;;  %v774_v58 = vadd.f32 %v773_v43, %v11249_v16  ;;  %v8584_v49 = vld [vmem:[#allocation8 + $0x98] sm:$0xf0] }
 0x13c   : > { %v811_v52 = vmax.f32 %v647_v48, 0.0  ;;  %v10083_v48 = vld [vmem:[#allocation8 + $0x8c] sm:$0xf] }
 0x13d   : > { %v812_v55 = vmax.f32 %v736_v50, 0.0  ;;  %v842_v3 = vmax.f32 %v774_v58, 0.0  ;;  %v10115_v50 = vld [vmem:[#allocation8 + $0x18c] sm:$0xf] }
 0x13e   : > { %v11337_v59 = vpack.c.bf16 %v811_v52, %v809_v51 }
 0x13f   : > { %v11339_v60 = vpack.c.bf16 %v812_v55, %v810_v54  ;;  %v686_v61 = vpop.f32.mrf.mxu2  ;;  %v8587_v54 = vor.u32 %v10083_v48, %v8584_v49  ;;  %v8712_v55 = vld [vmem:[#allocation8 + $0x198] sm:$0xf0] }
 0x140   : > { %1311 = vmatmul.bf16.gmra.mxu2 %v11337_v59  ;;  %1489 = vmatmul.bf16.gmra.mxu0 %v11337_v59  ;;  %v687_v63 = vadd.f32 %v686_v61, %v11247_v15 }
 0x141   : > { %1400 = vmatmul.bf16.gmra.mxu3 %v11339_v60  ;;  %1578 = vmatmul.bf16.gmra.mxu1 %v11339_v60  ;;  %v649_v4 = vpop.f32.mrf.mxu0 }
 0x142   : > { %v775_v0 = vpop.f32.mrf.mxu3  ;;  %v738_v8 = vpop.f32.mrf.mxu1  ;;  %v843_v9 = vmax.f32 %v687_v63, 0.0  ;;  %v650_v24 = vadd.f32 %v649_v4, %v11247_v15  ;;  %v8715_v63 = vor.u32 %v10115_v50, %v8712_v55  ;;  %1820 = vmatpush.bf16.msra.mxu0 %v8587_v54  ;;  %v8566_v50 = vld [vmem:[#allocation8 + $0x68] sm:$0xf]  ;;  %v10113_v55 = vld [vmem:[#allocation8 + $0x174] sm:$0xf0] }
 0x143   : > { %v776_v5 = vadd.f32 %v775_v0, %v11249_v16  ;;  %v739_v26 = vadd.f32 %v738_v8, %v11249_v16  ;;  %v8694_v54 = vld [vmem:[#allocation8 + $0x168] sm:$0xf] }
 0x144   : > { %v11347_v12 = vpack.c.bf16 %v843_v9, %v841_v62  ;;  %v813_v33 = vmax.f32 %v650_v24, 0.0  ;;  %1909 = vmatpush.bf16.msra.mxu1 %v8715_v63 }
 0x145   : > { %v844_v11 = vmax.f32 %v776_v5, 0.0  ;;  %v814_v36 = vmax.f32 %v739_v26, 0.0 }
 0x147   : > { %v11349_v17 = vpack.c.bf16 %v844_v11, %v842_v3  ;;  %v689_v23 = vpop.f32.mrf.mxu2 }
 0x148   : > { %v690_v35 = vadd.f32 %v689_v23, %v11247_v15 }
 0x149   : > { %v651_v27 = vpop.f32.mrf.mxu0 }
 0x14a   : > { %v778_v25 = vpop.f32.mrf.mxu3  ;;  %v652_v28 = vadd.f32 %v651_v27, %v11247_v15  ;;  %v740_v29 = vpop.f32.mrf.mxu1  ;;  %v845_v51 = vmax.f32 %v690_v35, 0.0 }
 0x14b   : > { %v741_v30 = vadd.f32 %v740_v29, %v11249_v16  ;;  %v779_v42 = vadd.f32 %v778_v25, %v11249_v16 }
 0x14c   : > { %v815_v34 = vmax.f32 %v652_v28, 0.0 }
 0x14d   : > { %v816_v41 = vmax.f32 %v741_v30, 0.0  ;;  %v846_v58 = vmax.f32 %v779_v42, 0.0 }
 0x14e   : > { %v11357_v43 = vpack.c.bf16 %v815_v34, %v813_v33 }
 0x14f   : > { %v11359_v44 = vpack.c.bf16 %v816_v41, %v814_v36  ;;  %v691_v45 = vpop.f32.mrf.mxu2 }
 0x150   : > { %1316 = vmatmul.bf16.gmra.mxu2 %v11357_v43  ;;  %1494 = vmatmul.bf16.gmra.mxu0 %v11357_v43  ;;  %v692_v52 = vadd.f32 %v691_v45, %v11247_v15 }
 0x151   : > { %1405 = vmatmul.bf16.gmra.mxu3 %v11359_v44  ;;  %1583 = vmatmul.bf16.gmra.mxu1 %v11359_v44  ;;  %v654_v61 = vpop.f32.mrf.mxu0 }
 0x152   : > { %v780_v53 = vpop.f32.mrf.mxu3  ;;  %v743_v0 = vpop.f32.mrf.mxu1  ;;  %v847_v3 = vmax.f32 %v692_v52, 0.0  ;;  %v655_v8 = vadd.f32 %v654_v61, %v11247_v15  ;;  %v8695_v61 = vor.u32 %v10113_v55, %v8694_v54  ;;  %v953_v55 = vld [vmem:[#allocation10] sm:$0xf] }
 0x153   : > { %v781_v62 = vadd.f32 %v780_v53, %v11249_v16  ;;  %v744_v10 = vadd.f32 %v743_v0, %v11249_v16 }
 0x154   : > { %v11367_v5 = vpack.c.bf16 %v847_v3, %v845_v51  ;;  %v817_v23 = vmax.f32 %v655_v8, 0.0  ;;  %v10081_v51 = vld [vmem:[#allocation8 + $0x74] sm:$0xf0]  ;;  %1732 = vmatpush.bf16.msra.mxu3 %v8695_v61 }
 0x155   : > { %v848_v4 = vmax.f32 %v781_v62, 0.0  ;;  %v818_v26 = vmax.f32 %v744_v10, 0.0  ;;  %v8567_v53 = vor.u32 %v10081_v51, %v8566_v50  ;;  %v8696_v50 = vld [vmem:[#allocation8 + $0x178] sm:$0xf0] }
 0x157   : > { %v11369_v6 = vpack.c.bf16 %v848_v4, %v846_v58  ;;  %v694_v7 = vpop.f32.mrf.mxu2  ;;  %1643 = vmatpush.bf16.msra.mxu2 %v8567_v53 }
 0x158   : > { %v695_v25 = vadd.f32 %v694_v7, %v11247_v15 }
 0x159   : > { %v656_v11 = vpop.f32.mrf.mxu0 }
 0x15a   : > { %v783_v9 = vpop.f32.mrf.mxu3  ;;  %v657_v18 = vadd.f32 %v656_v11, %v11247_v15  ;;  %v745_v19 = vpop.f32.mrf.mxu1  ;;  %v849_v34 = vmax.f32 %v695_v25, 0.0 }
 0x15b   : > { %v746_v20 = vadd.f32 %v745_v19, %v11249_v16  ;;  %v784_v28 = vadd.f32 %v783_v9, %v11249_v16 }
 0x15c   : > { %v819_v24 = vmax.f32 %v657_v18, 0.0 }
 0x15d   : > { %v820_v27 = vmax.f32 %v746_v20, 0.0  ;;  %v850_v41 = vmax.f32 %v784_v28, 0.0  ;;  %v10079_v20 = vld [vmem:[#allocation8 + $0x6c] sm:$0xf] }
 0x15e   : > { %v11377_v29 = vpack.c.bf16 %v819_v24, %v817_v23  ;;  %v8568_v23 = vld [vmem:[#allocation8 + $0x78] sm:$0xf0] }
 0x15f   : > { %v11379_v30 = vpack.c.bf16 %v820_v27, %v818_v26  ;;  %v696_v33 = vpop.f32.mrf.mxu2  ;;  %v8571_v27 = vor.u32 %v10079_v20, %v8568_v23 }
 0x160   : > { %1321 = vmatmul.bf16.gmra.mxu2 %v11377_v29  ;;  %1499 = vmatmul.bf16.gmra.mxu0 %v11377_v29  ;;  %v697_v35 = vadd.f32 %v696_v33, %v11247_v15 }
 0x161   : > { %1410 = vmatmul.bf16.gmra.mxu3 %v11379_v30  ;;  %1588 = vmatmul.bf16.gmra.mxu1 %v11379_v30  ;;  %v659_v42 = vpop.f32.mrf.mxu0 }
 0x162   : > { %v785_v36 = vpop.f32.mrf.mxu3  ;;  %v748_v48 = vpop.f32.mrf.mxu1  ;;  %v851_v49 = vmax.f32 %v697_v35, 0.0  ;;  %v660_v0 = vadd.f32 %v659_v42, %v11247_v15  ;;  %1821 = vmatpush.bf16.msra.mxu0 %v8571_v27 }
 0x163   : > { %v786_v45 = vadd.f32 %v785_v36, %v11249_v16  ;;  %v749_v4 = vadd.f32 %v748_v48, %v11249_v16 }
 0x164   : > { %v11387_v58 = vpack.c.bf16 %v851_v49, %v849_v34  ;;  %v821_v11 = vmax.f32 %v660_v0, 0.0  ;;  %v10111_v49 = vld [vmem:[#allocation8 + $0x16c] sm:$0xf] }
 0x165   : > { %v852_v52 = vmax.f32 %v786_v45, 0.0  ;;  %v822_v24 = vmax.f32 %v749_v4, 0.0  ;;  %v8550_v4 = vld [vmem:[#allocation8 + $0x48] sm:$0xf] }
 0x167   : > { %v11389_v62 = vpack.c.bf16 %v852_v52, %v850_v41  ;;  %v699_v63 = vpop.f32.mrf.mxu2  ;;  %v8699_v52 = vor.u32 %v10111_v49, %v8696_v50  ;;  %v8552_v49 = vld [vmem:[#allocation8 + $0x58] sm:$0xf0] }
 0x168   : > { %v700_v19 = vadd.f32 %v699_v63, %v11247_v15 }
 0x169   : > { %v661_v7 = vpop.f32.mrf.mxu0  ;;  %1910 = vmatpush.bf16.msra.mxu1 %v8699_v52 }
 0x16a   : > { %v788_v3 = vpop.f32.mrf.mxu3  ;;  %v662_v8 = vadd.f32 %v661_v7, %v11247_v15  ;;  %v750_v9 = vpop.f32.mrf.mxu1  ;;  %v853_v35 = vmax.f32 %v700_v19, 0.0  ;;  %v10077_v7 = vld [vmem:[#allocation8 + $0x54] sm:$0xf0] }
 0x16b   : > { %v751_v10 = vadd.f32 %v750_v9, %v11249_v16  ;;  %v789_v26 = vadd.f32 %v788_v3, %v11249_v16  ;;  %v8551_v9 = vor.u32 %v10077_v7, %v8550_v4  ;;  %v10107_v7 = vld [vmem:[#allocation8 + $0x14c] sm:$0xf] }
 0x16c   : > { %v823_v18 = vmax.f32 %v662_v8, 0.0 }
 0x16d   : > { %v824_v25 = vmax.f32 %v751_v10, 0.0  ;;  %v854_v42 = vmax.f32 %v789_v26, 0.0  ;;  %v8678_v10 = vld [vmem:[#allocation8 + $0x148] sm:$0xf]  ;;  %1644 = vmatpush.bf16.msra.mxu2 %v8551_v9 }
 0x16e   : > { %v11397_v28 = vpack.c.bf16 %v823_v18, %v821_v11  ;;  %v10109_v11 = vld [vmem:[#allocation8 + $0x154] sm:$0xf0] }
 0x16f   : > { %v11399_v33 = vpack.c.bf16 %v824_v25, %v822_v24  ;;  %v701_v34 = vpop.f32.mrf.mxu2  ;;  %v8679_v20 = vor.u32 %v10109_v11, %v8678_v10 }
 0x170   : > { %1326 = vmatmul.bf16.gmra.mxu2 %v11397_v28  ;;  %1504 = vmatmul.bf16.gmra.mxu0 %v11397_v28  ;;  %v702_v36 = vadd.f32 %v701_v34, %v11247_v15  ;;  %v11411_v15 = vperm.slane %v953_v55, 1 }
 0x171   : > { %1415 = vmatmul.bf16.gmra.mxu3 %v11399_v33  ;;  %1593 = vmatmul.bf16.gmra.mxu1 %v11399_v33 }
 0x172   : > { %v790_v41 = vpop.f32.mrf.mxu3  ;;  %v855_v48 = vmax.f32 %v702_v36, 0.0  ;;  %1733 = vmatpush.bf16.msra.mxu3 %v8679_v20 }
 0x173   : > { %v791_v45 = vadd.f32 %v790_v41, %v11249_v16  ;;  %v11416_v16 = vperm.slane %v953_v55, 0 }
 0x174   : > { %v11407_v53 = vpack.c.bf16 %v855_v48, %v853_v35  ;;  %v10075_v48 = vld [vmem:[#allocation8 + $0x4c] sm:$0xf] }
 0x175   : > { %v856_v51 = vmax.f32 %v791_v45, 0.0 }
 0x177   : > { %v11409_v54 = vpack.c.bf16 %v856_v51, %v854_v42  ;;  %v8555_v51 = vor.u32 %v10075_v48, %v8552_v49 }
 0x179   : > { %1822 = vmatpush.bf16.msra.mxu0 %v8555_v51 }
 0x17d   : > { %v1470_v61 = vpop.f32.mrf.mxu0 }
 0x17e   : > { %v1471_v63 = vadd.f32 %v1470_v61, %v11411_v15  ;;  %v1559_v0 = vpop.f32.mrf.mxu1 }
 0x180   : > { %v1560_v3 = vadd.f32 %v1559_v0, %v1471_v63  ;;  %1331 = vmatmul.bf16.gmra.mxu2 %v11267_v46  ;;  %1509 = vmatmul.bf16.gmra.mxu0 %v11267_v46 }
 0x181   : > { %1420 = vmatmul.bf16.gmra.mxu3 %v11269_v47  ;;  %1598 = vmatmul.bf16.gmra.mxu1 %v11269_v47 }
 0x182   : > { %v1996_v34 = vmax.f32 %v1560_v3, 0.0 }
 0x183   : > { %v1292_v8 = vpop.f32.mrf.mxu2 }
 0x184   : > { %v1293_v18 = vadd.f32 %v1292_v8, %v11416_v16  ;;  %v1381_v19 = vpop.f32.mrf.mxu3  ;;  %v8680_v8 = vld [vmem:[#allocation8 + $0x158] sm:$0xf0] }
 0x185   : > { %v1472_v23 = vpop.f32.mrf.mxu0  ;;  %v8683_v10 = vor.u32 %v10107_v7, %v8680_v8  ;;  %v8662_v8 = vld [vmem:[#allocation8 + $0x128] sm:$0xf] }
 0x186   : > { %v1382_v24 = vadd.f32 %v1381_v19, %v1293_v18  ;;  %v1473_v25 = vadd.f32 %v1472_v23, %v11411_v15  ;;  %v1561_v26 = vpop.f32.mrf.mxu1 }
 0x187   : > { %1911 = vmatpush.bf16.msra.mxu1 %v8683_v10 }
 0x188   : > { %v1562_v27 = vadd.f32 %v1561_v26, %v1473_v25  ;;  %v1995_v63 = vmax.f32 %v1382_v24, 0.0 }
 0x18a   : > { %v2000_v35 = vmax.f32 %v1562_v27, 0.0 }
 0x18b   : > { %v1294_v36 = vpop.f32.mrf.mxu2 }
 0x18c   : > { %v11422_v41 = vpack.c.bf16 %v2000_v35, %v1996_v34  ;;  %v1295_v42 = vadd.f32 %v1294_v36, %v11416_v16  ;;  %v1383_v45 = vpop.f32.mrf.mxu3 }
 0x18d   : > { %v1475_v50 = vpop.f32.mrf.mxu0 }
 0x18e   : > { %13239 = vst [vmem:[#allocation23_spill] sm:$0xff] %v11422_v41  ;;  %v1384_v52 = vadd.f32 %v1383_v45, %v1295_v42  ;;  %v1476_v55 = vadd.f32 %v1475_v50, %v11411_v15  ;;  %v1564_v61 = vpop.f32.mrf.mxu1 }
 0x190   : > { %v1999_v0 = vmax.f32 %v1384_v52, 0.0  ;;  %v1565_v4 = vadd.f32 %v1564_v61, %v1476_v55  ;;  %1336 = vmatmul.bf16.gmra.mxu2 %v11287_v21  ;;  %1514 = vmatmul.bf16.gmra.mxu0 %v11287_v21 }
 0x191   : > { %1425 = vmatmul.bf16.gmra.mxu3 %v11289_v22  ;;  %1603 = vmatmul.bf16.gmra.mxu1 %v11289_v22 }
 0x192   : > { %v11430_v3 = vpack.c.bf16 %v1999_v0, %v1995_v63  ;;  %v2004_v26 = vmax.f32 %v1565_v4, 0.0  ;;  %v8534_v63 = vld [vmem:[#allocation8 + $0x28] sm:$0xf]  ;;  %v10073_v0 = vld [vmem:[#allocation8 + $0x34] sm:$0xf0] }
 0x193   : > { %v1297_v9 = vpop.f32.mrf.mxu2  ;;  %v8535_v7 = vor.u32 %v10073_v0, %v8534_v63 }
 0x194   : > { %v1298_v11 = vadd.f32 %v1297_v9, %v11416_v16  ;;  %v1386_v18 = vpop.f32.mrf.mxu3  ;;  %v10105_v9 = vld [vmem:[#allocation8 + $0x134] sm:$0xf0] }
 0x195   : > { %v1477_v19 = vpop.f32.mrf.mxu0  ;;  %1645 = vmatpush.bf16.msra.mxu2 %v8535_v7 }
 0x196   : > { %v1387_v20 = vadd.f32 %v1386_v18, %v1298_v11  ;;  %v1478_v23 = vadd.f32 %v1477_v19, %v11411_v15  ;;  %v1566_v24 = vpop.f32.mrf.mxu1  ;;  %v8663_v18 = vor.u32 %v10105_v9, %v8662_v8  ;;  %v10103_v9 = vld [vmem:[#allocation8 + $0x12c] sm:$0xf] }
 0x198   : > { %v1567_v25 = vadd.f32 %v1566_v24, %v1478_v23  ;;  %v2003_v51 = vmax.f32 %v1387_v20, 0.0  ;;  %1734 = vmatpush.bf16.msra.mxu3 %v8663_v18 }
 0x19a   : > { %v2008_v27 = vmax.f32 %v1567_v25, 0.0 }
 0x19b   : > { %v1299_v34 = vpop.f32.mrf.mxu2 }
 0x19c   : > { %v11434_v35 = vpack.c.bf16 %v2008_v27, %v2004_v26  ;;  %v1300_v36 = vadd.f32 %v1299_v34, %v11416_v16  ;;  %v1388_v42 = vpop.f32.mrf.mxu3 }
 0x19d   : > { %v1480_v45 = vpop.f32.mrf.mxu0 }
 0x19e   : > { %v1389_v48 = vadd.f32 %v1388_v42, %v1300_v36  ;;  %v1481_v49 = vadd.f32 %v1480_v45, %v11411_v15  ;;  %v1569_v50 = vpop.f32.mrf.mxu1 }
 0x1a0   : > { %v2007_v52 = vmax.f32 %v1389_v48, 0.0  ;;  %v1570_v55 = vadd.f32 %v1569_v50, %v1481_v49  ;;  %1341 = vmatmul.bf16.gmra.mxu2 %v11307_v56  ;;  %1519 = vmatmul.bf16.gmra.mxu0 %v11307_v56  ;;  %v10071_v48 = vld [vmem:[#allocation8 + $0x2c] sm:$0xf]  ;;  %v8536_v49 = vld [vmem:[#allocation8 + $0x38] sm:$0xf0] }
 0x1a1   : > { %1430 = vmatmul.bf16.gmra.mxu3 %v11309_v57  ;;  %1608 = vmatmul.bf16.gmra.mxu1 %v11309_v57 }
 0x1a2   : > { %v11442_v61 = vpack.c.bf16 %v2007_v52, %v2003_v51  ;;  %v2012_v26 = vmax.f32 %v1570_v55, 0.0  ;;  %v8539_v51 = vor.u32 %v10071_v48, %v8536_v49 }
 0x1a3   : > { %v1302_v4 = vpop.f32.mrf.mxu2 }
 0x1a4   : > { %v1303_v10 = vadd.f32 %v1302_v4, %v11416_v16  ;;  %v1391_v11 = vpop.f32.mrf.mxu3  ;;  %1823 = vmatpush.bf16.msra.mxu0 %v8539_v51 }
 0x1a5   : > { %v1482_v19 = vpop.f32.mrf.mxu0 }
 0x1a6   : > { %v1392_v20 = vadd.f32 %v1391_v11, %v1303_v10  ;;  %v1483_v23 = vadd.f32 %v1482_v19, %v11411_v15  ;;  %v1571_v24 = vpop.f32.mrf.mxu1  ;;  %v8664_v10 = vld [vmem:[#allocation8 + $0x138] sm:$0xf0] }
 0x1a7   : > { %v8667_v18 = vor.u32 %v10103_v9, %v8664_v10  ;;  %v8518_v10 = vld [vmem:[#allocation8 + $0x8] sm:$0xf] }
 0x1a8   : > { %v1572_v25 = vadd.f32 %v1571_v24, %v1483_v23  ;;  %v2011_v4 = vmax.f32 %v1392_v20, 0.0 }
 0x1a9   : > { %1912 = vmatpush.bf16.msra.mxu1 %v8667_v18 }
 0x1aa   : > { %v2016_v27 = vmax.f32 %v1572_v25, 0.0 }
 0x1ab   : > { %v1304_v34 = vpop.f32.mrf.mxu2 }
 0x1ac   : > { %v11446_v36 = vpack.c.bf16 %v2016_v27, %v2012_v26  ;;  %v1305_v42 = vadd.f32 %v1304_v34, %v11416_v16  ;;  %v1393_v45 = vpop.f32.mrf.mxu3 }
 0x1ad   : > { %v1485_v50 = vpop.f32.mrf.mxu0 }
 0x1ae   : > { %13240 = vst [vmem:[#allocation24_spill] sm:$0xff] %v11446_v36  ;;  %v1394_v52 = vadd.f32 %v1393_v45, %v1305_v42  ;;  %v1486_v63 = vadd.f32 %v1485_v50, %v11411_v15  ;;  %v1574_v0 = vpop.f32.mrf.mxu1 }
 0x1b0   : > { %v2015_v7 = vmax.f32 %v1394_v52, 0.0  ;;  %v1575_v8 = vadd.f32 %v1574_v0, %v1486_v63  ;;  %1346 = vmatmul.bf16.gmra.mxu2 %v11327_v37  ;;  %1524 = vmatmul.bf16.gmra.mxu0 %v11327_v37 }
 0x1b1   : > { %1435 = vmatmul.bf16.gmra.mxu3 %v11329_v38  ;;  %1613 = vmatmul.bf16.gmra.mxu1 %v11329_v38 }
 0x1b2   : > { %v11454_v55 = vpack.c.bf16 %v2015_v7, %v2011_v4  ;;  %v2020_v34 = vmax.f32 %v1575_v8, 0.0 }
 0x1b3   : > { %v1307_v11 = vpop.f32.mrf.mxu2 }
 0x1b4   : > { %13241 = vst [vmem:[#allocation25_spill] sm:$0xff] %v11454_v55  ;;  %v1308_v19 = vadd.f32 %v1307_v11, %v11416_v16  ;;  %v1396_v23 = vpop.f32.mrf.mxu3  ;;  %v10069_v11 = vld [vmem:[#allocation8 + $0x14] sm:$0xf0] }
 0x1b5   : > { %v1487_v20 = vpop.f32.mrf.mxu0 }
 0x1b6   : > { %v1397_v24 = vadd.f32 %v1396_v23, %v1308_v19  ;;  %v1488_v25 = vadd.f32 %v1487_v20, %v11411_v15  ;;  %v1576_v26 = vpop.f32.mrf.mxu1  ;;  %v8519_v19 = vor.u32 %v10069_v11, %v8518_v10  ;;  %v8646_v23 = vld [vmem:[#allocation8 + $0x108] sm:$0xf]  ;;  %v10101_v20 = vld [vmem:[#allocation8 + $0x114] sm:$0xf0]  ;;  %v8520_v10 = vld [vmem:[#allocation8 + $0x18] sm:$0xf0] }
 0x1b8   : > { %v1577_v27 = vadd.f32 %v1576_v26, %v1488_v25  ;;  %v2019_v4 = vmax.f32 %v1397_v24, 0.0  ;;  %v8647_v26 = vor.u32 %v10101_v20, %v8646_v23  ;;  %1646 = vmatpush.bf16.msra.mxu2 %v8519_v19 }
 0x1ba   : > { %v2024_v42 = vmax.f32 %v1577_v27, 0.0  ;;  %1735 = vmatpush.bf16.msra.mxu3 %v8647_v26 }
 0x1bb   : > { %v1309_v45 = vpop.f32.mrf.mxu2 }
 0x1bc   : > { %v11458_v48 = vpack.c.bf16 %v2024_v42, %v2020_v34  ;;  %v1310_v49 = vadd.f32 %v1309_v45, %v11416_v16  ;;  %v1398_v50 = vpop.f32.mrf.mxu3 }
 0x1bd   : > { %v1490_v51 = vpop.f32.mrf.mxu0 }
 0x1be   : > { %v1399_v52 = vadd.f32 %v1398_v50, %v1310_v49  ;;  %v1491_v63 = vadd.f32 %v1490_v51, %v11411_v15  ;;  %v1579_v0 = vpop.f32.mrf.mxu1 }
 0x1c0   : > { %v2023_v7 = vmax.f32 %v1399_v52, 0.0  ;;  %v1580_v9 = vadd.f32 %v1579_v0, %v1491_v63  ;;  %1351 = vmatmul.bf16.gmra.mxu2 %v11347_v12  ;;  %1529 = vmatmul.bf16.gmra.mxu0 %v11347_v12 }
 0x1c1   : > { %1440 = vmatmul.bf16.gmra.mxu3 %v11349_v17  ;;  %1618 = vmatmul.bf16.gmra.mxu1 %v11349_v17 }
 0x1c2   : > { %v11466_v8 = vpack.c.bf16 %v2023_v7, %v2019_v4  ;;  %v2028_v50 = vmax.f32 %v1580_v9, 0.0  ;;  %v10067_v7 = vld [vmem:[#allocation8 + $0xc] sm:$0xf] }
 0x1c3   : > { %v1312_v18 = vpop.f32.mrf.mxu2 }
 0x1c4   : > { %v1313_v24 = vadd.f32 %v1312_v18, %v11416_v16  ;;  %v1401_v25 = vpop.f32.mrf.mxu3  ;;  %v8523_v18 = vor.u32 %v10067_v7, %v8520_v10 }
 0x1c5   : > { %v1492_v27 = vpop.f32.mrf.mxu0 }
 0x1c6   : > { %v1402_v34 = vadd.f32 %v1401_v25, %v1313_v24  ;;  %v1493_v42 = vadd.f32 %v1492_v27, %v11411_v15  ;;  %v1581_v45 = vpop.f32.mrf.mxu1  ;;  %1824 = vmatpush.bf16.msra.mxu0 %v8523_v18  ;;  %v10099_v27 = vld [vmem:[#allocation8 + $0x10c] sm:$0xf] }
 0x1c8   : > { %v1582_v49 = vadd.f32 %v1581_v45, %v1493_v42  ;;  %v2027_v24 = vmax.f32 %v1402_v34, 0.0  ;;  %v8648_v42 = vld [vmem:[#allocation8 + $0x118] sm:$0xf0] }
 0x1ca   : > { %v2032_v51 = vmax.f32 %v1582_v49, 0.0  ;;  %v8651_v49 = vor.u32 %v10099_v27, %v8648_v42 }
 0x1cb   : > { %v1314_v52 = vpop.f32.mrf.mxu2 }
 0x1cc   : > { %v11470_v63 = vpack.c.bf16 %v2032_v51, %v2028_v50  ;;  %v1315_v0 = vadd.f32 %v1314_v52, %v11416_v16  ;;  %v1403_v4 = vpop.f32.mrf.mxu3  ;;  %1913 = vmatpush.bf16.msra.mxu1 %v8651_v49 }
 0x1cd   : > { %v1495_v11 = vpop.f32.mrf.mxu0 }
 0x1ce   : > { %13242 = vst [vmem:[#allocation26_spill] sm:$0xff] %v11470_v63  ;;  %v1404_v23 = vadd.f32 %v1403_v4, %v1315_v0  ;;  %v1496_v19 = vadd.f32 %v1495_v11, %v11411_v15  ;;  %v1584_v20 = vpop.f32.mrf.mxu1 }
 0x1d0   : > { %v2031_v25 = vmax.f32 %v1404_v23, 0.0  ;;  %v1585_v26 = vadd.f32 %v1584_v20, %v1496_v19  ;;  %1356 = vmatmul.bf16.gmra.mxu2 %v11367_v5  ;;  %1534 = vmatmul.bf16.gmra.mxu0 %v11367_v5 }
 0x1d1   : > { %1445 = vmatmul.bf16.gmra.mxu3 %v11369_v6  ;;  %1623 = vmatmul.bf16.gmra.mxu1 %v11369_v6 }
 0x1d2   : > { %v11478_v9 = vpack.c.bf16 %v2031_v25, %v2027_v24  ;;  %v2036_v10 = vmax.f32 %v1585_v26, 0.0 }
 0x1d3   : > { %v1317_v45 = vpop.f32.mrf.mxu2 }
 0x1d4   : > { %13243 = vst [vmem:[#allocation27_spill] sm:$0xff] %v11478_v9  ;;  %v1318_v50 = vadd.f32 %v1317_v45, %v11416_v16  ;;  %v1406_v51 = vpop.f32.mrf.mxu3 }
 0x1d5   : > { %v1497_v34 = vpop.f32.mrf.mxu0 }
 0x1d6   : > { %v1407_v52 = vadd.f32 %v1406_v51, %v1318_v50  ;;  %v1498_v0 = vadd.f32 %v1497_v34, %v11411_v15  ;;  %v1586_v4 = vpop.f32.mrf.mxu1  ;;  %v8990_v51 = vld [vmem:[#allocation11 + $0x1c0] sm:$0xf] }
 0x1d7   : > { %v10190_v34 = vld [vmem:[#allocation11 + $0x1dc] sm:$0xf0] }
 0x1d8   : > { %v1587_v7 = vadd.f32 %v1586_v4, %v1498_v0  ;;  %v2035_v45 = vmax.f32 %v1407_v52, 0.0  ;;  %v8991_v4 = vor.u32 %v10190_v34, %v8990_v51 }
 0x1da   : > { %v2040_v11 = vmax.f32 %v1587_v7, 0.0  ;;  %v9246_v7 = vld [vmem:[#allocation11 + $0x3c0] sm:$0xf]  ;;  %3741 = vmatpush.bf16.msrb.mxu2 %v8991_v4 }
 0x1db   : > { %v1319_v18 = vpop.f32.mrf.mxu2 }
 0x1dc   : > { %v11482_v23 = vpack.c.bf16 %v2040_v11, %v2036_v10  ;;  %v1320_v19 = vadd.f32 %v1319_v18, %v11416_v16  ;;  %v1408_v20 = vpop.f32.mrf.mxu3  ;;  %v10254_v10 = vld [vmem:[#allocation11 + $0x3dc] sm:$0xf0] }
 0x1dd   : > { %v1500_v24 = vpop.f32.mrf.mxu0  ;;  %v9247_v18 = vor.u32 %v10254_v10, %v9246_v7 }
 0x1de   : > { %13244 = vst [vmem:[#allocation28_spill] sm:$0xff] %v11482_v23  ;;  %v1409_v25 = vadd.f32 %v1408_v20, %v1320_v19  ;;  %v1501_v27 = vadd.f32 %v1500_v24, %v11411_v15  ;;  %v1589_v42 = vpop.f32.mrf.mxu1 }
 0x1df   : > { %3830 = vmatpush.bf16.msrb.mxu3 %v9247_v18 }
 0x1e0   : > { %v2039_v49 = vmax.f32 %v1409_v25, 0.0  ;;  %v1590_v50 = vadd.f32 %v1589_v42, %v1501_v27  ;;  %1361 = vmatmul.bf16.gmra.mxu2 %v11387_v58  ;;  %1539 = vmatmul.bf16.gmra.mxu0 %v11387_v58 }
 0x1e1   : > { %1450 = vmatmul.bf16.gmra.mxu3 %v11389_v62  ;;  %1628 = vmatmul.bf16.gmra.mxu1 %v11389_v62 }
 0x1e2   : > { %v11490_v26 = vpack.c.bf16 %v2039_v49, %v2035_v45  ;;  %v2044_v42 = vmax.f32 %v1590_v50, 0.0 }
 0x1e3   : > { %v1322_v0 = vpop.f32.mrf.mxu2 }
 0x1e4   : > { %13245 = vst [vmem:[#allocation29_spill] sm:$0xff] %v11490_v26  ;;  %v1323_v52 = vadd.f32 %v1322_v0, %v11416_v16  ;;  %v1411_v11 = vpop.f32.mrf.mxu3  ;;  %v9502_v26 = vld [vmem:[#allocation11 + $0x5c0] sm:$0xf] }
 0x1e5   : > { %v1502_v19 = vpop.f32.mrf.mxu0  ;;  %v10318_v0 = vld [vmem:[#allocation11 + $0x5dc] sm:$0xf0] }
 0x1e6   : > { %v1412_v20 = vadd.f32 %v1411_v11, %v1323_v52  ;;  %v1503_v24 = vadd.f32 %v1502_v19, %v11411_v15  ;;  %v1591_v25 = vpop.f32.mrf.mxu1  ;;  %v9503_v7 = vor.u32 %v10318_v0, %v9502_v26  ;;  %v10382_v26 = vld [vmem:[#allocation11 + $0x7dc] sm:$0xf0] }
 0x1e8   : > { %v1592_v27 = vadd.f32 %v1591_v25, %v1503_v24  ;;  %3919 = vmatpush.bf16.msrb.mxu0 %v9503_v7  ;;  %v2043_v11 = vmax.f32 %v1412_v20, 0.0  ;;  %v9758_v24 = vld [vmem:[#allocation11 + $0x7c0] sm:$0xf] }
 0x1ea   : > { %v2048_v45 = vmax.f32 %v1592_v27, 0.0  ;;  %v9759_v27 = vor.u32 %v10382_v26, %v9758_v24 }
 0x1eb   : > { %v1324_v49 = vpop.f32.mrf.mxu2 }
 0x1ec   : > { %v11494_v23 = vpack.c.bf16 %v2048_v45, %v2044_v42  ;;  %v1325_v51 = vadd.f32 %v1324_v49, %v11416_v16  ;;  %v1413_v34 = vpop.f32.mrf.mxu3  ;;  %4008 = vmatpush.bf16.msrb.mxu1 %v9759_v27 }
 0x1ed   : > { %v1505_v63 = vpop.f32.mrf.mxu0 }
 0x1ee   : > { %13246 = vst [vmem:[#allocation30_spill] sm:$0xff] %v11494_v23  ;;  %v1414_v10 = vadd.f32 %v1413_v34, %v1325_v51  ;;  %v1506_v4 = vadd.f32 %v1505_v63, %v11411_v15  ;;  %v1594_v52 = vpop.f32.mrf.mxu1 }
 0x1f0   : > { %v2047_v18 = vmax.f32 %v1414_v10, 0.0  ;;  %v1595_v19 = vadd.f32 %v1594_v52, %v1506_v4  ;;  %1366 = vmatmul.bf16.gmra.mxu2 %v11407_v53  ;;  %1544 = vmatmul.bf16.gmra.mxu0 %v11407_v53 }
 0x1f1   : > { %1455 = vmatmul.bf16.gmra.mxu3 %v11409_v54  ;;  %1633 = vmatmul.bf16.gmra.mxu1 %v11409_v54 }
 0x1f2   : > { %v11502_v50 = vpack.c.bf16 %v2047_v18, %v2043_v11  ;;  %v2052_v0 = vmax.f32 %v1595_v19, 0.0 }
 0x1f3   : > { %v1327_v25 = vpop.f32.mrf.mxu2 }
 0x1f4   : > { %13247 = vst [vmem:[#allocation31_spill] sm:$0xff] %v11502_v50  ;;  %v1328_v63 = vadd.f32 %v1327_v25, %v11416_v16  ;;  %v1416_v42 = vpop.f32.mrf.mxu3 }
 0x1f5   : > { %v1507_v20 = vpop.f32.mrf.mxu0 }
 0x1f6   : > { %v1417_v45 = vadd.f32 %v1416_v42, %v1328_v63  ;;  %v1508_v49 = vadd.f32 %v1507_v20, %v11411_v15  ;;  %v1596_v51 = vpop.f32.mrf.mxu1  ;;  %v8958_v42 = vld [vmem:[#allocation11 + $0x180] sm:$0xf] }
 0x1f7   : > { %v10182_v20 = vld [vmem:[#allocation11 + $0x19c] sm:$0xf0] }
 0x1f8   : > { %v1597_v34 = vadd.f32 %v1596_v51, %v1508_v49  ;;  %v2051_v23 = vmax.f32 %v1417_v45, 0.0  ;;  %v8959_v51 = vor.u32 %v10182_v20, %v8958_v42  ;;  %v9470_v20 = vld [vmem:[#allocation11 + $0x580] sm:$0xf] }
 0x1fa   : > { %v2056_v7 = vmax.f32 %v1597_v34, 0.0  ;;  %v9214_v34 = vld [vmem:[#allocation11 + $0x380] sm:$0xf]  ;;  %3742 = vmatpush.bf16.msrb.mxu2 %v8959_v51 }
 0x1fb   : > { %v1329_v10 = vpop.f32.mrf.mxu2 }
 0x1fc   : > { %v11506_v4 = vpack.c.bf16 %v2056_v7, %v2052_v0  ;;  %v1330_v52 = vadd.f32 %v1329_v10, %v11416_v16  ;;  %v1418_v11 = vpop.f32.mrf.mxu3  ;;  %v10246_v0 = vld [vmem:[#allocation11 + $0x39c] sm:$0xf0] }
 0x1fd   : > { %v1510_v18 = vpop.f32.mrf.mxu0  ;;  %v9215_v10 = vor.u32 %v10246_v0, %v9214_v34 }
 0x1fe   : > { %13248 = vst [vmem:[#allocation32_spill] sm:$0xff] %v11506_v4  ;;  %v1419_v24 = vadd.f32 %v1418_v11, %v1330_v52  ;;  %v1511_v26 = vadd.f32 %v1510_v18, %v11411_v15  ;;  %v1599_v25 = vpop.f32.mrf.mxu1 }
 0x1ff   : > { %3831 = vmatpush.bf16.msrb.mxu3 %v9215_v10 }
 0x200   : > { %v2055_v27 = vmax.f32 %v1419_v24, 0.0  ;;  %v1600_v63 = vadd.f32 %v1599_v25, %v1511_v26  ;;  %1647 = vmatmul.bf16.vlgmr.msra.gmra.mxu2 %v11257_v31  ;;  %1825 = vmatmul.bf16.vlgmr.msra.gmra.mxu0 %v11257_v31 }
 0x201   : > { %1736 = vmatmul.bf16.vlgmr.msra.gmra.mxu3 %v11259_v32  ;;  %1914 = vmatmul.bf16.vlgmr.msra.gmra.mxu1 %v11259_v32 }
 0x202   : > { %v11514_v19 = vpack.c.bf16 %v2055_v27, %v2051_v23  ;;  %v2060_v23 = vmax.f32 %v1600_v63, 0.0 }
 0x203   : > { %v1332_v49 = vpop.f32.mrf.mxu2 }
 0x204   : > { %v1333_v45 = vadd.f32 %v1332_v49, %v11416_v16  ;;  %v1421_v7 = vpop.f32.mrf.mxu3  ;;  %v10310_v49 = vld [vmem:[#allocation11 + $0x59c] sm:$0xf0] }
 0x205   : > { %v1512_v52 = vpop.f32.mrf.mxu0  ;;  %v9471_v34 = vor.u32 %v10310_v49, %v9470_v20 }
 0x206   : > { %v1422_v11 = vadd.f32 %v1421_v7, %v1333_v45  ;;  %v1513_v31 = vadd.f32 %v1512_v52, %v11411_v15  ;;  %v1601_v18 = vpop.f32.mrf.mxu1 }
 0x207   : > { %3920 = vmatpush.bf16.msrb.mxu0 %v9471_v34 }
 0x208   : > { %v1602_v32 = vadd.f32 %v1601_v18, %v1513_v31  ;;  %v2059_v7 = vmax.f32 %v1422_v11, 0.0  ;;  %v9726_v31 = vld [vmem:[#allocation11 + $0x780] sm:$0xf] }
 0x209   : > { %v10374_v18 = vld [vmem:[#allocation11 + $0x79c] sm:$0xf0] }
 0x20a   : > { %v2064_v24 = vmax.f32 %v1602_v32, 0.0 }
 0x20b   : > { %v1334_v26 = vpop.f32.mrf.mxu2 }
 0x20c   : > { %v11518_v25 = vpack.c.bf16 %v2064_v24, %v2060_v23  ;;  %v1335_v27 = vadd.f32 %v1334_v26, %v11416_v16  ;;  %v1423_v42 = vpop.f32.mrf.mxu3  ;;  %v9727_v23 = vor.u32 %v10374_v18, %v9726_v31 }
 0x20d   : > { %v1515_v4 = vpop.f32.mrf.mxu0 }
 0x20e   : > { %13249 = vst [vmem:[#allocation33_spill] sm:$0xff] %v11518_v25  ;;  %v1424_v0 = vadd.f32 %v1423_v42, %v1335_v27  ;;  %v1516_v51 = vadd.f32 %v1515_v4, %v11411_v15  ;;  %v1604_v45 = vpop.f32.mrf.mxu1  ;;  %4009 = vmatpush.bf16.msrb.mxu1 %v9727_v23 }
 0x210   : > { %v2063_v10 = vmax.f32 %v1424_v0, 0.0  ;;  %v1605_v52 = vadd.f32 %v1604_v45, %v1516_v51  ;;  %1652 = vmatmul.bf16.gmra.mxu2 %v11277_v1  ;;  %1830 = vmatmul.bf16.gmra.mxu0 %v11277_v1 }
 0x211   : > { %1741 = vmatmul.bf16.gmra.mxu3 %v11279_v2  ;;  %1919 = vmatmul.bf16.gmra.mxu1 %v11279_v2 }
 0x212   : > { %v11526_v63 = vpack.c.bf16 %v2063_v10, %v2059_v7  ;;  %v2068_v20 = vmax.f32 %v1605_v52, 0.0 }
 0x213   : > { %v1337_v32 = vpop.f32.mrf.mxu2 }
 0x214   : > { %13250 = vst [vmem:[#allocation34_spill] sm:$0xff] %v11526_v63  ;;  %v1338_v4 = vadd.f32 %v1337_v32, %v11416_v16  ;;  %v1426_v24 = vpop.f32.mrf.mxu3 }
 0x215   : > { %v1517_v11 = vpop.f32.mrf.mxu0 }
 0x216   : > { %v1427_v26 = vadd.f32 %v1426_v24, %v1338_v4  ;;  %v1518_v27 = vadd.f32 %v1517_v11, %v11411_v15  ;;  %v1606_v42 = vpop.f32.mrf.mxu1  ;;  %v8926_v4 = vld [vmem:[#allocation11 + $0x140] sm:$0xf] }
 0x217   : > { %v10174_v24 = vld [vmem:[#allocation11 + $0x15c] sm:$0xf0] }
 0x218   : > { %v1607_v1 = vadd.f32 %v1606_v42, %v1518_v27  ;;  %v2067_v18 = vmax.f32 %v1427_v26, 0.0  ;;  %v8927_v27 = vor.u32 %v10174_v24, %v8926_v4  ;;  %v9182_v42 = vld [vmem:[#allocation11 + $0x340] sm:$0xf] }
 0x219   : > { %v9438_v4 = vld [vmem:[#allocation11 + $0x540] sm:$0xf] }
 0x21a   : > { %v2072_v49 = vmax.f32 %v1607_v1, 0.0  ;;  %v10238_v1 = vld [vmem:[#allocation11 + $0x35c] sm:$0xf0]  ;;  %3743 = vmatpush.bf16.msrb.mxu2 %v8927_v27 }
 0x21b   : > { %v1339_v34 = vpop.f32.mrf.mxu2  ;;  %v10302_v24 = vld [vmem:[#allocation11 + $0x55c] sm:$0xf0] }
 0x21c   : > { %v11530_v2 = vpack.c.bf16 %v2072_v49, %v2068_v20  ;;  %v1340_v0 = vadd.f32 %v1339_v34, %v11416_v16  ;;  %v1428_v51 = vpop.f32.mrf.mxu3  ;;  %v9183_v49 = vor.u32 %v10238_v1, %v9182_v42  ;;  %v9439_v42 = vor.u32 %v10302_v24, %v9438_v4 }
 0x21d   : > { %v1520_v45 = vpop.f32.mrf.mxu0 }
 0x21e   : > { %v1429_v7 = vadd.f32 %v1428_v51, %v1340_v0  ;;  %v1521_v10 = vadd.f32 %v1520_v45, %v11411_v15  ;;  %v1609_v31 = vpop.f32.mrf.mxu1  ;;  %3832 = vmatpush.bf16.msrb.mxu3 %v9183_v49  ;;  %3921 = vmatpush.bf16.msrb.mxu0 %v9439_v42 }
 0x220   : > { %v2071_v32 = vmax.f32 %v1429_v7, 0.0  ;;  %v1610_v23 = vadd.f32 %v1609_v31, %v1521_v10  ;;  %1657 = vmatmul.bf16.gmra.mxu2 %v11297_v39  ;;  %1835 = vmatmul.bf16.gmra.mxu0 %v11297_v39 }
 0x221   : > { %1746 = vmatmul.bf16.gmra.mxu3 %v11299_v40  ;;  %1924 = vmatmul.bf16.gmra.mxu1 %v11299_v40 }
 0x222   : > { %v11538_v52 = vpack.c.bf16 %v2071_v32, %v2067_v18  ;;  %v2076_v45 = vmax.f32 %v1610_v23, 0.0 }
 0x223   : > { %v1342_v11 = vpop.f32.mrf.mxu2 }
 0x224   : > { %v1343_v26 = vadd.f32 %v1342_v11, %v11416_v16  ;;  %v1431_v20 = vpop.f32.mrf.mxu3 }
 0x225   : > { %v1522_v34 = vpop.f32.mrf.mxu0 }
 0x226   : > { %v1432_v0 = vadd.f32 %v1431_v20, %v1343_v26  ;;  %v1523_v39 = vadd.f32 %v1522_v34, %v11411_v15  ;;  %v1611_v51 = vpop.f32.mrf.mxu1 }
 0x228   : > { %v1612_v40 = vadd.f32 %v1611_v51, %v1523_v39  ;;  %v2075_v20 = vmax.f32 %v1432_v0, 0.0  ;;  %v9694_v39 = vld [vmem:[#allocation11 + $0x740] sm:$0xf] }
 0x229   : > { %v10366_v51 = vld [vmem:[#allocation11 + $0x75c] sm:$0xf0] }
 0x22a   : > { %v2080_v7 = vmax.f32 %v1612_v40, 0.0 }
 0x22b   : > { %v1344_v10 = vpop.f32.mrf.mxu2 }
 0x22c   : > { %v11542_v31 = vpack.c.bf16 %v2080_v7, %v2076_v45  ;;  %v1345_v18 = vadd.f32 %v1344_v10, %v11416_v16  ;;  %v1433_v32 = vpop.f32.mrf.mxu3  ;;  %v9695_v45 = vor.u32 %v10366_v51, %v9694_v39 }
 0x22d   : > { %v1525_v11 = vpop.f32.mrf.mxu0 }
 0x22e   : > { %13251 = vst [vmem:[#allocation35_spill] sm:$0xff] %v11542_v31  ;;  %v1434_v1 = vadd.f32 %v1433_v32, %v1345_v18  ;;  %v1526_v27 = vadd.f32 %v1525_v11, %v11411_v15  ;;  %v1614_v26 = vpop.f32.mrf.mxu1  ;;  %4010 = vmatpush.bf16.msrb.mxu1 %v9695_v45 }
 0x230   : > { %v2079_v49 = vmax.f32 %v1434_v1, 0.0  ;;  %v1615_v34 = vadd.f32 %v1614_v26, %v1526_v27  ;;  %1662 = vmatmul.bf16.gmra.mxu2 %v11317_v13  ;;  %1840 = vmatmul.bf16.gmra.mxu0 %v11317_v13 }
 0x231   : > { %1751 = vmatmul.bf16.gmra.mxu3 %v11319_v14  ;;  %1929 = vmatmul.bf16.gmra.mxu1 %v11319_v14 }
 0x232   : > { %v11550_v23 = vpack.c.bf16 %v2079_v49, %v2075_v20  ;;  %v2084_v24 = vmax.f32 %v1615_v34, 0.0 }
 0x233   : > { %v1347_v40 = vpop.f32.mrf.mxu2 }
 0x234   : > { %v1348_v7 = vadd.f32 %v1347_v40, %v11416_v16  ;;  %v1436_v10 = vpop.f32.mrf.mxu3 }
 0x235   : > { %v1527_v0 = vpop.f32.mrf.mxu0 }
 0x236   : > { %v1437_v18 = vadd.f32 %v1436_v10, %v1348_v7  ;;  %v1528_v32 = vadd.f32 %v1527_v0, %v11411_v15  ;;  %v1616_v4 = vpop.f32.mrf.mxu1  ;;  %v8894_v7 = vld [vmem:[#allocation11 + $0x100] sm:$0xf] }
 0x237   : > { %v10166_v10 = vld [vmem:[#allocation11 + $0x11c] sm:$0xf0] }
 0x238   : > { %v1617_v13 = vadd.f32 %v1616_v4, %v1528_v32  ;;  %v2083_v51 = vmax.f32 %v1437_v18, 0.0  ;;  %v8895_v32 = vor.u32 %v10166_v10, %v8894_v7  ;;  %v9150_v4 = vld [vmem:[#allocation11 + $0x300] sm:$0xf] }
 0x239   : > { %v9406_v7 = vld [vmem:[#allocation11 + $0x500] sm:$0xf] }
 0x23a   : > { %v2088_v11 = vmax.f32 %v1617_v13, 0.0  ;;  %v10230_v13 = vld [vmem:[#allocation11 + $0x31c] sm:$0xf0]  ;;  %3744 = vmatpush.bf16.msrb.mxu2 %v8895_v32 }
 0x23b   : > { %v1349_v42 = vpop.f32.mrf.mxu2  ;;  %v10294_v10 = vld [vmem:[#allocation11 + $0x51c] sm:$0xf0] }
 0x23c   : > { %v11554_v14 = vpack.c.bf16 %v2088_v11, %v2084_v24  ;;  %v1350_v1 = vadd.f32 %v1349_v42, %v11416_v16  ;;  %v1438_v27 = vpop.f32.mrf.mxu3  ;;  %v9151_v11 = vor.u32 %v10230_v13, %v9150_v4  ;;  %v9407_v4 = vor.u32 %v10294_v10, %v9406_v7 }
 0x23d   : > { %v1530_v26 = vpop.f32.mrf.mxu0 }
 0x23e   : > { %v1439_v20 = vadd.f32 %v1438_v27, %v1350_v1  ;;  %v1531_v49 = vadd.f32 %v1530_v26, %v11411_v15  ;;  %v1619_v39 = vpop.f32.mrf.mxu1  ;;  %3833 = vmatpush.bf16.msrb.mxu3 %v9151_v11  ;;  %3922 = vmatpush.bf16.msrb.mxu0 %v9407_v4 }
 0x240   : > { %v2087_v40 = vmax.f32 %v1439_v20, 0.0  ;;  %v1620_v45 = vadd.f32 %v1619_v39, %v1531_v49  ;;  %1667 = vmatmul.bf16.gmra.mxu2 %v11337_v59  ;;  %1845 = vmatmul.bf16.gmra.mxu0 %v11337_v59 }
 0x241   : > { %1756 = vmatmul.bf16.gmra.mxu3 %v11339_v60  ;;  %1934 = vmatmul.bf16.gmra.mxu1 %v11339_v60 }
 0x242   : > { %v11562_v34 = vpack.c.bf16 %v2087_v40, %v2083_v51  ;;  %v2092_v26 = vmax.f32 %v1620_v45, 0.0 }
 0x243   : > { %v1352_v0 = vpop.f32.mrf.mxu2 }
 0x244   : > { %v1353_v18 = vadd.f32 %v1352_v0, %v11416_v16  ;;  %v1441_v24 = vpop.f32.mrf.mxu3 }
 0x245   : > { %v1532_v42 = vpop.f32.mrf.mxu0 }
 0x246   : > { %v1442_v1 = vadd.f32 %v1441_v24, %v1353_v18  ;;  %v1533_v59 = vadd.f32 %v1532_v42, %v11411_v15  ;;  %v1621_v27 = vpop.f32.mrf.mxu1 }
 0x248   : > { %v1622_v60 = vadd.f32 %v1621_v27, %v1533_v59  ;;  %v2091_v24 = vmax.f32 %v1442_v1, 0.0  ;;  %v9662_v59 = vld [vmem:[#allocation11 + $0x700] sm:$0xf] }
 0x249   : > { %v10358_v27 = vld [vmem:[#allocation11 + $0x71c] sm:$0xf0] }
 0x24a   : > { %v2096_v20 = vmax.f32 %v1622_v60, 0.0 }
 0x24b   : > { %v1354_v49 = vpop.f32.mrf.mxu2 }
 0x24c   : > { %v11566_v39 = vpack.c.bf16 %v2096_v20, %v2092_v26  ;;  %v1355_v51 = vadd.f32 %v1354_v49, %v11416_v16  ;;  %v1443_v40 = vpop.f32.mrf.mxu3  ;;  %v9663_v26 = vor.u32 %v10358_v27, %v9662_v59 }
 0x24d   : > { %v1535_v0 = vpop.f32.mrf.mxu0 }
 0x24e   : > { %v1444_v13 = vadd.f32 %v1443_v40, %v1355_v51  ;;  %v1536_v32 = vadd.f32 %v1535_v0, %v11411_v15  ;;  %v1624_v18 = vpop.f32.mrf.mxu1  ;;  %4011 = vmatpush.bf16.msrb.mxu1 %v9663_v26 }
 0x250   : > { %v2095_v11 = vmax.f32 %v1444_v13, 0.0  ;;  %v1625_v42 = vadd.f32 %v1624_v18, %v1536_v32  ;;  %1672 = vmatmul.bf16.gmra.mxu2 %v11357_v43  ;;  %1850 = vmatmul.bf16.gmra.mxu0 %v11357_v43 }
 0x251   : > { %1761 = vmatmul.bf16.gmra.mxu3 %v11359_v44  ;;  %1939 = vmatmul.bf16.gmra.mxu1 %v11359_v44 }
 0x252   : > { %v11574_v45 = vpack.c.bf16 %v2095_v11, %v2091_v24  ;;  %v2100_v10 = vmax.f32 %v1625_v42, 0.0 }
 0x253   : > { %v1357_v60 = vpop.f32.mrf.mxu2 }
 0x254   : > { %v1358_v20 = vadd.f32 %v1357_v60, %v11416_v16  ;;  %v1446_v49 = vpop.f32.mrf.mxu3 }
 0x255   : > { %v1537_v1 = vpop.f32.mrf.mxu0 }
 0x256   : > { %v1447_v51 = vadd.f32 %v1446_v49, %v1358_v20  ;;  %v1538_v40 = vadd.f32 %v1537_v1, %v11411_v15  ;;  %v1626_v7 = vpop.f32.mrf.mxu1  ;;  %v8862_v20 = vld [vmem:[#allocation11 + $0xc0] sm:$0xf] }
 0x257   : > { %v10158_v49 = vld [vmem:[#allocation11 + $0xdc] sm:$0xf0] }
 0x258   : > { %v1627_v43 = vadd.f32 %v1626_v7, %v1538_v40  ;;  %v2099_v27 = vmax.f32 %v1447_v51, 0.0  ;;  %v8863_v40 = vor.u32 %v10158_v49, %v8862_v20  ;;  %v9118_v7 = vld [vmem:[#allocation11 + $0x2c0] sm:$0xf] }
 0x259   : > { %v9374_v20 = vld [vmem:[#allocation11 + $0x4c0] sm:$0xf] }
 0x25a   : > { %v2104_v0 = vmax.f32 %v1627_v43, 0.0  ;;  %v10222_v43 = vld [vmem:[#allocation11 + $0x2dc] sm:$0xf0]  ;;  %3745 = vmatpush.bf16.msrb.mxu2 %v8863_v40 }
 0x25b   : > { %v1359_v4 = vpop.f32.mrf.mxu2  ;;  %v10286_v49 = vld [vmem:[#allocation11 + $0x4dc] sm:$0xf0] }
 0x25c   : > { %v11578_v44 = vpack.c.bf16 %v2104_v0, %v2100_v10  ;;  %v1360_v13 = vadd.f32 %v1359_v4, %v11416_v16  ;;  %v1448_v32 = vpop.f32.mrf.mxu3  ;;  %v9119_v0 = vor.u32 %v10222_v43, %v9118_v7  ;;  %v9375_v7 = vor.u32 %v10286_v49, %v9374_v20 }
 0x25d   : > { %v1540_v18 = vpop.f32.mrf.mxu0 }
 0x25e   : > { %v1449_v24 = vadd.f32 %v1448_v32, %v1360_v13  ;;  %v1541_v11 = vadd.f32 %v1540_v18, %v11411_v15  ;;  %v1629_v59 = vpop.f32.mrf.mxu1  ;;  %3834 = vmatpush.bf16.msrb.mxu3 %v9119_v0  ;;  %3923 = vmatpush.bf16.msrb.mxu0 %v9375_v7  ;;  %v10659_v7 = vld [vmem:[#allocation10] sm:$0xf] }
 0x260   : > { %v2103_v60 = vmax.f32 %v1449_v24, 0.0  ;;  %v1630_v26 = vadd.f32 %v1629_v59, %v1541_v11  ;;  %1677 = vmatmul.bf16.gmra.mxu2 %v11377_v29  ;;  %1855 = vmatmul.bf16.gmra.mxu0 %v11377_v29 }
 0x261   : > { %1766 = vmatmul.bf16.gmra.mxu3 %v11379_v30  ;;  %1944 = vmatmul.bf16.gmra.mxu1 %v11379_v30 }
 0x262   : > { %v11586_v42 = vpack.c.bf16 %v2103_v60, %v2099_v27  ;;  %v2108_v18 = vmax.f32 %v1630_v26, 0.0 }
 0x263   : > { %v1362_v1 = vpop.f32.mrf.mxu2 }
 0x264   : > { %v1363_v51 = vadd.f32 %v1362_v1, %v11416_v16  ;;  %v1451_v10 = vpop.f32.mrf.mxu3 }
 0x265   : > { %v1542_v4 = vpop.f32.mrf.mxu0 }
 0x266   : > { %v1452_v13 = vadd.f32 %v1451_v10, %v1363_v51  ;;  %v1543_v29 = vadd.f32 %v1542_v4, %v11411_v15  ;;  %v1631_v32 = vpop.f32.mrf.mxu1 }
 0x268   : > { %v1632_v30 = vadd.f32 %v1631_v32, %v1543_v29  ;;  %v2107_v10 = vmax.f32 %v1452_v13, 0.0  ;;  %v9630_v29 = vld [vmem:[#allocation11 + $0x6c0] sm:$0xf] }
 0x269   : > { %v10350_v32 = vld [vmem:[#allocation11 + $0x6dc] sm:$0xf0] }
 0x26a   : > { %v2112_v24 = vmax.f32 %v1632_v30, 0.0 }
 0x26b   : > { %v1364_v11 = vpop.f32.mrf.mxu2 }
 0x26c   : > { %v11590_v59 = vpack.c.bf16 %v2112_v24, %v2108_v18  ;;  %v1365_v27 = vadd.f32 %v1364_v11, %v11416_v16  ;;  %v1453_v60 = vpop.f32.mrf.mxu3  ;;  %v9631_v18 = vor.u32 %v10350_v32, %v9630_v29 }
 0x26d   : > { %v1545_v1 = vpop.f32.mrf.mxu0 }
 0x26e   : > { %v1454_v43 = vadd.f32 %v1453_v60, %v1365_v27  ;;  %v1546_v40 = vadd.f32 %v1545_v1, %v11411_v15  ;;  %v1634_v51 = vpop.f32.mrf.mxu1  ;;  %4012 = vmatpush.bf16.msrb.mxu1 %v9631_v18 }
 0x270   : > { %v2111_v0 = vmax.f32 %v1454_v43, 0.0  ;;  %v1635_v4 = vadd.f32 %v1634_v51, %v1546_v40  ;;  %1682 = vmatmul.bf16.gmra.mxu2 %v11397_v28  ;;  %1860 = vmatmul.bf16.gmra.mxu0 %v11397_v28 }
 0x271   : > { %1771 = vmatmul.bf16.gmra.mxu3 %v11399_v33  ;;  %1949 = vmatmul.bf16.gmra.mxu1 %v11399_v33  ;;  %v11602_v33 = vperm.slane %v10659_v7, 3 }
 0x272   : > { %v11598_v26 = vpack.c.bf16 %v2111_v0, %v2107_v10  ;;  %v2116_v49 = vmax.f32 %v1635_v4, 0.0  ;;  %v11610_v4 = vperm.slane %v10659_v7, 2 }
 0x273   : > { %v1367_v30 = vpop.f32.mrf.mxu2 }
 0x274   : > { %v1368_v24 = vadd.f32 %v1367_v30, %v11416_v16  ;;  %v1456_v11 = vpop.f32.mrf.mxu3 }
 0x275   : > { %v1547_v13 = vpop.f32.mrf.mxu0 }
 0x276   : > { %v1457_v27 = vadd.f32 %v1456_v11, %v1368_v24  ;;  %v1548_v60 = vadd.f32 %v1547_v13, %v11411_v15  ;;  %v1636_v20 = vpop.f32.mrf.mxu1  ;;  %v8830_v11 = vld [vmem:[#allocation11 + $0x80] sm:$0xf] }
 0x277   : > { %v10150_v13 = vld [vmem:[#allocation11 + $0x9c] sm:$0xf0] }
 0x278   : > { %v1637_v28 = vadd.f32 %v1636_v20, %v1548_v60  ;;  %v2115_v18 = vmax.f32 %v1457_v27, 0.0  ;;  %v8831_v20 = vor.u32 %v10150_v13, %v8830_v11  ;;  %v10214_v27 = vld [vmem:[#allocation11 + $0x29c] sm:$0xf0] }
 0x279   : > { %v9342_v11 = vld [vmem:[#allocation11 + $0x480] sm:$0xf] }
 0x27a   : > { %v2120_v1 = vmax.f32 %v1637_v28, 0.0  ;;  %v9086_v28 = vld [vmem:[#allocation11 + $0x280] sm:$0xf]  ;;  %3746 = vmatpush.bf16.msrb.mxu2 %v8831_v20 }
 0x27b   : > { %v1369_v43 = vpop.f32.mrf.mxu2  ;;  %v10278_v13 = vld [vmem:[#allocation11 + $0x49c] sm:$0xf0] }
 0x27c   : > { %v11604_v40 = vpack.c.bf16 %v2120_v1, %v2116_v49  ;;  %v1370_v51 = vadd.f32 %v1369_v43, %v11416_v16  ;;  %v1458_v10 = vpop.f32.mrf.mxu3  ;;  %v9087_v43 = vor.u32 %v10214_v27, %v9086_v28  ;;  %v9343_v28 = vor.u32 %v10278_v13, %v9342_v11 }
 0x27d   : > { %v1826_v0 = vpop.f32.mrf.mxu0 }
 0x27e   : > { %v1459_v29 = vadd.f32 %v1458_v10, %v1370_v51  ;;  %v1827_v32 = vadd.f32 %v1826_v0, %v11602_v33  ;;  %v1915_v30 = vpop.f32.mrf.mxu1  ;;  %3835 = vmatpush.bf16.msrb.mxu3 %v9087_v43  ;;  %3924 = vmatpush.bf16.msrb.mxu0 %v9343_v28 }
 0x280   : > { %v2119_v15 = vmax.f32 %v1459_v29, 0.0  ;;  %v1916_v24 = vadd.f32 %v1915_v30, %v1827_v32  ;;  %1687 = vmatmul.bf16.gmra.mxu2 %v11267_v46  ;;  %1865 = vmatmul.bf16.gmra.mxu0 %v11267_v46 }
 0x281   : > { %1776 = vmatmul.bf16.gmra.mxu3 %v11269_v47  ;;  %1954 = vmatmul.bf16.gmra.mxu1 %v11269_v47 }
 0x282   : > { %v11614_v16 = vpack.c.bf16 %v2119_v15, %v2115_v18  ;;  %v1998_v0 = vmax.f32 %v1916_v24, 0.0 }
 0x283   : > { %v1648_v60 = vpop.f32.mrf.mxu2 }
 0x284   : > { %v1649_v49 = vadd.f32 %v1648_v60, %v11610_v4  ;;  %v1737_v1 = vpop.f32.mrf.mxu3 }
 0x285   : > { %v1828_v51 = vpop.f32.mrf.mxu0 }
 0x286   : > { %v1738_v46 = vadd.f32 %v1737_v1, %v1649_v49  ;;  %v1829_v7 = vadd.f32 %v1828_v51, %v11602_v33  ;;  %v1917_v10 = vpop.f32.mrf.mxu1 }
 0x288   : > { %v1918_v47 = vadd.f32 %v1917_v10, %v1829_v7  ;;  %v1997_v1 = vmax.f32 %v1738_v46, 0.0  ;;  %v9598_v7 = vld [vmem:[#allocation11 + $0x680] sm:$0xf] }
 0x289   : > { %v10342_v10 = vld [vmem:[#allocation11 + $0x69c] sm:$0xf0] }
 0x28a   : > { %v2002_v29 = vmax.f32 %v1918_v47, 0.0 }
 0x28b   : > { %v1650_v32 = vpop.f32.mrf.mxu2 }
 0x28c   : > { %v11618_v30 = vpack.c.bf16 %v2002_v29, %v1998_v0  ;;  %v1651_v18 = vadd.f32 %v1650_v32, %v11610_v4  ;;  %v1739_v15 = vpop.f32.mrf.mxu3  ;;  %v9599_v0 = vor.u32 %v10342_v10, %v9598_v7 }
 0x28d   : > { %v1831_v60 = vpop.f32.mrf.mxu0 }
 0x28e   : > { %13252 = vst [vmem:[#allocation36_spill] sm:$0xff] %v11618_v30  ;;  %v1740_v27 = vadd.f32 %v1739_v15, %v1651_v18  ;;  %v1832_v20 = vadd.f32 %v1831_v60, %v11602_v33  ;;  %v1920_v49 = vpop.f32.mrf.mxu1  ;;  %4013 = vmatpush.bf16.msrb.mxu1 %v9599_v0 }
 0x290   : > { %v2001_v43 = vmax.f32 %v1740_v27, 0.0  ;;  %v1921_v51 = vadd.f32 %v1920_v49, %v1832_v20  ;;  %1692 = vmatmul.bf16.gmra.mxu2 %v11287_v21  ;;  %1870 = vmatmul.bf16.gmra.mxu0 %v11287_v21 }
 0x291   : > { %1781 = vmatmul.bf16.gmra.mxu3 %v11289_v22  ;;  %1959 = vmatmul.bf16.gmra.mxu1 %v11289_v22 }
 0x292   : > { %v11626_v24 = vpack.c.bf16 %v2001_v43, %v1997_v1  ;;  %v2006_v13 = vmax.f32 %v1921_v51, 0.0 }
 0x293   : > { %v1653_v47 = vpop.f32.mrf.mxu2 }
 0x294   : > { %v1654_v29 = vadd.f32 %v1653_v47, %v11610_v4  ;;  %v1742_v32 = vpop.f32.mrf.mxu3 }
 0x295   : > { %v1833_v46 = vpop.f32.mrf.mxu0 }
 0x296   : > { %v1743_v18 = vadd.f32 %v1742_v32, %v1654_v29  ;;  %v1834_v15 = vadd.f32 %v1833_v46, %v11602_v33  ;;  %v1922_v11 = vpop.f32.mrf.mxu1  ;;  %v8798_v29 = vld [vmem:[#allocation11 + $0x40] sm:$0xf] }
 0x297   : > { %v10142_v32 = vld [vmem:[#allocation11 + $0x5c] sm:$0xf0] }
 0x298   : > { %v1923_v21 = vadd.f32 %v1922_v11, %v1834_v15  ;;  %v2005_v10 = vmax.f32 %v1743_v18, 0.0  ;;  %v8799_v15 = vor.u32 %v10142_v32, %v8798_v29  ;;  %v9054_v11 = vld [vmem:[#allocation11 + $0x240] sm:$0xf] }
 0x299   : > { %v9310_v29 = vld [vmem:[#allocation11 + $0x440] sm:$0xf] }
 0x29a   : > { %v2010_v60 = vmax.f32 %v1923_v21, 0.0  ;;  %v10206_v21 = vld [vmem:[#allocation11 + $0x25c] sm:$0xf0]  ;;  %3747 = vmatpush.bf16.msrb.mxu2 %v8799_v15 }
 0x29b   : > { %v1655_v28 = vpop.f32.mrf.mxu2  ;;  %v10270_v32 = vld [vmem:[#allocation11 + $0x45c] sm:$0xf0] }
 0x29c   : > { %v11630_v22 = vpack.c.bf16 %v2010_v60, %v2006_v13  ;;  %v1656_v27 = vadd.f32 %v1655_v28, %v11610_v4  ;;  %v1744_v20 = vpop.f32.mrf.mxu3  ;;  %v9055_v60 = vor.u32 %v10206_v21, %v9054_v11  ;;  %v9311_v11 = vor.u32 %v10270_v32, %v9310_v29 }
 0x29d   : > { %v1836_v49 = vpop.f32.mrf.mxu0 }
 0x29e   : > { %13253 = vst [vmem:[#allocation37_spill] sm:$0xff] %v11630_v22  ;;  %v1745_v1 = vadd.f32 %v1744_v20, %v1656_v27  ;;  %v1837_v43 = vadd.f32 %v1836_v49, %v11602_v33  ;;  %v1925_v7 = vpop.f32.mrf.mxu1  ;;  %3836 = vmatpush.bf16.msrb.mxu3 %v9055_v60  ;;  %3925 = vmatpush.bf16.msrb.mxu0 %v9311_v11 }
 0x2a0   : > { %v2009_v47 = vmax.f32 %v1745_v1, 0.0  ;;  %v1926_v0 = vadd.f32 %v1925_v7, %v1837_v43  ;;  %1697 = vmatmul.bf16.gmra.mxu2 %v11307_v56  ;;  %1875 = vmatmul.bf16.gmra.mxu0 %v11307_v56 }
 0x2a1   : > { %1786 = vmatmul.bf16.gmra.mxu3 %v11309_v57  ;;  %1964 = vmatmul.bf16.gmra.mxu1 %v11309_v57 }
 0x2a2   : > { %v11638_v51 = vpack.c.bf16 %v2009_v47, %v2005_v10  ;;  %v2014_v49 = vmax.f32 %v1926_v0, 0.0 }
 0x2a3   : > { %v1658_v46 = vpop.f32.mrf.mxu2 }
 0x2a4   : > { %v1659_v18 = vadd.f32 %v1658_v46, %v11610_v4  ;;  %v1747_v13 = vpop.f32.mrf.mxu3 }
 0x2a5   : > { %v1838_v28 = vpop.f32.mrf.mxu0 }
 0x2a6   : > { %v1748_v27 = vadd.f32 %v1747_v13, %v1659_v18  ;;  %v1839_v56 = vadd.f32 %v1838_v28, %v11602_v33  ;;  %v1927_v20 = vpop.f32.mrf.mxu1 }
 0x2a8   : > { %v1928_v57 = vadd.f32 %v1927_v20, %v1839_v56  ;;  %v2013_v13 = vmax.f32 %v1748_v27, 0.0  ;;  %v9566_v56 = vld [vmem:[#allocation11 + $0x640] sm:$0xf] }
 0x2a9   : > { %v10334_v20 = vld [vmem:[#allocation11 + $0x65c] sm:$0xf0] }
 0x2aa   : > { %v2018_v1 = vmax.f32 %v1928_v57, 0.0 }
 0x2ab   : > { %v1660_v43 = vpop.f32.mrf.mxu2 }
 0x2ac   : > { %v11642_v7 = vpack.c.bf16 %v2018_v1, %v2014_v49  ;;  %v1661_v10 = vadd.f32 %v1660_v43, %v11610_v4  ;;  %v1749_v47 = vpop.f32.mrf.mxu3  ;;  %v9567_v49 = vor.u32 %v10334_v20, %v9566_v56 }
 0x2ad   : > { %v1841_v46 = vpop.f32.mrf.mxu0 }
 0x2ae   : > { %13254 = vst [vmem:[#allocation38_spill] sm:$0xff] %v11642_v7  ;;  %v1750_v21 = vadd.f32 %v1749_v47, %v1661_v10  ;;  %v1842_v15 = vadd.f32 %v1841_v46, %v11602_v33  ;;  %v1930_v18 = vpop.f32.mrf.mxu1  ;;  %4014 = vmatpush.bf16.msrb.mxu1 %v9567_v49 }
 0x2b0   : > { %v2017_v60 = vmax.f32 %v1750_v21, 0.0  ;;  %v1931_v28 = vadd.f32 %v1930_v18, %v1842_v15  ;;  %1702 = vmatmul.bf16.gmra.mxu2 %v11327_v37  ;;  %1880 = vmatmul.bf16.gmra.mxu0 %v11327_v37 }
 0x2b1   : > { %1791 = vmatmul.bf16.gmra.mxu3 %v11329_v38  ;;  %1969 = vmatmul.bf16.gmra.mxu1 %v11329_v38 }
 0x2b2   : > { %v11650_v0 = vpack.c.bf16 %v2017_v60, %v2013_v13  ;;  %v2022_v32 = vmax.f32 %v1931_v28, 0.0 }
 0x2b3   : > { %v1663_v57 = vpop.f32.mrf.mxu2 }
 0x2b4   : > { %13255 = vst [vmem:[#allocation39_spill] sm:$0xff] %v11650_v0  ;;  %v1664_v1 = vadd.f32 %v1663_v57, %v11610_v4  ;;  %v1752_v43 = vpop.f32.mrf.mxu3 }
 0x2b5   : > { %v1843_v27 = vpop.f32.mrf.mxu0 }
 0x2b6   : > { %v1753_v10 = vadd.f32 %v1752_v43, %v1664_v1  ;;  %v1844_v47 = vadd.f32 %v1843_v27, %v11602_v33  ;;  %v1932_v29 = vpop.f32.mrf.mxu1  ;;  %v8766_v1 = vld [vmem:[#allocation11] sm:$0xf] }
 0x2b7   : > { %v10134_v43 = vld [vmem:[#allocation11 + $0x1c] sm:$0xf0] }
 0x2b8   : > { %v1933_v37 = vadd.f32 %v1932_v29, %v1844_v47  ;;  %v2021_v20 = vmax.f32 %v1753_v10, 0.0  ;;  %v8767_v47 = vor.u32 %v10134_v43, %v8766_v1  ;;  %v9022_v29 = vld [vmem:[#allocation11 + $0x200] sm:$0xf] }
 0x2b9   : > { %v9278_v1 = vld [vmem:[#allocation11 + $0x400] sm:$0xf] }
 0x2ba   : > { %v2026_v46 = vmax.f32 %v1933_v37, 0.0  ;;  %v10198_v37 = vld [vmem:[#allocation11 + $0x21c] sm:$0xf0]  ;;  %3748 = vmatpush.bf16.msrb.mxu2 %v8767_v47 }
 0x2bb   : > { %v1665_v11 = vpop.f32.mrf.mxu2  ;;  %v10262_v43 = vld [vmem:[#allocation11 + $0x41c] sm:$0xf0] }
 0x2bc   : > { %v11654_v38 = vpack.c.bf16 %v2026_v46, %v2022_v32  ;;  %v1666_v21 = vadd.f32 %v1665_v11, %v11610_v4  ;;  %v1754_v15 = vpop.f32.mrf.mxu3  ;;  %v9023_v46 = vor.u32 %v10198_v37, %v9022_v29  ;;  %v9279_v29 = vor.u32 %v10262_v43, %v9278_v1 }
 0x2bd   : > { %v1846_v18 = vpop.f32.mrf.mxu0 }
 0x2be   : > { %13256 = vst [vmem:[#allocation40_spill] sm:$0xff] %v11654_v38  ;;  %v1755_v13 = vadd.f32 %v1754_v15, %v1666_v21  ;;  %v1847_v60 = vadd.f32 %v1846_v18, %v11602_v33  ;;  %v1935_v56 = vpop.f32.mrf.mxu1  ;;  %3837 = vmatpush.bf16.msrb.mxu3 %v9023_v46  ;;  %3926 = vmatpush.bf16.msrb.mxu0 %v9279_v29 }
 0x2c0   : > { %v2025_v57 = vmax.f32 %v1755_v13, 0.0  ;;  %v1936_v49 = vadd.f32 %v1935_v56, %v1847_v60  ;;  %1707 = vmatmul.bf16.gmra.mxu2 %v11347_v12  ;;  %1885 = vmatmul.bf16.gmra.mxu0 %v11347_v12 }
 0x2c1   : > { %1796 = vmatmul.bf16.gmra.mxu3 %v11349_v17  ;;  %1974 = vmatmul.bf16.gmra.mxu1 %v11349_v17 }
 0x2c2   : > { %v11662_v28 = vpack.c.bf16 %v2025_v57, %v2021_v20  ;;  %v2030_v18 = vmax.f32 %v1936_v49, 0.0 }
 0x2c3   : > { %v1668_v27 = vpop.f32.mrf.mxu2 }
 0x2c4   : > { %v1669_v10 = vadd.f32 %v1668_v27, %v11610_v4  ;;  %v1757_v32 = vpop.f32.mrf.mxu3 }
 0x2c5   : > { %v1848_v11 = vpop.f32.mrf.mxu0 }
 0x2c6   : > { %v1758_v21 = vadd.f32 %v1757_v32, %v1669_v10  ;;  %v1849_v12 = vadd.f32 %v1848_v11, %v11602_v33  ;;  %v1937_v15 = vpop.f32.mrf.mxu1 }
 0x2c8   : > { %v1938_v17 = vadd.f32 %v1937_v15, %v1849_v12  ;;  %v2029_v32 = vmax.f32 %v1758_v21, 0.0  ;;  %v9534_v12 = vld [vmem:[#allocation11 + $0x600] sm:$0xf] }
 0x2c9   : > { %v10326_v15 = vld [vmem:[#allocation11 + $0x61c] sm:$0xf0] }
 0x2ca   : > { %v2034_v13 = vmax.f32 %v1938_v17, 0.0 }
 0x2cb   : > { %v1670_v60 = vpop.f32.mrf.mxu2 }
 0x2cc   : > { %v11666_v56 = vpack.c.bf16 %v2034_v13, %v2030_v18  ;;  %v1671_v20 = vadd.f32 %v1670_v60, %v11610_v4  ;;  %v1759_v57 = vpop.f32.mrf.mxu3  ;;  %v9535_v18 = vor.u32 %v10326_v15, %v9534_v12 }
 0x2cd   : > { %v1851_v27 = vpop.f32.mrf.mxu0 }
 0x2ce   : > { %13257 = vst [vmem:[#allocation41_spill] sm:$0xff] %v11666_v56  ;;  %v1760_v37 = vadd.f32 %v1759_v57, %v1671_v20  ;;  %v1852_v47 = vadd.f32 %v1851_v27, %v11602_v33  ;;  %v1940_v10 = vpop.f32.mrf.mxu1  ;;  %4015 = vmatpush.bf16.msrb.mxu1 %v9535_v18 }
 0x2d0   : > { %v2033_v46 = vmax.f32 %v1760_v37, 0.0  ;;  %v1941_v11 = vadd.f32 %v1940_v10, %v1852_v47  ;;  %1712 = vmatmul.bf16.gmra.mxu2 %v11367_v5  ;;  %1890 = vmatmul.bf16.gmra.mxu0 %v11367_v5 }
 0x2d1   : > { %1801 = vmatmul.bf16.gmra.mxu3 %v11369_v6  ;;  %1979 = vmatmul.bf16.gmra.mxu1 %v11369_v6 }
 0x2d2   : > { %v11674_v49 = vpack.c.bf16 %v2033_v46, %v2029_v32  ;;  %v2038_v43 = vmax.f32 %v1941_v11, 0.0 }
 0x2d3   : > { %v1673_v17 = vpop.f32.mrf.mxu2 }
 0x2d4   : > { %13258 = vst [vmem:[#allocation42_spill] sm:$0xff] %v11674_v49  ;;  %v1674_v13 = vadd.f32 %v1673_v17, %v11610_v4  ;;  %v1762_v60 = vpop.f32.mrf.mxu3 }
 0x2d5   : > { %v1853_v21 = vpop.f32.mrf.mxu0 }
 0x2d6   : > { %v1763_v20 = vadd.f32 %v1762_v60, %v1674_v13  ;;  %v1854_v57 = vadd.f32 %v1853_v21, %v11602_v33  ;;  %v1942_v1 = vpop.f32.mrf.mxu1  ;;  %v10186_v13 = vld [vmem:[#allocation11 + $0x1c4] sm:$0xf] }
 0x2d7   : > { %v8992_v60 = vld [vmem:[#allocation11 + $0x1e0] sm:$0xf0] }
 0x2d8   : > { %v1943_v5 = vadd.f32 %v1942_v1, %v1854_v57  ;;  %v2037_v15 = vmax.f32 %v1763_v20, 0.0  ;;  %v8995_v57 = vor.u32 %v10186_v13, %v8992_v60  ;;  %v10250_v1 = vld [vmem:[#allocation11 + $0x3c4] sm:$0xf] }
 0x2d9   : > { %v10314_v13 = vld [vmem:[#allocation11 + $0x5c4] sm:$0xf] }
 0x2da   : > { %v2042_v27 = vmax.f32 %v1943_v5, 0.0  ;;  %v9248_v5 = vld [vmem:[#allocation11 + $0x3e0] sm:$0xf0]  ;;  %4097 = vmatpush.bf16.msra.mxu2 %v8995_v57 }
 0x2db   : > { %v1675_v29 = vpop.f32.mrf.mxu2  ;;  %v9504_v60 = vld [vmem:[#allocation11 + $0x5e0] sm:$0xf0] }
 0x2dc   : > { %v11678_v6 = vpack.c.bf16 %v2042_v27, %v2038_v43  ;;  %v1676_v37 = vadd.f32 %v1675_v29, %v11610_v4  ;;  %v1764_v47 = vpop.f32.mrf.mxu3  ;;  %v9251_v27 = vor.u32 %v10250_v1, %v9248_v5  ;;  %v9507_v1 = vor.u32 %v10314_v13, %v9504_v60 }
 0x2dd   : > { %v1856_v10 = vpop.f32.mrf.mxu0 }
 0x2de   : > { %13259 = vst [vmem:[#allocation43_spill] sm:$0xff] %v11678_v6  ;;  %v1765_v32 = vadd.f32 %v1764_v47, %v1676_v37  ;;  %v1857_v46 = vadd.f32 %v1856_v10, %v11602_v33  ;;  %v1945_v12 = vpop.f32.mrf.mxu1  ;;  %4186 = vmatpush.bf16.msra.mxu3 %v9251_v27  ;;  %4275 = vmatpush.bf16.msra.mxu0 %v9507_v1 }
 0x2e0   : > { %v2041_v17 = vmax.f32 %v1765_v32, 0.0  ;;  %v1946_v18 = vadd.f32 %v1945_v12, %v1857_v46  ;;  %1717 = vmatmul.bf16.gmra.mxu2 %v11387_v58  ;;  %1895 = vmatmul.bf16.gmra.mxu0 %v11387_v58 }
 0x2e1   : > { %1806 = vmatmul.bf16.gmra.mxu3 %v11389_v62  ;;  %1984 = vmatmul.bf16.gmra.mxu1 %v11389_v62 }
 0x2e2   : > { %v11686_v11 = vpack.c.bf16 %v2041_v17, %v2037_v15  ;;  %v2046_v10 = vmax.f32 %v1946_v18, 0.0 }
 0x2e3   : > { %v1678_v21 = vpop.f32.mrf.mxu2 }
 0x2e4   : > { %13260 = vst [vmem:[#allocation44_spill] sm:$0xff] %v11686_v11  ;;  %v1679_v20 = vadd.f32 %v1678_v21, %v11610_v4  ;;  %v1767_v43 = vpop.f32.mrf.mxu3 }
 0x2e5   : > { %v1858_v29 = vpop.f32.mrf.mxu0 }
 0x2e6   : > { %v1768_v37 = vadd.f32 %v1767_v43, %v1679_v20  ;;  %v1859_v58 = vadd.f32 %v1858_v29, %v11602_v33  ;;  %v1947_v47 = vpop.f32.mrf.mxu1 }
 0x2e8   : > { %v1948_v62 = vadd.f32 %v1947_v47, %v1859_v58  ;;  %v2045_v43 = vmax.f32 %v1768_v37, 0.0  ;;  %v10378_v58 = vld [vmem:[#allocation11 + $0x7c4] sm:$0xf] }
 0x2e9   : > { %v9760_v47 = vld [vmem:[#allocation11 + $0x7e0] sm:$0xf0] }
 0x2ea   : > { %v2050_v32 = vmax.f32 %v1948_v62, 0.0 }
 0x2eb   : > { %v1680_v46 = vpop.f32.mrf.mxu2 }
 0x2ec   : > { %v11690_v12 = vpack.c.bf16 %v2050_v32, %v2046_v10  ;;  %v1681_v15 = vadd.f32 %v1680_v46, %v11610_v4  ;;  %v1769_v17 = vpop.f32.mrf.mxu3  ;;  %v9763_v10 = vor.u32 %v10378_v58, %v9760_v47 }
 0x2ed   : > { %v1861_v21 = vpop.f32.mrf.mxu0 }
 0x2ee   : > { %13261 = vst [vmem:[#allocation45_spill] sm:$0xff] %v11690_v12  ;;  %v1770_v5 = vadd.f32 %v1769_v17, %v1681_v15  ;;  %v1862_v57 = vadd.f32 %v1861_v21, %v11602_v33  ;;  %v1950_v20 = vpop.f32.mrf.mxu1  ;;  %4364 = vmatpush.bf16.msra.mxu1 %v9763_v10 }
 0x2f0   : > { %v2049_v27 = vmax.f32 %v1770_v5, 0.0  ;;  %v1951_v29 = vadd.f32 %v1950_v20, %v1862_v57  ;;  %1722 = vmatmul.bf16.gmra.mxu2 %v11407_v53  ;;  %1900 = vmatmul.bf16.gmra.mxu0 %v11407_v53 }
 0x2f1   : > { %1811 = vmatmul.bf16.gmra.mxu3 %v11409_v54  ;;  %1989 = vmatmul.bf16.gmra.mxu1 %v11409_v54 }
 0x2f2   : > { %v11698_v18 = vpack.c.bf16 %v2049_v27, %v2045_v43  ;;  %v2054_v60 = vmax.f32 %v1951_v29, 0.0 }
 0x2f3   : > { %v1683_v62 = vpop.f32.mrf.mxu2 }
 0x2f4   : > { %13262 = vst [vmem:[#allocation46_spill] sm:$0xff] %v11698_v18  ;;  %v1684_v32 = vadd.f32 %v1683_v62, %v11610_v4  ;;  %v1772_v46 = vpop.f32.mrf.mxu3 }
 0x2f5   : > { %v1863_v37 = vpop.f32.mrf.mxu0 }
 0x2f6   : > { %v1773_v15 = vadd.f32 %v1772_v46, %v1684_v32  ;;  %v1864_v17 = vadd.f32 %v1863_v37, %v11602_v33  ;;  %v1952_v13 = vpop.f32.mrf.mxu1  ;;  %v10178_v32 = vld [vmem:[#allocation11 + $0x184] sm:$0xf] }
 0x2f7   : > { %v8960_v46 = vld [vmem:[#allocation11 + $0x1a0] sm:$0xf0] }
 0x2f8   : > { %v1953_v53 = vadd.f32 %v1952_v13, %v1864_v17  ;;  %v2053_v47 = vmax.f32 %v1773_v15, 0.0  ;;  %v8963_v17 = vor.u32 %v10178_v32, %v8960_v46  ;;  %v10242_v13 = vld [vmem:[#allocation11 + $0x384] sm:$0xf] }
 0x2fa   : > { %v2058_v21 = vmax.f32 %v1953_v53, 0.0  ;;  %v9216_v53 = vld [vmem:[#allocation11 + $0x3a0] sm:$0xf0]  ;;  %4098 = vmatpush.bf16.msra.mxu2 %v8963_v17 }
 0x2fb   : > { %v1685_v1 = vpop.f32.mrf.mxu2 }
 0x2fc   : > { %v11702_v54 = vpack.c.bf16 %v2058_v21, %v2054_v60  ;;  %v1686_v5 = vadd.f32 %v1685_v1, %v11610_v4  ;;  %v1774_v57 = vpop.f32.mrf.mxu3  ;;  %v9219_v21 = vor.u32 %v10242_v13, %v9216_v53 }
 0x2fd   : > { %v1866_v20 = vpop.f32.mrf.mxu0 }
 0x2fe   : > { %13263 = vst [vmem:[#allocation47_spill] sm:$0xff] %v11702_v54  ;;  %v1775_v43 = vadd.f32 %v1774_v57, %v1686_v5  ;;  %v1867_v27 = vadd.f32 %v1866_v20, %v11602_v33  ;;  %v1955_v58 = vpop.f32.mrf.mxu1  ;;  %4187 = vmatpush.bf16.msra.mxu3 %v9219_v21 }
 0x300   : > { %v2057_v62 = vmax.f32 %v1775_v43, 0.0  ;;  %v1956_v10 = vadd.f32 %v1955_v58, %v1867_v27  ;;  %3749 = vmatmul.bf16.vlgmr.msrb.gmra.mxu2 %v11430_v3  ;;  %3927 = vmatmul.bf16.vlgmr.msrb.gmra.mxu0 %v11626_v24 }
 0x301   : > { %3838 = vmatmul.bf16.vlgmr.msrb.gmra.mxu3 %v11422_v41  ;;  %4016 = vmatmul.bf16.vlgmr.msrb.gmra.mxu1 %v11618_v30  ;;  %v10306_v30 = vld [vmem:[#allocation11 + $0x584] sm:$0xf] }
 0x302   : > { %v11710_v29 = vpack.c.bf16 %v2057_v62, %v2053_v47  ;;  %v2062_v27 = vmax.f32 %v1956_v10, 0.0 }
 0x303   : > { %v1688_v37 = vpop.f32.mrf.mxu2 }
 0x304   : > { %v1689_v15 = vadd.f32 %v1688_v37, %v11610_v4  ;;  %v1777_v60 = vpop.f32.mrf.mxu3  ;;  %v9472_v37 = vld [vmem:[#allocation11 + $0x5a0] sm:$0xf0] }
 0x305   : > { %v1868_v1 = vpop.f32.mrf.mxu0  ;;  %v9475_v13 = vor.u32 %v10306_v30, %v9472_v37  ;;  %v9728_v30 = vld [vmem:[#allocation11 + $0x7a0] sm:$0xf0] }
 0x306   : > { %v1778_v5 = vadd.f32 %v1777_v60, %v1689_v15  ;;  %v1869_v57 = vadd.f32 %v1868_v1, %v11602_v33  ;;  %v1957_v20 = vpop.f32.mrf.mxu1 }
 0x307   : > { %4276 = vmatpush.bf16.msra.mxu0 %v9475_v13 }
 0x308   : > { %v1958_v43 = vadd.f32 %v1957_v20, %v1869_v57  ;;  %v2061_v60 = vmax.f32 %v1778_v5, 0.0  ;;  %v10370_v57 = vld [vmem:[#allocation11 + $0x784] sm:$0xf] }
 0x30a   : > { %v2066_v58 = vmax.f32 %v1958_v43, 0.0  ;;  %v9731_v43 = vor.u32 %v10370_v57, %v9728_v30 }
 0x30b   : > { %v1690_v47 = vpop.f32.mrf.mxu2 }
 0x30c   : > { %v11714_v62 = vpack.c.bf16 %v2066_v58, %v2062_v27  ;;  %v1691_v32 = vadd.f32 %v1690_v47, %v11610_v4  ;;  %v1779_v46 = vpop.f32.mrf.mxu3  ;;  %4365 = vmatpush.bf16.msra.mxu1 %v9731_v43 }
 0x30d   : > { %v1871_v41 = vpop.f32.mrf.mxu0 }
 0x30e   : > { %13264 = vst [vmem:[#allocation48_spill] sm:$0xff] %v11714_v62  ;;  %v1780_v53 = vadd.f32 %v1779_v46, %v1691_v32  ;;  %v1872_v17 = vadd.f32 %v1871_v41, %v11602_v33  ;;  %v1960_v15 = vpop.f32.mrf.mxu1 }
 0x310   : > { %v2065_v21 = vmax.f32 %v1780_v53, 0.0  ;;  %v1961_v1 = vadd.f32 %v1960_v15, %v1872_v17  ;;  %3754 = vmatmul.bf16.gmra.mxu2 %v11442_v61  ;;  %3932 = vmatmul.bf16.gmra.mxu0 %v11638_v51 }
 0x311   : > { %3843 = vmatmul.bf16.gmra.mxu3 %v11434_v35  ;;  %4021 = vmatmul.bf16.gmra.mxu1 %v11630_v22 }
 0x312   : > { %v11722_v10 = vpack.c.bf16 %v2065_v21, %v2061_v60  ;;  %v2070_v37 = vmax.f32 %v1961_v1, 0.0 }
 0x313   : > { %v1693_v20 = vpop.f32.mrf.mxu2 }
 0x314   : > { %13265 = vst [vmem:[#allocation49_spill] sm:$0xff] %v11722_v10  ;;  %v1694_v41 = vadd.f32 %v1693_v20, %v11610_v4  ;;  %v1782_v27 = vpop.f32.mrf.mxu3 }
 0x315   : > { %v1873_v5 = vpop.f32.mrf.mxu0 }
 0x316   : > { %v1783_v58 = vadd.f32 %v1782_v27, %v1694_v41  ;;  %v1874_v47 = vadd.f32 %v1873_v5, %v11602_v33  ;;  %v1962_v32 = vpop.f32.mrf.mxu1  ;;  %v10170_v27 = vld [vmem:[#allocation11 + $0x144] sm:$0xf] }
 0x317   : > { %v8928_v5 = vld [vmem:[#allocation11 + $0x160] sm:$0xf0] }
 0x318   : > { %v1963_v46 = vadd.f32 %v1962_v32, %v1874_v47  ;;  %v2069_v22 = vmax.f32 %v1783_v58, 0.0  ;;  %v8931_v32 = vor.u32 %v10170_v27, %v8928_v5 }
 0x31a   : > { %v2074_v13 = vmax.f32 %v1963_v46, 0.0  ;;  %v10234_v46 = vld [vmem:[#allocation11 + $0x344] sm:$0xf]  ;;  %4099 = vmatpush.bf16.msra.mxu2 %v8931_v32 }
 0x31b   : > { %v1695_v53 = vpop.f32.mrf.mxu2 }
 0x31c   : > { %v11726_v17 = vpack.c.bf16 %v2074_v13, %v2070_v37  ;;  %v1696_v15 = vadd.f32 %v1695_v53, %v11610_v4  ;;  %v1784_v60 = vpop.f32.mrf.mxu3  ;;  %v9184_v37 = vld [vmem:[#allocation11 + $0x360] sm:$0xf0] }
 0x31d   : > { %v1876_v21 = vpop.f32.mrf.mxu0  ;;  %v9187_v53 = vor.u32 %v10234_v46, %v9184_v37 }
 0x31e   : > { %v1785_v57 = vadd.f32 %v1784_v60, %v1696_v15  ;;  %v1877_v30 = vadd.f32 %v1876_v21, %v11602_v33  ;;  %v1965_v20 = vpop.f32.mrf.mxu1 }
 0x31f   : > { %4188 = vmatpush.bf16.msra.mxu3 %v9187_v53 }
 0x320   : > { %v2073_v43 = vmax.f32 %v1785_v57, 0.0  ;;  %v1966_v41 = vadd.f32 %v1965_v20, %v1877_v30  ;;  %3759 = vmatmul.bf16.gmra.mxu2 %v11454_v55  ;;  %3937 = vmatmul.bf16.gmra.mxu0 %v11650_v0 }
 0x321   : > { %3848 = vmatmul.bf16.gmra.mxu3 %v11446_v36  ;;  %4026 = vmatmul.bf16.gmra.mxu1 %v11642_v7  ;;  %v10298_v36 = vld [vmem:[#allocation11 + $0x544] sm:$0xf] }
 0x322   : > { %v11734_v1 = vpack.c.bf16 %v2073_v43, %v2069_v22  ;;  %v2078_v22 = vmax.f32 %v1966_v41, 0.0 }
 0x323   : > { %v1698_v47 = vpop.f32.mrf.mxu2 }
 0x324   : > { %v1699_v58 = vadd.f32 %v1698_v47, %v11610_v4  ;;  %v1787_v13 = vpop.f32.mrf.mxu3  ;;  %v9440_v47 = vld [vmem:[#allocation11 + $0x560] sm:$0xf0] }
 0x325   : > { %v1878_v15 = vpop.f32.mrf.mxu0  ;;  %v9443_v46 = vor.u32 %v10298_v36, %v9440_v47  ;;  %v9696_v36 = vld [vmem:[#allocation11 + $0x760] sm:$0xf0] }
 0x326   : > { %v1788_v60 = vadd.f32 %v1787_v13, %v1699_v58  ;;  %v1879_v21 = vadd.f32 %v1878_v15, %v11602_v33  ;;  %v1967_v57 = vpop.f32.mrf.mxu1 }
 0x327   : > { %4277 = vmatpush.bf16.msra.mxu0 %v9443_v46 }
 0x328   : > { %v1968_v30 = vadd.f32 %v1967_v57, %v1879_v21  ;;  %v2077_v13 = vmax.f32 %v1788_v60, 0.0  ;;  %v10362_v21 = vld [vmem:[#allocation11 + $0x744] sm:$0xf] }
 0x32a   : > { %v2082_v20 = vmax.f32 %v1968_v30, 0.0  ;;  %v9699_v30 = vor.u32 %v10362_v21, %v9696_v36 }
 0x32b   : > { %v1700_v43 = vpop.f32.mrf.mxu2 }
 0x32c   : > { %v11738_v7 = vpack.c.bf16 %v2082_v20, %v2078_v22  ;;  %v1701_v27 = vadd.f32 %v1700_v43, %v11610_v4  ;;  %v1789_v5 = vpop.f32.mrf.mxu3  ;;  %4366 = vmatpush.bf16.msra.mxu1 %v9699_v30 }
 0x32d   : > { %v1881_v0 = vpop.f32.mrf.mxu0 }
 0x32e   : > { %13266 = vst [vmem:[#allocation50_spill] sm:$0xff] %v11738_v7  ;;  %v1790_v37 = vadd.f32 %v1789_v5, %v1701_v27  ;;  %v1882_v32 = vadd.f32 %v1881_v0, %v11602_v33  ;;  %v1970_v58 = vpop.f32.mrf.mxu1 }
 0x330   : > { %v2081_v53 = vmax.f32 %v1790_v37, 0.0  ;;  %v1971_v15 = vadd.f32 %v1970_v58, %v1882_v32  ;;  %3764 = vmatmul.bf16.gmra.mxu2 %v11466_v8  ;;  %3942 = vmatmul.bf16.gmra.mxu0 %v11662_v28 }
 0x331   : > { %3853 = vmatmul.bf16.gmra.mxu3 %v11458_v48  ;;  %4031 = vmatmul.bf16.gmra.mxu1 %v11654_v38 }
 0x332   : > { %v11746_v41 = vpack.c.bf16 %v2081_v53, %v2077_v13  ;;  %v2086_v47 = vmax.f32 %v1971_v15, 0.0  ;;  %v13267_v15 = vld [vmem:[#allocation26_spill] sm:$0xff] }
 0x333   : > { %v1703_v57 = vpop.f32.mrf.mxu2 }
 0x334   : > { %v1704_v0 = vadd.f32 %v1703_v57, %v11610_v4  ;;  %v1792_v22 = vpop.f32.mrf.mxu3 }
 0x335   : > { %v1883_v60 = vpop.f32.mrf.mxu0 }
 0x336   : > { %v1793_v20 = vadd.f32 %v1792_v22, %v1704_v0  ;;  %v1884_v43 = vadd.f32 %v1883_v60, %v11602_v33  ;;  %v1972_v27 = vpop.f32.mrf.mxu1  ;;  %v10162_v60 = vld [vmem:[#allocation11 + $0x104] sm:$0xf] }
 0x338   : > { %v1973_v5 = vadd.f32 %v1972_v27, %v1884_v43  ;;  %v2085_v38 = vmax.f32 %v1793_v20, 0.0  ;;  %v8896_v43 = vld [vmem:[#allocation11 + $0x120] sm:$0xf0] }
 0x33a   : > { %v2090_v46 = vmax.f32 %v1973_v5, 0.0  ;;  %v8899_v5 = vor.u32 %v10162_v60, %v8896_v43 }
 0x33b   : > { %v1705_v37 = vpop.f32.mrf.mxu2 }
 0x33c   : > { %v11750_v32 = vpack.c.bf16 %v2090_v46, %v2086_v47  ;;  %v1706_v58 = vadd.f32 %v1705_v37, %v11610_v4  ;;  %v1794_v13 = vpop.f32.mrf.mxu3  ;;  %v10226_v47 = vld [vmem:[#allocation11 + $0x304] sm:$0xf]  ;;  %4100 = vmatpush.bf16.msra.mxu2 %v8899_v5 }
 0x33d   : > { %v1886_v53 = vpop.f32.mrf.mxu0  ;;  %v9152_v46 = vld [vmem:[#allocation11 + $0x320] sm:$0xf0] }
 0x33e   : > { %v1795_v21 = vadd.f32 %v1794_v13, %v1706_v58  ;;  %v1887_v36 = vadd.f32 %v1886_v53, %v11602_v33  ;;  %v1975_v57 = vpop.f32.mrf.mxu1  ;;  %v9155_v58 = vor.u32 %v10226_v47, %v9152_v46 }
 0x340   : > { %v2089_v30 = vmax.f32 %v1795_v21, 0.0  ;;  %v1976_v0 = vadd.f32 %v1975_v57, %v1887_v36  ;;  %3769 = vmatmul.bf16.gmra.mxu2 %v11478_v9  ;;  %3947 = vmatmul.bf16.gmra.mxu0 %v11674_v49  ;;  %v10290_v49 = vld [vmem:[#allocation11 + $0x504] sm:$0xf] }
 0x341   : > { %3858 = vmatmul.bf16.gmra.mxu3 %v13267_v15  ;;  %4036 = vmatmul.bf16.gmra.mxu1 %v11666_v56 }
 0x342   : > { %v11758_v22 = vpack.c.bf16 %v2089_v30, %v2085_v38  ;;  %4189 = vmatpush.bf16.msra.mxu3 %v9155_v58  ;;  %v2094_v38 = vmax.f32 %v1976_v0, 0.0  ;;  %v13268_v0 = vld [vmem:[#allocation29_spill] sm:$0xff] }
 0x343   : > { %v1708_v27 = vpop.f32.mrf.mxu2 }
 0x344   : > { %v1709_v20 = vadd.f32 %v1708_v27, %v11610_v4  ;;  %v1797_v37 = vpop.f32.mrf.mxu3  ;;  %v9408_v27 = vld [vmem:[#allocation11 + $0x520] sm:$0xf0] }
 0x345   : > { %v1888_v13 = vpop.f32.mrf.mxu0  ;;  %v9411_v47 = vor.u32 %v10290_v49, %v9408_v27  ;;  %v9664_v49 = vld [vmem:[#allocation11 + $0x720] sm:$0xf0] }
 0x346   : > { %v1798_v53 = vadd.f32 %v1797_v37, %v1709_v20  ;;  %v1889_v21 = vadd.f32 %v1888_v13, %v11602_v33  ;;  %v1977_v36 = vpop.f32.mrf.mxu1 }
 0x347   : > { %4278 = vmatpush.bf16.msra.mxu0 %v9411_v47 }
 0x348   : > { %v1978_v57 = vadd.f32 %v1977_v36, %v1889_v21  ;;  %v2093_v37 = vmax.f32 %v1798_v53, 0.0  ;;  %v13269_v21 = vld [vmem:[#allocation28_spill] sm:$0xff]  ;;  %v10354_v36 = vld [vmem:[#allocation11 + $0x704] sm:$0xf] }
 0x34a   : > { %v2098_v30 = vmax.f32 %v1978_v57, 0.0 }
 0x34b   : > { %v1710_v56 = vpop.f32.mrf.mxu2 }
 0x34c   : > { %v11762_v15 = vpack.c.bf16 %v2098_v30, %v2094_v38  ;;  %v1711_v60 = vadd.f32 %v1710_v56, %v11610_v4  ;;  %v1799_v43 = vpop.f32.mrf.mxu3  ;;  %v9667_v38 = vor.u32 %v10354_v36, %v9664_v49 }
 0x34d   : > { %v1891_v9 = vpop.f32.mrf.mxu0 }
 0x34e   : > { %v1800_v46 = vadd.f32 %v1799_v43, %v1711_v60  ;;  %v1892_v5 = vadd.f32 %v1891_v9, %v11602_v33  ;;  %v1980_v20 = vpop.f32.mrf.mxu1  ;;  %4367 = vmatpush.bf16.msra.mxu1 %v9667_v38 }
 0x350   : > { %v2097_v58 = vmax.f32 %v1800_v46, 0.0  ;;  %v1981_v13 = vadd.f32 %v1980_v20, %v1892_v5  ;;  %3774 = vmatmul.bf16.gmra.mxu2 %v13268_v0  ;;  %3952 = vmatmul.bf16.gmra.mxu0 %v11686_v11 }
 0x351   : > { %3863 = vmatmul.bf16.gmra.mxu3 %v13269_v21  ;;  %4041 = vmatmul.bf16.gmra.mxu1 %v11678_v6 }
 0x352   : > { %v11770_v56 = vpack.c.bf16 %v2097_v58, %v2093_v37  ;;  %v2102_v46 = vmax.f32 %v1981_v13, 0.0  ;;  %v13270_v13 = vld [vmem:[#allocation30_spill] sm:$0xff] }
 0x353   : > { %v1713_v57 = vpop.f32.mrf.mxu2 }
 0x354   : > { %v1714_v9 = vadd.f32 %v1713_v57, %v11610_v4  ;;  %v1802_v30 = vpop.f32.mrf.mxu3 }
 0x355   : > { %v1893_v53 = vpop.f32.mrf.mxu0 }
 0x356   : > { %v1803_v60 = vadd.f32 %v1802_v30, %v1714_v9  ;;  %v1894_v43 = vadd.f32 %v1893_v53, %v11602_v33  ;;  %v1982_v27 = vpop.f32.mrf.mxu1  ;;  %v10154_v53 = vld [vmem:[#allocation11 + $0xc4] sm:$0xf] }
 0x358   : > { %v1983_v47 = vadd.f32 %v1982_v27, %v1894_v43  ;;  %v2101_v11 = vmax.f32 %v1803_v60, 0.0  ;;  %v8864_v43 = vld [vmem:[#allocation11 + $0xe0] sm:$0xf0] }
 0x35a   : > { %v2106_v5 = vmax.f32 %v1983_v47, 0.0  ;;  %v8867_v47 = vor.u32 %v10154_v53, %v8864_v43 }
 0x35b   : > { %v1715_v20 = vpop.f32.mrf.mxu2 }
 0x35c   : > { %v11774_v6 = vpack.c.bf16 %v2106_v5, %v2102_v46  ;;  %v1716_v37 = vadd.f32 %v1715_v20, %v11610_v4  ;;  %v1804_v58 = vpop.f32.mrf.mxu3  ;;  %v10218_v46 = vld [vmem:[#allocation11 + $0x2c4] sm:$0xf]  ;;  %4101 = vmatpush.bf16.msra.mxu2 %v8867_v47 }
 0x35d   : > { %v1896_v21 = vpop.f32.mrf.mxu0 }
 0x35e   : > { %v1805_v36 = vadd.f32 %v1804_v58, %v1716_v37  ;;  %v1897_v49 = vadd.f32 %v1896_v21, %v11602_v33  ;;  %v1985_v57 = vpop.f32.mrf.mxu1  ;;  %v9120_v21 = vld [vmem:[#allocation11 + $0x2e0] sm:$0xf0] }
 0x35f   : > { %v9123_v20 = vor.u32 %v10218_v46, %v9120_v21 }
 0x360   : > { %v2105_v38 = vmax.f32 %v1805_v36, 0.0  ;;  %v1986_v9 = vadd.f32 %v1985_v57, %v1897_v49  ;;  %3779 = vmatmul.bf16.gmra.mxu2 %v11502_v50  ;;  %3957 = vmatmul.bf16.gmra.mxu0 %v11698_v18  ;;  %v10282_v18 = vld [vmem:[#allocation11 + $0x4c4] sm:$0xf] }
 0x361   : > { %3868 = vmatmul.bf16.gmra.mxu3 %v13270_v13  ;;  %4046 = vmatmul.bf16.gmra.mxu1 %v11690_v12 }
 0x362   : > { %v11782_v30 = vpack.c.bf16 %v2105_v38, %v2101_v11  ;;  %4190 = vmatpush.bf16.msra.mxu3 %v9123_v20  ;;  %v2110_v11 = vmax.f32 %v1986_v9, 0.0  ;;  %v13271_v9 = vld [vmem:[#allocation32_spill] sm:$0xff] }
 0x363   : > { %v1718_v27 = vpop.f32.mrf.mxu2 }
 0x364   : > { %v1719_v60 = vadd.f32 %v1718_v27, %v11610_v4  ;;  %v1807_v5 = vpop.f32.mrf.mxu3  ;;  %v9376_v27 = vld [vmem:[#allocation11 + $0x4e0] sm:$0xf0] }
 0x365   : > { %v1898_v37 = vpop.f32.mrf.mxu0  ;;  %v9379_v46 = vor.u32 %v10282_v18, %v9376_v27 }
 0x366   : > { %v1808_v58 = vadd.f32 %v1807_v5, %v1719_v60  ;;  %v1899_v36 = vadd.f32 %v1898_v37, %v11602_v33  ;;  %v1987_v49 = vpop.f32.mrf.mxu1 }
 0x367   : > { %4279 = vmatpush.bf16.msra.mxu0 %v9379_v46 }
 0x368   : > { %v1988_v57 = vadd.f32 %v1987_v49, %v1899_v36  ;;  %v2109_v5 = vmax.f32 %v1808_v58, 0.0 }
 0x36a   : > { %v2114_v38 = vmax.f32 %v1988_v57, 0.0 }
 0x36b   : > { %v1720_v12 = vpop.f32.mrf.mxu2 }
 0x36c   : > { %v11786_v13 = vpack.c.bf16 %v2114_v38, %v2110_v11  ;;  %v1721_v53 = vadd.f32 %v1720_v12, %v11610_v4  ;;  %v1809_v43 = vpop.f32.mrf.mxu3  ;;  %v10346_v38 = vld [vmem:[#allocation11 + $0x6c4] sm:$0xf] }
 0x36d   : > { %v1901_v50 = vpop.f32.mrf.mxu0 }
 0x36e   : > { %v1810_v21 = vadd.f32 %v1809_v43, %v1721_v53  ;;  %v1902_v47 = vadd.f32 %v1901_v50, %v11602_v33  ;;  %v1990_v60 = vpop.f32.mrf.mxu1  ;;  %v9632_v53 = vld [vmem:[#allocation11 + $0x6e0] sm:$0xf0] }
 0x36f   : > { %v9635_v43 = vor.u32 %v10346_v38, %v9632_v53  ;;  %v10210_v38 = vld [vmem:[#allocation11 + $0x284] sm:$0xf] }
 0x370   : > { %v2113_v20 = vmax.f32 %v1810_v21, 0.0  ;;  %v1991_v37 = vadd.f32 %v1990_v60, %v1902_v47  ;;  %3784 = vmatmul.bf16.gmra.mxu2 %v11514_v19  ;;  %3962 = vmatmul.bf16.gmra.mxu0 %v11710_v29 }
 0x371   : > { %3873 = vmatmul.bf16.gmra.mxu3 %v13271_v9  ;;  %4051 = vmatmul.bf16.gmra.mxu1 %v11702_v54  ;;  %v11801_v54 = vld [vmem:[#allocation13] sm:$0xff] }
 0x372   : > { %v11794_v12 = vpack.c.bf16 %v2113_v20, %v2109_v5  ;;  %4368 = vmatpush.bf16.msra.mxu1 %v9635_v43  ;;  %v2118_v46 = vmax.f32 %v1991_v37, 0.0  ;;  %13272 = vst [vmem:[#allocation29_spill] sm:$0xff] %v11801_v54  ;;  %v11806_v37 = vperm.slane %v11801_v54, 0  ;;  %v10274_v54 = vld [vmem:[#allocation11 + $0x484] sm:$0xf] }
 0x373   : > { %v1723_v36 = vpop.f32.mrf.mxu2 }
 0x374   : > { %v1724_v18 = vadd.f32 %v1723_v36, %v11610_v4  ;;  %v1812_v49 = vpop.f32.mrf.mxu3 }
 0x375   : > { %v1903_v50 = vpop.f32.mrf.mxu0 }
 0x376   : > { %v1813_v57 = vadd.f32 %v1812_v49, %v1724_v18  ;;  %v1904_v58 = vadd.f32 %v1903_v50, %v11602_v33  ;;  %v1992_v11 = vpop.f32.mrf.mxu1 }
 0x378   : > { %v1993_v27 = vadd.f32 %v1992_v11, %v1904_v58  ;;  %v2117_v33 = vmax.f32 %v1813_v57, 0.0  ;;  %v10146_v58 = vld [vmem:[#allocation11 + $0x84] sm:$0xf] }
 0x379   : > { %v8832_v11 = vld [vmem:[#allocation11 + $0xa0] sm:$0xf0] }
 0x37a   : > { %v2122_v21 = vmax.f32 %v1993_v27, 0.0  ;;  %v8835_v43 = vor.u32 %v10146_v58, %v8832_v11  ;;  %v9088_v57 = vld [vmem:[#allocation11 + $0x2a0] sm:$0xf0] }
 0x37b   : > { %v1725_v47 = vpop.f32.mrf.mxu2 }
 0x37c   : > { %v11798_v60 = vpack.c.bf16 %v2122_v21, %v2118_v46  ;;  %v1726_v5 = vadd.f32 %v1725_v47, %v11610_v4  ;;  %v1814_v20 = vpop.f32.mrf.mxu3  ;;  %v9091_v21 = vor.u32 %v10210_v38, %v9088_v57  ;;  %4102 = vmatpush.bf16.msra.mxu2 %v8835_v43 }
 0x37d   : > { %v3928_v36 = vpop.f32.mrf.mxu0 }
 0x37e   : > { %v1815_v18 = vadd.f32 %v1814_v20, %v1726_v5  ;;  %v4017_v49 = vpop.f32.mrf.mxu1  ;;  %4191 = vmatpush.bf16.msra.mxu3 %v9091_v21 }
 0x380   : > { %v2121_v50 = vmax.f32 %v1815_v18, 0.0  ;;  %3789 = vmatmul.bf16.gmra.mxu2 %v11526_v63  ;;  %3967 = vmatmul.bf16.gmra.mxu0 %v11722_v10  ;;  %v9344_v10 = vld [vmem:[#allocation11 + $0x4a0] sm:$0xf0] }
 0x381   : > { %3878 = vmatmul.bf16.gmra.mxu3 %v11518_v25  ;;  %4056 = vmatmul.bf16.gmra.mxu1 %v11714_v62  ;;  %v9347_v58 = vor.u32 %v10274_v54, %v9344_v10 }
 0x382   : > { %v11810_v4 = vpack.c.bf16 %v2121_v50, %v2117_v33 }
 0x383   : > { %v3750_v53 = vpop.f32.mrf.mxu2  ;;  %4280 = vmatpush.bf16.msra.mxu0 %v9347_v58 }
 0x384   : > { %v3751_v27 = vadd.f32 %v3750_v53, %v11806_v37  ;;  %v3839_v46 = vpop.f32.mrf.mxu3 }
 0x385   : > { %v3930_v47 = vpop.f32.mrf.mxu0 }
 0x386   : > { %v3840_v5 = vadd.f32 %v3839_v46, %v3751_v27  ;;  %v4019_v20 = vpop.f32.mrf.mxu1 }
 0x388   : > { %v3929_v18 = vadd.f32 %v3928_v36, %v3840_v5 }
 0x38a   : > { %v4018_v25 = vadd.f32 %v4017_v49, %v3929_v18  ;;  %v10338_v49 = vld [vmem:[#allocation11 + $0x684] sm:$0xf] }
 0x38b   : > { %v3752_v62 = vpop.f32.mrf.mxu2 }
 0x38c   : > { %v3753_v33 = vadd.f32 %v3752_v62, %v11806_v37  ;;  %v3841_v50 = vpop.f32.mrf.mxu3  ;;  %v9600_v62 = vld [vmem:[#allocation11 + $0x6a0] sm:$0xf0]  ;;  %v6589_v57 = vmax.f32 %v4018_v25, 0.0 }
 0x38d   : > { %v3933_v63 = vpop.f32.mrf.mxu0  ;;  %v9603_v43 = vor.u32 %v10338_v49, %v9600_v62  ;;  %v10138_v62 = vld [vmem:[#allocation11 + $0x44] sm:$0xf] }
 0x38e   : > { %v3842_v11 = vadd.f32 %v3841_v50, %v3753_v33  ;;  %v4022_v9 = vpop.f32.mrf.mxu1 }
 0x38f   : > { %4369 = vmatpush.bf16.msra.mxu1 %v9603_v43 }
 0x390   : > { %v3931_v53 = vadd.f32 %v3930_v47, %v3842_v11  ;;  %3794 = vmatmul.bf16.gmra.mxu2 %v11538_v52  ;;  %3972 = vmatmul.bf16.gmra.mxu0 %v11734_v1 }
 0x391   : > { %3883 = vmatmul.bf16.gmra.mxu3 %v11530_v2  ;;  %4061 = vmatmul.bf16.gmra.mxu1 %v11726_v17 }
 0x392   : > { %v4020_v36 = vadd.f32 %v4019_v20, %v3931_v53 }
 0x393   : > { %v3755_v38 = vpop.f32.mrf.mxu2 }
 0x394   : > { %v6597_v27 = vmax.f32 %v4020_v36, 0.0  ;;  %v3756_v54 = vadd.f32 %v3755_v38, %v11806_v37  ;;  %v3844_v10 = vpop.f32.mrf.mxu3 }
 0x395   : > { %v3935_v46 = vpop.f32.mrf.mxu0 }
 0x396   : > { %v11819_v21 = vpack.c.bf16 %v6597_v27, %v6589_v57  ;;  %v3845_v47 = vadd.f32 %v3844_v10, %v3756_v54  ;;  %v4024_v5 = vpop.f32.mrf.mxu1  ;;  %v9056_v57 = vld [vmem:[#allocation11 + $0x260] sm:$0xf0] }
 0x398   : > { %13273 = vst [vmem:[#allocation51_spill] sm:$0xff] %v11819_v21  ;;  %v3934_v18 = vadd.f32 %v3933_v63, %v3845_v47  ;;  %v8800_v63 = vld [vmem:[#allocation11 + $0x60] sm:$0xf0] }
 0x399   : > { %v8803_v43 = vor.u32 %v10138_v62, %v8800_v63  ;;  %v10266_v63 = vld [vmem:[#allocation11 + $0x444] sm:$0xf] }
 0x39a   : > { %v4023_v33 = vadd.f32 %v4022_v9, %v3934_v18  ;;  %v10202_v9 = vld [vmem:[#allocation11 + $0x244] sm:$0xf] }
 0x39b   : > { %v3757_v50 = vpop.f32.mrf.mxu2  ;;  %4103 = vmatpush.bf16.msra.mxu2 %v8803_v43  ;;  %v9568_v43 = vld [vmem:[#allocation11 + $0x660] sm:$0xf0] }
 0x39c   : > { %v3758_v20 = vadd.f32 %v3757_v50, %v11806_v37  ;;  %v3846_v58 = vpop.f32.mrf.mxu3  ;;  %v6605_v27 = vmax.f32 %v4023_v33, 0.0  ;;  %v9312_v33 = vld [vmem:[#allocation11 + $0x460] sm:$0xf0] }
 0x39d   : > { %v3938_v11 = vpop.f32.mrf.mxu0 }
 0x39e   : > { %v3847_v53 = vadd.f32 %v3846_v58, %v3758_v20  ;;  %v4027_v49 = vpop.f32.mrf.mxu1 }
 0x3a0   : > { %v3936_v25 = vadd.f32 %v3935_v46, %v3847_v53  ;;  %3799 = vmatmul.bf16.gmra.mxu2 %v11550_v23  ;;  %3977 = vmatmul.bf16.gmra.mxu0 %v11746_v41  ;;  %v9059_v46 = vor.u32 %v10202_v9, %v9056_v57 }
 0x3a1   : > { %3888 = vmatmul.bf16.gmra.mxu3 %v11542_v31  ;;  %4066 = vmatmul.bf16.gmra.mxu1 %v11738_v7 }
 0x3a2   : > { %v4025_v36 = vadd.f32 %v4024_v5, %v3936_v25  ;;  %4192 = vmatpush.bf16.msra.mxu3 %v9059_v46 }
 0x3a3   : > { %v3760_v38 = vpop.f32.mrf.mxu2 }
 0x3a4   : > { %v3761_v54 = vadd.f32 %v3760_v38, %v11806_v37  ;;  %v3849_v10 = vpop.f32.mrf.mxu3  ;;  %v6613_v47 = vmax.f32 %v4025_v36, 0.0  ;;  %v9315_v38 = vor.u32 %v10266_v63, %v9312_v33 }
 0x3a5   : > { %v3940_v18 = vpop.f32.mrf.mxu0 }
 0x3a6   : > { %v3850_v50 = vadd.f32 %v3849_v10, %v3761_v54  ;;  %v4029_v20 = vpop.f32.mrf.mxu1  ;;  %v11827_v58 = vpack.c.bf16 %v6613_v47, %v6605_v27  ;;  %4281 = vmatpush.bf16.msra.mxu0 %v9315_v38 }
 0x3a8   : > { %13274 = vst [vmem:[#allocation52_spill] sm:$0xff] %v11827_v58  ;;  %v3939_v5 = vadd.f32 %v3938_v11, %v3850_v50 }
 0x3aa   : > { %v4028_v53 = vadd.f32 %v4027_v49, %v3939_v5  ;;  %v10330_v49 = vld [vmem:[#allocation11 + $0x644] sm:$0xf] }
 0x3ab   : > { %v3762_v25 = vpop.f32.mrf.mxu2  ;;  %v9571_v27 = vor.u32 %v10330_v49, %v9568_v43  ;;  %v10130_v49 = vld [vmem:[#allocation11 + $0x4] sm:$0xf] }
 0x3ac   : > { %v3763_v21 = vadd.f32 %v3762_v25, %v11806_v37  ;;  %v3851_v62 = vpop.f32.mrf.mxu3  ;;  %v6621_v54 = vmax.f32 %v4028_v53, 0.0 }
 0x3ad   : > { %v3943_v7 = vpop.f32.mrf.mxu0  ;;  %4370 = vmatpush.bf16.msra.mxu1 %v9571_v27  ;;  %v9024_v27 = vld [vmem:[#allocation11 + $0x220] sm:$0xf0] }
 0x3ae   : > { %v3852_v31 = vadd.f32 %v3851_v62, %v3763_v21  ;;  %v4032_v9 = vpop.f32.mrf.mxu1 }
 0x3b0   : > { %v3941_v36 = vadd.f32 %v3940_v18, %v3852_v31  ;;  %3804 = vmatmul.bf16.gmra.mxu2 %v11562_v34  ;;  %3982 = vmatmul.bf16.gmra.mxu0 %v11758_v22 }
 0x3b1   : > { %3893 = vmatmul.bf16.gmra.mxu3 %v11554_v14  ;;  %4071 = vmatmul.bf16.gmra.mxu1 %v11750_v32 }
 0x3b2   : > { %v4030_v11 = vadd.f32 %v4029_v20, %v3941_v36 }
 0x3b3   : > { %v3765_v57 = vpop.f32.mrf.mxu2 }
 0x3b4   : > { %v3766_v10 = vadd.f32 %v3765_v57, %v11806_v37  ;;  %v3854_v21 = vpop.f32.mrf.mxu3  ;;  %v6629_v46 = vmax.f32 %v4030_v11, 0.0 }
 0x3b5   : > { %v3945_v47 = vpop.f32.mrf.mxu0 }
 0x3b6   : > { %v3855_v31 = vadd.f32 %v3854_v21, %v3766_v10  ;;  %v4034_v18 = vpop.f32.mrf.mxu1  ;;  %v11835_v50 = vpack.c.bf16 %v6629_v46, %v6621_v54 }
 0x3b8   : > { %13275 = vst [vmem:[#allocation53_spill] sm:$0xff] %v11835_v50  ;;  %v3944_v5 = vadd.f32 %v3943_v7, %v3855_v31  ;;  %v8768_v7 = vld [vmem:[#allocation11 + $0x20] sm:$0xf0] }
 0x3b9   : > { %v8771_v57 = vor.u32 %v10130_v49, %v8768_v7  ;;  %v10258_v7 = vld [vmem:[#allocation11 + $0x404] sm:$0xf] }
 0x3ba   : > { %v4033_v25 = vadd.f32 %v4032_v9, %v3944_v5  ;;  %v10194_v9 = vld [vmem:[#allocation11 + $0x204] sm:$0xf] }
 0x3bb   : > { %v3767_v62 = vpop.f32.mrf.mxu2  ;;  %v9027_v46 = vor.u32 %v10194_v9, %v9024_v27  ;;  %4104 = vmatpush.bf16.msra.mxu2 %v8771_v57  ;;  %v9536_v57 = vld [vmem:[#allocation11 + $0x620] sm:$0xf0] }
 0x3bc   : > { %v3768_v20 = vadd.f32 %v3767_v62, %v11806_v37  ;;  %v3856_v63 = vpop.f32.mrf.mxu3  ;;  %v6637_v54 = vmax.f32 %v4033_v25, 0.0  ;;  %v9280_v25 = vld [vmem:[#allocation11 + $0x420] sm:$0xf0] }
 0x3bd   : > { %v3948_v33 = vpop.f32.mrf.mxu0  ;;  %4193 = vmatpush.bf16.msra.mxu3 %v9027_v46 }
 0x3be   : > { %v3857_v38 = vadd.f32 %v3856_v63, %v3768_v20  ;;  %v4037_v36 = vpop.f32.mrf.mxu1 }
 0x3c0   : > { %v3946_v53 = vadd.f32 %v3945_v47, %v3857_v38  ;;  %3809 = vmatmul.bf16.gmra.mxu2 %v11574_v45  ;;  %3987 = vmatmul.bf16.gmra.mxu0 %v11770_v56 }
 0x3c1   : > { %3898 = vmatmul.bf16.gmra.mxu3 %v11566_v39  ;;  %4076 = vmatmul.bf16.gmra.mxu1 %v11762_v15 }
 0x3c2   : > { %v4035_v11 = vadd.f32 %v4034_v18, %v3946_v53 }
 0x3c3   : > { %v3770_v43 = vpop.f32.mrf.mxu2 }
 0x3c4   : > { %v3771_v10 = vadd.f32 %v3770_v43, %v11806_v37  ;;  %v3859_v21 = vpop.f32.mrf.mxu3  ;;  %v6645_v47 = vmax.f32 %v4035_v11, 0.0  ;;  %v9283_v43 = vor.u32 %v10258_v7, %v9280_v25 }
 0x3c5   : > { %v3950_v31 = vpop.f32.mrf.mxu0 }
 0x3c6   : > { %v3860_v5 = vadd.f32 %v3859_v21, %v3771_v10  ;;  %v4039_v62 = vpop.f32.mrf.mxu1  ;;  %v11843_v20 = vpack.c.bf16 %v6645_v47, %v6637_v54  ;;  %4282 = vmatpush.bf16.msra.mxu0 %v9283_v43 }
 0x3c8   : > { %13276 = vst [vmem:[#allocation54_spill] sm:$0xff] %v11843_v20  ;;  %v3949_v18 = vadd.f32 %v3948_v33, %v3860_v5 }
 0x3ca   : > { %v4038_v63 = vadd.f32 %v4037_v36, %v3949_v18  ;;  %v10322_v36 = vld [vmem:[#allocation11 + $0x604] sm:$0xf] }
 0x3cb   : > { %v3772_v38 = vpop.f32.mrf.mxu2  ;;  %v9539_v54 = vor.u32 %v10322_v36, %v9536_v57  ;;  %v8998_v36 = vld [vmem:[#allocation11 + $0x1c8] sm:$0xf] }
 0x3cc   : > { %v3773_v53 = vadd.f32 %v3772_v38, %v11806_v37  ;;  %v3861_v49 = vpop.f32.mrf.mxu3  ;;  %v6653_v10 = vmax.f32 %v4038_v63, 0.0 }
 0x3cd   : > { %v3953_v50 = vpop.f32.mrf.mxu0  ;;  %4371 = vmatpush.bf16.msra.mxu1 %v9539_v54  ;;  %v10255_v54 = vld [vmem:[#allocation11 + $0x3e4] sm:$0xf0] }
 0x3ce   : > { %v3862_v58 = vadd.f32 %v3861_v49, %v3773_v53  ;;  %v4042_v9 = vpop.f32.mrf.mxu1 }
 0x3d0   : > { %v3951_v11 = vadd.f32 %v3950_v31, %v3862_v58  ;;  %3814 = vmatmul.bf16.gmra.mxu2 %v11586_v42  ;;  %3992 = vmatmul.bf16.gmra.mxu0 %v11782_v30 }
 0x3d1   : > { %3903 = vmatmul.bf16.gmra.mxu3 %v11578_v44  ;;  %4081 = vmatmul.bf16.gmra.mxu1 %v11774_v6 }
 0x3d2   : > { %v4040_v33 = vadd.f32 %v4039_v62, %v3951_v11 }
 0x3d3   : > { %v3775_v27 = vpop.f32.mrf.mxu2 }
 0x3d4   : > { %v3776_v21 = vadd.f32 %v3775_v27, %v11806_v37  ;;  %v3864_v46 = vpop.f32.mrf.mxu3  ;;  %v6661_v47 = vmax.f32 %v4040_v33, 0.0 }
 0x3d5   : > { %v3955_v5 = vpop.f32.mrf.mxu0 }
 0x3d6   : > { %v3865_v58 = vadd.f32 %v3864_v46, %v3776_v21  ;;  %v4044_v31 = vpop.f32.mrf.mxu1  ;;  %v11851_v18 = vpack.c.bf16 %v6661_v47, %v6653_v10 }
 0x3d8   : > { %13277 = vst [vmem:[#allocation55_spill] sm:$0xff] %v11851_v18  ;;  %v3954_v38 = vadd.f32 %v3953_v50, %v3865_v58  ;;  %v10191_v50 = vld [vmem:[#allocation11 + $0x1e4] sm:$0xf0] }
 0x3d9   : > { %v8999_v27 = vor.u32 %v10191_v50, %v8998_v36  ;;  %v9510_v50 = vld [vmem:[#allocation11 + $0x5c8] sm:$0xf] }
 0x3da   : > { %v4043_v53 = vadd.f32 %v4042_v9, %v3954_v38  ;;  %v9254_v9 = vld [vmem:[#allocation11 + $0x3c8] sm:$0xf] }
 0x3db   : > { %v3777_v49 = vpop.f32.mrf.mxu2  ;;  %v9255_v47 = vor.u32 %v10255_v54, %v9254_v9  ;;  %4453 = vmatpush.bf16.msrb.mxu2 %v8999_v27  ;;  %v10383_v27 = vld [vmem:[#allocation11 + $0x7e4] sm:$0xf0] }
 0x3dc   : > { %v3778_v62 = vadd.f32 %v3777_v49, %v11806_v37  ;;  %v3866_v7 = vpop.f32.mrf.mxu3  ;;  %v6669_v10 = vmax.f32 %v4043_v53, 0.0  ;;  %v10319_v53 = vld [vmem:[#allocation11 + $0x5e4] sm:$0xf0] }
 0x3dd   : > { %v3958_v25 = vpop.f32.mrf.mxu0  ;;  %4542 = vmatpush.bf16.msrb.mxu3 %v9255_v47 }
 0x3de   : > { %v3867_v43 = vadd.f32 %v3866_v7, %v3778_v62  ;;  %v4047_v11 = vpop.f32.mrf.mxu1 }
 0x3e0   : > { %v3956_v63 = vadd.f32 %v3955_v5, %v3867_v43  ;;  %3819 = vmatmul.bf16.gmra.mxu2 %v11598_v26  ;;  %3997 = vmatmul.bf16.gmra.mxu0 %v11794_v12 }
 0x3e1   : > { %3908 = vmatmul.bf16.gmra.mxu3 %v11590_v59  ;;  %4086 = vmatmul.bf16.gmra.mxu1 %v11786_v13 }
 0x3e2   : > { %v4045_v33 = vadd.f32 %v4044_v31, %v3956_v63 }
 0x3e3   : > { %v3780_v57 = vpop.f32.mrf.mxu2 }
 0x3e4   : > { %v3781_v21 = vadd.f32 %v3780_v57, %v11806_v37  ;;  %v3869_v46 = vpop.f32.mrf.mxu3  ;;  %v6677_v5 = vmax.f32 %v4045_v33, 0.0  ;;  %v9511_v57 = vor.u32 %v10319_v53, %v9510_v50 }
 0x3e5   : > { %v3960_v58 = vpop.f32.mrf.mxu0 }
 0x3e6   : > { %v3870_v38 = vadd.f32 %v3869_v46, %v3781_v21  ;;  %v4049_v49 = vpop.f32.mrf.mxu1  ;;  %v11859_v62 = vpack.c.bf16 %v6677_v5, %v6669_v10  ;;  %4631 = vmatpush.bf16.msrb.mxu0 %v9511_v57 }
 0x3e8   : > { %13278 = vst [vmem:[#allocation56_spill] sm:$0xff] %v11859_v62  ;;  %v3959_v31 = vadd.f32 %v3958_v25, %v3870_v38 }
 0x3ea   : > { %v4048_v7 = vadd.f32 %v4047_v11, %v3959_v31  ;;  %v9766_v11 = vld [vmem:[#allocation11 + $0x7c8] sm:$0xf] }
 0x3eb   : > { %v3782_v43 = vpop.f32.mrf.mxu2  ;;  %v9767_v10 = vor.u32 %v10383_v27, %v9766_v11  ;;  %v13281_v11 = vld [vmem:[#allocation36_spill] sm:$0xff] }
 0x3ec   : > { %v3783_v63 = vadd.f32 %v3782_v43, %v11806_v37  ;;  %v3871_v36 = vpop.f32.mrf.mxu3  ;;  %v6685_v21 = vmax.f32 %v4048_v7, 0.0 }
 0x3ed   : > { %v3963_v18 = vpop.f32.mrf.mxu0  ;;  %4720 = vmatpush.bf16.msrb.mxu1 %v9767_v10 }
 0x3ee   : > { %v3872_v20 = vadd.f32 %v3871_v36, %v3783_v63  ;;  %v4052_v9 = vpop.f32.mrf.mxu1 }
 0x3f0   : > { %v3961_v33 = vadd.f32 %v3960_v58, %v3872_v20  ;;  %3824 = vmatmul.bf16.gmra.mxu2 %v11614_v16  ;;  %4002 = vmatmul.bf16.gmra.mxu0 %v11810_v4 }
 0x3f1   : > { %3913 = vmatmul.bf16.gmra.mxu3 %v11604_v40  ;;  %4091 = vmatmul.bf16.gmra.mxu1 %v11798_v60 }
 0x3f2   : > { %v4050_v25 = vadd.f32 %v4049_v49, %v3961_v33 }
 0x3f3   : > { %v3785_v54 = vpop.f32.mrf.mxu2 }
 0x3f4   : > { %v3786_v46 = vadd.f32 %v3785_v54, %v11806_v37  ;;  %v3874_v47 = vpop.f32.mrf.mxu3  ;;  %v6693_v5 = vmax.f32 %v4050_v25, 0.0  ;;  %v13280_v25 = vld [vmem:[#allocation23_spill] sm:$0xff] }
 0x3f5   : > { %v3965_v38 = vpop.f32.mrf.mxu0  ;;  %v8966_v54 = vld [vmem:[#allocation11 + $0x188] sm:$0xf] }
 0x3f6   : > { %v3875_v20 = vadd.f32 %v3874_v47, %v3786_v46  ;;  %v4054_v58 = vpop.f32.mrf.mxu1  ;;  %v11867_v31 = vpack.c.bf16 %v6693_v5, %v6685_v21  ;;  %v10247_v46 = vld [vmem:[#allocation11 + $0x3a4] sm:$0xf0] }
 0x3f8   : > { %13279 = vst [vmem:[#allocation57_spill] sm:$0xff] %v11867_v31  ;;  %v3964_v43 = vadd.f32 %v3963_v18, %v3875_v20  ;;  %v10183_v18 = vld [vmem:[#allocation11 + $0x1a4] sm:$0xf0] }
 0x3f9   : > { %v8967_v21 = vor.u32 %v10183_v18, %v8966_v54  ;;  %v9478_v18 = vld [vmem:[#allocation11 + $0x588] sm:$0xf] }
 0x3fa   : > { %v4053_v63 = vadd.f32 %v4052_v9, %v3964_v43  ;;  %v9222_v9 = vld [vmem:[#allocation11 + $0x388] sm:$0xf] }
 0x3fb   : > { %v3787_v36 = vpop.f32.mrf.mxu2  ;;  %4454 = vmatpush.bf16.msrb.mxu2 %v8967_v21  ;;  %v9734_v21 = vld [vmem:[#allocation11 + $0x788] sm:$0xf] }
 0x3fc   : > { %v3788_v49 = vadd.f32 %v3787_v36, %v11806_v37  ;;  %v3876_v50 = vpop.f32.mrf.mxu3  ;;  %v6701_v47 = vmax.f32 %v4053_v63, 0.0  ;;  %v10311_v63 = vld [vmem:[#allocation11 + $0x5a4] sm:$0xf0] }
 0x3fd   : > { %v3968_v53 = vpop.f32.mrf.mxu0 }
 0x3fe   : > { %v3877_v57 = vadd.f32 %v3876_v50, %v3788_v49  ;;  %v4057_v33 = vpop.f32.mrf.mxu1 }
 0x400   : > { %v3966_v7 = vadd.f32 %v3965_v38, %v3877_v57  ;;  %4105 = vmatmul.bf16.vlgmr.msra.gmra.mxu2 %v11430_v3  ;;  %4283 = vmatmul.bf16.vlgmr.msra.gmra.mxu0 %v11626_v24  ;;  %v9223_v38 = vor.u32 %v10247_v46, %v9222_v9 }
 0x401   : > { %4194 = vmatmul.bf16.vlgmr.msra.gmra.mxu3 %v13280_v25  ;;  %4372 = vmatmul.bf16.vlgmr.msra.gmra.mxu1 %v13281_v11 }
 0x402   : > { %v4055_v27 = vadd.f32 %v4054_v58, %v3966_v7  ;;  %4543 = vmatpush.bf16.msrb.mxu3 %v9223_v38 }
 0x403   : > { %v3790_v10 = vpop.f32.mrf.mxu2 }
 0x404   : > { %v3791_v5 = vadd.f32 %v3790_v10, %v11806_v37  ;;  %v3879_v20 = vpop.f32.mrf.mxu3  ;;  %v6709_v43 = vmax.f32 %v4055_v27, 0.0  ;;  %v9479_v10 = vor.u32 %v10311_v63, %v9478_v18 }
 0x405   : > { %v3970_v36 = vpop.f32.mrf.mxu0 }
 0x406   : > { %v3880_v49 = vadd.f32 %v3879_v20, %v3791_v5  ;;  %v4059_v50 = vpop.f32.mrf.mxu1  ;;  %v11875_v57 = vpack.c.bf16 %v6709_v43, %v6701_v47  ;;  %4632 = vmatpush.bf16.msrb.mxu0 %v9479_v10 }
 0x408   : > { %13282 = vst [vmem:[#allocation58_spill] sm:$0xff] %v11875_v57  ;;  %v3969_v58 = vadd.f32 %v3968_v53, %v3880_v49  ;;  %v13283_v53 = vld [vmem:[#allocation37_spill] sm:$0xff] }
 0x40a   : > { %v4058_v7 = vadd.f32 %v4057_v33, %v3969_v58 }
 0x40b   : > { %v3792_v31 = vpop.f32.mrf.mxu2 }
 0x40c   : > { %v3793_v62 = vadd.f32 %v3792_v31, %v11806_v37  ;;  %v3881_v54 = vpop.f32.mrf.mxu3  ;;  %v10375_v31 = vld [vmem:[#allocation11 + $0x7a4] sm:$0xf0]  ;;  %v6717_v5 = vmax.f32 %v4058_v7, 0.0 }
 0x40d   : > { %v3973_v11 = vpop.f32.mrf.mxu0  ;;  %v9735_v47 = vor.u32 %v10375_v31, %v9734_v21  ;;  %v13285_v31 = vld [vmem:[#allocation39_spill] sm:$0xff] }
 0x40e   : > { %v3882_v25 = vadd.f32 %v3881_v54, %v3793_v62  ;;  %v4062_v9 = vpop.f32.mrf.mxu1 }
 0x40f   : > { %4721 = vmatpush.bf16.msrb.mxu1 %v9735_v47 }
 0x410   : > { %v3971_v27 = vadd.f32 %v3970_v36, %v3882_v25  ;;  %4110 = vmatmul.bf16.gmra.mxu2 %v11442_v61  ;;  %4288 = vmatmul.bf16.gmra.mxu0 %v11638_v51 }
 0x411   : > { %4199 = vmatmul.bf16.gmra.mxu3 %v11434_v35  ;;  %4377 = vmatmul.bf16.gmra.mxu1 %v13283_v53 }
 0x412   : > { %v4060_v33 = vadd.f32 %v4059_v50, %v3971_v27 }
 0x413   : > { %v3795_v46 = vpop.f32.mrf.mxu2 }
 0x414   : > { %v3796_v20 = vadd.f32 %v3795_v46, %v11806_v37  ;;  %v3884_v62 = vpop.f32.mrf.mxu3  ;;  %v6725_v38 = vmax.f32 %v4060_v33, 0.0  ;;  %v13286_v33 = vld [vmem:[#allocation24_spill] sm:$0xff]  ;;  %v13287_v46 = vld [vmem:[#allocation38_spill] sm:$0xff] }
 0x415   : > { %v3975_v43 = vpop.f32.mrf.mxu0 }
 0x416   : > { %v3885_v25 = vadd.f32 %v3884_v62, %v3796_v20  ;;  %v4064_v36 = vpop.f32.mrf.mxu1  ;;  %v11883_v49 = vpack.c.bf16 %v6725_v38, %v6717_v5  ;;  %v8934_v5 = vld [vmem:[#allocation11 + $0x148] sm:$0xf] }
 0x417   : > { %v10239_v38 = vld [vmem:[#allocation11 + $0x364] sm:$0xf0] }
 0x418   : > { %13284 = vst [vmem:[#allocation37_spill] sm:$0xff] %v11883_v49  ;;  %v3974_v58 = vadd.f32 %v3973_v11, %v3885_v25  ;;  %v10175_v11 = vld [vmem:[#allocation11 + $0x164] sm:$0xf0] }
 0x419   : > { %v8935_v62 = vor.u32 %v10175_v11, %v8934_v5  ;;  %v9446_v11 = vld [vmem:[#allocation11 + $0x548] sm:$0xf] }
 0x41a   : > { %v4063_v54 = vadd.f32 %v4062_v9, %v3974_v58  ;;  %v9190_v9 = vld [vmem:[#allocation11 + $0x348] sm:$0xf] }
 0x41b   : > { %v3797_v18 = vpop.f32.mrf.mxu2  ;;  %4455 = vmatpush.bf16.msrb.mxu2 %v8935_v62  ;;  %v9702_v62 = vld [vmem:[#allocation11 + $0x748] sm:$0xf] }
 0x41c   : > { %v3798_v50 = vadd.f32 %v3797_v18, %v11806_v37  ;;  %v3886_v63 = vpop.f32.mrf.mxu3  ;;  %v6733_v25 = vmax.f32 %v4063_v54, 0.0  ;;  %v10303_v54 = vld [vmem:[#allocation11 + $0x564] sm:$0xf0] }
 0x41d   : > { %v3978_v10 = vpop.f32.mrf.mxu0 }
 0x41e   : > { %v3887_v27 = vadd.f32 %v3886_v63, %v3798_v50  ;;  %v4067_v21 = vpop.f32.mrf.mxu1 }
 0x420   : > { %v3976_v7 = vadd.f32 %v3975_v43, %v3887_v27  ;;  %4115 = vmatmul.bf16.gmra.mxu2 %v11454_v55  ;;  %4293 = vmatmul.bf16.gmra.mxu0 %v13285_v31  ;;  %v9191_v43 = vor.u32 %v10239_v38, %v9190_v9 }
 0x421   : > { %4204 = vmatmul.bf16.gmra.mxu3 %v13286_v33  ;;  %4382 = vmatmul.bf16.gmra.mxu1 %v13287_v46 }
 0x422   : > { %v4065_v47 = vadd.f32 %v4064_v36, %v3976_v7  ;;  %4544 = vmatpush.bf16.msrb.mxu3 %v9191_v43 }
 0x423   : > { %v3800_v20 = vpop.f32.mrf.mxu2 }
 0x424   : > { %v3801_v58 = vadd.f32 %v3800_v20, %v11806_v37  ;;  %v3889_v18 = vpop.f32.mrf.mxu3  ;;  %v6741_v50 = vmax.f32 %v4065_v47, 0.0  ;;  %v9447_v20 = vor.u32 %v10303_v54, %v9446_v11 }
 0x425   : > { %v3980_v63 = vpop.f32.mrf.mxu0 }
 0x426   : > { %v3890_v27 = vadd.f32 %v3889_v18, %v3801_v58  ;;  %v4069_v49 = vpop.f32.mrf.mxu1  ;;  %v11891_v57 = vpack.c.bf16 %v6741_v50, %v6733_v25  ;;  %4633 = vmatpush.bf16.msrb.mxu0 %v9447_v20 }
 0x428   : > { %13288 = vst [vmem:[#allocation59_spill] sm:$0xff] %v11891_v57  ;;  %v3979_v36 = vadd.f32 %v3978_v10, %v3890_v27  ;;  %v13289_v10 = vld [vmem:[#allocation40_spill] sm:$0xff] }
 0x42a   : > { %v4068_v7 = vadd.f32 %v4067_v21, %v3979_v36 }
 0x42b   : > { %v3802_v46 = vpop.f32.mrf.mxu2 }
 0x42c   : > { %v3803_v33 = vadd.f32 %v3802_v46, %v11806_v37  ;;  %v3891_v5 = vpop.f32.mrf.mxu3  ;;  %v10367_v46 = vld [vmem:[#allocation11 + $0x764] sm:$0xf0]  ;;  %v6749_v58 = vmax.f32 %v4068_v7, 0.0 }
 0x42d   : > { %v3983_v31 = vpop.f32.mrf.mxu0  ;;  %v9703_v25 = vor.u32 %v10367_v46, %v9702_v62  ;;  %v13291_v46 = vld [vmem:[#allocation27_spill] sm:$0xff] }
 0x42e   : > { %v3892_v55 = vadd.f32 %v3891_v5, %v3803_v33  ;;  %v4072_v9 = vpop.f32.mrf.mxu1 }
 0x42f   : > { %4722 = vmatpush.bf16.msrb.mxu1 %v9703_v25  ;;  %v13294_v25 = vld [vmem:[#allocation41_spill] sm:$0xff] }
 0x430   : > { %v3981_v47 = vadd.f32 %v3980_v63, %v3892_v55  ;;  %4120 = vmatmul.bf16.gmra.mxu2 %v11466_v8  ;;  %4298 = vmatmul.bf16.gmra.mxu0 %v11662_v28 }
 0x431   : > { %4209 = vmatmul.bf16.gmra.mxu3 %v11458_v48  ;;  %4387 = vmatmul.bf16.gmra.mxu1 %v13289_v10 }
 0x432   : > { %v4070_v21 = vadd.f32 %v4069_v49, %v3981_v47 }
 0x433   : > { %v3805_v38 = vpop.f32.mrf.mxu2 }
 0x434   : > { %v3806_v18 = vadd.f32 %v3805_v38, %v11806_v37  ;;  %v3894_v33 = vpop.f32.mrf.mxu3  ;;  %v6757_v43 = vmax.f32 %v4070_v21, 0.0  ;;  %v13292_v38 = vld [vmem:[#allocation42_spill] sm:$0xff] }
 0x435   : > { %v3985_v50 = vpop.f32.mrf.mxu0  ;;  %v13293_v21 = vld [vmem:[#allocation26_spill] sm:$0xff] }
 0x436   : > { %v3895_v55 = vadd.f32 %v3894_v33, %v3806_v18  ;;  %v4074_v63 = vpop.f32.mrf.mxu1  ;;  %v11899_v27 = vpack.c.bf16 %v6757_v43, %v6749_v58  ;;  %v8902_v18 = vld [vmem:[#allocation11 + $0x108] sm:$0xf] }
 0x438   : > { %13290 = vst [vmem:[#allocation60_spill] sm:$0xff] %v11899_v27  ;;  %v3984_v36 = vadd.f32 %v3983_v31, %v3895_v55  ;;  %v10167_v31 = vld [vmem:[#allocation11 + $0x124] sm:$0xf0] }
 0x439   : > { %v8903_v43 = vor.u32 %v10167_v31, %v8902_v18  ;;  %v10231_v55 = vld [vmem:[#allocation11 + $0x324] sm:$0xf0] }
 0x43a   : > { %v4073_v5 = vadd.f32 %v4072_v9, %v3984_v36  ;;  %v9158_v9 = vld [vmem:[#allocation11 + $0x308] sm:$0xf] }
 0x43b   : > { %v3807_v11 = vpop.f32.mrf.mxu2  ;;  %4456 = vmatpush.bf16.msrb.mxu2 %v8903_v43  ;;  %v9414_v31 = vld [vmem:[#allocation11 + $0x508] sm:$0xf]  ;;  %v13296_v43 = vld [vmem:[#allocation44_spill] sm:$0xff] }
 0x43c   : > { %v3808_v49 = vadd.f32 %v3807_v11, %v11806_v37  ;;  %v3896_v54 = vpop.f32.mrf.mxu3  ;;  %v6765_v36 = vmax.f32 %v4073_v5, 0.0  ;;  %v10295_v5 = vld [vmem:[#allocation11 + $0x524] sm:$0xf0] }
 0x43d   : > { %v3988_v20 = vpop.f32.mrf.mxu0 }
 0x43e   : > { %v3897_v47 = vadd.f32 %v3896_v54, %v3808_v49  ;;  %v4077_v62 = vpop.f32.mrf.mxu1 }
 0x440   : > { %v3986_v7 = vadd.f32 %v3985_v50, %v3897_v47  ;;  %4125 = vmatmul.bf16.gmra.mxu2 %v13291_v46  ;;  %4303 = vmatmul.bf16.gmra.mxu0 %v13292_v38  ;;  %v9159_v50 = vor.u32 %v10231_v55, %v9158_v9  ;;  %v13297_v55 = vld [vmem:[#allocation28_spill] sm:$0xff] }
 0x441   : > { %4214 = vmatmul.bf16.gmra.mxu3 %v13293_v21  ;;  %4392 = vmatmul.bf16.gmra.mxu1 %v13294_v25 }
 0x442   : > { %v4075_v58 = vadd.f32 %v4074_v63, %v3986_v7  ;;  %4545 = vmatpush.bf16.msrb.mxu3 %v9159_v50 }
 0x443   : > { %v3810_v33 = vpop.f32.mrf.mxu2 }
 0x444   : > { %v3811_v11 = vadd.f32 %v3810_v33, %v11806_v37  ;;  %v3899_v49 = vpop.f32.mrf.mxu3  ;;  %v6773_v54 = vmax.f32 %v4075_v58, 0.0  ;;  %v9415_v33 = vor.u32 %v10295_v5, %v9414_v31 }
 0x445   : > { %v3990_v47 = vpop.f32.mrf.mxu0 }
 0x446   : > { %v3900_v27 = vadd.f32 %v3899_v49, %v3811_v11  ;;  %v4079_v57 = vpop.f32.mrf.mxu1  ;;  %v11907_v21 = vpack.c.bf16 %v6773_v54, %v6765_v36  ;;  %4634 = vmatpush.bf16.msrb.mxu0 %v9415_v33 }
 0x448   : > { %13295 = vst [vmem:[#allocation61_spill] sm:$0xff] %v11907_v21  ;;  %v3989_v63 = vadd.f32 %v3988_v20, %v3900_v27  ;;  %v13298_v27 = vld [vmem:[#allocation43_spill] sm:$0xff] }
 0x44a   : > { %v4078_v7 = vadd.f32 %v4077_v62, %v3989_v63  ;;  %v9670_v62 = vld [vmem:[#allocation11 + $0x708] sm:$0xf] }
 0x44b   : > { %v3812_v25 = vpop.f32.mrf.mxu2 }
 0x44c   : > { %v3813_v38 = vadd.f32 %v3812_v25, %v11806_v37  ;;  %v3901_v18 = vpop.f32.mrf.mxu3  ;;  %v10359_v25 = vld [vmem:[#allocation11 + $0x724] sm:$0xf0]  ;;  %v6781_v49 = vmax.f32 %v4078_v7, 0.0 }
 0x44d   : > { %v3993_v46 = vpop.f32.mrf.mxu0  ;;  %v9671_v11 = vor.u32 %v10359_v25, %v9670_v62  ;;  %v13300_v25 = vld [vmem:[#allocation31_spill] sm:$0xff] }
 0x44e   : > { %v3902_v10 = vadd.f32 %v3901_v18, %v3813_v38  ;;  %v4082_v9 = vpop.f32.mrf.mxu1 }
 0x44f   : > { %4723 = vmatpush.bf16.msrb.mxu1 %v9671_v11  ;;  %v13303_v11 = vld [vmem:[#allocation45_spill] sm:$0xff] }
 0x450   : > { %v3991_v58 = vadd.f32 %v3990_v47, %v3902_v10  ;;  %4130 = vmatmul.bf16.gmra.mxu2 %v13268_v0  ;;  %4308 = vmatmul.bf16.gmra.mxu0 %v13296_v43 }
 0x451   : > { %4219 = vmatmul.bf16.gmra.mxu3 %v13297_v55  ;;  %4397 = vmatmul.bf16.gmra.mxu1 %v13298_v27 }
 0x452   : > { %v4080_v20 = vadd.f32 %v4079_v57, %v3991_v58 }
 0x453   : > { %v3815_v36 = vpop.f32.mrf.mxu2 }
 0x454   : > { %v3816_v50 = vadd.f32 %v3815_v36, %v11806_v37  ;;  %v3904_v38 = vpop.f32.mrf.mxu3  ;;  %v6789_v54 = vmax.f32 %v4080_v20, 0.0  ;;  %v13301_v36 = vld [vmem:[#allocation46_spill] sm:$0xff] }
 0x455   : > { %v3995_v63 = vpop.f32.mrf.mxu0  ;;  %v13302_v20 = vld [vmem:[#allocation30_spill] sm:$0xff] }
 0x456   : > { %v3905_v10 = vadd.f32 %v3904_v38, %v3816_v50  ;;  %v4084_v47 = vpop.f32.mrf.mxu1  ;;  %v11915_v18 = vpack.c.bf16 %v6789_v54, %v6781_v49  ;;  %v8870_v50 = vld [vmem:[#allocation11 + $0xc8] sm:$0xf] }
 0x458   : > { %13299 = vst [vmem:[#allocation62_spill] sm:$0xff] %v11915_v18  ;;  %v3994_v31 = vadd.f32 %v3993_v46, %v3905_v10  ;;  %v10159_v46 = vld [vmem:[#allocation11 + $0xe4] sm:$0xf0] }
 0x459   : > { %v8871_v54 = vor.u32 %v10159_v46, %v8870_v50  ;;  %v10223_v10 = vld [vmem:[#allocation11 + $0x2e4] sm:$0xf0] }
 0x45a   : > { %v4083_v5 = vadd.f32 %v4082_v9, %v3994_v31  ;;  %v9126_v9 = vld [vmem:[#allocation11 + $0x2c8] sm:$0xf] }
 0x45b   : > { %v3817_v33 = vpop.f32.mrf.mxu2  ;;  %4457 = vmatpush.bf16.msrb.mxu2 %v8871_v54  ;;  %v9382_v46 = vld [vmem:[#allocation11 + $0x4c8] sm:$0xf]  ;;  %v13305_v54 = vld [vmem:[#allocation32_spill] sm:$0xff] }
 0x45c   : > { %v3818_v57 = vadd.f32 %v3817_v33, %v11806_v37  ;;  %v3906_v58 = vpop.f32.mrf.mxu3  ;;  %v6797_v31 = vmax.f32 %v4083_v5, 0.0  ;;  %v10287_v5 = vld [vmem:[#allocation11 + $0x4e4] sm:$0xf0] }
 0x45d   : > { %v3998_v21 = vpop.f32.mrf.mxu0 }
 0x45e   : > { %v3907_v27 = vadd.f32 %v3906_v58, %v3818_v57  ;;  %v4087_v62 = vpop.f32.mrf.mxu1 }
 0x460   : > { %v3996_v7 = vadd.f32 %v3995_v63, %v3907_v27  ;;  %4135 = vmatmul.bf16.gmra.mxu2 %v13300_v25  ;;  %4313 = vmatmul.bf16.gmra.mxu0 %v13301_v36  ;;  %v9127_v27 = vor.u32 %v10223_v10, %v9126_v9 }
 0x461   : > { %4224 = vmatmul.bf16.gmra.mxu3 %v13302_v20  ;;  %4402 = vmatmul.bf16.gmra.mxu1 %v13303_v11 }
 0x462   : > { %v4085_v49 = vadd.f32 %v4084_v47, %v3996_v7  ;;  %4546 = vmatpush.bf16.msrb.mxu3 %v9127_v27 }
 0x463   : > { %v3820_v38 = vpop.f32.mrf.mxu2 }
 0x464   : > { %v3821_v33 = vadd.f32 %v3820_v38, %v11806_v37  ;;  %v3909_v57 = vpop.f32.mrf.mxu3  ;;  %v6805_v63 = vmax.f32 %v4085_v49, 0.0  ;;  %v9383_v38 = vor.u32 %v10287_v5, %v9382_v46 }
 0x465   : > { %v4000_v58 = vpop.f32.mrf.mxu0 }
 0x466   : > { %v3910_v18 = vadd.f32 %v3909_v57, %v3821_v33  ;;  %v4089_v36 = vpop.f32.mrf.mxu1  ;;  %v11923_v20 = vpack.c.bf16 %v6805_v63, %v6797_v31  ;;  %4635 = vmatpush.bf16.msrb.mxu0 %v9383_v38  ;;  %v9638_v63 = vld [vmem:[#allocation11 + $0x6c8] sm:$0xf] }
 0x468   : > { %13304 = vst [vmem:[#allocation63_spill] sm:$0xff] %v11923_v20  ;;  %v3999_v47 = vadd.f32 %v3998_v21, %v3910_v18  ;;  %v13306_v21 = vld [vmem:[#allocation47_spill] sm:$0xff] }
 0x46a   : > { %v4088_v7 = vadd.f32 %v4087_v62, %v3999_v47 }
 0x46b   : > { %v3822_v11 = vpop.f32.mrf.mxu2 }
 0x46c   : > { %v3823_v25 = vadd.f32 %v3822_v11, %v11806_v37  ;;  %v3911_v50 = vpop.f32.mrf.mxu3  ;;  %v6813_v11 = vmax.f32 %v4088_v7, 0.0 }
 0x46d   : > { %v4003_v55 = vpop.f32.mrf.mxu0 }
 0x46e   : > { %v3912_v43 = vadd.f32 %v3911_v50, %v3823_v25  ;;  %v4092_v9 = vpop.f32.mrf.mxu1 }
 0x470   : > { %v4001_v49 = vadd.f32 %v4000_v58, %v3912_v43  ;;  %4140 = vmatmul.bf16.gmra.mxu2 %v11514_v19  ;;  %4318 = vmatmul.bf16.gmra.mxu0 %v11710_v29  ;;  %v10351_v43 = vld [vmem:[#allocation11 + $0x6e4] sm:$0xf0] }
 0x471   : > { %4229 = vmatmul.bf16.gmra.mxu3 %v13305_v54  ;;  %4407 = vmatmul.bf16.gmra.mxu1 %v13306_v21  ;;  %v9639_v47 = vor.u32 %v10351_v43, %v9638_v63 }
 0x472   : > { %v4090_v18 = vadd.f32 %v4089_v36, %v4001_v49 }
 0x473   : > { %v3825_v62 = vpop.f32.mrf.mxu2  ;;  %4724 = vmatpush.bf16.msrb.mxu1 %v9639_v47  ;;  %v10215_v47 = vld [vmem:[#allocation11 + $0x2a4] sm:$0xf0] }
 0x474   : > { %v3826_v10 = vadd.f32 %v3825_v62, %v11806_v37  ;;  %v3914_v31 = vpop.f32.mrf.mxu3  ;;  %v6821_v33 = vmax.f32 %v4090_v18, 0.0  ;;  %v13308_v18 = vld [vmem:[#allocation34_spill] sm:$0xff] }
 0x475   : > { %v4005_v57 = vpop.f32.mrf.mxu0 }
 0x476   : > { %v3915_v25 = vadd.f32 %v3914_v31, %v3826_v10  ;;  %v4094_v27 = vpop.f32.mrf.mxu1  ;;  %v11931_v58 = vpack.c.bf16 %v6821_v33, %v6813_v11  ;;  %v13309_v10 = vld [vmem:[#allocation49_spill] sm:$0xff]  ;;  %v8838_v33 = vld [vmem:[#allocation11 + $0x88] sm:$0xf] }
 0x477   : > { %v13310_v31 = vld [vmem:[#allocation29_spill] sm:$0xff] }
 0x478   : > { %13307 = vst [vmem:[#allocation64_spill] sm:$0xff] %v11931_v58  ;;  %v4004_v50 = vadd.f32 %v4003_v55, %v3915_v25  ;;  %v11937_v21 = vperm.slane %v13310_v31, 1  ;;  %v13311_v11 = vld [vmem:[#allocation33_spill] sm:$0xff]  ;;  %v13312_v55 = vld [vmem:[#allocation48_spill] sm:$0xff]  ;;  %v10151_v25 = vld [vmem:[#allocation11 + $0xa4] sm:$0xf0] }
 0x479   : > { %v8839_v43 = vor.u32 %v10151_v25, %v8838_v33  ;;  %v9350_v25 = vld [vmem:[#allocation11 + $0x488] sm:$0xf] }
 0x47a   : > { %v4093_v46 = vadd.f32 %v4092_v9, %v4004_v50 }
 0x47b   : > { %v3827_v5 = vpop.f32.mrf.mxu2  ;;  %4458 = vmatpush.bf16.msrb.mxu2 %v8839_v43 }
 0x47c   : > { %v3828_v36 = vadd.f32 %v3827_v5, %v11806_v37  ;;  %v3916_v38 = vpop.f32.mrf.mxu3  ;;  %v9094_v37 = vld [vmem:[#allocation11 + $0x288] sm:$0xf]  ;;  %v6829_v50 = vmax.f32 %v4093_v46, 0.0 }
 0x47d   : > { %v4284_v7 = vpop.f32.mrf.mxu0  ;;  %v10279_v46 = vld [vmem:[#allocation11 + $0x4a4] sm:$0xf0] }
 0x47e   : > { %v3917_v49 = vadd.f32 %v3916_v38, %v3828_v36  ;;  %v4373_v62 = vpop.f32.mrf.mxu1  ;;  %v9095_v36 = vor.u32 %v10215_v47, %v9094_v37 }
 0x480   : > { %v4006_v20 = vadd.f32 %v4005_v57, %v3917_v49  ;;  %4145 = vmatmul.bf16.gmra.mxu2 %v13308_v18  ;;  %4323 = vmatmul.bf16.gmra.mxu0 %v13309_v10 }
 0x481   : > { %4234 = vmatmul.bf16.gmra.mxu3 %v13311_v11  ;;  %4412 = vmatmul.bf16.gmra.mxu1 %v13312_v55 }
 0x482   : > { %v4095_v9 = vadd.f32 %v4094_v27, %v4006_v20  ;;  %4547 = vmatpush.bf16.msrb.mxu3 %v9095_v36 }
 0x483   : > { %v4106_v63 = vpop.f32.mrf.mxu2 }
 0x484   : > { %v4107_v57 = vadd.f32 %v4106_v63, %v11937_v21  ;;  %v4195_v5 = vpop.f32.mrf.mxu3  ;;  %v6837_v38 = vmax.f32 %v4095_v9, 0.0  ;;  %v9351_v63 = vor.u32 %v10279_v46, %v9350_v25 }
 0x485   : > { %v4286_v49 = vpop.f32.mrf.mxu0 }
 0x486   : > { %v4196_v31 = vadd.f32 %v4195_v5, %v4107_v57  ;;  %v4375_v58 = vpop.f32.mrf.mxu1  ;;  %v11942_v11 = vpack.c.bf16 %v6837_v38, %v6829_v50  ;;  %4636 = vmatpush.bf16.msrb.mxu0 %v9351_v63 }
 0x488   : > { %13313 = vst [vmem:[#allocation29_spill] sm:$0xff] %v11942_v11  ;;  %v4285_v20 = vadd.f32 %v4284_v7, %v4196_v31 }
 0x48a   : > { %v4374_v27 = vadd.f32 %v4373_v62, %v4285_v20  ;;  %v9606_v62 = vld [vmem:[#allocation11 + $0x688] sm:$0xf] }
 0x48b   : > { %v4108_v55 = vpop.f32.mrf.mxu2 }
 0x48c   : > { %v4109_v10 = vadd.f32 %v4108_v55, %v11937_v21  ;;  %v4197_v33 = vpop.f32.mrf.mxu3  ;;  %v10343_v55 = vld [vmem:[#allocation11 + $0x6a4] sm:$0xf0]  ;;  %v6590_v50 = vmax.f32 %v4374_v27, 0.0 }
 0x48d   : > { %v4289_v18 = vpop.f32.mrf.mxu0  ;;  %v9607_v47 = vor.u32 %v10343_v55, %v9606_v62  ;;  %v13316_v62 = vld [vmem:[#allocation50_spill] sm:$0xff] }
 0x48e   : > { %v4198_v54 = vadd.f32 %v4197_v33, %v4109_v10  ;;  %v4378_v37 = vpop.f32.mrf.mxu1 }
 0x48f   : > { %4725 = vmatpush.bf16.msrb.mxu1 %v9607_v47 }
 0x490   : > { %v4287_v9 = vadd.f32 %v4286_v49, %v4198_v54  ;;  %4150 = vmatmul.bf16.gmra.mxu2 %v11538_v52  ;;  %4328 = vmatmul.bf16.gmra.mxu0 %v11734_v1 }
 0x491   : > { %4239 = vmatmul.bf16.gmra.mxu3 %v11530_v2  ;;  %4417 = vmatmul.bf16.gmra.mxu1 %v11726_v17 }
 0x492   : > { %v4376_v7 = vadd.f32 %v4375_v58, %v4287_v9 }
 0x493   : > { %v4111_v43 = vpop.f32.mrf.mxu2 }
 0x494   : > { %v6598_v57 = vmax.f32 %v4376_v7, 0.0  ;;  %v4112_v10 = vadd.f32 %v4111_v43, %v11937_v21  ;;  %v4200_v5 = vpop.f32.mrf.mxu3  ;;  %v13315_v7 = vld [vmem:[#allocation35_spill] sm:$0xff] }
 0x495   : > { %v4291_v36 = vpop.f32.mrf.mxu0  ;;  %v8806_v43 = vld [vmem:[#allocation11 + $0x48] sm:$0xf] }
 0x496   : > { %v11950_v54 = vpack.c.bf16 %v6598_v57, %v6590_v50  ;;  %v4201_v38 = vadd.f32 %v4200_v5, %v4112_v10  ;;  %v4380_v49 = vpop.f32.mrf.mxu1  ;;  %v10207_v57 = vld [vmem:[#allocation11 + $0x264] sm:$0xf0] }
 0x498   : > { %13314 = vst [vmem:[#allocation65_spill] sm:$0xff] %v11950_v54  ;;  %v4290_v31 = vadd.f32 %v4289_v18, %v4201_v38  ;;  %v10143_v18 = vld [vmem:[#allocation11 + $0x64] sm:$0xf0] }
 0x499   : > { %v8807_v50 = vor.u32 %v10143_v18, %v8806_v43  ;;  %v9318_v18 = vld [vmem:[#allocation11 + $0x448] sm:$0xf] }
 0x49a   : > { %v4379_v20 = vadd.f32 %v4378_v37, %v4290_v31  ;;  %v9062_v37 = vld [vmem:[#allocation11 + $0x248] sm:$0xf] }
 0x49b   : > { %v4113_v33 = vpop.f32.mrf.mxu2  ;;  %4459 = vmatpush.bf16.msrb.mxu2 %v8807_v50 }
 0x49c   : > { %v4114_v58 = vadd.f32 %v4113_v33, %v11937_v21  ;;  %v4202_v25 = vpop.f32.mrf.mxu3  ;;  %v6606_v10 = vmax.f32 %v4379_v20, 0.0  ;;  %v10271_v20 = vld [vmem:[#allocation11 + $0x464] sm:$0xf0] }
 0x49d   : > { %v4294_v46 = vpop.f32.mrf.mxu0 }
 0x49e   : > { %v4203_v63 = vadd.f32 %v4202_v25, %v4114_v58  ;;  %v4383_v9 = vpop.f32.mrf.mxu1 }
 0x4a0   : > { %v4292_v27 = vadd.f32 %v4291_v36, %v4203_v63  ;;  %4155 = vmatmul.bf16.gmra.mxu2 %v11550_v23  ;;  %4333 = vmatmul.bf16.gmra.mxu0 %v11746_v41  ;;  %v9063_v36 = vor.u32 %v10207_v57, %v9062_v37 }
 0x4a1   : > { %4244 = vmatmul.bf16.gmra.mxu3 %v13315_v7  ;;  %4422 = vmatmul.bf16.gmra.mxu1 %v13316_v62 }
 0x4a2   : > { %v4381_v55 = vadd.f32 %v4380_v49, %v4292_v27  ;;  %4548 = vmatpush.bf16.msrb.mxu3 %v9063_v36 }
 0x4a3   : > { %v4116_v47 = vpop.f32.mrf.mxu2 }
 0x4a4   : > { %v4117_v5 = vadd.f32 %v4116_v47, %v11937_v21  ;;  %v4205_v38 = vpop.f32.mrf.mxu3  ;;  %v6614_v31 = vmax.f32 %v4381_v55, 0.0  ;;  %v9319_v47 = vor.u32 %v10271_v20, %v9318_v18 }
 0x4a5   : > { %v4296_v33 = vpop.f32.mrf.mxu0 }
 0x4a6   : > { %v4206_v58 = vadd.f32 %v4205_v38, %v4117_v5  ;;  %v4385_v25 = vpop.f32.mrf.mxu1  ;;  %v11958_v63 = vpack.c.bf16 %v6614_v31, %v6606_v10  ;;  %4637 = vmatpush.bf16.msrb.mxu0 %v9319_v47 }
 0x4a8   : > { %13317 = vst [vmem:[#allocation66_spill] sm:$0xff] %v11958_v63  ;;  %v4295_v49 = vadd.f32 %v4294_v46, %v4206_v58 }
 0x4aa   : > { %v4384_v27 = vadd.f32 %v4383_v9, %v4295_v49  ;;  %v9574_v9 = vld [vmem:[#allocation11 + $0x648] sm:$0xf] }
 0x4ab   : > { %v4118_v11 = vpop.f32.mrf.mxu2 }
 0x4ac   : > { %v4119_v54 = vadd.f32 %v4118_v11, %v11937_v21  ;;  %v4207_v43 = vpop.f32.mrf.mxu3  ;;  %v10335_v11 = vld [vmem:[#allocation11 + $0x664] sm:$0xf0]  ;;  %v6622_v10 = vmax.f32 %v4384_v27, 0.0 }
 0x4ad   : > { %v4299_v62 = vpop.f32.mrf.mxu0  ;;  %v9575_v57 = vor.u32 %v10335_v11, %v9574_v9  ;;  %v8774_v9 = vld [vmem:[#allocation11 + $0x8] sm:$0xf] }
 0x4ae   : > { %v4208_v7 = vadd.f32 %v4207_v43, %v4119_v54  ;;  %v4388_v37 = vpop.f32.mrf.mxu1 }
 0x4af   : > { %4726 = vmatpush.bf16.msrb.mxu1 %v9575_v57  ;;  %v10199_v57 = vld [vmem:[#allocation11 + $0x224] sm:$0xf0] }
 0x4b0   : > { %v4297_v55 = vadd.f32 %v4296_v33, %v4208_v7  ;;  %4160 = vmatmul.bf16.gmra.mxu2 %v11562_v34  ;;  %4338 = vmatmul.bf16.gmra.mxu0 %v11758_v22 }
 0x4b1   : > { %4249 = vmatmul.bf16.gmra.mxu3 %v11554_v14  ;;  %4427 = vmatmul.bf16.gmra.mxu1 %v11750_v32 }
 0x4b2   : > { %v4386_v46 = vadd.f32 %v4385_v25, %v4297_v55 }
 0x4b3   : > { %v4121_v50 = vpop.f32.mrf.mxu2 }
 0x4b4   : > { %v4122_v5 = vadd.f32 %v4121_v50, %v11937_v21  ;;  %v4210_v54 = vpop.f32.mrf.mxu3  ;;  %v6630_v38 = vmax.f32 %v4386_v46, 0.0 }
 0x4b5   : > { %v4301_v36 = vpop.f32.mrf.mxu0 }
 0x4b6   : > { %v4211_v7 = vadd.f32 %v4210_v54, %v4122_v5  ;;  %v4390_v31 = vpop.f32.mrf.mxu1  ;;  %v11966_v33 = vpack.c.bf16 %v6630_v38, %v6622_v10 }
 0x4b8   : > { %13318 = vst [vmem:[#allocation67_spill] sm:$0xff] %v11966_v33  ;;  %v4300_v58 = vadd.f32 %v4299_v62, %v4211_v7  ;;  %v10135_v62 = vld [vmem:[#allocation11 + $0x24] sm:$0xf0] }
 0x4b9   : > { %v8775_v50 = vor.u32 %v10135_v62, %v8774_v9  ;;  %v9286_v62 = vld [vmem:[#allocation11 + $0x408] sm:$0xf] }
 0x4ba   : > { %v4389_v49 = vadd.f32 %v4388_v37, %v4300_v58  ;;  %v9030_v37 = vld [vmem:[#allocation11 + $0x208] sm:$0xf] }
 0x4bb   : > { %v4123_v43 = vpop.f32.mrf.mxu2  ;;  %v9031_v38 = vor.u32 %v10199_v57, %v9030_v37  ;;  %4460 = vmatpush.bf16.msrb.mxu2 %v8775_v50  ;;  %v10327_v50 = vld [vmem:[#allocation11 + $0x624] sm:$0xf0] }
 0x4bc   : > { %v4124_v25 = vadd.f32 %v4123_v43, %v11937_v21  ;;  %v4212_v18 = vpop.f32.mrf.mxu3  ;;  %v6638_v10 = vmax.f32 %v4389_v49, 0.0  ;;  %v10263_v49 = vld [vmem:[#allocation11 + $0x424] sm:$0xf0] }
 0x4bd   : > { %v4304_v20 = vpop.f32.mrf.mxu0  ;;  %4549 = vmatpush.bf16.msrb.mxu3 %v9031_v38 }
 0x4be   : > { %v4213_v47 = vadd.f32 %v4212_v18, %v4124_v25  ;;  %v4393_v55 = vpop.f32.mrf.mxu1 }
 0x4c0   : > { %v4302_v27 = vadd.f32 %v4301_v36, %v4213_v47  ;;  %4165 = vmatmul.bf16.gmra.mxu2 %v11574_v45  ;;  %4343 = vmatmul.bf16.gmra.mxu0 %v11770_v56 }
 0x4c1   : > { %4254 = vmatmul.bf16.gmra.mxu3 %v11566_v39  ;;  %4432 = vmatmul.bf16.gmra.mxu1 %v11762_v15 }
 0x4c2   : > { %v4391_v46 = vadd.f32 %v4390_v31, %v4302_v27 }
 0x4c3   : > { %v4126_v11 = vpop.f32.mrf.mxu2 }
 0x4c4   : > { %v4127_v5 = vadd.f32 %v4126_v11, %v11937_v21  ;;  %v4215_v54 = vpop.f32.mrf.mxu3  ;;  %v6646_v36 = vmax.f32 %v4391_v46, 0.0  ;;  %v9287_v11 = vor.u32 %v10263_v49, %v9286_v62 }
 0x4c5   : > { %v4306_v7 = vpop.f32.mrf.mxu0 }
 0x4c6   : > { %v4216_v58 = vadd.f32 %v4215_v54, %v4127_v5  ;;  %v4395_v43 = vpop.f32.mrf.mxu1  ;;  %v11974_v25 = vpack.c.bf16 %v6646_v36, %v6638_v10  ;;  %4638 = vmatpush.bf16.msrb.mxu0 %v9287_v11 }
 0x4c8   : > { %13319 = vst [vmem:[#allocation68_spill] sm:$0xff] %v11974_v25  ;;  %v4305_v31 = vadd.f32 %v4304_v20, %v4216_v58 }
 0x4ca   : > { %v4394_v18 = vadd.f32 %v4393_v55, %v4305_v31  ;;  %v9542_v55 = vld [vmem:[#allocation11 + $0x608] sm:$0xf] }
 0x4cb   : > { %v4128_v47 = vpop.f32.mrf.mxu2  ;;  %v9543_v10 = vor.u32 %v10327_v50, %v9542_v55  ;;  %v10187_v55 = vld [vmem:[#allocation11 + $0x1cc] sm:$0xf] }
 0x4cc   : > { %v4129_v27 = vadd.f32 %v4128_v47, %v11937_v21  ;;  %v4217_v9 = vpop.f32.mrf.mxu3  ;;  %v6654_v5 = vmax.f32 %v4394_v18, 0.0 }
 0x4cd   : > { %v4309_v33 = vpop.f32.mrf.mxu0  ;;  %4727 = vmatpush.bf16.msrb.mxu1 %v9543_v10  ;;  %v9256_v10 = vld [vmem:[#allocation11 + $0x3e8] sm:$0xf0] }
 0x4ce   : > { %v4218_v63 = vadd.f32 %v4217_v9, %v4129_v27  ;;  %v4398_v37 = vpop.f32.mrf.mxu1 }
 0x4d0   : > { %v4307_v46 = vadd.f32 %v4306_v7, %v4218_v63  ;;  %4170 = vmatmul.bf16.gmra.mxu2 %v11586_v42  ;;  %4348 = vmatmul.bf16.gmra.mxu0 %v11782_v30 }
 0x4d1   : > { %4259 = vmatmul.bf16.gmra.mxu3 %v11578_v44  ;;  %4437 = vmatmul.bf16.gmra.mxu1 %v11774_v6 }
 0x4d2   : > { %v4396_v20 = vadd.f32 %v4395_v43, %v4307_v46 }
 0x4d3   : > { %v4131_v57 = vpop.f32.mrf.mxu2 }
 0x4d4   : > { %v4132_v54 = vadd.f32 %v4131_v57, %v11937_v21  ;;  %v4220_v38 = vpop.f32.mrf.mxu3  ;;  %v6662_v36 = vmax.f32 %v4396_v20, 0.0 }
 0x4d5   : > { %v4311_v58 = vpop.f32.mrf.mxu0 }
 0x4d6   : > { %v4221_v63 = vadd.f32 %v4220_v38, %v4132_v54  ;;  %v4400_v7 = vpop.f32.mrf.mxu1  ;;  %v11982_v31 = vpack.c.bf16 %v6662_v36, %v6654_v5 }
 0x4d8   : > { %13320 = vst [vmem:[#allocation69_spill] sm:$0xff] %v11982_v31  ;;  %v4310_v47 = vadd.f32 %v4309_v33, %v4221_v63  ;;  %v9000_v33 = vld [vmem:[#allocation11 + $0x1e8] sm:$0xf0] }
 0x4d9   : > { %v9003_v57 = vor.u32 %v10187_v55, %v9000_v33  ;;  %v10315_v33 = vld [vmem:[#allocation11 + $0x5cc] sm:$0xf] }
 0x4da   : > { %v4399_v27 = vadd.f32 %v4398_v37, %v4310_v47  ;;  %v10251_v37 = vld [vmem:[#allocation11 + $0x3cc] sm:$0xf] }
 0x4db   : > { %v4133_v9 = vpop.f32.mrf.mxu2  ;;  %v9259_v36 = vor.u32 %v10251_v37, %v9256_v10  ;;  %4809 = vmatpush.bf16.msra.mxu2 %v9003_v57  ;;  %v9768_v57 = vld [vmem:[#allocation11 + $0x7e8] sm:$0xf0] }
 0x4dc   : > { %v4134_v43 = vadd.f32 %v4133_v9, %v11937_v21  ;;  %v4222_v62 = vpop.f32.mrf.mxu3  ;;  %v6670_v5 = vmax.f32 %v4399_v27, 0.0  ;;  %v9512_v27 = vld [vmem:[#allocation11 + $0x5e8] sm:$0xf0] }
 0x4dd   : > { %v4314_v49 = vpop.f32.mrf.mxu0  ;;  %4898 = vmatpush.bf16.msra.mxu3 %v9259_v36 }
 0x4de   : > { %v4223_v11 = vadd.f32 %v4222_v62, %v4134_v43  ;;  %v4403_v46 = vpop.f32.mrf.mxu1 }
 0x4e0   : > { %v4312_v18 = vadd.f32 %v4311_v58, %v4223_v11  ;;  %4175 = vmatmul.bf16.gmra.mxu2 %v11598_v26  ;;  %4353 = vmatmul.bf16.gmra.mxu0 %v11794_v12 }
 0x4e1   : > { %4264 = vmatmul.bf16.gmra.mxu3 %v11590_v59  ;;  %4442 = vmatmul.bf16.gmra.mxu1 %v11786_v13 }
 0x4e2   : > { %v4401_v20 = vadd.f32 %v4400_v7, %v4312_v18 }
 0x4e3   : > { %v4136_v50 = vpop.f32.mrf.mxu2 }
 0x4e4   : > { %v4137_v54 = vadd.f32 %v4136_v50, %v11937_v21  ;;  %v4225_v38 = vpop.f32.mrf.mxu3  ;;  %v6678_v58 = vmax.f32 %v4401_v20, 0.0  ;;  %v9515_v50 = vor.u32 %v10315_v33, %v9512_v27 }
 0x4e5   : > { %v4316_v63 = vpop.f32.mrf.mxu0 }
 0x4e6   : > { %v4226_v47 = vadd.f32 %v4225_v38, %v4137_v54  ;;  %v4405_v9 = vpop.f32.mrf.mxu1  ;;  %v11990_v43 = vpack.c.bf16 %v6678_v58, %v6670_v5  ;;  %4987 = vmatpush.bf16.msra.mxu0 %v9515_v50 }
 0x4e8   : > { %13321 = vst [vmem:[#allocation70_spill] sm:$0xff] %v11990_v43  ;;  %v4315_v7 = vadd.f32 %v4314_v49, %v4226_v47 }
 0x4ea   : > { %v4404_v62 = vadd.f32 %v4403_v46, %v4315_v7  ;;  %v10379_v46 = vld [vmem:[#allocation11 + $0x7cc] sm:$0xf] }
 0x4eb   : > { %v4138_v11 = vpop.f32.mrf.mxu2  ;;  %v9771_v5 = vor.u32 %v10379_v46, %v9768_v57  ;;  %v13324_v46 = vld [vmem:[#allocation36_spill] sm:$0xff] }
 0x4ec   : > { %v4139_v18 = vadd.f32 %v4138_v11, %v11937_v21  ;;  %v4227_v55 = vpop.f32.mrf.mxu3  ;;  %v6686_v54 = vmax.f32 %v4404_v62, 0.0 }
 0x4ed   : > { %v4319_v31 = vpop.f32.mrf.mxu0  ;;  %5076 = vmatpush.bf16.msra.mxu1 %v9771_v5 }
 0x4ee   : > { %v4228_v25 = vadd.f32 %v4227_v55, %v4139_v18  ;;  %v4408_v37 = vpop.f32.mrf.mxu1 }
 0x4f0   : > { %v4317_v20 = vadd.f32 %v4316_v63, %v4228_v25  ;;  %4180 = vmatmul.bf16.gmra.mxu2 %v11614_v16  ;;  %4358 = vmatmul.bf16.gmra.mxu0 %v11810_v4 }
 0x4f1   : > { %4269 = vmatmul.bf16.gmra.mxu3 %v11604_v40  ;;  %4447 = vmatmul.bf16.gmra.mxu1 %v11798_v60 }
 0x4f2   : > { %v4406_v49 = vadd.f32 %v4405_v9, %v4317_v20 }
 0x4f3   : > { %v4141_v10 = vpop.f32.mrf.mxu2 }
 0x4f4   : > { %v4142_v38 = vadd.f32 %v4141_v10, %v11937_v21  ;;  %v4230_v36 = vpop.f32.mrf.mxu3  ;;  %v6694_v58 = vmax.f32 %v4406_v49, 0.0  ;;  %v13323_v49 = vld [vmem:[#allocation23_spill] sm:$0xff] }
 0x4f5   : > { %v4321_v47 = vpop.f32.mrf.mxu0  ;;  %v10179_v10 = vld [vmem:[#allocation11 + $0x18c] sm:$0xf] }
 0x4f6   : > { %v4231_v25 = vadd.f32 %v4230_v36, %v4142_v38  ;;  %v4410_v63 = vpop.f32.mrf.mxu1  ;;  %v11998_v7 = vpack.c.bf16 %v6694_v58, %v6686_v54  ;;  %v9224_v38 = vld [vmem:[#allocation11 + $0x3a8] sm:$0xf0] }
 0x4f8   : > { %13322 = vst [vmem:[#allocation71_spill] sm:$0xff] %v11998_v7  ;;  %v4320_v11 = vadd.f32 %v4319_v31, %v4231_v25  ;;  %v8968_v31 = vld [vmem:[#allocation11 + $0x1a8] sm:$0xf0] }
 0x4f9   : > { %v8971_v54 = vor.u32 %v10179_v10, %v8968_v31  ;;  %v10307_v31 = vld [vmem:[#allocation11 + $0x58c] sm:$0xf] }
 0x4fa   : > { %v4409_v18 = vadd.f32 %v4408_v37, %v4320_v11  ;;  %v10243_v37 = vld [vmem:[#allocation11 + $0x38c] sm:$0xf] }
 0x4fb   : > { %v4143_v55 = vpop.f32.mrf.mxu2  ;;  %4810 = vmatpush.bf16.msra.mxu2 %v8971_v54 }
 0x4fc   : > { %v4144_v9 = vadd.f32 %v4143_v55, %v11937_v21  ;;  %v4232_v33 = vpop.f32.mrf.mxu3  ;;  %v6702_v36 = vmax.f32 %v4409_v18, 0.0  ;;  %v9480_v18 = vld [vmem:[#allocation11 + $0x5a8] sm:$0xf0] }
 0x4fd   : > { %v4324_v27 = vpop.f32.mrf.mxu0 }
 0x4fe   : > { %v4233_v50 = vadd.f32 %v4232_v33, %v4144_v9  ;;  %v4413_v20 = vpop.f32.mrf.mxu1 }
 0x500   : > { %v4322_v62 = vadd.f32 %v4321_v47, %v4233_v50  ;;  %4461 = vmatmul.bf16.vlgmr.msrb.gmra.mxu2 %v11430_v3  ;;  %4639 = vmatmul.bf16.vlgmr.msrb.gmra.mxu0 %v11626_v24  ;;  %v9227_v47 = vor.u32 %v10243_v37, %v9224_v38 }
 0x501   : > { %4550 = vmatmul.bf16.vlgmr.msrb.gmra.mxu3 %v13323_v49  ;;  %4728 = vmatmul.bf16.vlgmr.msrb.gmra.mxu1 %v13324_v46 }
 0x502   : > { %v4411_v57 = vadd.f32 %v4410_v63, %v4322_v62  ;;  %4899 = vmatpush.bf16.msra.mxu3 %v9227_v47 }
 0x503   : > { %v4146_v5 = vpop.f32.mrf.mxu2 }
 0x504   : > { %v4147_v58 = vadd.f32 %v4146_v5, %v11937_v21  ;;  %v4235_v25 = vpop.f32.mrf.mxu3  ;;  %v6710_v11 = vmax.f32 %v4411_v57, 0.0  ;;  %v9483_v5 = vor.u32 %v10307_v31, %v9480_v18 }
 0x505   : > { %v4326_v55 = vpop.f32.mrf.mxu0 }
 0x506   : > { %v4236_v9 = vadd.f32 %v4235_v25, %v4147_v58  ;;  %v4415_v33 = vpop.f32.mrf.mxu1  ;;  %v12006_v50 = vpack.c.bf16 %v6710_v11, %v6702_v36  ;;  %4988 = vmatpush.bf16.msra.mxu0 %v9483_v5 }
 0x508   : > { %13325 = vst [vmem:[#allocation72_spill] sm:$0xff] %v12006_v50  ;;  %v4325_v63 = vadd.f32 %v4324_v27, %v4236_v9 }
 0x50a   : > { %v4414_v62 = vadd.f32 %v4413_v20, %v4325_v63  ;;  %v10371_v20 = vld [vmem:[#allocation11 + $0x78c] sm:$0xf] }
 0x50b   : > { %v4148_v7 = vpop.f32.mrf.mxu2 }
 0x50c   : > { %v4149_v43 = vadd.f32 %v4148_v7, %v11937_v21  ;;  %v4237_v10 = vpop.f32.mrf.mxu3  ;;  %v9736_v7 = vld [vmem:[#allocation11 + $0x7a8] sm:$0xf0]  ;;  %v6718_v36 = vmax.f32 %v4414_v62, 0.0 }
 0x50d   : > { %v4329_v46 = vpop.f32.mrf.mxu0  ;;  %v9739_v38 = vor.u32 %v10371_v20, %v9736_v7  ;;  %v13327_v20 = vld [vmem:[#allocation25_spill] sm:$0xff]  ;;  %v13328_v7 = vld [vmem:[#allocation39_spill] sm:$0xff] }
 0x50e   : > { %v4238_v49 = vadd.f32 %v4237_v10, %v4149_v43  ;;  %v4418_v37 = vpop.f32.mrf.mxu1 }
 0x50f   : > { %5077 = vmatpush.bf16.msra.mxu1 %v9739_v38 }
 0x510   : > { %v4327_v57 = vadd.f32 %v4326_v55, %v4238_v49  ;;  %4466 = vmatmul.bf16.gmra.mxu2 %v11442_v61  ;;  %4644 = vmatmul.bf16.gmra.mxu0 %v11638_v51 }
 0x511   : > { %4555 = vmatmul.bf16.gmra.mxu3 %v11434_v35  ;;  %4733 = vmatmul.bf16.gmra.mxu1 %v13283_v53 }
 0x512   : > { %v4416_v27 = vadd.f32 %v4415_v33, %v4327_v57 }
 0x513   : > { %v4151_v54 = vpop.f32.mrf.mxu2 }
 0x514   : > { %v4152_v58 = vadd.f32 %v4151_v54, %v11937_v21  ;;  %v4240_v43 = vpop.f32.mrf.mxu3  ;;  %v6726_v25 = vmax.f32 %v4416_v27, 0.0  ;;  %v13329_v27 = vld [vmem:[#allocation24_spill] sm:$0xff]  ;;  %v13330_v54 = vld [vmem:[#allocation38_spill] sm:$0xff] }
 0x515   : > { %v4331_v47 = vpop.f32.mrf.mxu0 }
 0x516   : > { %v4241_v49 = vadd.f32 %v4240_v43, %v4152_v58  ;;  %v4420_v11 = vpop.f32.mrf.mxu1  ;;  %v12014_v55 = vpack.c.bf16 %v6726_v25, %v6718_v36  ;;  %v10171_v36 = vld [vmem:[#allocation11 + $0x14c] sm:$0xf] }
 0x517   : > { %v9192_v25 = vld [vmem:[#allocation11 + $0x368] sm:$0xf0] }
 0x518   : > { %13326 = vst [vmem:[#allocation73_spill] sm:$0xff] %v12014_v55  ;;  %v4330_v9 = vadd.f32 %v4329_v46, %v4241_v49  ;;  %v8936_v46 = vld [vmem:[#allocation11 + $0x168] sm:$0xf0] }
 0x519   : > { %v8939_v43 = vor.u32 %v10171_v36, %v8936_v46  ;;  %v10299_v46 = vld [vmem:[#allocation11 + $0x54c] sm:$0xf] }
 0x51a   : > { %v4419_v63 = vadd.f32 %v4418_v37, %v4330_v9  ;;  %v10235_v37 = vld [vmem:[#allocation11 + $0x34c] sm:$0xf] }
 0x51b   : > { %v4153_v10 = vpop.f32.mrf.mxu2  ;;  %4811 = vmatpush.bf16.msra.mxu2 %v8939_v43  ;;  %v10363_v43 = vld [vmem:[#allocation11 + $0x74c] sm:$0xf] }
 0x51c   : > { %v4154_v33 = vadd.f32 %v4153_v10, %v11937_v21  ;;  %v4242_v31 = vpop.f32.mrf.mxu3  ;;  %v6734_v49 = vmax.f32 %v4419_v63, 0.0  ;;  %v9448_v63 = vld [vmem:[#allocation11 + $0x568] sm:$0xf0] }
 0x51d   : > { %v4334_v18 = vpop.f32.mrf.mxu0 }
 0x51e   : > { %v4243_v5 = vadd.f32 %v4242_v31, %v4154_v33  ;;  %v4423_v57 = vpop.f32.mrf.mxu1 }
 0x520   : > { %v4332_v62 = vadd.f32 %v4331_v47, %v4243_v5  ;;  %4471 = vmatmul.bf16.gmra.mxu2 %v13327_v20  ;;  %4649 = vmatmul.bf16.gmra.mxu0 %v13328_v7  ;;  %v9195_v47 = vor.u32 %v10235_v37, %v9192_v25 }
 0x521   : > { %4560 = vmatmul.bf16.gmra.mxu3 %v13329_v27  ;;  %4738 = vmatmul.bf16.gmra.mxu1 %v13330_v54 }
 0x522   : > { %v4421_v38 = vadd.f32 %v4420_v11, %v4332_v62  ;;  %4900 = vmatpush.bf16.msra.mxu3 %v9195_v47 }
 0x523   : > { %v4156_v58 = vpop.f32.mrf.mxu2 }
 0x524   : > { %v4157_v9 = vadd.f32 %v4156_v58, %v11937_v21  ;;  %v4245_v10 = vpop.f32.mrf.mxu3  ;;  %v6742_v33 = vmax.f32 %v4421_v38, 0.0  ;;  %v9451_v58 = vor.u32 %v10299_v46, %v9448_v63 }
 0x525   : > { %v4336_v31 = vpop.f32.mrf.mxu0 }
 0x526   : > { %v4246_v5 = vadd.f32 %v4245_v10, %v4157_v9  ;;  %v4425_v55 = vpop.f32.mrf.mxu1  ;;  %v12022_v50 = vpack.c.bf16 %v6742_v33, %v6734_v49  ;;  %4989 = vmatpush.bf16.msra.mxu0 %v9451_v58 }
 0x528   : > { %13331 = vst [vmem:[#allocation74_spill] sm:$0xff] %v12022_v50  ;;  %v4335_v11 = vadd.f32 %v4334_v18, %v4246_v5  ;;  %v13332_v18 = vld [vmem:[#allocation40_spill] sm:$0xff] }
 0x52a   : > { %v4424_v62 = vadd.f32 %v4423_v57, %v4335_v11 }
 0x52b   : > { %v4158_v54 = vpop.f32.mrf.mxu2 }
 0x52c   : > { %v4159_v27 = vadd.f32 %v4158_v54, %v11937_v21  ;;  %v4247_v36 = vpop.f32.mrf.mxu3  ;;  %v9704_v54 = vld [vmem:[#allocation11 + $0x768] sm:$0xf0]  ;;  %v6750_v9 = vmax.f32 %v4424_v62, 0.0 }
 0x52d   : > { %v4339_v7 = vpop.f32.mrf.mxu0  ;;  %v9707_v49 = vor.u32 %v10363_v43, %v9704_v54  ;;  %v13334_v54 = vld [vmem:[#allocation27_spill] sm:$0xff] }
 0x52e   : > { %v4248_v20 = vadd.f32 %v4247_v36, %v4159_v27  ;;  %v4428_v37 = vpop.f32.mrf.mxu1 }
 0x52f   : > { %5078 = vmatpush.bf16.msra.mxu1 %v9707_v49  ;;  %v13337_v49 = vld [vmem:[#allocation41_spill] sm:$0xff] }
 0x530   : > { %v4337_v38 = vadd.f32 %v4336_v31, %v4248_v20  ;;  %4476 = vmatmul.bf16.gmra.mxu2 %v11466_v8  ;;  %4654 = vmatmul.bf16.gmra.mxu0 %v11662_v28 }
 0x531   : > { %4565 = vmatmul.bf16.gmra.mxu3 %v11458_v48  ;;  %4743 = vmatmul.bf16.gmra.mxu1 %v13332_v18 }
 0x532   : > { %v4426_v57 = vadd.f32 %v4425_v55, %v4337_v38 }
 0x533   : > { %v4161_v25 = vpop.f32.mrf.mxu2 }
 0x534   : > { %v4162_v10 = vadd.f32 %v4161_v25, %v11937_v21  ;;  %v4250_v27 = vpop.f32.mrf.mxu3  ;;  %v6758_v47 = vmax.f32 %v4426_v57, 0.0  ;;  %v13335_v25 = vld [vmem:[#allocation42_spill] sm:$0xff] }
 0x535   : > { %v4341_v33 = vpop.f32.mrf.mxu0  ;;  %v13336_v57 = vld [vmem:[#allocation26_spill] sm:$0xff] }
 0x536   : > { %v4251_v20 = vadd.f32 %v4250_v27, %v4162_v10  ;;  %v4430_v31 = vpop.f32.mrf.mxu1  ;;  %v12030_v5 = vpack.c.bf16 %v6758_v47, %v6750_v9  ;;  %v10163_v10 = vld [vmem:[#allocation11 + $0x10c] sm:$0xf] }
 0x538   : > { %13333 = vst [vmem:[#allocation75_spill] sm:$0xff] %v12030_v5  ;;  %v4340_v11 = vadd.f32 %v4339_v7, %v4251_v20  ;;  %v8904_v7 = vld [vmem:[#allocation11 + $0x128] sm:$0xf0] }
 0x539   : > { %v8907_v47 = vor.u32 %v10163_v10, %v8904_v7  ;;  %v9160_v20 = vld [vmem:[#allocation11 + $0x328] sm:$0xf0] }
 0x53a   : > { %v4429_v36 = vadd.f32 %v4428_v37, %v4340_v11  ;;  %v10227_v37 = vld [vmem:[#allocation11 + $0x30c] sm:$0xf] }
 0x53b   : > { %v4163_v46 = vpop.f32.mrf.mxu2  ;;  %4812 = vmatpush.bf16.msra.mxu2 %v8907_v47  ;;  %v10291_v7 = vld [vmem:[#allocation11 + $0x50c] sm:$0xf]  ;;  %v13339_v47 = vld [vmem:[#allocation44_spill] sm:$0xff] }
 0x53c   : > { %v4164_v55 = vadd.f32 %v4163_v46, %v11937_v21  ;;  %v4252_v63 = vpop.f32.mrf.mxu3  ;;  %v6766_v11 = vmax.f32 %v4429_v36, 0.0  ;;  %v9416_v36 = vld [vmem:[#allocation11 + $0x528] sm:$0xf0] }
 0x53d   : > { %v4344_v58 = vpop.f32.mrf.mxu0 }
 0x53e   : > { %v4253_v38 = vadd.f32 %v4252_v63, %v4164_v55  ;;  %v4433_v43 = vpop.f32.mrf.mxu1 }
 0x540   : > { %v4342_v62 = vadd.f32 %v4341_v33, %v4253_v38  ;;  %4481 = vmatmul.bf16.gmra.mxu2 %v13334_v54  ;;  %4659 = vmatmul.bf16.gmra.mxu0 %v13335_v25  ;;  %v9163_v33 = vor.u32 %v10227_v37, %v9160_v20  ;;  %v13340_v20 = vld [vmem:[#allocation28_spill] sm:$0xff] }
 0x541   : > { %4570 = vmatmul.bf16.gmra.mxu3 %v13336_v57  ;;  %4748 = vmatmul.bf16.gmra.mxu1 %v13337_v49 }
 0x542   : > { %v4431_v9 = vadd.f32 %v4430_v31, %v4342_v62  ;;  %4901 = vmatpush.bf16.msra.mxu3 %v9163_v33 }
 0x543   : > { %v4166_v27 = vpop.f32.mrf.mxu2 }
 0x544   : > { %v4167_v46 = vadd.f32 %v4166_v27, %v11937_v21  ;;  %v4255_v55 = vpop.f32.mrf.mxu3  ;;  %v6774_v63 = vmax.f32 %v4431_v9, 0.0  ;;  %v9419_v27 = vor.u32 %v10291_v7, %v9416_v36 }
 0x545   : > { %v4346_v38 = vpop.f32.mrf.mxu0 }
 0x546   : > { %v4256_v5 = vadd.f32 %v4255_v55, %v4167_v46  ;;  %v4435_v50 = vpop.f32.mrf.mxu1  ;;  %v12038_v57 = vpack.c.bf16 %v6774_v63, %v6766_v11  ;;  %4990 = vmatpush.bf16.msra.mxu0 %v9419_v27 }
 0x548   : > { %13338 = vst [vmem:[#allocation76_spill] sm:$0xff] %v12038_v57  ;;  %v4345_v31 = vadd.f32 %v4344_v58, %v4256_v5  ;;  %v13341_v5 = vld [vmem:[#allocation43_spill] sm:$0xff] }
 0x54a   : > { %v4434_v62 = vadd.f32 %v4433_v43, %v4345_v31  ;;  %v10355_v43 = vld [vmem:[#allocation11 + $0x70c] sm:$0xf] }
 0x54b   : > { %v4168_v49 = vpop.f32.mrf.mxu2 }
 0x54c   : > { %v4169_v25 = vadd.f32 %v4168_v49, %v11937_v21  ;;  %v4257_v10 = vpop.f32.mrf.mxu3  ;;  %v9672_v49 = vld [vmem:[#allocation11 + $0x728] sm:$0xf0]  ;;  %v6782_v55 = vmax.f32 %v4434_v62, 0.0 }
 0x54d   : > { %v4349_v54 = vpop.f32.mrf.mxu0  ;;  %v9675_v46 = vor.u32 %v10355_v43, %v9672_v49  ;;  %v13343_v49 = vld [vmem:[#allocation31_spill] sm:$0xff] }
 0x54e   : > { %v4258_v18 = vadd.f32 %v4257_v10, %v4169_v25  ;;  %v4438_v37 = vpop.f32.mrf.mxu1 }
 0x54f   : > { %5079 = vmatpush.bf16.msra.mxu1 %v9675_v46  ;;  %v13346_v46 = vld [vmem:[#allocation45_spill] sm:$0xff] }
 0x550   : > { %v4347_v9 = vadd.f32 %v4346_v38, %v4258_v18  ;;  %4486 = vmatmul.bf16.gmra.mxu2 %v13268_v0  ;;  %4664 = vmatmul.bf16.gmra.mxu0 %v13339_v47 }
 0x551   : > { %4575 = vmatmul.bf16.gmra.mxu3 %v13340_v20  ;;  %4753 = vmatmul.bf16.gmra.mxu1 %v13341_v5 }
 0x552   : > { %v4436_v58 = vadd.f32 %v4435_v50, %v4347_v9 }
 0x553   : > { %v4171_v11 = vpop.f32.mrf.mxu2 }
 0x554   : > { %v4172_v33 = vadd.f32 %v4171_v11, %v11937_v21  ;;  %v4260_v25 = vpop.f32.mrf.mxu3  ;;  %v6790_v63 = vmax.f32 %v4436_v58, 0.0  ;;  %v13344_v11 = vld [vmem:[#allocation46_spill] sm:$0xff] }
 0x555   : > { %v4351_v31 = vpop.f32.mrf.mxu0  ;;  %v13345_v58 = vld [vmem:[#allocation30_spill] sm:$0xff] }
 0x556   : > { %v4261_v18 = vadd.f32 %v4260_v25, %v4172_v33  ;;  %v4440_v38 = vpop.f32.mrf.mxu1  ;;  %v12046_v10 = vpack.c.bf16 %v6790_v63, %v6782_v55  ;;  %v10155_v33 = vld [vmem:[#allocation11 + $0xcc] sm:$0xf] }
 0x558   : > { %13342 = vst [vmem:[#allocation77_spill] sm:$0xff] %v12046_v10  ;;  %v4350_v7 = vadd.f32 %v4349_v54, %v4261_v18  ;;  %v8872_v54 = vld [vmem:[#allocation11 + $0xe8] sm:$0xf0] }
 0x559   : > { %v8875_v63 = vor.u32 %v10155_v33, %v8872_v54  ;;  %v9128_v18 = vld [vmem:[#allocation11 + $0x2e8] sm:$0xf0] }
 0x55a   : > { %v4439_v36 = vadd.f32 %v4438_v37, %v4350_v7  ;;  %v10219_v37 = vld [vmem:[#allocation11 + $0x2cc] sm:$0xf] }
 0x55b   : > { %v4173_v27 = vpop.f32.mrf.mxu2  ;;  %4813 = vmatpush.bf16.msra.mxu2 %v8875_v63  ;;  %v10283_v54 = vld [vmem:[#allocation11 + $0x4cc] sm:$0xf]  ;;  %v13348_v63 = vld [vmem:[#allocation32_spill] sm:$0xff] }
 0x55c   : > { %v4174_v50 = vadd.f32 %v4173_v27, %v11937_v21  ;;  %v4262_v9 = vpop.f32.mrf.mxu3  ;;  %v6798_v7 = vmax.f32 %v4439_v36, 0.0  ;;  %v9384_v36 = vld [vmem:[#allocation11 + $0x4e8] sm:$0xf0] }
 0x55d   : > { %v4354_v57 = vpop.f32.mrf.mxu0 }
 0x55e   : > { %v4263_v5 = vadd.f32 %v4262_v9, %v4174_v50  ;;  %v4443_v43 = vpop.f32.mrf.mxu1 }
 0x560   : > { %v4352_v62 = vadd.f32 %v4351_v31, %v4263_v5  ;;  %4491 = vmatmul.bf16.gmra.mxu2 %v13343_v49  ;;  %4669 = vmatmul.bf16.gmra.mxu0 %v13344_v11  ;;  %v9131_v5 = vor.u32 %v10219_v37, %v9128_v18 }
 0x561   : > { %4580 = vmatmul.bf16.gmra.mxu3 %v13345_v58  ;;  %4758 = vmatmul.bf16.gmra.mxu1 %v13346_v46 }
 0x562   : > { %v4441_v55 = vadd.f32 %v4440_v38, %v4352_v62  ;;  %4902 = vmatpush.bf16.msra.mxu3 %v9131_v5 }
 0x563   : > { %v4176_v25 = vpop.f32.mrf.mxu2 }
 0x564   : > { %v4177_v27 = vadd.f32 %v4176_v25, %v11937_v21  ;;  %v4265_v50 = vpop.f32.mrf.mxu3  ;;  %v6806_v31 = vmax.f32 %v4441_v55, 0.0  ;;  %v9387_v25 = vor.u32 %v10283_v54, %v9384_v36 }
 0x565   : > { %v4356_v9 = vpop.f32.mrf.mxu0 }
 0x566   : > { %v4266_v10 = vadd.f32 %v4265_v50, %v4177_v27  ;;  %v4445_v11 = vpop.f32.mrf.mxu1  ;;  %v12054_v58 = vpack.c.bf16 %v6806_v31, %v6798_v7  ;;  %4991 = vmatpush.bf16.msra.mxu0 %v9387_v25  ;;  %v10347_v31 = vld [vmem:[#allocation11 + $0x6cc] sm:$0xf] }
 0x568   : > { %13347 = vst [vmem:[#allocation78_spill] sm:$0xff] %v12054_v58  ;;  %v4355_v38 = vadd.f32 %v4354_v57, %v4266_v10  ;;  %v13349_v57 = vld [vmem:[#allocation47_spill] sm:$0xff] }
 0x56a   : > { %v4444_v62 = vadd.f32 %v4443_v43, %v4355_v38 }
 0x56b   : > { %v4178_v46 = vpop.f32.mrf.mxu2 }
 0x56c   : > { %v4179_v49 = vadd.f32 %v4178_v46, %v11937_v21  ;;  %v4267_v33 = vpop.f32.mrf.mxu3  ;;  %v6814_v46 = vmax.f32 %v4444_v62, 0.0 }
 0x56d   : > { %v4359_v20 = vpop.f32.mrf.mxu0 }
 0x56e   : > { %v4268_v47 = vadd.f32 %v4267_v33, %v4179_v49  ;;  %v4448_v37 = vpop.f32.mrf.mxu1 }
 0x570   : > { %v4357_v55 = vadd.f32 %v4356_v9, %v4268_v47  ;;  %4496 = vmatmul.bf16.gmra.mxu2 %v11514_v19  ;;  %4674 = vmatmul.bf16.gmra.mxu0 %v11710_v29  ;;  %v9640_v47 = vld [vmem:[#allocation11 + $0x6e8] sm:$0xf0] }
 0x571   : > { %4585 = vmatmul.bf16.gmra.mxu3 %v13348_v63  ;;  %4763 = vmatmul.bf16.gmra.mxu1 %v13349_v57  ;;  %v9643_v38 = vor.u32 %v10347_v31, %v9640_v47  ;;  %v10211_v31 = vld [vmem:[#allocation11 + $0x28c] sm:$0xf] }
 0x572   : > { %v4446_v10 = vadd.f32 %v4445_v11, %v4357_v55 }
 0x573   : > { %v4181_v43 = vpop.f32.mrf.mxu2  ;;  %5080 = vmatpush.bf16.msra.mxu1 %v9643_v38 }
 0x574   : > { %v4182_v18 = vadd.f32 %v4181_v43, %v11937_v21  ;;  %v4270_v7 = vpop.f32.mrf.mxu3  ;;  %v6822_v27 = vmax.f32 %v4446_v10, 0.0  ;;  %v13351_v10 = vld [vmem:[#allocation34_spill] sm:$0xff] }
 0x575   : > { %v4361_v50 = vpop.f32.mrf.mxu0 }
 0x576   : > { %v4271_v49 = vadd.f32 %v4270_v7, %v4182_v18  ;;  %v4450_v5 = vpop.f32.mrf.mxu1  ;;  %v12062_v9 = vpack.c.bf16 %v6822_v27, %v6814_v46  ;;  %v13352_v18 = vld [vmem:[#allocation49_spill] sm:$0xff]  ;;  %v12067_v7 = vld [vmem:[#allocation13] sm:$0xff] }
 0x577   : > { %13353 = vst [vmem:[#allocation80_spill] sm:$0xff] %v12067_v7  ;;  %v12070_v46 = vperm.slane %v12067_v7, 2 }
 0x578   : > { %13350 = vst [vmem:[#allocation79_spill] sm:$0xff] %v12062_v9  ;;  %v4360_v33 = vadd.f32 %v4359_v20, %v4271_v49  ;;  %v13354_v20 = vld [vmem:[#allocation33_spill] sm:$0xff]  ;;  %v8840_v49 = vld [vmem:[#allocation11 + $0xa8] sm:$0xf0] }
 0x57a   : > { %v4449_v54 = vadd.f32 %v4448_v37, %v4360_v33  ;;  %v13355_v37 = vld [vmem:[#allocation48_spill] sm:$0xff] }
 0x57b   : > { %v4183_v36 = vpop.f32.mrf.mxu2 }
 0x57c   : > { %v4184_v11 = vadd.f32 %v4183_v36, %v11937_v21  ;;  %v4272_v25 = vpop.f32.mrf.mxu3  ;;  %v10147_v21 = vld [vmem:[#allocation11 + $0x8c] sm:$0xf]  ;;  %v6830_v33 = vmax.f32 %v4449_v54, 0.0 }
 0x57d   : > { %v4640_v62 = vpop.f32.mrf.mxu0  ;;  %v8843_v38 = vor.u32 %v10147_v21, %v8840_v49  ;;  %v10275_v49 = vld [vmem:[#allocation11 + $0x48c] sm:$0xf] }
 0x57e   : > { %v4273_v55 = vadd.f32 %v4272_v25, %v4184_v11  ;;  %v4729_v43 = vpop.f32.mrf.mxu1  ;;  %v9352_v54 = vld [vmem:[#allocation11 + $0x4a8] sm:$0xf0] }
 0x57f   : > { %4814 = vmatpush.bf16.msra.mxu2 %v8843_v38 }
 0x580   : > { %v4362_v58 = vadd.f32 %v4361_v50, %v4273_v55  ;;  %4501 = vmatmul.bf16.gmra.mxu2 %v13351_v10  ;;  %4679 = vmatmul.bf16.gmra.mxu0 %v13352_v18  ;;  %v9096_v50 = vld [vmem:[#allocation11 + $0x2a8] sm:$0xf0] }
 0x581   : > { %4590 = vmatmul.bf16.gmra.mxu3 %v13354_v20  ;;  %4768 = vmatmul.bf16.gmra.mxu1 %v13355_v37  ;;  %v9099_v25 = vor.u32 %v10211_v31, %v9096_v50 }
 0x582   : > { %v4451_v27 = vadd.f32 %v4450_v5, %v4362_v58 }
 0x583   : > { %v4462_v47 = vpop.f32.mrf.mxu2  ;;  %4903 = vmatpush.bf16.msra.mxu3 %v9099_v25 }
 0x584   : > { %v4463_v36 = vadd.f32 %v4462_v47, %v12070_v46  ;;  %v4551_v11 = vpop.f32.mrf.mxu3  ;;  %v6838_v55 = vmax.f32 %v4451_v27, 0.0  ;;  %v9355_v47 = vor.u32 %v10275_v49, %v9352_v54 }
 0x585   : > { %v4642_v9 = vpop.f32.mrf.mxu0 }
 0x586   : > { %v4552_v7 = vadd.f32 %v4551_v11, %v4463_v36  ;;  %v4731_v18 = vpop.f32.mrf.mxu1  ;;  %v12075_v20 = vpack.c.bf16 %v6838_v55, %v6830_v33  ;;  %4992 = vmatpush.bf16.msra.mxu0 %v9355_v47 }
 0x588   : > { %13356 = vst [vmem:[#allocation81_spill] sm:$0xff] %v12075_v20  ;;  %v4641_v58 = vadd.f32 %v4640_v62, %v4552_v7  ;;  %v9608_v7 = vld [vmem:[#allocation11 + $0x6a8] sm:$0xf0] }
 0x58a   : > { %v4730_v5 = vadd.f32 %v4729_v43, %v4641_v58  ;;  %v10339_v43 = vld [vmem:[#allocation11 + $0x68c] sm:$0xf] }
 0x58b   : > { %v4464_v37 = vpop.f32.mrf.mxu2  ;;  %v9611_v38 = vor.u32 %v10339_v43, %v9608_v7  ;;  %v13359_v43 = vld [vmem:[#allocation50_spill] sm:$0xff] }
 0x58c   : > { %v4465_v10 = vadd.f32 %v4464_v37, %v12070_v46  ;;  %v4553_v21 = vpop.f32.mrf.mxu3  ;;  %v6591_v50 = vmax.f32 %v4730_v5, 0.0 }
 0x58d   : > { %v4645_v57 = vpop.f32.mrf.mxu0  ;;  %5081 = vmatpush.bf16.msra.mxu1 %v9611_v38 }
 0x58e   : > { %v4554_v63 = vadd.f32 %v4553_v21, %v4465_v10  ;;  %v4734_v31 = vpop.f32.mrf.mxu1 }
 0x590   : > { %v4643_v27 = vadd.f32 %v4642_v9, %v4554_v63  ;;  %4506 = vmatmul.bf16.gmra.mxu2 %v11538_v52  ;;  %4684 = vmatmul.bf16.gmra.mxu0 %v11734_v1 }
 0x591   : > { %4595 = vmatmul.bf16.gmra.mxu3 %v11530_v2  ;;  %4773 = vmatmul.bf16.gmra.mxu1 %v11726_v17 }
 0x592   : > { %v4732_v62 = vadd.f32 %v4731_v18, %v4643_v27 }
 0x593   : > { %v4467_v37 = vpop.f32.mrf.mxu2 }
 0x594   : > { %v6599_v33 = vmax.f32 %v4732_v62, 0.0  ;;  %v4468_v10 = vadd.f32 %v4467_v37, %v12070_v46  ;;  %v4556_v36 = vpop.f32.mrf.mxu3  ;;  %v13358_v62 = vld [vmem:[#allocation35_spill] sm:$0xff] }
 0x595   : > { %v4647_v11 = vpop.f32.mrf.mxu0  ;;  %v10139_v37 = vld [vmem:[#allocation11 + $0x4c] sm:$0xf] }
 0x596   : > { %v12083_v63 = vpack.c.bf16 %v6599_v33, %v6591_v50  ;;  %v4557_v9 = vadd.f32 %v4556_v36, %v4468_v10  ;;  %v4736_v25 = vpop.f32.mrf.mxu1  ;;  %v9064_v33 = vld [vmem:[#allocation11 + $0x268] sm:$0xf0] }
 0x598   : > { %13357 = vst [vmem:[#allocation82_spill] sm:$0xff] %v12083_v63  ;;  %v4646_v55 = vadd.f32 %v4645_v57, %v4557_v9  ;;  %v8808_v57 = vld [vmem:[#allocation11 + $0x68] sm:$0xf0] }
 0x599   : > { %v8811_v50 = vor.u32 %v10139_v37, %v8808_v57  ;;  %v10267_v57 = vld [vmem:[#allocation11 + $0x44c] sm:$0xf] }
 0x59a   : > { %v4735_v58 = vadd.f32 %v4734_v31, %v4646_v55  ;;  %v10203_v31 = vld [vmem:[#allocation11 + $0x24c] sm:$0xf] }
 0x59b   : > { %v4469_v21 = vpop.f32.mrf.mxu2  ;;  %4815 = vmatpush.bf16.msra.mxu2 %v8811_v50 }
 0x59c   : > { %v4470_v18 = vadd.f32 %v4469_v21, %v12070_v46  ;;  %v4558_v49 = vpop.f32.mrf.mxu3  ;;  %v6607_v10 = vmax.f32 %v4735_v58, 0.0  ;;  %v9320_v58 = vld [vmem:[#allocation11 + $0x468] sm:$0xf0] }
 0x59d   : > { %v4650_v54 = vpop.f32.mrf.mxu0 }
 0x59e   : > { %v4559_v47 = vadd.f32 %v4558_v49, %v4470_v18  ;;  %v4739_v27 = vpop.f32.mrf.mxu1 }
 0x5a0   : > { %v4648_v5 = vadd.f32 %v4647_v11, %v4559_v47  ;;  %4511 = vmatmul.bf16.gmra.mxu2 %v11550_v23  ;;  %4689 = vmatmul.bf16.gmra.mxu0 %v11746_v41  ;;  %v9067_v11 = vor.u32 %v10203_v31, %v9064_v33 }
 0x5a1   : > { %4600 = vmatmul.bf16.gmra.mxu3 %v13358_v62  ;;  %4778 = vmatmul.bf16.gmra.mxu1 %v13359_v43 }
 0x5a2   : > { %v4737_v7 = vadd.f32 %v4736_v25, %v4648_v5  ;;  %4904 = vmatpush.bf16.msra.mxu3 %v9067_v11 }
 0x5a3   : > { %v4472_v38 = vpop.f32.mrf.mxu2 }
 0x5a4   : > { %v4473_v36 = vadd.f32 %v4472_v38, %v12070_v46  ;;  %v4561_v9 = vpop.f32.mrf.mxu3  ;;  %v6615_v55 = vmax.f32 %v4737_v7, 0.0  ;;  %v9323_v38 = vor.u32 %v10267_v57, %v9320_v58 }
 0x5a5   : > { %v4652_v21 = vpop.f32.mrf.mxu0 }
 0x5a6   : > { %v4562_v18 = vadd.f32 %v4561_v9, %v4473_v36  ;;  %v4741_v49 = vpop.f32.mrf.mxu1  ;;  %v12091_v47 = vpack.c.bf16 %v6615_v55, %v6607_v10  ;;  %4993 = vmatpush.bf16.msra.mxu0 %v9323_v38 }
 0x5a8   : > { %13360 = vst [vmem:[#allocation83_spill] sm:$0xff] %v12091_v47  ;;  %v4651_v25 = vadd.f32 %v4650_v54, %v4562_v18 }
 0x5aa   : > { %v4740_v5 = vadd.f32 %v4739_v27, %v4651_v25  ;;  %v10331_v27 = vld [vmem:[#allocation11 + $0x64c] sm:$0xf] }
 0x5ab   : > { %v4474_v20 = vpop.f32.mrf.mxu2 }
 0x5ac   : > { %v4475_v63 = vadd.f32 %v4474_v20, %v12070_v46  ;;  %v4563_v37 = vpop.f32.mrf.mxu3  ;;  %v9576_v20 = vld [vmem:[#allocation11 + $0x668] sm:$0xf0]  ;;  %v6623_v10 = vmax.f32 %v4740_v5, 0.0 }
 0x5ad   : > { %v4655_v43 = vpop.f32.mrf.mxu0  ;;  %v9579_v33 = vor.u32 %v10331_v27, %v9576_v20  ;;  %v10131_v27 = vld [vmem:[#allocation11 + $0xc] sm:$0xf] }
 0x5ae   : > { %v4564_v62 = vadd.f32 %v4563_v37, %v4475_v63  ;;  %v4744_v31 = vpop.f32.mrf.mxu1 }
 0x5af   : > { %5082 = vmatpush.bf16.msra.mxu1 %v9579_v33  ;;  %v9032_v33 = vld [vmem:[#allocation11 + $0x228] sm:$0xf0] }
 0x5b0   : > { %v4653_v7 = vadd.f32 %v4652_v21, %v4564_v62  ;;  %4516 = vmatmul.bf16.gmra.mxu2 %v11562_v34  ;;  %4694 = vmatmul.bf16.gmra.mxu0 %v11758_v22 }
 0x5b1   : > { %4605 = vmatmul.bf16.gmra.mxu3 %v11554_v14  ;;  %4783 = vmatmul.bf16.gmra.mxu1 %v11750_v32 }
 0x5b2   : > { %v4742_v54 = vadd.f32 %v4741_v49, %v4653_v7 }
 0x5b3   : > { %v4477_v50 = vpop.f32.mrf.mxu2 }
 0x5b4   : > { %v4478_v36 = vadd.f32 %v4477_v50, %v12070_v46  ;;  %v4566_v63 = vpop.f32.mrf.mxu3  ;;  %v6631_v9 = vmax.f32 %v4742_v54, 0.0 }
 0x5b5   : > { %v4657_v11 = vpop.f32.mrf.mxu0 }
 0x5b6   : > { %v4567_v62 = vadd.f32 %v4566_v63, %v4478_v36  ;;  %v4746_v55 = vpop.f32.mrf.mxu1  ;;  %v12099_v21 = vpack.c.bf16 %v6631_v9, %v6623_v10 }
 0x5b8   : > { %13361 = vst [vmem:[#allocation84_spill] sm:$0xff] %v12099_v21  ;;  %v4656_v18 = vadd.f32 %v4655_v43, %v4567_v62  ;;  %v8776_v43 = vld [vmem:[#allocation11 + $0x28] sm:$0xf0] }
 0x5b9   : > { %v8779_v50 = vor.u32 %v10131_v27, %v8776_v43  ;;  %v10259_v43 = vld [vmem:[#allocation11 + $0x40c] sm:$0xf] }
 0x5ba   : > { %v4745_v25 = vadd.f32 %v4744_v31, %v4656_v18  ;;  %v10195_v31 = vld [vmem:[#allocation11 + $0x20c] sm:$0xf] }
 0x5bb   : > { %v4479_v37 = vpop.f32.mrf.mxu2  ;;  %v9035_v9 = vor.u32 %v10195_v31, %v9032_v33  ;;  %4816 = vmatpush.bf16.msra.mxu2 %v8779_v50  ;;  %v9544_v50 = vld [vmem:[#allocation11 + $0x628] sm:$0xf0] }
 0x5bc   : > { %v4480_v49 = vadd.f32 %v4479_v37, %v12070_v46  ;;  %v4568_v57 = vpop.f32.mrf.mxu3  ;;  %v6639_v10 = vmax.f32 %v4745_v25, 0.0  ;;  %v9288_v25 = vld [vmem:[#allocation11 + $0x428] sm:$0xf0] }
 0x5bd   : > { %v4660_v58 = vpop.f32.mrf.mxu0  ;;  %4905 = vmatpush.bf16.msra.mxu3 %v9035_v9 }
 0x5be   : > { %v4569_v38 = vadd.f32 %v4568_v57, %v4480_v49  ;;  %v4749_v7 = vpop.f32.mrf.mxu1 }
 0x5c0   : > { %v4658_v5 = vadd.f32 %v4657_v11, %v4569_v38  ;;  %4521 = vmatmul.bf16.gmra.mxu2 %v11574_v45  ;;  %4699 = vmatmul.bf16.gmra.mxu0 %v11770_v56 }
 0x5c1   : > { %4610 = vmatmul.bf16.gmra.mxu3 %v11566_v39  ;;  %4788 = vmatmul.bf16.gmra.mxu1 %v11762_v15 }
 0x5c2   : > { %v4747_v54 = vadd.f32 %v4746_v55, %v4658_v5 }
 0x5c3   : > { %v4482_v20 = vpop.f32.mrf.mxu2 }
 0x5c4   : > { %v4483_v36 = vadd.f32 %v4482_v20, %v12070_v46  ;;  %v4571_v63 = vpop.f32.mrf.mxu3  ;;  %v6647_v11 = vmax.f32 %v4747_v54, 0.0  ;;  %v9291_v20 = vor.u32 %v10259_v43, %v9288_v25 }
 0x5c5   : > { %v4662_v62 = vpop.f32.mrf.mxu0 }
 0x5c6   : > { %v4572_v18 = vadd.f32 %v4571_v63, %v4483_v36  ;;  %v4751_v37 = vpop.f32.mrf.mxu1  ;;  %v12107_v49 = vpack.c.bf16 %v6647_v11, %v6639_v10  ;;  %4994 = vmatpush.bf16.msra.mxu0 %v9291_v20 }
 0x5c8   : > { %13362 = vst [vmem:[#allocation85_spill] sm:$0xff] %v12107_v49  ;;  %v4661_v55 = vadd.f32 %v4660_v58, %v4572_v18 }
 0x5ca   : > { %v4750_v57 = vadd.f32 %v4749_v7, %v4661_v55  ;;  %v10323_v7 = vld [vmem:[#allocation11 + $0x60c] sm:$0xf] }
 0x5cb   : > { %v4484_v38 = vpop.f32.mrf.mxu2  ;;  %v9547_v10 = vor.u32 %v10323_v7, %v9544_v50  ;;  %v9006_v7 = vld [vmem:[#allocation11 + $0x1d0] sm:$0xf] }
 0x5cc   : > { %v4485_v5 = vadd.f32 %v4484_v38, %v12070_v46  ;;  %v4573_v27 = vpop.f32.mrf.mxu3  ;;  %v6655_v36 = vmax.f32 %v4750_v57, 0.0 }
 0x5cd   : > { %v4665_v21 = vpop.f32.mrf.mxu0  ;;  %5083 = vmatpush.bf16.msra.mxu1 %v9547_v10  ;;  %v10256_v10 = vld [vmem:[#allocation11 + $0x3ec] sm:$0xf0] }
 0x5ce   : > { %v4574_v47 = vadd.f32 %v4573_v27, %v4485_v5  ;;  %v4754_v31 = vpop.f32.mrf.mxu1 }
 0x5d0   : > { %v4663_v54 = vadd.f32 %v4662_v62, %v4574_v47  ;;  %4526 = vmatmul.bf16.gmra.mxu2 %v11586_v42  ;;  %4704 = vmatmul.bf16.gmra.mxu0 %v11782_v30 }
 0x5d1   : > { %4615 = vmatmul.bf16.gmra.mxu3 %v11578_v44  ;;  %4793 = vmatmul.bf16.gmra.mxu1 %v11774_v6 }
 0x5d2   : > { %v4752_v58 = vadd.f32 %v4751_v37, %v4663_v54 }
 0x5d3   : > { %v4487_v33 = vpop.f32.mrf.mxu2 }
 0x5d4   : > { %v4488_v63 = vadd.f32 %v4487_v33, %v12070_v46  ;;  %v4576_v9 = vpop.f32.mrf.mxu3  ;;  %v6663_v11 = vmax.f32 %v4752_v58, 0.0 }
 0x5d5   : > { %v4667_v18 = vpop.f32.mrf.mxu0 }
 0x5d6   : > { %v4577_v47 = vadd.f32 %v4576_v9, %v4488_v63  ;;  %v4756_v62 = vpop.f32.mrf.mxu1  ;;  %v12115_v55 = vpack.c.bf16 %v6663_v11, %v6655_v36 }
 0x5d8   : > { %13363 = vst [vmem:[#allocation86_spill] sm:$0xff] %v12115_v55  ;;  %v4666_v38 = vadd.f32 %v4665_v21, %v4577_v47  ;;  %v10192_v21 = vld [vmem:[#allocation11 + $0x1ec] sm:$0xf0] }
 0x5d9   : > { %v9007_v33 = vor.u32 %v10192_v21, %v9006_v7  ;;  %v9518_v21 = vld [vmem:[#allocation11 + $0x5d0] sm:$0xf] }
 0x5da   : > { %v4755_v5 = vadd.f32 %v4754_v31, %v4666_v38  ;;  %v9262_v31 = vld [vmem:[#allocation11 + $0x3d0] sm:$0xf] }
 0x5db   : > { %v4489_v27 = vpop.f32.mrf.mxu2  ;;  %v9263_v11 = vor.u32 %v10256_v10, %v9262_v31  ;;  %5165 = vmatpush.bf16.msrb.mxu2 %v9007_v33  ;;  %v10384_v33 = vld [vmem:[#allocation11 + $0x7ec] sm:$0xf0] }
 0x5dc   : > { %v4490_v37 = vadd.f32 %v4489_v27, %v12070_v46  ;;  %v4578_v43 = vpop.f32.mrf.mxu3  ;;  %v6671_v36 = vmax.f32 %v4755_v5, 0.0  ;;  %v10320_v5 = vld [vmem:[#allocation11 + $0x5ec] sm:$0xf0] }
 0x5dd   : > { %v4670_v25 = vpop.f32.mrf.mxu0  ;;  %5254 = vmatpush.bf16.msrb.mxu3 %v9263_v11 }
 0x5de   : > { %v4579_v20 = vadd.f32 %v4578_v43, %v4490_v37  ;;  %v4759_v54 = vpop.f32.mrf.mxu1 }
 0x5e0   : > { %v4668_v57 = vadd.f32 %v4667_v18, %v4579_v20  ;;  %4531 = vmatmul.bf16.gmra.mxu2 %v11598_v26  ;;  %4709 = vmatmul.bf16.gmra.mxu0 %v11794_v12 }
 0x5e1   : > { %4620 = vmatmul.bf16.gmra.mxu3 %v11590_v59  ;;  %4798 = vmatmul.bf16.gmra.mxu1 %v11786_v13 }
 0x5e2   : > { %v4757_v58 = vadd.f32 %v4756_v62, %v4668_v57 }
 0x5e3   : > { %v4492_v50 = vpop.f32.mrf.mxu2 }
 0x5e4   : > { %v4493_v63 = vadd.f32 %v4492_v50, %v12070_v46  ;;  %v4581_v9 = vpop.f32.mrf.mxu3  ;;  %v6679_v18 = vmax.f32 %v4757_v58, 0.0  ;;  %v9519_v50 = vor.u32 %v10320_v5, %v9518_v21 }
 0x5e5   : > { %v4672_v47 = vpop.f32.mrf.mxu0 }
 0x5e6   : > { %v4582_v38 = vadd.f32 %v4581_v9, %v4493_v63  ;;  %v4761_v27 = vpop.f32.mrf.mxu1  ;;  %v12123_v37 = vpack.c.bf16 %v6679_v18, %v6671_v36  ;;  %5343 = vmatpush.bf16.msrb.mxu0 %v9519_v50 }
 0x5e8   : > { %13364 = vst [vmem:[#allocation87_spill] sm:$0xff] %v12123_v37  ;;  %v4671_v62 = vadd.f32 %v4670_v25, %v4582_v38 }
 0x5ea   : > { %v4760_v43 = vadd.f32 %v4759_v54, %v4671_v62  ;;  %v9774_v54 = vld [vmem:[#allocation11 + $0x7d0] sm:$0xf] }
 0x5eb   : > { %v4494_v20 = vpop.f32.mrf.mxu2  ;;  %v9775_v36 = vor.u32 %v10384_v33, %v9774_v54  ;;  %v13367_v54 = vld [vmem:[#allocation36_spill] sm:$0xff] }
 0x5ec   : > { %v4495_v57 = vadd.f32 %v4494_v20, %v12070_v46  ;;  %v4583_v7 = vpop.f32.mrf.mxu3  ;;  %v6687_v63 = vmax.f32 %v4760_v43, 0.0 }
 0x5ed   : > { %v4675_v55 = vpop.f32.mrf.mxu0  ;;  %5432 = vmatpush.bf16.msrb.mxu1 %v9775_v36 }
 0x5ee   : > { %v4584_v49 = vadd.f32 %v4583_v7, %v4495_v57  ;;  %v4764_v31 = vpop.f32.mrf.mxu1 }
 0x5f0   : > { %v4673_v58 = vadd.f32 %v4672_v47, %v4584_v49  ;;  %4536 = vmatmul.bf16.gmra.mxu2 %v11614_v16  ;;  %4714 = vmatmul.bf16.gmra.mxu0 %v11810_v4 }
 0x5f1   : > { %4625 = vmatmul.bf16.gmra.mxu3 %v11604_v40  ;;  %4803 = vmatmul.bf16.gmra.mxu1 %v11798_v60 }
 0x5f2   : > { %v4762_v25 = vadd.f32 %v4761_v27, %v4673_v58 }
 0x5f3   : > { %v4497_v10 = vpop.f32.mrf.mxu2 }
 0x5f4   : > { %v4498_v9 = vadd.f32 %v4497_v10, %v12070_v46  ;;  %v4586_v11 = vpop.f32.mrf.mxu3  ;;  %v6695_v18 = vmax.f32 %v4762_v25, 0.0  ;;  %v13366_v25 = vld [vmem:[#allocation23_spill] sm:$0xff]  ;;  %v8974_v10 = vld [vmem:[#allocation11 + $0x190] sm:$0xf] }
 0x5f5   : > { %v4677_v38 = vpop.f32.mrf.mxu0 }
 0x5f6   : > { %v4587_v49 = vadd.f32 %v4586_v11, %v4498_v9  ;;  %v4766_v47 = vpop.f32.mrf.mxu1  ;;  %v12131_v62 = vpack.c.bf16 %v6695_v18, %v6687_v63  ;;  %v10248_v9 = vld [vmem:[#allocation11 + $0x3ac] sm:$0xf0] }
 0x5f8   : > { %13365 = vst [vmem:[#allocation88_spill] sm:$0xff] %v12131_v62  ;;  %v4676_v20 = vadd.f32 %v4675_v55, %v4587_v49  ;;  %v10184_v55 = vld [vmem:[#allocation11 + $0x1ac] sm:$0xf0] }
 0x5f9   : > { %v8975_v63 = vor.u32 %v10184_v55, %v8974_v10  ;;  %v9486_v55 = vld [vmem:[#allocation11 + $0x590] sm:$0xf] }
 0x5fa   : > { %v4765_v57 = vadd.f32 %v4764_v31, %v4676_v20  ;;  %v9230_v31 = vld [vmem:[#allocation11 + $0x390] sm:$0xf] }
 0x5fb   : > { %v4499_v7 = vpop.f32.mrf.mxu2  ;;  %5166 = vmatpush.bf16.msrb.mxu2 %v8975_v63 }
 0x5fc   : > { %v4500_v27 = vadd.f32 %v4499_v7, %v12070_v46  ;;  %v4588_v21 = vpop.f32.mrf.mxu3  ;;  %v6703_v11 = vmax.f32 %v4765_v57, 0.0  ;;  %v10312_v57 = vld [vmem:[#allocation11 + $0x5ac] sm:$0xf0] }
 0x5fd   : > { %v4680_v5 = vpop.f32.mrf.mxu0 }
 0x5fe   : > { %v4589_v50 = vadd.f32 %v4588_v21, %v4500_v27  ;;  %v4769_v58 = vpop.f32.mrf.mxu1 }
 0x600   : > { %v4678_v43 = vadd.f32 %v4677_v38, %v4589_v50  ;;  %4817 = vmatmul.bf16.vlgmr.msra.gmra.mxu2 %v11430_v3  ;;  %4995 = vmatmul.bf16.vlgmr.msra.gmra.mxu0 %v11626_v24  ;;  %v9231_v38 = vor.u32 %v10248_v9, %v9230_v31 }
 0x601   : > { %4906 = vmatmul.bf16.vlgmr.msra.gmra.mxu3 %v13366_v25  ;;  %5084 = vmatmul.bf16.vlgmr.msra.gmra.mxu1 %v13367_v54 }
 0x602   : > { %v4767_v33 = vadd.f32 %v4766_v47, %v4678_v43  ;;  %5255 = vmatpush.bf16.msrb.mxu3 %v9231_v38 }
 0x603   : > { %v4502_v36 = vpop.f32.mrf.mxu2 }
 0x604   : > { %v4503_v18 = vadd.f32 %v4502_v36, %v12070_v46  ;;  %v4591_v49 = vpop.f32.mrf.mxu3  ;;  %v6711_v20 = vmax.f32 %v4767_v33, 0.0  ;;  %v9487_v36 = vor.u32 %v10312_v57, %v9486_v55 }
 0x605   : > { %v4682_v7 = vpop.f32.mrf.mxu0 }
 0x606   : > { %v4592_v27 = vadd.f32 %v4591_v49, %v4503_v18  ;;  %v4771_v21 = vpop.f32.mrf.mxu1  ;;  %v12139_v50 = vpack.c.bf16 %v6711_v20, %v6703_v11  ;;  %5344 = vmatpush.bf16.msrb.mxu0 %v9487_v36 }
 0x608   : > { %13368 = vst [vmem:[#allocation89_spill] sm:$0xff] %v12139_v50  ;;  %v4681_v47 = vadd.f32 %v4680_v5, %v4592_v27 }
 0x60a   : > { %v4770_v43 = vadd.f32 %v4769_v58, %v4681_v47  ;;  %v9742_v58 = vld [vmem:[#allocation11 + $0x790] sm:$0xf] }
 0x60b   : > { %v4504_v62 = vpop.f32.mrf.mxu2 }
 0x60c   : > { %v4505_v37 = vadd.f32 %v4504_v62, %v12070_v46  ;;  %v4593_v10 = vpop.f32.mrf.mxu3  ;;  %v10376_v62 = vld [vmem:[#allocation11 + $0x7ac] sm:$0xf0]  ;;  %v6719_v11 = vmax.f32 %v4770_v43, 0.0 }
 0x60d   : > { %v4685_v54 = vpop.f32.mrf.mxu0  ;;  %v9743_v9 = vor.u32 %v10376_v62, %v9742_v58  ;;  %v13370_v58 = vld [vmem:[#allocation25_spill] sm:$0xff]  ;;  %v13371_v62 = vld [vmem:[#allocation39_spill] sm:$0xff] }
 0x60e   : > { %v4594_v25 = vadd.f32 %v4593_v10, %v4505_v37  ;;  %v4774_v31 = vpop.f32.mrf.mxu1 }
 0x60f   : > { %5433 = vmatpush.bf16.msrb.mxu1 %v9743_v9 }
 0x610   : > { %v4683_v33 = vadd.f32 %v4682_v7, %v4594_v25  ;;  %4822 = vmatmul.bf16.gmra.mxu2 %v11442_v61  ;;  %5000 = vmatmul.bf16.gmra.mxu0 %v11638_v51 }
 0x611   : > { %4911 = vmatmul.bf16.gmra.mxu3 %v11434_v35  ;;  %5089 = vmatmul.bf16.gmra.mxu1 %v13283_v53 }
 0x612   : > { %v4772_v5 = vadd.f32 %v4771_v21, %v4683_v33 }
 0x613   : > { %v4507_v63 = vpop.f32.mrf.mxu2 }
 0x614   : > { %v4508_v18 = vadd.f32 %v4507_v63, %v12070_v46  ;;  %v4596_v37 = vpop.f32.mrf.mxu3  ;;  %v6727_v49 = vmax.f32 %v4772_v5, 0.0  ;;  %v13372_v5 = vld [vmem:[#allocation24_spill] sm:$0xff]  ;;  %v13373_v63 = vld [vmem:[#allocation38_spill] sm:$0xff] }
 0x615   : > { %v4687_v38 = vpop.f32.mrf.mxu0 }
 0x616   : > { %v4597_v25 = vadd.f32 %v4596_v37, %v4508_v18  ;;  %v4776_v20 = vpop.f32.mrf.mxu1  ;;  %v12147_v7 = vpack.c.bf16 %v6727_v49, %v6719_v11  ;;  %v8942_v11 = vld [vmem:[#allocation11 + $0x150] sm:$0xf] }
 0x617   : > { %v10240_v49 = vld [vmem:[#allocation11 + $0x36c] sm:$0xf0] }
 0x618   : > { %13369 = vst [vmem:[#allocation90_spill] sm:$0xff] %v12147_v7  ;;  %v4686_v27 = vadd.f32 %v4685_v54, %v4597_v25  ;;  %v10176_v54 = vld [vmem:[#allocation11 + $0x16c] sm:$0xf0] }
 0x619   : > { %v8943_v37 = vor.u32 %v10176_v54, %v8942_v11  ;;  %v9454_v54 = vld [vmem:[#allocation11 + $0x550] sm:$0xf] }
 0x61a   : > { %v4775_v47 = vadd.f32 %v4774_v31, %v4686_v27  ;;  %v9198_v31 = vld [vmem:[#allocation11 + $0x350] sm:$0xf] }
 0x61b   : > { %v4509_v10 = vpop.f32.mrf.mxu2  ;;  %5167 = vmatpush.bf16.msrb.mxu2 %v8943_v37  ;;  %v9710_v37 = vld [vmem:[#allocation11 + $0x750] sm:$0xf] }
 0x61c   : > { %v4510_v21 = vadd.f32 %v4509_v10, %v12070_v46  ;;  %v4598_v55 = vpop.f32.mrf.mxu3  ;;  %v6735_v25 = vmax.f32 %v4775_v47, 0.0  ;;  %v10304_v47 = vld [vmem:[#allocation11 + $0x56c] sm:$0xf0] }
 0x61d   : > { %v4690_v57 = vpop.f32.mrf.mxu0 }
 0x61e   : > { %v4599_v36 = vadd.f32 %v4598_v55, %v4510_v21  ;;  %v4779_v33 = vpop.f32.mrf.mxu1 }
 0x620   : > { %v4688_v43 = vadd.f32 %v4687_v38, %v4599_v36  ;;  %4827 = vmatmul.bf16.gmra.mxu2 %v13370_v58  ;;  %5005 = vmatmul.bf16.gmra.mxu0 %v13371_v62  ;;  %v9199_v38 = vor.u32 %v10240_v49, %v9198_v31 }
 0x621   : > { %4916 = vmatmul.bf16.gmra.mxu3 %v13372_v5  ;;  %5094 = vmatmul.bf16.gmra.mxu1 %v13373_v63 }
 0x622   : > { %v4777_v9 = vadd.f32 %v4776_v20, %v4688_v43  ;;  %5256 = vmatpush.bf16.msrb.mxu3 %v9199_v38 }
 0x623   : > { %v4512_v18 = vpop.f32.mrf.mxu2 }
 0x624   : > { %v4513_v27 = vadd.f32 %v4512_v18, %v12070_v46  ;;  %v4601_v10 = vpop.f32.mrf.mxu3  ;;  %v6743_v21 = vmax.f32 %v4777_v9, 0.0  ;;  %v9455_v18 = vor.u32 %v10304_v47, %v9454_v54 }
 0x625   : > { %v4692_v55 = vpop.f32.mrf.mxu0 }
 0x626   : > { %v4602_v36 = vadd.f32 %v4601_v10, %v4513_v27  ;;  %v4781_v7 = vpop.f32.mrf.mxu1  ;;  %v12155_v50 = vpack.c.bf16 %v6743_v21, %v6735_v25  ;;  %5345 = vmatpush.bf16.msrb.mxu0 %v9455_v18 }
 0x628   : > { %13374 = vst [vmem:[#allocation91_spill] sm:$0xff] %v12155_v50  ;;  %v4691_v20 = vadd.f32 %v4690_v57, %v4602_v36  ;;  %v13375_v57 = vld [vmem:[#allocation40_spill] sm:$0xff] }
 0x62a   : > { %v4780_v43 = vadd.f32 %v4779_v33, %v4691_v20 }
 0x62b   : > { %v4514_v63 = vpop.f32.mrf.mxu2 }
 0x62c   : > { %v4515_v5 = vadd.f32 %v4514_v63, %v12070_v46  ;;  %v4603_v11 = vpop.f32.mrf.mxu3  ;;  %v10368_v63 = vld [vmem:[#allocation11 + $0x76c] sm:$0xf0]  ;;  %v6751_v27 = vmax.f32 %v4780_v43, 0.0 }
 0x62d   : > { %v4695_v62 = vpop.f32.mrf.mxu0  ;;  %v9711_v25 = vor.u32 %v10368_v63, %v9710_v37  ;;  %v13377_v63 = vld [vmem:[#allocation27_spill] sm:$0xff] }
 0x62e   : > { %v4604_v58 = vadd.f32 %v4603_v11, %v4515_v5  ;;  %v4784_v31 = vpop.f32.mrf.mxu1 }
 0x62f   : > { %5434 = vmatpush.bf16.msrb.mxu1 %v9711_v25  ;;  %v13380_v25 = vld [vmem:[#allocation41_spill] sm:$0xff] }
 0x630   : > { %v4693_v9 = vadd.f32 %v4692_v55, %v4604_v58  ;;  %4832 = vmatmul.bf16.gmra.mxu2 %v11466_v8  ;;  %5010 = vmatmul.bf16.gmra.mxu0 %v11662_v28 }
 0x631   : > { %4921 = vmatmul.bf16.gmra.mxu3 %v11458_v48  ;;  %5099 = vmatmul.bf16.gmra.mxu1 %v13375_v57 }
 0x632   : > { %v4782_v33 = vadd.f32 %v4781_v7, %v4693_v9 }
 0x633   : > { %v4517_v49 = vpop.f32.mrf.mxu2 }
 0x634   : > { %v4518_v10 = vadd.f32 %v4517_v49, %v12070_v46  ;;  %v4606_v5 = vpop.f32.mrf.mxu3  ;;  %v6759_v38 = vmax.f32 %v4782_v33, 0.0  ;;  %v13378_v49 = vld [vmem:[#allocation42_spill] sm:$0xff] }
 0x635   : > { %v4697_v21 = vpop.f32.mrf.mxu0  ;;  %v13379_v33 = vld [vmem:[#allocation26_spill] sm:$0xff] }
 0x636   : > { %v4607_v58 = vadd.f32 %v4606_v5, %v4518_v10  ;;  %v4786_v55 = vpop.f32.mrf.mxu1  ;;  %v12163_v36 = vpack.c.bf16 %v6759_v38, %v6751_v27  ;;  %v8910_v10 = vld [vmem:[#allocation11 + $0x110] sm:$0xf] }
 0x638   : > { %13376 = vst [vmem:[#allocation92_spill] sm:$0xff] %v12163_v36  ;;  %v4696_v20 = vadd.f32 %v4695_v62, %v4607_v58  ;;  %v10168_v62 = vld [vmem:[#allocation11 + $0x12c] sm:$0xf0] }
 0x639   : > { %v8911_v38 = vor.u32 %v10168_v62, %v8910_v10  ;;  %v10232_v58 = vld [vmem:[#allocation11 + $0x32c] sm:$0xf0] }
 0x63a   : > { %v4785_v11 = vadd.f32 %v4784_v31, %v4696_v20  ;;  %v9166_v31 = vld [vmem:[#allocation11 + $0x310] sm:$0xf] }
 0x63b   : > { %v4519_v54 = vpop.f32.mrf.mxu2  ;;  %5168 = vmatpush.bf16.msrb.mxu2 %v8911_v38  ;;  %v9422_v62 = vld [vmem:[#allocation11 + $0x510] sm:$0xf] }
 0x63c   : > { %v4520_v7 = vadd.f32 %v4519_v54, %v12070_v46  ;;  %v4608_v47 = vpop.f32.mrf.mxu3  ;;  %v6767_v20 = vmax.f32 %v4785_v11, 0.0  ;;  %v10296_v11 = vld [vmem:[#allocation11 + $0x52c] sm:$0xf0] }
 0x63d   : > { %v4700_v18 = vpop.f32.mrf.mxu0  ;;  %v13382_v38 = vld [vmem:[#allocation44_spill] sm:$0xff] }
 0x63e   : > { %v4609_v9 = vadd.f32 %v4608_v47, %v4520_v7  ;;  %v4789_v37 = vpop.f32.mrf.mxu1 }
 0x640   : > { %v4698_v43 = vadd.f32 %v4697_v21, %v4609_v9  ;;  %4837 = vmatmul.bf16.gmra.mxu2 %v13377_v63  ;;  %5015 = vmatmul.bf16.gmra.mxu0 %v13378_v49  ;;  %v9167_v21 = vor.u32 %v10232_v58, %v9166_v31  ;;  %v13383_v58 = vld [vmem:[#allocation28_spill] sm:$0xff] }
 0x641   : > { %4926 = vmatmul.bf16.gmra.mxu3 %v13379_v33  ;;  %5104 = vmatmul.bf16.gmra.mxu1 %v13380_v25 }
 0x642   : > { %v4787_v27 = vadd.f32 %v4786_v55, %v4698_v43  ;;  %5257 = vmatpush.bf16.msrb.mxu3 %v9167_v21 }
 0x643   : > { %v4522_v5 = vpop.f32.mrf.mxu2 }
 0x644   : > { %v4523_v54 = vadd.f32 %v4522_v5, %v12070_v46  ;;  %v4611_v7 = vpop.f32.mrf.mxu3  ;;  %v6775_v47 = vmax.f32 %v4787_v27, 0.0  ;;  %v9423_v5 = vor.u32 %v10296_v11, %v9422_v62 }
 0x645   : > { %v4702_v9 = vpop.f32.mrf.mxu0 }
 0x646   : > { %v4612_v36 = vadd.f32 %v4611_v7, %v4523_v54  ;;  %v4791_v50 = vpop.f32.mrf.mxu1  ;;  %v12171_v33 = vpack.c.bf16 %v6775_v47, %v6767_v20  ;;  %5346 = vmatpush.bf16.msrb.mxu0 %v9423_v5 }
 0x648   : > { %13381 = vst [vmem:[#allocation93_spill] sm:$0xff] %v12171_v33  ;;  %v4701_v55 = vadd.f32 %v4700_v18, %v4612_v36  ;;  %v13384_v36 = vld [vmem:[#allocation43_spill] sm:$0xff] }
 0x64a   : > { %v4790_v43 = vadd.f32 %v4789_v37, %v4701_v55  ;;  %v9678_v37 = vld [vmem:[#allocation11 + $0x710] sm:$0xf] }
 0x64b   : > { %v4524_v25 = vpop.f32.mrf.mxu2 }
 0x64c   : > { %v4525_v49 = vadd.f32 %v4524_v25, %v12070_v46  ;;  %v4613_v10 = vpop.f32.mrf.mxu3  ;;  %v10360_v25 = vld [vmem:[#allocation11 + $0x72c] sm:$0xf0]  ;;  %v6783_v7 = vmax.f32 %v4790_v43, 0.0 }
 0x64d   : > { %v4705_v63 = vpop.f32.mrf.mxu0  ;;  %v9679_v54 = vor.u32 %v10360_v25, %v9678_v37  ;;  %v13386_v25 = vld [vmem:[#allocation31_spill] sm:$0xff] }
 0x64e   : > { %v4614_v57 = vadd.f32 %v4613_v10, %v4525_v49  ;;  %v4794_v31 = vpop.f32.mrf.mxu1 }
 0x64f   : > { %5435 = vmatpush.bf16.msrb.mxu1 %v9679_v54  ;;  %v13389_v54 = vld [vmem:[#allocation45_spill] sm:$0xff] }
 0x650   : > { %v4703_v27 = vadd.f32 %v4702_v9, %v4614_v57  ;;  %4842 = vmatmul.bf16.gmra.mxu2 %v13268_v0  ;;  %5020 = vmatmul.bf16.gmra.mxu0 %v13382_v38 }
 0x651   : > { %4931 = vmatmul.bf16.gmra.mxu3 %v13383_v58  ;;  %5109 = vmatmul.bf16.gmra.mxu1 %v13384_v36 }
 0x652   : > { %v4792_v18 = vadd.f32 %v4791_v50, %v4703_v27 }
 0x653   : > { %v4527_v20 = vpop.f32.mrf.mxu2 }
 0x654   : > { %v4528_v21 = vadd.f32 %v4527_v20, %v12070_v46  ;;  %v4616_v49 = vpop.f32.mrf.mxu3  ;;  %v6791_v47 = vmax.f32 %v4792_v18, 0.0  ;;  %v13387_v20 = vld [vmem:[#allocation46_spill] sm:$0xff] }
 0x655   : > { %v4707_v55 = vpop.f32.mrf.mxu0  ;;  %v13388_v18 = vld [vmem:[#allocation30_spill] sm:$0xff] }
 0x656   : > { %v4617_v57 = vadd.f32 %v4616_v49, %v4528_v21  ;;  %v4796_v9 = vpop.f32.mrf.mxu1  ;;  %v12179_v10 = vpack.c.bf16 %v6791_v47, %v6783_v7  ;;  %v8878_v21 = vld [vmem:[#allocation11 + $0xd0] sm:$0xf] }
 0x658   : > { %13385 = vst [vmem:[#allocation94_spill] sm:$0xff] %v12179_v10  ;;  %v4706_v62 = vadd.f32 %v4705_v63, %v4617_v57  ;;  %v10160_v63 = vld [vmem:[#allocation11 + $0xec] sm:$0xf0] }
 0x659   : > { %v8879_v47 = vor.u32 %v10160_v63, %v8878_v21  ;;  %v10224_v57 = vld [vmem:[#allocation11 + $0x2ec] sm:$0xf0] }
 0x65a   : > { %v4795_v11 = vadd.f32 %v4794_v31, %v4706_v62  ;;  %v9134_v31 = vld [vmem:[#allocation11 + $0x2d0] sm:$0xf] }
 0x65b   : > { %v4529_v5 = vpop.f32.mrf.mxu2  ;;  %5169 = vmatpush.bf16.msrb.mxu2 %v8879_v47  ;;  %v9390_v63 = vld [vmem:[#allocation11 + $0x4d0] sm:$0xf] }
 0x65c   : > { %v4530_v50 = vadd.f32 %v4529_v5, %v12070_v46  ;;  %v4618_v27 = vpop.f32.mrf.mxu3  ;;  %v6799_v62 = vmax.f32 %v4795_v11, 0.0  ;;  %v10288_v11 = vld [vmem:[#allocation11 + $0x4ec] sm:$0xf0] }
 0x65d   : > { %v4710_v33 = vpop.f32.mrf.mxu0  ;;  %v13391_v47 = vld [vmem:[#allocation32_spill] sm:$0xff] }
 0x65e   : > { %v4619_v36 = vadd.f32 %v4618_v27, %v4530_v50  ;;  %v4799_v37 = vpop.f32.mrf.mxu1 }
 0x660   : > { %v4708_v43 = vadd.f32 %v4707_v55, %v4619_v36  ;;  %4847 = vmatmul.bf16.gmra.mxu2 %v13386_v25  ;;  %5025 = vmatmul.bf16.gmra.mxu0 %v13387_v20  ;;  %v9135_v36 = vor.u32 %v10224_v57, %v9134_v31 }
 0x661   : > { %4936 = vmatmul.bf16.gmra.mxu3 %v13388_v18  ;;  %5114 = vmatmul.bf16.gmra.mxu1 %v13389_v54 }
 0x662   : > { %v4797_v7 = vadd.f32 %v4796_v9, %v4708_v43  ;;  %5258 = vmatpush.bf16.msrb.mxu3 %v9135_v36 }
 0x663   : > { %v4532_v49 = vpop.f32.mrf.mxu2 }
 0x664   : > { %v4533_v5 = vadd.f32 %v4532_v49, %v12070_v46  ;;  %v4621_v50 = vpop.f32.mrf.mxu3  ;;  %v6807_v55 = vmax.f32 %v4797_v7, 0.0  ;;  %v9391_v49 = vor.u32 %v10288_v11, %v9390_v63 }
 0x665   : > { %v4712_v27 = vpop.f32.mrf.mxu0 }
 0x666   : > { %v4622_v10 = vadd.f32 %v4621_v50, %v4533_v5  ;;  %v4801_v20 = vpop.f32.mrf.mxu1  ;;  %v12187_v18 = vpack.c.bf16 %v6807_v55, %v6799_v62  ;;  %5347 = vmatpush.bf16.msrb.mxu0 %v9391_v49  ;;  %v9646_v55 = vld [vmem:[#allocation11 + $0x6d0] sm:$0xf] }
 0x668   : > { %13390 = vst [vmem:[#allocation95_spill] sm:$0xff] %v12187_v18  ;;  %v4711_v9 = vadd.f32 %v4710_v33, %v4622_v10  ;;  %v13392_v33 = vld [vmem:[#allocation47_spill] sm:$0xff] }
 0x66a   : > { %v4800_v43 = vadd.f32 %v4799_v37, %v4711_v9 }
 0x66b   : > { %v4534_v54 = vpop.f32.mrf.mxu2 }
 0x66c   : > { %v4535_v25 = vadd.f32 %v4534_v54, %v12070_v46  ;;  %v4623_v21 = vpop.f32.mrf.mxu3  ;;  %v6815_v54 = vmax.f32 %v4800_v43, 0.0 }
 0x66d   : > { %v4715_v58 = vpop.f32.mrf.mxu0 }
 0x66e   : > { %v4624_v38 = vadd.f32 %v4623_v21, %v4535_v25  ;;  %v4804_v31 = vpop.f32.mrf.mxu1 }
 0x670   : > { %v4713_v7 = vadd.f32 %v4712_v27, %v4624_v38  ;;  %4852 = vmatmul.bf16.gmra.mxu2 %v11514_v19  ;;  %5030 = vmatmul.bf16.gmra.mxu0 %v11710_v29  ;;  %v10352_v38 = vld [vmem:[#allocation11 + $0x6ec] sm:$0xf0] }
 0x671   : > { %4941 = vmatmul.bf16.gmra.mxu3 %v13391_v47  ;;  %5119 = vmatmul.bf16.gmra.mxu1 %v13392_v33  ;;  %v9647_v9 = vor.u32 %v10352_v38, %v9646_v55 }
 0x672   : > { %v4802_v10 = vadd.f32 %v4801_v20, %v4713_v7 }
 0x673   : > { %v4537_v37 = vpop.f32.mrf.mxu2  ;;  %5436 = vmatpush.bf16.msrb.mxu1 %v9647_v9  ;;  %v10216_v9 = vld [vmem:[#allocation11 + $0x2ac] sm:$0xf0] }
 0x674   : > { %v4538_v57 = vadd.f32 %v4537_v37, %v12070_v46  ;;  %v4626_v62 = vpop.f32.mrf.mxu3  ;;  %v6823_v5 = vmax.f32 %v4802_v10, 0.0  ;;  %v13394_v10 = vld [vmem:[#allocation34_spill] sm:$0xff] }
 0x675   : > { %v4717_v50 = vpop.f32.mrf.mxu0 }
 0x676   : > { %v4627_v25 = vadd.f32 %v4626_v62, %v4538_v57  ;;  %v4806_v36 = vpop.f32.mrf.mxu1  ;;  %v12195_v27 = vpack.c.bf16 %v6823_v5, %v6815_v54  ;;  %v13395_v57 = vld [vmem:[#allocation49_spill] sm:$0xff]  ;;  %v13396_v62 = vld [vmem:[#allocation80_spill] sm:$0xff] }
 0x677   : > { %v12201_v33 = vperm.slane %v13396_v62, 3  ;;  %v13397_v54 = vld [vmem:[#allocation33_spill] sm:$0xff]  ;;  %v8846_v5 = vld [vmem:[#allocation11 + $0x90] sm:$0xf] }
 0x678   : > { %13393 = vst [vmem:[#allocation96_spill] sm:$0xff] %v12195_v27  ;;  %v4716_v21 = vadd.f32 %v4715_v58, %v4627_v25  ;;  %v13398_v58 = vld [vmem:[#allocation48_spill] sm:$0xff] }
 0x679   : > { %v10152_v25 = vld [vmem:[#allocation11 + $0xac] sm:$0xf0] }
 0x67a   : > { %v4805_v63 = vadd.f32 %v4804_v31, %v4716_v21  ;;  %v8847_v38 = vor.u32 %v10152_v25, %v8846_v5  ;;  %v9358_v25 = vld [vmem:[#allocation11 + $0x490] sm:$0xf] }
 0x67b   : > { %v4539_v11 = vpop.f32.mrf.mxu2 }
 0x67c   : > { %v4540_v20 = vadd.f32 %v4539_v11, %v12070_v46  ;;  %v4628_v49 = vpop.f32.mrf.mxu3  ;;  %v9102_v46 = vld [vmem:[#allocation11 + $0x290] sm:$0xf]  ;;  %v6831_v21 = vmax.f32 %v4805_v63, 0.0  ;;  %5170 = vmatpush.bf16.msrb.mxu2 %v8847_v38 }
 0x67d   : > { %v4996_v43 = vpop.f32.mrf.mxu0  ;;  %v10280_v63 = vld [vmem:[#allocation11 + $0x4ac] sm:$0xf0] }
 0x67e   : > { %v4629_v7 = vadd.f32 %v4628_v49, %v4540_v20  ;;  %v5085_v37 = vpop.f32.mrf.mxu1  ;;  %v9103_v20 = vor.u32 %v10216_v9, %v9102_v46 }
 0x680   : > { %v4718_v18 = vadd.f32 %v4717_v50, %v4629_v7  ;;  %4857 = vmatmul.bf16.gmra.mxu2 %v13394_v10  ;;  %5035 = vmatmul.bf16.gmra.mxu0 %v13395_v57 }
 0x681   : > { %4946 = vmatmul.bf16.gmra.mxu3 %v13397_v54  ;;  %5124 = vmatmul.bf16.gmra.mxu1 %v13398_v58 }
 0x682   : > { %v4807_v31 = vadd.f32 %v4806_v36, %v4718_v18  ;;  %5259 = vmatpush.bf16.msrb.mxu3 %v9103_v20 }
 0x683   : > { %v4818_v55 = vpop.f32.mrf.mxu2 }
 0x684   : > { %v4819_v50 = vadd.f32 %v4818_v55, %v12201_v33  ;;  %v4907_v11 = vpop.f32.mrf.mxu3  ;;  %v6839_v49 = vmax.f32 %v4807_v31, 0.0  ;;  %v9359_v55 = vor.u32 %v10280_v63, %v9358_v25 }
 0x685   : > { %v4998_v7 = vpop.f32.mrf.mxu0 }
 0x686   : > { %v4908_v62 = vadd.f32 %v4907_v11, %v4819_v50  ;;  %v5087_v27 = vpop.f32.mrf.mxu1  ;;  %v12206_v54 = vpack.c.bf16 %v6839_v49, %v6831_v21  ;;  %5348 = vmatpush.bf16.msrb.mxu0 %v9359_v55 }
 0x688   : > { %13399 = vst [vmem:[#allocation80_spill] sm:$0xff] %v12206_v54  ;;  %v4997_v18 = vadd.f32 %v4996_v43, %v4908_v62 }
 0x68a   : > { %v5086_v36 = vadd.f32 %v5085_v37, %v4997_v18  ;;  %v9614_v37 = vld [vmem:[#allocation11 + $0x690] sm:$0xf] }
 0x68b   : > { %v4820_v58 = vpop.f32.mrf.mxu2 }
 0x68c   : > { %v4821_v57 = vadd.f32 %v4820_v58, %v12201_v33  ;;  %v4909_v5 = vpop.f32.mrf.mxu3  ;;  %v10344_v58 = vld [vmem:[#allocation11 + $0x6ac] sm:$0xf0]  ;;  %v6592_v21 = vmax.f32 %v5086_v36, 0.0 }
 0x68d   : > { %v5001_v10 = vpop.f32.mrf.mxu0  ;;  %v9615_v9 = vor.u32 %v10344_v58, %v9614_v37  ;;  %v13402_v37 = vld [vmem:[#allocation50_spill] sm:$0xff] }
 0x68e   : > { %v4910_v47 = vadd.f32 %v4909_v5, %v4821_v57  ;;  %v5090_v46 = vpop.f32.mrf.mxu1 }
 0x68f   : > { %5437 = vmatpush.bf16.msrb.mxu1 %v9615_v9 }
 0x690   : > { %v4999_v31 = vadd.f32 %v4998_v7, %v4910_v47  ;;  %4862 = vmatmul.bf16.gmra.mxu2 %v11538_v52  ;;  %5040 = vmatmul.bf16.gmra.mxu0 %v11734_v1 }
 0x691   : > { %4951 = vmatmul.bf16.gmra.mxu3 %v11530_v2  ;;  %5129 = vmatmul.bf16.gmra.mxu1 %v11726_v17 }
 0x692   : > { %v5088_v43 = vadd.f32 %v5087_v27, %v4999_v31 }
 0x693   : > { %v4823_v38 = vpop.f32.mrf.mxu2 }
 0x694   : > { %v6600_v50 = vmax.f32 %v5088_v43, 0.0  ;;  %v4824_v57 = vadd.f32 %v4823_v38, %v12201_v33  ;;  %v4912_v11 = vpop.f32.mrf.mxu3  ;;  %v13401_v43 = vld [vmem:[#allocation35_spill] sm:$0xff]  ;;  %v8814_v38 = vld [vmem:[#allocation11 + $0x50] sm:$0xf] }
 0x695   : > { %v5003_v20 = vpop.f32.mrf.mxu0 }
 0x696   : > { %v12214_v47 = vpack.c.bf16 %v6600_v50, %v6592_v21  ;;  %v4913_v49 = vadd.f32 %v4912_v11, %v4824_v57  ;;  %v5092_v7 = vpop.f32.mrf.mxu1  ;;  %v10208_v50 = vld [vmem:[#allocation11 + $0x26c] sm:$0xf0] }
 0x698   : > { %13400 = vst [vmem:[#allocation97_spill] sm:$0xff] %v12214_v47  ;;  %v5002_v62 = vadd.f32 %v5001_v10, %v4913_v49  ;;  %v10144_v10 = vld [vmem:[#allocation11 + $0x6c] sm:$0xf0] }
 0x699   : > { %v8815_v21 = vor.u32 %v10144_v10, %v8814_v38  ;;  %v9326_v10 = vld [vmem:[#allocation11 + $0x450] sm:$0xf] }
 0x69a   : > { %v5091_v18 = vadd.f32 %v5090_v46, %v5002_v62  ;;  %v9070_v46 = vld [vmem:[#allocation11 + $0x250] sm:$0xf] }
 0x69b   : > { %v4825_v5 = vpop.f32.mrf.mxu2  ;;  %5171 = vmatpush.bf16.msrb.mxu2 %v8815_v21 }
 0x69c   : > { %v4826_v27 = vadd.f32 %v4825_v5, %v12201_v33  ;;  %v4914_v25 = vpop.f32.mrf.mxu3  ;;  %v6608_v57 = vmax.f32 %v5091_v18, 0.0  ;;  %v10272_v18 = vld [vmem:[#allocation11 + $0x46c] sm:$0xf0] }
 0x69d   : > { %v5006_v63 = vpop.f32.mrf.mxu0 }
 0x69e   : > { %v4915_v55 = vadd.f32 %v4914_v25, %v4826_v27  ;;  %v5095_v31 = vpop.f32.mrf.mxu1 }
 0x6a0   : > { %v5004_v36 = vadd.f32 %v5003_v20, %v4915_v55  ;;  %4867 = vmatmul.bf16.gmra.mxu2 %v11550_v23  ;;  %5045 = vmatmul.bf16.gmra.mxu0 %v11746_v41  ;;  %v9071_v20 = vor.u32 %v10208_v50, %v9070_v46 }
 0x6a1   : > { %4956 = vmatmul.bf16.gmra.mxu3 %v13401_v43  ;;  %5134 = vmatmul.bf16.gmra.mxu1 %v13402_v37 }
 0x6a2   : > { %v5093_v58 = vadd.f32 %v5092_v7, %v5004_v36  ;;  %5260 = vmatpush.bf16.msrb.mxu3 %v9071_v20 }
 0x6a3   : > { %v4828_v9 = vpop.f32.mrf.mxu2 }
 0x6a4   : > { %v4829_v11 = vadd.f32 %v4828_v9, %v12201_v33  ;;  %v4917_v49 = vpop.f32.mrf.mxu3  ;;  %v6616_v62 = vmax.f32 %v5093_v58, 0.0  ;;  %v9327_v9 = vor.u32 %v10272_v18, %v9326_v10 }
 0x6a5   : > { %v5008_v5 = vpop.f32.mrf.mxu0 }
 0x6a6   : > { %v4918_v27 = vadd.f32 %v4917_v49, %v4829_v11  ;;  %v5097_v25 = vpop.f32.mrf.mxu1  ;;  %v12222_v55 = vpack.c.bf16 %v6616_v62, %v6608_v57  ;;  %5349 = vmatpush.bf16.msrb.mxu0 %v9327_v9 }
 0x6a8   : > { %13403 = vst [vmem:[#allocation98_spill] sm:$0xff] %v12222_v55  ;;  %v5007_v7 = vadd.f32 %v5006_v63, %v4918_v27 }
 0x6aa   : > { %v5096_v36 = vadd.f32 %v5095_v31, %v5007_v7  ;;  %v9582_v31 = vld [vmem:[#allocation11 + $0x650] sm:$0xf] }
 0x6ab   : > { %v4830_v54 = vpop.f32.mrf.mxu2 }
 0x6ac   : > { %v4831_v47 = vadd.f32 %v4830_v54, %v12201_v33  ;;  %v4919_v38 = vpop.f32.mrf.mxu3  ;;  %v10336_v54 = vld [vmem:[#allocation11 + $0x66c] sm:$0xf0]  ;;  %v6624_v57 = vmax.f32 %v5096_v36, 0.0 }
 0x6ad   : > { %v5011_v37 = vpop.f32.mrf.mxu0  ;;  %v9583_v50 = vor.u32 %v10336_v54, %v9582_v31  ;;  %v8782_v31 = vld [vmem:[#allocation11 + $0x10] sm:$0xf] }
 0x6ae   : > { %v4920_v43 = vadd.f32 %v4919_v38, %v4831_v47  ;;  %v5100_v46 = vpop.f32.mrf.mxu1 }
 0x6af   : > { %5438 = vmatpush.bf16.msrb.mxu1 %v9583_v50  ;;  %v10200_v50 = vld [vmem:[#allocation11 + $0x22c] sm:$0xf0] }
 0x6b0   : > { %v5009_v58 = vadd.f32 %v5008_v5, %v4920_v43  ;;  %4872 = vmatmul.bf16.gmra.mxu2 %v11562_v34  ;;  %5050 = vmatmul.bf16.gmra.mxu0 %v11758_v22 }
 0x6b1   : > { %4961 = vmatmul.bf16.gmra.mxu3 %v11554_v14  ;;  %5139 = vmatmul.bf16.gmra.mxu1 %v11750_v32 }
 0x6b2   : > { %v5098_v63 = vadd.f32 %v5097_v25, %v5009_v58 }
 0x6b3   : > { %v4833_v21 = vpop.f32.mrf.mxu2 }
 0x6b4   : > { %v4834_v11 = vadd.f32 %v4833_v21, %v12201_v33  ;;  %v4922_v47 = vpop.f32.mrf.mxu3  ;;  %v6632_v49 = vmax.f32 %v5098_v63, 0.0 }
 0x6b5   : > { %v5013_v20 = vpop.f32.mrf.mxu0 }
 0x6b6   : > { %v4923_v43 = vadd.f32 %v4922_v47, %v4834_v11  ;;  %v5102_v62 = vpop.f32.mrf.mxu1  ;;  %v12230_v5 = vpack.c.bf16 %v6632_v49, %v6624_v57 }
 0x6b8   : > { %13404 = vst [vmem:[#allocation99_spill] sm:$0xff] %v12230_v5  ;;  %v5012_v27 = vadd.f32 %v5011_v37, %v4923_v43  ;;  %v10136_v37 = vld [vmem:[#allocation11 + $0x2c] sm:$0xf0] }
 0x6b9   : > { %v8783_v21 = vor.u32 %v10136_v37, %v8782_v31  ;;  %v9294_v37 = vld [vmem:[#allocation11 + $0x410] sm:$0xf] }
 0x6ba   : > { %v5101_v7 = vadd.f32 %v5100_v46, %v5012_v27  ;;  %v9038_v46 = vld [vmem:[#allocation11 + $0x210] sm:$0xf] }
 0x6bb   : > { %v4835_v38 = vpop.f32.mrf.mxu2  ;;  %v9039_v49 = vor.u32 %v10200_v50, %v9038_v46  ;;  %5172 = vmatpush.bf16.msrb.mxu2 %v8783_v21  ;;  %v10328_v21 = vld [vmem:[#allocation11 + $0x62c] sm:$0xf0] }
 0x6bc   : > { %v4836_v25 = vadd.f32 %v4835_v38, %v12201_v33  ;;  %v4924_v10 = vpop.f32.mrf.mxu3  ;;  %v6640_v57 = vmax.f32 %v5101_v7, 0.0  ;;  %v10264_v7 = vld [vmem:[#allocation11 + $0x42c] sm:$0xf0] }
 0x6bd   : > { %v5016_v18 = vpop.f32.mrf.mxu0  ;;  %5261 = vmatpush.bf16.msrb.mxu3 %v9039_v49 }
 0x6be   : > { %v4925_v9 = vadd.f32 %v4924_v10, %v4836_v25  ;;  %v5105_v58 = vpop.f32.mrf.mxu1 }
 0x6c0   : > { %v5014_v36 = vadd.f32 %v5013_v20, %v4925_v9  ;;  %4877 = vmatmul.bf16.gmra.mxu2 %v11574_v45  ;;  %5055 = vmatmul.bf16.gmra.mxu0 %v11770_v56 }
 0x6c1   : > { %4966 = vmatmul.bf16.gmra.mxu3 %v11566_v39  ;;  %5144 = vmatmul.bf16.gmra.mxu1 %v11762_v15 }
 0x6c2   : > { %v5103_v63 = vadd.f32 %v5102_v62, %v5014_v36 }
 0x6c3   : > { %v4838_v54 = vpop.f32.mrf.mxu2 }
 0x6c4   : > { %v4839_v11 = vadd.f32 %v4838_v54, %v12201_v33  ;;  %v4927_v47 = vpop.f32.mrf.mxu3  ;;  %v6648_v20 = vmax.f32 %v5103_v63, 0.0  ;;  %v9295_v54 = vor.u32 %v10264_v7, %v9294_v37 }
 0x6c5   : > { %v5018_v43 = vpop.f32.mrf.mxu0 }
 0x6c6   : > { %v4928_v27 = vadd.f32 %v4927_v47, %v4839_v11  ;;  %v5107_v38 = vpop.f32.mrf.mxu1  ;;  %v12238_v25 = vpack.c.bf16 %v6648_v20, %v6640_v57  ;;  %5350 = vmatpush.bf16.msrb.mxu0 %v9295_v54 }
 0x6c8   : > { %13405 = vst [vmem:[#allocation100_spill] sm:$0xff] %v12238_v25  ;;  %v5017_v62 = vadd.f32 %v5016_v18, %v4928_v27 }
 0x6ca   : > { %v5106_v10 = vadd.f32 %v5105_v58, %v5017_v62  ;;  %v9550_v58 = vld [vmem:[#allocation11 + $0x610] sm:$0xf] }
 0x6cb   : > { %v4840_v9 = vpop.f32.mrf.mxu2  ;;  %v9551_v57 = vor.u32 %v10328_v21, %v9550_v58  ;;  %v10188_v58 = vld [vmem:[#allocation11 + $0x1d4] sm:$0xf] }
 0x6cc   : > { %v4841_v36 = vadd.f32 %v4840_v9, %v12201_v33  ;;  %v4929_v31 = vpop.f32.mrf.mxu3  ;;  %v6656_v11 = vmax.f32 %v5106_v10, 0.0 }
 0x6cd   : > { %v5021_v5 = vpop.f32.mrf.mxu0  ;;  %5439 = vmatpush.bf16.msrb.mxu1 %v9551_v57  ;;  %v9264_v57 = vld [vmem:[#allocation11 + $0x3f0] sm:$0xf0] }
 0x6ce   : > { %v4930_v55 = vadd.f32 %v4929_v31, %v4841_v36  ;;  %v5110_v46 = vpop.f32.mrf.mxu1 }
 0x6d0   : > { %v5019_v63 = vadd.f32 %v5018_v43, %v4930_v55  ;;  %4882 = vmatmul.bf16.gmra.mxu2 %v11586_v42  ;;  %5060 = vmatmul.bf16.gmra.mxu0 %v11782_v30 }
 0x6d1   : > { %4971 = vmatmul.bf16.gmra.mxu3 %v11578_v44  ;;  %5149 = vmatmul.bf16.gmra.mxu1 %v11774_v6 }
 0x6d2   : > { %v5108_v18 = vadd.f32 %v5107_v38, %v5019_v63 }
 0x6d3   : > { %v4843_v50 = vpop.f32.mrf.mxu2 }
 0x6d4   : > { %v4844_v47 = vadd.f32 %v4843_v50, %v12201_v33  ;;  %v4932_v49 = vpop.f32.mrf.mxu3  ;;  %v6664_v20 = vmax.f32 %v5108_v18, 0.0 }
 0x6d5   : > { %v5023_v27 = vpop.f32.mrf.mxu0 }
 0x6d6   : > { %v4933_v55 = vadd.f32 %v4932_v49, %v4844_v47  ;;  %v5112_v43 = vpop.f32.mrf.mxu1  ;;  %v12246_v62 = vpack.c.bf16 %v6664_v20, %v6656_v11 }
 0x6d8   : > { %13406 = vst [vmem:[#allocation101_spill] sm:$0xff] %v12246_v62  ;;  %v5022_v9 = vadd.f32 %v5021_v5, %v4933_v55  ;;  %v9008_v5 = vld [vmem:[#allocation11 + $0x1f0] sm:$0xf0] }
 0x6d9   : > { %v9011_v50 = vor.u32 %v10188_v58, %v9008_v5  ;;  %v10316_v5 = vld [vmem:[#allocation11 + $0x5d4] sm:$0xf] }
 0x6da   : > { %v5111_v36 = vadd.f32 %v5110_v46, %v5022_v9  ;;  %v10252_v46 = vld [vmem:[#allocation11 + $0x3d4] sm:$0xf] }
 0x6db   : > { %v4845_v31 = vpop.f32.mrf.mxu2  ;;  %v9267_v20 = vor.u32 %v10252_v46, %v9264_v57  ;;  %5521 = vmatpush.bf16.msra.mxu2 %v9011_v50  ;;  %v9776_v50 = vld [vmem:[#allocation11 + $0x7f0] sm:$0xf0] }
 0x6dc   : > { %v4846_v38 = vadd.f32 %v4845_v31, %v12201_v33  ;;  %v4934_v37 = vpop.f32.mrf.mxu3  ;;  %v6672_v11 = vmax.f32 %v5111_v36, 0.0  ;;  %v9520_v36 = vld [vmem:[#allocation11 + $0x5f0] sm:$0xf0] }
 0x6dd   : > { %v5026_v7 = vpop.f32.mrf.mxu0  ;;  %5610 = vmatpush.bf16.msra.mxu3 %v9267_v20 }
 0x6de   : > { %v4935_v54 = vadd.f32 %v4934_v37, %v4846_v38  ;;  %v5115_v63 = vpop.f32.mrf.mxu1 }
 0x6e0   : > { %v5024_v10 = vadd.f32 %v5023_v27, %v4935_v54  ;;  %4887 = vmatmul.bf16.gmra.mxu2 %v11598_v26  ;;  %5065 = vmatmul.bf16.gmra.mxu0 %v11794_v12 }
 0x6e1   : > { %4976 = vmatmul.bf16.gmra.mxu3 %v11590_v59  ;;  %5154 = vmatmul.bf16.gmra.mxu1 %v11786_v13 }
 0x6e2   : > { %v5113_v18 = vadd.f32 %v5112_v43, %v5024_v10 }
 0x6e3   : > { %v4848_v21 = vpop.f32.mrf.mxu2 }
 0x6e4   : > { %v4849_v47 = vadd.f32 %v4848_v21, %v12201_v33  ;;  %v4937_v49 = vpop.f32.mrf.mxu3  ;;  %v6680_v27 = vmax.f32 %v5113_v18, 0.0  ;;  %v9523_v21 = vor.u32 %v10316_v5, %v9520_v36 }
 0x6e5   : > { %v5028_v55 = vpop.f32.mrf.mxu0 }
 0x6e6   : > { %v4938_v9 = vadd.f32 %v4937_v49, %v4849_v47  ;;  %v5117_v31 = vpop.f32.mrf.mxu1  ;;  %v12254_v38 = vpack.c.bf16 %v6680_v27, %v6672_v11  ;;  %5699 = vmatpush.bf16.msra.mxu0 %v9523_v21 }
 0x6e8   : > { %13407 = vst [vmem:[#allocation102_spill] sm:$0xff] %v12254_v38  ;;  %v5027_v43 = vadd.f32 %v5026_v7, %v4938_v9 }
 0x6ea   : > { %v5116_v37 = vadd.f32 %v5115_v63, %v5027_v43  ;;  %v10380_v63 = vld [vmem:[#allocation11 + $0x7d4] sm:$0xf] }
 0x6eb   : > { %v4850_v54 = vpop.f32.mrf.mxu2  ;;  %v9779_v11 = vor.u32 %v10380_v63, %v9776_v50  ;;  %v13410_v63 = vld [vmem:[#allocation36_spill] sm:$0xff] }
 0x6ec   : > { %v4851_v10 = vadd.f32 %v4850_v54, %v12201_v33  ;;  %v4939_v58 = vpop.f32.mrf.mxu3  ;;  %v6688_v47 = vmax.f32 %v5116_v37, 0.0 }
 0x6ed   : > { %v5031_v62 = vpop.f32.mrf.mxu0  ;;  %5788 = vmatpush.bf16.msra.mxu1 %v9779_v11 }
 0x6ee   : > { %v4940_v25 = vadd.f32 %v4939_v58, %v4851_v10  ;;  %v5120_v46 = vpop.f32.mrf.mxu1 }
 0x6f0   : > { %v5029_v18 = vadd.f32 %v5028_v55, %v4940_v25  ;;  %4892 = vmatmul.bf16.gmra.mxu2 %v11614_v16  ;;  %5070 = vmatmul.bf16.gmra.mxu0 %v11810_v4 }
 0x6f1   : > { %4981 = vmatmul.bf16.gmra.mxu3 %v11604_v40  ;;  %5159 = vmatmul.bf16.gmra.mxu1 %v11798_v60 }
 0x6f2   : > { %v5118_v7 = vadd.f32 %v5117_v31, %v5029_v18 }
 0x6f3   : > { %v4853_v57 = vpop.f32.mrf.mxu2 }
 0x6f4   : > { %v4854_v49 = vadd.f32 %v4853_v57, %v12201_v33  ;;  %v4942_v20 = vpop.f32.mrf.mxu3  ;;  %v6696_v27 = vmax.f32 %v5118_v7, 0.0  ;;  %v13409_v7 = vld [vmem:[#allocation23_spill] sm:$0xff]  ;;  %v10180_v57 = vld [vmem:[#allocation11 + $0x194] sm:$0xf] }
 0x6f5   : > { %v5033_v9 = vpop.f32.mrf.mxu0 }
 0x6f6   : > { %v4943_v25 = vadd.f32 %v4942_v20, %v4854_v49  ;;  %v5122_v55 = vpop.f32.mrf.mxu1  ;;  %v12262_v43 = vpack.c.bf16 %v6696_v27, %v6688_v47  ;;  %v9232_v49 = vld [vmem:[#allocation11 + $0x3b0] sm:$0xf0] }
 0x6f8   : > { %13408 = vst [vmem:[#allocation103_spill] sm:$0xff] %v12262_v43  ;;  %v5032_v54 = vadd.f32 %v5031_v62, %v4943_v25  ;;  %v8976_v62 = vld [vmem:[#allocation11 + $0x1b0] sm:$0xf0] }
 0x6f9   : > { %v8979_v47 = vor.u32 %v10180_v57, %v8976_v62  ;;  %v10308_v62 = vld [vmem:[#allocation11 + $0x594] sm:$0xf] }
 0x6fa   : > { %v5121_v10 = vadd.f32 %v5120_v46, %v5032_v54  ;;  %v10244_v46 = vld [vmem:[#allocation11 + $0x394] sm:$0xf] }
 0x6fb   : > { %v4855_v58 = vpop.f32.mrf.mxu2  ;;  %5522 = vmatpush.bf16.msra.mxu2 %v8979_v47 }
 0x6fc   : > { %v4856_v31 = vadd.f32 %v4855_v58, %v12201_v33  ;;  %v4944_v5 = vpop.f32.mrf.mxu3  ;;  %v6704_v20 = vmax.f32 %v5121_v10, 0.0  ;;  %v9488_v10 = vld [vmem:[#allocation11 + $0x5b0] sm:$0xf0] }
 0x6fd   : > { %v5036_v36 = vpop.f32.mrf.mxu0 }
 0x6fe   : > { %v4945_v21 = vadd.f32 %v4944_v5, %v4856_v31  ;;  %v5125_v18 = vpop.f32.mrf.mxu1 }
 0x700   : > { %v5034_v37 = vadd.f32 %v5033_v9, %v4945_v21  ;;  %5173 = vmatmul.bf16.vlgmr.msrb.gmra.mxu2 %v11430_v3  ;;  %5351 = vmatmul.bf16.vlgmr.msrb.gmra.mxu0 %v11626_v24  ;;  %v9235_v9 = vor.u32 %v10244_v46, %v9232_v49 }
 0x701   : > { %5262 = vmatmul.bf16.vlgmr.msrb.gmra.mxu3 %v13409_v7  ;;  %5440 = vmatmul.bf16.vlgmr.msrb.gmra.mxu1 %v13410_v63 }
 0x702   : > { %v5123_v50 = vadd.f32 %v5122_v55, %v5034_v37  ;;  %5611 = vmatpush.bf16.msra.mxu3 %v9235_v9 }
 0x703   : > { %v4858_v11 = vpop.f32.mrf.mxu2 }
 0x704   : > { %v4859_v27 = vadd.f32 %v4858_v11, %v12201_v33  ;;  %v4947_v25 = vpop.f32.mrf.mxu3  ;;  %v6712_v54 = vmax.f32 %v5123_v50, 0.0  ;;  %v9491_v11 = vor.u32 %v10308_v62, %v9488_v10 }
 0x705   : > { %v5038_v58 = vpop.f32.mrf.mxu0 }
 0x706   : > { %v4948_v31 = vadd.f32 %v4947_v25, %v4859_v27  ;;  %v5127_v5 = vpop.f32.mrf.mxu1  ;;  %v12270_v21 = vpack.c.bf16 %v6712_v54, %v6704_v20  ;;  %5700 = vmatpush.bf16.msra.mxu0 %v9491_v11 }
 0x708   : > { %13411 = vst [vmem:[#allocation104_spill] sm:$0xff] %v12270_v21  ;;  %v5037_v55 = vadd.f32 %v5036_v36, %v4948_v31 }
 0x70a   : > { %v5126_v37 = vadd.f32 %v5125_v18, %v5037_v55  ;;  %v10372_v18 = vld [vmem:[#allocation11 + $0x794] sm:$0xf] }
 0x70b   : > { %v4860_v43 = vpop.f32.mrf.mxu2 }
 0x70c   : > { %v4861_v38 = vadd.f32 %v4860_v43, %v12201_v33  ;;  %v4949_v57 = vpop.f32.mrf.mxu3  ;;  %v9744_v43 = vld [vmem:[#allocation11 + $0x7b0] sm:$0xf0]  ;;  %v6720_v20 = vmax.f32 %v5126_v37, 0.0 }
 0x70d   : > { %v5041_v63 = vpop.f32.mrf.mxu0  ;;  %v9747_v49 = vor.u32 %v10372_v18, %v9744_v43  ;;  %v13413_v18 = vld [vmem:[#allocation25_spill] sm:$0xff]  ;;  %v13414_v43 = vld [vmem:[#allocation39_spill] sm:$0xff] }
 0x70e   : > { %v4950_v7 = vadd.f32 %v4949_v57, %v4861_v38  ;;  %v5130_v46 = vpop.f32.mrf.mxu1 }
 0x70f   : > { %5789 = vmatpush.bf16.msra.mxu1 %v9747_v49 }
 0x710   : > { %v5039_v50 = vadd.f32 %v5038_v58, %v4950_v7  ;;  %5178 = vmatmul.bf16.gmra.mxu2 %v11442_v61  ;;  %5356 = vmatmul.bf16.gmra.mxu0 %v11638_v51 }
 0x711   : > { %5267 = vmatmul.bf16.gmra.mxu3 %v11434_v35  ;;  %5445 = vmatmul.bf16.gmra.mxu1 %v13283_v53 }
 0x712   : > { %v5128_v36 = vadd.f32 %v5127_v5, %v5039_v50 }
 0x713   : > { %v4863_v47 = vpop.f32.mrf.mxu2 }
 0x714   : > { %v4864_v27 = vadd.f32 %v4863_v47, %v12201_v33  ;;  %v4952_v38 = vpop.f32.mrf.mxu3  ;;  %v6728_v25 = vmax.f32 %v5128_v36, 0.0  ;;  %v13415_v36 = vld [vmem:[#allocation24_spill] sm:$0xff]  ;;  %v13416_v47 = vld [vmem:[#allocation38_spill] sm:$0xff] }
 0x715   : > { %v5043_v9 = vpop.f32.mrf.mxu0 }
 0x716   : > { %v4953_v7 = vadd.f32 %v4952_v38, %v4864_v27  ;;  %v5132_v54 = vpop.f32.mrf.mxu1  ;;  %v12278_v58 = vpack.c.bf16 %v6728_v25, %v6720_v20  ;;  %v10172_v20 = vld [vmem:[#allocation11 + $0x154] sm:$0xf] }
 0x717   : > { %v9200_v25 = vld [vmem:[#allocation11 + $0x370] sm:$0xf0] }
 0x718   : > { %13412 = vst [vmem:[#allocation105_spill] sm:$0xff] %v12278_v58  ;;  %v5042_v31 = vadd.f32 %v5041_v63, %v4953_v7  ;;  %v8944_v63 = vld [vmem:[#allocation11 + $0x170] sm:$0xf0] }
 0x719   : > { %v8947_v38 = vor.u32 %v10172_v20, %v8944_v63  ;;  %v10300_v63 = vld [vmem:[#allocation11 + $0x554] sm:$0xf] }
 0x71a   : > { %v5131_v55 = vadd.f32 %v5130_v46, %v5042_v31  ;;  %v10236_v46 = vld [vmem:[#allocation11 + $0x354] sm:$0xf] }
 0x71b   : > { %v4865_v57 = vpop.f32.mrf.mxu2  ;;  %5523 = vmatpush.bf16.msra.mxu2 %v8947_v38  ;;  %v10364_v38 = vld [vmem:[#allocation11 + $0x754] sm:$0xf] }
 0x71c   : > { %v4866_v5 = vadd.f32 %v4865_v57, %v12201_v33  ;;  %v4954_v62 = vpop.f32.mrf.mxu3  ;;  %v6736_v7 = vmax.f32 %v5131_v55, 0.0  ;;  %v9456_v55 = vld [vmem:[#allocation11 + $0x570] sm:$0xf0] }
 0x71d   : > { %v5046_v10 = vpop.f32.mrf.mxu0 }
 0x71e   : > { %v4955_v11 = vadd.f32 %v4954_v62, %v4866_v5  ;;  %v5135_v50 = vpop.f32.mrf.mxu1 }
 0x720   : > { %v5044_v37 = vadd.f32 %v5043_v9, %v4955_v11  ;;  %5183 = vmatmul.bf16.gmra.mxu2 %v13413_v18  ;;  %5361 = vmatmul.bf16.gmra.mxu0 %v13414_v43  ;;  %v9203_v9 = vor.u32 %v10236_v46, %v9200_v25 }
 0x721   : > { %5272 = vmatmul.bf16.gmra.mxu3 %v13415_v36  ;;  %5450 = vmatmul.bf16.gmra.mxu1 %v13416_v47 }
 0x722   : > { %v5133_v49 = vadd.f32 %v5132_v54, %v5044_v37  ;;  %5612 = vmatpush.bf16.msra.mxu3 %v9203_v9 }
 0x723   : > { %v4868_v27 = vpop.f32.mrf.mxu2 }
 0x724   : > { %v4869_v31 = vadd.f32 %v4868_v27, %v12201_v33  ;;  %v4957_v57 = vpop.f32.mrf.mxu3  ;;  %v6744_v5 = vmax.f32 %v5133_v49, 0.0  ;;  %v9459_v27 = vor.u32 %v10300_v63, %v9456_v55 }
 0x725   : > { %v5048_v62 = vpop.f32.mrf.mxu0 }
 0x726   : > { %v4958_v11 = vadd.f32 %v4957_v57, %v4869_v31  ;;  %v5137_v58 = vpop.f32.mrf.mxu1  ;;  %v12286_v21 = vpack.c.bf16 %v6744_v5, %v6736_v7  ;;  %5701 = vmatpush.bf16.msra.mxu0 %v9459_v27 }
 0x728   : > { %13417 = vst [vmem:[#allocation106_spill] sm:$0xff] %v12286_v21  ;;  %v5047_v54 = vadd.f32 %v5046_v10, %v4958_v11  ;;  %v13418_v10 = vld [vmem:[#allocation40_spill] sm:$0xff] }
 0x72a   : > { %v5136_v37 = vadd.f32 %v5135_v50, %v5047_v54 }
 0x72b   : > { %v4870_v47 = vpop.f32.mrf.mxu2 }
 0x72c   : > { %v4871_v36 = vadd.f32 %v4870_v47, %v12201_v33  ;;  %v4959_v20 = vpop.f32.mrf.mxu3  ;;  %v9712_v47 = vld [vmem:[#allocation11 + $0x770] sm:$0xf0]  ;;  %v6752_v31 = vmax.f32 %v5136_v37, 0.0 }
 0x72d   : > { %v5051_v43 = vpop.f32.mrf.mxu0  ;;  %v9715_v7 = vor.u32 %v10364_v38, %v9712_v47  ;;  %v13420_v47 = vld [vmem:[#allocation27_spill] sm:$0xff] }
 0x72e   : > { %v4960_v18 = vadd.f32 %v4959_v20, %v4871_v36  ;;  %v5140_v46 = vpop.f32.mrf.mxu1 }
 0x72f   : > { %5790 = vmatpush.bf16.msra.mxu1 %v9715_v7  ;;  %v13423_v7 = vld [vmem:[#allocation41_spill] sm:$0xff] }
 0x730   : > { %v5049_v49 = vadd.f32 %v5048_v62, %v4960_v18  ;;  %5188 = vmatmul.bf16.gmra.mxu2 %v11466_v8  ;;  %5366 = vmatmul.bf16.gmra.mxu0 %v11662_v28 }
 0x731   : > { %5277 = vmatmul.bf16.gmra.mxu3 %v11458_v48  ;;  %5455 = vmatmul.bf16.gmra.mxu1 %v13418_v10 }
 0x732   : > { %v5138_v50 = vadd.f32 %v5137_v58, %v5049_v49 }
 0x733   : > { %v4873_v25 = vpop.f32.mrf.mxu2 }
 0x734   : > { %v4874_v57 = vadd.f32 %v4873_v25, %v12201_v33  ;;  %v4962_v36 = vpop.f32.mrf.mxu3  ;;  %v6760_v9 = vmax.f32 %v5138_v50, 0.0  ;;  %v13421_v25 = vld [vmem:[#allocation42_spill] sm:$0xff] }
 0x735   : > { %v5053_v5 = vpop.f32.mrf.mxu0  ;;  %v13422_v50 = vld [vmem:[#allocation26_spill] sm:$0xff] }
 0x736   : > { %v4963_v18 = vadd.f32 %v4962_v36, %v4874_v57  ;;  %v5142_v62 = vpop.f32.mrf.mxu1  ;;  %v12294_v11 = vpack.c.bf16 %v6760_v9, %v6752_v31  ;;  %v10164_v57 = vld [vmem:[#allocation11 + $0x114] sm:$0xf] }
 0x738   : > { %13419 = vst [vmem:[#allocation107_spill] sm:$0xff] %v12294_v11  ;;  %v5052_v54 = vadd.f32 %v5051_v43, %v4963_v18  ;;  %v8912_v43 = vld [vmem:[#allocation11 + $0x130] sm:$0xf0] }
 0x739   : > { %v8915_v9 = vor.u32 %v10164_v57, %v8912_v43  ;;  %v9168_v18 = vld [vmem:[#allocation11 + $0x330] sm:$0xf0] }
 0x73a   : > { %v5141_v20 = vadd.f32 %v5140_v46, %v5052_v54  ;;  %v10228_v46 = vld [vmem:[#allocation11 + $0x314] sm:$0xf] }
 0x73b   : > { %v4875_v63 = vpop.f32.mrf.mxu2  ;;  %5524 = vmatpush.bf16.msra.mxu2 %v8915_v9  ;;  %v10292_v43 = vld [vmem:[#allocation11 + $0x514] sm:$0xf] }
 0x73c   : > { %v4876_v58 = vadd.f32 %v4875_v63, %v12201_v33  ;;  %v4964_v55 = vpop.f32.mrf.mxu3  ;;  %v6768_v54 = vmax.f32 %v5141_v20, 0.0  ;;  %v9424_v20 = vld [vmem:[#allocation11 + $0x530] sm:$0xf0] }
 0x73d   : > { %v5056_v27 = vpop.f32.mrf.mxu0  ;;  %v13425_v9 = vld [vmem:[#allocation44_spill] sm:$0xff] }
 0x73e   : > { %v4965_v49 = vadd.f32 %v4964_v55, %v4876_v58  ;;  %v5145_v38 = vpop.f32.mrf.mxu1 }
 0x740   : > { %v5054_v37 = vadd.f32 %v5053_v5, %v4965_v49  ;;  %5193 = vmatmul.bf16.gmra.mxu2 %v13420_v47  ;;  %5371 = vmatmul.bf16.gmra.mxu0 %v13421_v25  ;;  %v9171_v5 = vor.u32 %v10228_v46, %v9168_v18  ;;  %v13426_v18 = vld [vmem:[#allocation28_spill] sm:$0xff] }
 0x741   : > { %5282 = vmatmul.bf16.gmra.mxu3 %v13422_v50  ;;  %5460 = vmatmul.bf16.gmra.mxu1 %v13423_v7 }
 0x742   : > { %v5143_v31 = vadd.f32 %v5142_v62, %v5054_v37  ;;  %5613 = vmatpush.bf16.msra.mxu3 %v9171_v5 }
 0x743   : > { %v4878_v36 = vpop.f32.mrf.mxu2 }
 0x744   : > { %v4879_v63 = vadd.f32 %v4878_v36, %v12201_v33  ;;  %v4967_v58 = vpop.f32.mrf.mxu3  ;;  %v6776_v55 = vmax.f32 %v5143_v31, 0.0  ;;  %v9427_v36 = vor.u32 %v10292_v43, %v9424_v20 }
 0x745   : > { %v5058_v49 = vpop.f32.mrf.mxu0 }
 0x746   : > { %v4968_v11 = vadd.f32 %v4967_v58, %v4879_v63  ;;  %v5147_v21 = vpop.f32.mrf.mxu1  ;;  %v12302_v50 = vpack.c.bf16 %v6776_v55, %v6768_v54  ;;  %5702 = vmatpush.bf16.msra.mxu0 %v9427_v36 }
 0x748   : > { %13424 = vst [vmem:[#allocation108_spill] sm:$0xff] %v12302_v50  ;;  %v5057_v62 = vadd.f32 %v5056_v27, %v4968_v11  ;;  %v13427_v11 = vld [vmem:[#allocation43_spill] sm:$0xff] }
 0x74a   : > { %v5146_v37 = vadd.f32 %v5145_v38, %v5057_v62  ;;  %v10356_v38 = vld [vmem:[#allocation11 + $0x714] sm:$0xf] }
 0x74b   : > { %v4880_v7 = vpop.f32.mrf.mxu2 }
 0x74c   : > { %v4881_v25 = vadd.f32 %v4880_v7, %v12201_v33  ;;  %v4969_v57 = vpop.f32.mrf.mxu3  ;;  %v9680_v7 = vld [vmem:[#allocation11 + $0x730] sm:$0xf0]  ;;  %v6784_v58 = vmax.f32 %v5146_v37, 0.0 }
 0x74d   : > { %v5061_v47 = vpop.f32.mrf.mxu0  ;;  %v9683_v63 = vor.u32 %v10356_v38, %v9680_v7  ;;  %v13429_v7 = vld [vmem:[#allocation31_spill] sm:$0xff] }
 0x74e   : > { %v4970_v10 = vadd.f32 %v4969_v57, %v4881_v25  ;;  %v5150_v46 = vpop.f32.mrf.mxu1 }
 0x74f   : > { %5791 = vmatpush.bf16.msra.mxu1 %v9683_v63  ;;  %v13432_v63 = vld [vmem:[#allocation45_spill] sm:$0xff] }
 0x750   : > { %v5059_v31 = vadd.f32 %v5058_v49, %v4970_v10  ;;  %5198 = vmatmul.bf16.gmra.mxu2 %v13268_v0  ;;  %5376 = vmatmul.bf16.gmra.mxu0 %v13425_v9 }
 0x751   : > { %5287 = vmatmul.bf16.gmra.mxu3 %v13426_v18  ;;  %5465 = vmatmul.bf16.gmra.mxu1 %v13427_v11 }
 0x752   : > { %v5148_v27 = vadd.f32 %v5147_v21, %v5059_v31 }
 0x753   : > { %v4883_v54 = vpop.f32.mrf.mxu2 }
 0x754   : > { %v4884_v5 = vadd.f32 %v4883_v54, %v12201_v33  ;;  %v4972_v25 = vpop.f32.mrf.mxu3  ;;  %v6792_v55 = vmax.f32 %v5148_v27, 0.0  ;;  %v13430_v54 = vld [vmem:[#allocation46_spill] sm:$0xff] }
 0x755   : > { %v5063_v62 = vpop.f32.mrf.mxu0  ;;  %v13431_v27 = vld [vmem:[#allocation30_spill] sm:$0xff] }
 0x756   : > { %v4973_v10 = vadd.f32 %v4972_v25, %v4884_v5  ;;  %v5152_v49 = vpop.f32.mrf.mxu1  ;;  %v12310_v57 = vpack.c.bf16 %v6792_v55, %v6784_v58  ;;  %v10156_v5 = vld [vmem:[#allocation11 + $0xd4] sm:$0xf] }
 0x758   : > { %13428 = vst [vmem:[#allocation109_spill] sm:$0xff] %v12310_v57  ;;  %v5062_v43 = vadd.f32 %v5061_v47, %v4973_v10  ;;  %v8880_v47 = vld [vmem:[#allocation11 + $0xf0] sm:$0xf0] }
 0x759   : > { %v8883_v55 = vor.u32 %v10156_v5, %v8880_v47  ;;  %v9136_v10 = vld [vmem:[#allocation11 + $0x2f0] sm:$0xf0] }
 0x75a   : > { %v5151_v20 = vadd.f32 %v5150_v46, %v5062_v43  ;;  %v10220_v46 = vld [vmem:[#allocation11 + $0x2d4] sm:$0xf] }
 0x75b   : > { %v4885_v36 = vpop.f32.mrf.mxu2  ;;  %5525 = vmatpush.bf16.msra.mxu2 %v8883_v55  ;;  %v10284_v47 = vld [vmem:[#allocation11 + $0x4d4] sm:$0xf] }
 0x75c   : > { %v4886_v21 = vadd.f32 %v4885_v36, %v12201_v33  ;;  %v4974_v31 = vpop.f32.mrf.mxu3  ;;  %v6800_v43 = vmax.f32 %v5151_v20, 0.0  ;;  %v9392_v20 = vld [vmem:[#allocation11 + $0x4f0] sm:$0xf0] }
 0x75d   : > { %v5066_v50 = vpop.f32.mrf.mxu0  ;;  %v13434_v55 = vld [vmem:[#allocation32_spill] sm:$0xff] }
 0x75e   : > { %v4975_v11 = vadd.f32 %v4974_v31, %v4886_v21  ;;  %v5155_v38 = vpop.f32.mrf.mxu1 }
 0x760   : > { %v5064_v37 = vadd.f32 %v5063_v62, %v4975_v11  ;;  %5203 = vmatmul.bf16.gmra.mxu2 %v13429_v7  ;;  %5381 = vmatmul.bf16.gmra.mxu0 %v13430_v54  ;;  %v9139_v11 = vor.u32 %v10220_v46, %v9136_v10 }
 0x761   : > { %5292 = vmatmul.bf16.gmra.mxu3 %v13431_v27  ;;  %5470 = vmatmul.bf16.gmra.mxu1 %v13432_v63 }
 0x762   : > { %v5153_v58 = vadd.f32 %v5152_v49, %v5064_v37  ;;  %5614 = vmatpush.bf16.msra.mxu3 %v9139_v11 }
 0x763   : > { %v4888_v25 = vpop.f32.mrf.mxu2 }
 0x764   : > { %v4889_v36 = vadd.f32 %v4888_v25, %v12201_v33  ;;  %v4977_v21 = vpop.f32.mrf.mxu3  ;;  %v6808_v62 = vmax.f32 %v5153_v58, 0.0  ;;  %v9395_v25 = vor.u32 %v10284_v47, %v9392_v20 }
 0x765   : > { %v5068_v31 = vpop.f32.mrf.mxu0 }
 0x766   : > { %v4978_v57 = vadd.f32 %v4977_v21, %v4889_v36  ;;  %v5157_v54 = vpop.f32.mrf.mxu1  ;;  %v12318_v27 = vpack.c.bf16 %v6808_v62, %v6800_v43  ;;  %5703 = vmatpush.bf16.msra.mxu0 %v9395_v25  ;;  %v10348_v62 = vld [vmem:[#allocation11 + $0x6d4] sm:$0xf] }
 0x768   : > { %13433 = vst [vmem:[#allocation110_spill] sm:$0xff] %v12318_v27  ;;  %v5067_v49 = vadd.f32 %v5066_v50, %v4978_v57  ;;  %v13435_v50 = vld [vmem:[#allocation47_spill] sm:$0xff] }
 0x76a   : > { %v5156_v37 = vadd.f32 %v5155_v38, %v5067_v49 }
 0x76b   : > { %v4890_v63 = vpop.f32.mrf.mxu2 }
 0x76c   : > { %v4891_v7 = vadd.f32 %v4890_v63, %v12201_v33  ;;  %v4979_v5 = vpop.f32.mrf.mxu3  ;;  %v6816_v63 = vmax.f32 %v5156_v37, 0.0 }
 0x76d   : > { %v5071_v18 = vpop.f32.mrf.mxu0 }
 0x76e   : > { %v4980_v9 = vadd.f32 %v4979_v5, %v4891_v7  ;;  %v5160_v46 = vpop.f32.mrf.mxu1 }
 0x770   : > { %v5069_v58 = vadd.f32 %v5068_v31, %v4980_v9  ;;  %5208 = vmatmul.bf16.gmra.mxu2 %v11514_v19  ;;  %5386 = vmatmul.bf16.gmra.mxu0 %v11710_v29  ;;  %v9648_v9 = vld [vmem:[#allocation11 + $0x6f0] sm:$0xf0] }
 0x771   : > { %5297 = vmatmul.bf16.gmra.mxu3 %v13434_v55  ;;  %5475 = vmatmul.bf16.gmra.mxu1 %v13435_v50  ;;  %v9651_v49 = vor.u32 %v10348_v62, %v9648_v9  ;;  %v10212_v62 = vld [vmem:[#allocation11 + $0x294] sm:$0xf] }
 0x772   : > { %v5158_v57 = vadd.f32 %v5157_v54, %v5069_v58 }
 0x773   : > { %v4893_v38 = vpop.f32.mrf.mxu2  ;;  %5792 = vmatpush.bf16.msra.mxu1 %v9651_v49 }
 0x774   : > { %v4894_v10 = vadd.f32 %v4893_v38, %v12201_v33  ;;  %v4982_v43 = vpop.f32.mrf.mxu3  ;;  %v6824_v36 = vmax.f32 %v5158_v57, 0.0  ;;  %v13437_v57 = vld [vmem:[#allocation34_spill] sm:$0xff] }
 0x775   : > { %v5073_v21 = vpop.f32.mrf.mxu0 }
 0x776   : > { %v4983_v7 = vadd.f32 %v4982_v43, %v4894_v10  ;;  %v5162_v11 = vpop.f32.mrf.mxu1  ;;  %v12326_v31 = vpack.c.bf16 %v6824_v36, %v6816_v63  ;;  %v13438_v10 = vld [vmem:[#allocation49_spill] sm:$0xff]  ;;  %v12331_v43 = vld [vmem:[#allocation13] sm:$0xff] }
 0x777   : > { %13439 = vst [vmem:[#allocation112_spill] sm:$0xff] %v12331_v43  ;;  %v12334_v63 = vperm.slane %v12331_v43, 4 }
 0x778   : > { %13436 = vst [vmem:[#allocation111_spill] sm:$0xff] %v12326_v31  ;;  %v5072_v5 = vadd.f32 %v5071_v18, %v4983_v7  ;;  %v13440_v18 = vld [vmem:[#allocation33_spill] sm:$0xff]  ;;  %v8848_v7 = vld [vmem:[#allocation11 + $0xb0] sm:$0xf0] }
 0x77a   : > { %v5161_v47 = vadd.f32 %v5160_v46, %v5072_v5  ;;  %v13441_v46 = vld [vmem:[#allocation48_spill] sm:$0xff] }
 0x77b   : > { %v4895_v20 = vpop.f32.mrf.mxu2 }
 0x77c   : > { %v4896_v54 = vadd.f32 %v4895_v20, %v12201_v33  ;;  %v4984_v25 = vpop.f32.mrf.mxu3  ;;  %v10148_v33 = vld [vmem:[#allocation11 + $0x94] sm:$0xf]  ;;  %v6832_v5 = vmax.f32 %v5161_v47, 0.0 }
 0x77d   : > { %v5352_v37 = vpop.f32.mrf.mxu0  ;;  %v8851_v49 = vor.u32 %v10148_v33, %v8848_v7  ;;  %v10276_v7 = vld [vmem:[#allocation11 + $0x494] sm:$0xf] }
 0x77e   : > { %v4985_v58 = vadd.f32 %v4984_v25, %v4896_v54  ;;  %v5441_v38 = vpop.f32.mrf.mxu1  ;;  %v9360_v47 = vld [vmem:[#allocation11 + $0x4b0] sm:$0xf0] }
 0x77f   : > { %5526 = vmatpush.bf16.msra.mxu2 %v8851_v49 }
 0x780   : > { %v5074_v27 = vadd.f32 %v5073_v21, %v4985_v58  ;;  %5213 = vmatmul.bf16.gmra.mxu2 %v13437_v57  ;;  %5391 = vmatmul.bf16.gmra.mxu0 %v13438_v10  ;;  %v9104_v21 = vld [vmem:[#allocation11 + $0x2b0] sm:$0xf0] }
 0x781   : > { %5302 = vmatmul.bf16.gmra.mxu3 %v13440_v18  ;;  %5480 = vmatmul.bf16.gmra.mxu1 %v13441_v46  ;;  %v9107_v25 = vor.u32 %v10212_v62, %v9104_v21 }
 0x782   : > { %v5163_v36 = vadd.f32 %v5162_v11, %v5074_v27 }
 0x783   : > { %v5174_v9 = vpop.f32.mrf.mxu2  ;;  %5615 = vmatpush.bf16.msra.mxu3 %v9107_v25 }
 0x784   : > { %v5175_v20 = vadd.f32 %v5174_v9, %v12334_v63  ;;  %v5263_v54 = vpop.f32.mrf.mxu3  ;;  %v6840_v58 = vmax.f32 %v5163_v36, 0.0  ;;  %v9363_v9 = vor.u32 %v10276_v7, %v9360_v47 }
 0x785   : > { %v5354_v31 = vpop.f32.mrf.mxu0 }
 0x786   : > { %v5264_v43 = vadd.f32 %v5263_v54, %v5175_v20  ;;  %v5443_v10 = vpop.f32.mrf.mxu1  ;;  %v12339_v18 = vpack.c.bf16 %v6840_v58, %v6832_v5  ;;  %5704 = vmatpush.bf16.msra.mxu0 %v9363_v9 }
 0x788   : > { %13442 = vst [vmem:[#allocation113_spill] sm:$0xff] %v12339_v18  ;;  %v5353_v27 = vadd.f32 %v5352_v37, %v5264_v43  ;;  %v9616_v43 = vld [vmem:[#allocation11 + $0x6b0] sm:$0xf0] }
 0x78a   : > { %v5442_v11 = vadd.f32 %v5441_v38, %v5353_v27  ;;  %v10340_v38 = vld [vmem:[#allocation11 + $0x694] sm:$0xf] }
 0x78b   : > { %v5176_v46 = vpop.f32.mrf.mxu2  ;;  %v9619_v49 = vor.u32 %v10340_v38, %v9616_v43  ;;  %v13445_v38 = vld [vmem:[#allocation50_spill] sm:$0xff] }
 0x78c   : > { %v5177_v57 = vadd.f32 %v5176_v46, %v12334_v63  ;;  %v5265_v33 = vpop.f32.mrf.mxu3  ;;  %v6593_v21 = vmax.f32 %v5442_v11, 0.0 }
 0x78d   : > { %v5357_v50 = vpop.f32.mrf.mxu0  ;;  %5793 = vmatpush.bf16.msra.mxu1 %v9619_v49 }
 0x78e   : > { %v5266_v55 = vadd.f32 %v5265_v33, %v5177_v57  ;;  %v5446_v62 = vpop.f32.mrf.mxu1 }
 0x790   : > { %v5355_v36 = vadd.f32 %v5354_v31, %v5266_v55  ;;  %5218 = vmatmul.bf16.gmra.mxu2 %v11538_v52  ;;  %5396 = vmatmul.bf16.gmra.mxu0 %v11734_v1 }
 0x791   : > { %5307 = vmatmul.bf16.gmra.mxu3 %v11530_v2  ;;  %5485 = vmatmul.bf16.gmra.mxu1 %v11726_v17 }
 0x792   : > { %v5444_v37 = vadd.f32 %v5443_v10, %v5355_v36 }
 0x793   : > { %v5179_v46 = vpop.f32.mrf.mxu2 }
 0x794   : > { %v6601_v5 = vmax.f32 %v5444_v37, 0.0  ;;  %v5180_v57 = vadd.f32 %v5179_v46, %v12334_v63  ;;  %v5268_v20 = vpop.f32.mrf.mxu3  ;;  %v13444_v37 = vld [vmem:[#allocation35_spill] sm:$0xff]  ;;  %v10140_v46 = vld [vmem:[#allocation11 + $0x54] sm:$0xf] }
 0x795   : > { %v5359_v54 = vpop.f32.mrf.mxu0 }
 0x796   : > { %v12347_v55 = vpack.c.bf16 %v6601_v5, %v6593_v21  ;;  %v5269_v31 = vadd.f32 %v5268_v20, %v5180_v57  ;;  %v5448_v25 = vpop.f32.mrf.mxu1  ;;  %v9072_v5 = vld [vmem:[#allocation11 + $0x270] sm:$0xf0] }
 0x798   : > { %13443 = vst [vmem:[#allocation114_spill] sm:$0xff] %v12347_v55  ;;  %v5358_v58 = vadd.f32 %v5357_v50, %v5269_v31  ;;  %v8816_v50 = vld [vmem:[#allocation11 + $0x70] sm:$0xf0] }
 0x799   : > { %v8819_v21 = vor.u32 %v10140_v46, %v8816_v50  ;;  %v10268_v50 = vld [vmem:[#allocation11 + $0x454] sm:$0xf] }
 0x79a   : > { %v5447_v27 = vadd.f32 %v5446_v62, %v5358_v58  ;;  %v10204_v62 = vld [vmem:[#allocation11 + $0x254] sm:$0xf] }
 0x79b   : > { %v5181_v33 = vpop.f32.mrf.mxu2  ;;  %5527 = vmatpush.bf16.msra.mxu2 %v8819_v21 }
 0x79c   : > { %v5182_v10 = vadd.f32 %v5181_v33, %v12334_v63  ;;  %v5270_v7 = vpop.f32.mrf.mxu3  ;;  %v6609_v57 = vmax.f32 %v5447_v27, 0.0  ;;  %v9328_v27 = vld [vmem:[#allocation11 + $0x470] sm:$0xf0] }
 0x79d   : > { %v5362_v47 = vpop.f32.mrf.mxu0 }
 0x79e   : > { %v5271_v9 = vadd.f32 %v5270_v7, %v5182_v10  ;;  %v5451_v36 = vpop.f32.mrf.mxu1 }
 0x7a0   : > { %v5360_v11 = vadd.f32 %v5359_v54, %v5271_v9  ;;  %5223 = vmatmul.bf16.gmra.mxu2 %v11550_v23  ;;  %5401 = vmatmul.bf16.gmra.mxu0 %v11746_v41  ;;  %v9075_v54 = vor.u32 %v10204_v62, %v9072_v5 }
 0x7a1   : > { %5312 = vmatmul.bf16.gmra.mxu3 %v13444_v37  ;;  %5490 = vmatmul.bf16.gmra.mxu1 %v13445_v38 }
 0x7a2   : > { %v5449_v43 = vadd.f32 %v5448_v25, %v5360_v11  ;;  %5616 = vmatpush.bf16.msra.mxu3 %v9075_v54 }
 0x7a3   : > { %v5184_v49 = vpop.f32.mrf.mxu2 }
 0x7a4   : > { %v5185_v20 = vadd.f32 %v5184_v49, %v12334_v63  ;;  %v5273_v31 = vpop.f32.mrf.mxu3  ;;  %v6617_v58 = vmax.f32 %v5449_v43, 0.0  ;;  %v9331_v49 = vor.u32 %v10268_v50, %v9328_v27 }
 0x7a5   : > { %v5364_v33 = vpop.f32.mrf.mxu0 }
 0x7a6   : > { %v5274_v10 = vadd.f32 %v5273_v31, %v5185_v20  ;;  %v5453_v7 = vpop.f32.mrf.mxu1  ;;  %v12355_v9 = vpack.c.bf16 %v6617_v58, %v6609_v57  ;;  %5705 = vmatpush.bf16.msra.mxu0 %v9331_v49 }
 0x7a8   : > { %13446 = vst [vmem:[#allocation115_spill] sm:$0xff] %v12355_v9  ;;  %v5363_v25 = vadd.f32 %v5362_v47, %v5274_v10 }
 0x7aa   : > { %v5452_v11 = vadd.f32 %v5451_v36, %v5363_v25  ;;  %v10332_v36 = vld [vmem:[#allocation11 + $0x654] sm:$0xf] }
 0x7ab   : > { %v5186_v55 = vpop.f32.mrf.mxu2 }
 0x7ac   : > { %v5187_v18 = vadd.f32 %v5186_v55, %v12334_v63  ;;  %v5275_v46 = vpop.f32.mrf.mxu3  ;;  %v9584_v55 = vld [vmem:[#allocation11 + $0x670] sm:$0xf0]  ;;  %v6625_v57 = vmax.f32 %v5452_v11, 0.0 }
 0x7ad   : > { %v5367_v38 = vpop.f32.mrf.mxu0  ;;  %v9587_v5 = vor.u32 %v10332_v36, %v9584_v55  ;;  %v10132_v36 = vld [vmem:[#allocation11 + $0x14] sm:$0xf] }
 0x7ae   : > { %v5276_v37 = vadd.f32 %v5275_v46, %v5187_v18  ;;  %v5456_v62 = vpop.f32.mrf.mxu1 }
 0x7af   : > { %5794 = vmatpush.bf16.msra.mxu1 %v9587_v5  ;;  %v9040_v5 = vld [vmem:[#allocation11 + $0x230] sm:$0xf0] }
 0x7b0   : > { %v5365_v43 = vadd.f32 %v5364_v33, %v5276_v37  ;;  %5228 = vmatmul.bf16.gmra.mxu2 %v11562_v34  ;;  %5406 = vmatmul.bf16.gmra.mxu0 %v11758_v22 }
 0x7b1   : > { %5317 = vmatmul.bf16.gmra.mxu3 %v11554_v14  ;;  %5495 = vmatmul.bf16.gmra.mxu1 %v11750_v32 }
 0x7b2   : > { %v5454_v47 = vadd.f32 %v5453_v7, %v5365_v43 }
 0x7b3   : > { %v5189_v21 = vpop.f32.mrf.mxu2 }
 0x7b4   : > { %v5190_v20 = vadd.f32 %v5189_v21, %v12334_v63  ;;  %v5278_v18 = vpop.f32.mrf.mxu3  ;;  %v6633_v31 = vmax.f32 %v5454_v47, 0.0 }
 0x7b5   : > { %v5369_v54 = vpop.f32.mrf.mxu0 }
 0x7b6   : > { %v5279_v37 = vadd.f32 %v5278_v18, %v5190_v20  ;;  %v5458_v58 = vpop.f32.mrf.mxu1  ;;  %v12363_v33 = vpack.c.bf16 %v6633_v31, %v6625_v57 }
 0x7b8   : > { %13447 = vst [vmem:[#allocation116_spill] sm:$0xff] %v12363_v33  ;;  %v5368_v10 = vadd.f32 %v5367_v38, %v5279_v37  ;;  %v8784_v38 = vld [vmem:[#allocation11 + $0x30] sm:$0xf0] }
 0x7b9   : > { %v8787_v21 = vor.u32 %v10132_v36, %v8784_v38  ;;  %v10260_v38 = vld [vmem:[#allocation11 + $0x414] sm:$0xf] }
 0x7ba   : > { %v5457_v25 = vadd.f32 %v5456_v62, %v5368_v10  ;;  %v10196_v62 = vld [vmem:[#allocation11 + $0x214] sm:$0xf] }
 0x7bb   : > { %v5191_v46 = vpop.f32.mrf.mxu2  ;;  %v9043_v31 = vor.u32 %v10196_v62, %v9040_v5  ;;  %5528 = vmatpush.bf16.msra.mxu2 %v8787_v21  ;;  %v9552_v21 = vld [vmem:[#allocation11 + $0x630] sm:$0xf0] }
 0x7bc   : > { %v5192_v7 = vadd.f32 %v5191_v46, %v12334_v63  ;;  %v5280_v50 = vpop.f32.mrf.mxu3  ;;  %v6641_v57 = vmax.f32 %v5457_v25, 0.0  ;;  %v9296_v25 = vld [vmem:[#allocation11 + $0x430] sm:$0xf0] }
 0x7bd   : > { %v5372_v27 = vpop.f32.mrf.mxu0  ;;  %5617 = vmatpush.bf16.msra.mxu3 %v9043_v31 }
 0x7be   : > { %v5281_v49 = vadd.f32 %v5280_v50, %v5192_v7  ;;  %v5461_v43 = vpop.f32.mrf.mxu1 }
 0x7c0   : > { %v5370_v11 = vadd.f32 %v5369_v54, %v5281_v49  ;;  %5233 = vmatmul.bf16.gmra.mxu2 %v11574_v45  ;;  %5411 = vmatmul.bf16.gmra.mxu0 %v11770_v56 }
 0x7c1   : > { %5322 = vmatmul.bf16.gmra.mxu3 %v11566_v39  ;;  %5500 = vmatmul.bf16.gmra.mxu1 %v11762_v15 }
 0x7c2   : > { %v5459_v47 = vadd.f32 %v5458_v58, %v5370_v11 }
 0x7c3   : > { %v5194_v55 = vpop.f32.mrf.mxu2 }
 0x7c4   : > { %v5195_v20 = vadd.f32 %v5194_v55, %v12334_v63  ;;  %v5283_v18 = vpop.f32.mrf.mxu3  ;;  %v6649_v54 = vmax.f32 %v5459_v47, 0.0  ;;  %v9299_v55 = vor.u32 %v10260_v38, %v9296_v25 }
 0x7c5   : > { %v5374_v37 = vpop.f32.mrf.mxu0 }
 0x7c6   : > { %v5284_v10 = vadd.f32 %v5283_v18, %v5195_v20  ;;  %v5463_v46 = vpop.f32.mrf.mxu1  ;;  %v12371_v7 = vpack.c.bf16 %v6649_v54, %v6641_v57  ;;  %5706 = vmatpush.bf16.msra.mxu0 %v9299_v55 }
 0x7c8   : > { %13448 = vst [vmem:[#allocation117_spill] sm:$0xff] %v12371_v7  ;;  %v5373_v58 = vadd.f32 %v5372_v27, %v5284_v10 }
 0x7ca   : > { %v5462_v50 = vadd.f32 %v5461_v43, %v5373_v58  ;;  %v10324_v43 = vld [vmem:[#allocation11 + $0x614] sm:$0xf] }
 0x7cb   : > { %v5196_v49 = vpop.f32.mrf.mxu2  ;;  %v9555_v57 = vor.u32 %v10324_v43, %v9552_v21  ;;  %v9014_v43 = vld [vmem:[#allocation11 + $0x1d8] sm:$0xf] }
 0x7cc   : > { %v5197_v11 = vadd.f32 %v5196_v49, %v12334_v63  ;;  %v5285_v36 = vpop.f32.mrf.mxu3  ;;  %v6657_v20 = vmax.f32 %v5462_v50, 0.0 }
 0x7cd   : > { %v5377_v33 = vpop.f32.mrf.mxu0  ;;  %5795 = vmatpush.bf16.msra.mxu1 %v9555_v57  ;;  %v10257_v57 = vld [vmem:[#allocation11 + $0x3f4] sm:$0xf0] }
 0x7ce   : > { %v5286_v9 = vadd.f32 %v5285_v36, %v5197_v11  ;;  %v5466_v62 = vpop.f32.mrf.mxu1 }
 0x7d0   : > { %v5375_v47 = vadd.f32 %v5374_v37, %v5286_v9  ;;  %5238 = vmatmul.bf16.gmra.mxu2 %v11586_v42  ;;  %5416 = vmatmul.bf16.gmra.mxu0 %v11782_v30 }
 0x7d1   : > { %5327 = vmatmul.bf16.gmra.mxu3 %v11578_v44  ;;  %5505 = vmatmul.bf16.gmra.mxu1 %v11774_v6 }
 0x7d2   : > { %v5464_v27 = vadd.f32 %v5463_v46, %v5375_v47 }
 0x7d3   : > { %v5199_v5 = vpop.f32.mrf.mxu2 }
 0x7d4   : > { %v5200_v18 = vadd.f32 %v5199_v5, %v12334_v63  ;;  %v5288_v31 = vpop.f32.mrf.mxu3  ;;  %v6665_v54 = vmax.f32 %v5464_v27, 0.0 }
 0x7d5   : > { %v5379_v10 = vpop.f32.mrf.mxu0 }
 0x7d6   : > { %v5289_v9 = vadd.f32 %v5288_v31, %v5200_v18  ;;  %v5468_v37 = vpop.f32.mrf.mxu1  ;;  %v12379_v58 = vpack.c.bf16 %v6665_v54, %v6657_v20 }
 0x7d8   : > { %13449 = vst [vmem:[#allocation118_spill] sm:$0xff] %v12379_v58  ;;  %v5378_v49 = vadd.f32 %v5377_v33, %v5289_v9  ;;  %v10193_v33 = vld [vmem:[#allocation11 + $0x1f4] sm:$0xf0] }
 0x7d9   : > { %v9015_v5 = vor.u32 %v10193_v33, %v9014_v43  ;;  %v9526_v33 = vld [vmem:[#allocation11 + $0x5d8] sm:$0xf] }
 0x7da   : > { %v5467_v11 = vadd.f32 %v5466_v62, %v5378_v49  ;;  %v9270_v62 = vld [vmem:[#allocation11 + $0x3d8] sm:$0xf] }
 0x7db   : > { %v5201_v36 = vpop.f32.mrf.mxu2  ;;  %v9271_v54 = vor.u32 %v10257_v57, %v9270_v62  ;;  %5877 = vmatpush.bf16.msrb.mxu2 %v9015_v5  ;;  %v10385_v5 = vld [vmem:[#allocation11 + $0x7f4] sm:$0xf0] }
 0x7dc   : > { %v5202_v46 = vadd.f32 %v5201_v36, %v12334_v63  ;;  %v5290_v38 = vpop.f32.mrf.mxu3  ;;  %v6673_v20 = vmax.f32 %v5467_v11, 0.0  ;;  %v10321_v11 = vld [vmem:[#allocation11 + $0x5f4] sm:$0xf0] }
 0x7dd   : > { %v5382_v25 = vpop.f32.mrf.mxu0  ;;  %5966 = vmatpush.bf16.msrb.mxu3 %v9271_v54 }
 0x7de   : > { %v5291_v55 = vadd.f32 %v5290_v38, %v5202_v46  ;;  %v5471_v47 = vpop.f32.mrf.mxu1 }
 0x7e0   : > { %v5380_v50 = vadd.f32 %v5379_v10, %v5291_v55  ;;  %5243 = vmatmul.bf16.gmra.mxu2 %v11598_v26  ;;  %5421 = vmatmul.bf16.gmra.mxu0 %v11794_v12 }
 0x7e1   : > { %5332 = vmatmul.bf16.gmra.mxu3 %v11590_v59  ;;  %5510 = vmatmul.bf16.gmra.mxu1 %v11786_v13 }
 0x7e2   : > { %v5469_v27 = vadd.f32 %v5468_v37, %v5380_v50 }
 0x7e3   : > { %v5204_v21 = vpop.f32.mrf.mxu2 }
 0x7e4   : > { %v5205_v18 = vadd.f32 %v5204_v21, %v12334_v63  ;;  %v5293_v31 = vpop.f32.mrf.mxu3  ;;  %v6681_v10 = vmax.f32 %v5469_v27, 0.0  ;;  %v9527_v21 = vor.u32 %v10321_v11, %v9526_v33 }
 0x7e5   : > { %v5384_v9 = vpop.f32.mrf.mxu0 }
 0x7e6   : > { %v5294_v49 = vadd.f32 %v5293_v31, %v5205_v18  ;;  %v5473_v36 = vpop.f32.mrf.mxu1  ;;  %v12387_v46 = vpack.c.bf16 %v6681_v10, %v6673_v20  ;;  %6055 = vmatpush.bf16.msrb.mxu0 %v9527_v21 }
 0x7e8   : > { %13450 = vst [vmem:[#allocation119_spill] sm:$0xff] %v12387_v46  ;;  %v5383_v37 = vadd.f32 %v5382_v25, %v5294_v49 }
 0x7ea   : > { %v5472_v38 = vadd.f32 %v5471_v47, %v5383_v37  ;;  %v9782_v47 = vld [vmem:[#allocation11 + $0x7d8] sm:$0xf] }
 0x7eb   : > { %v5206_v55 = vpop.f32.mrf.mxu2  ;;  %v9783_v20 = vor.u32 %v10385_v5, %v9782_v47  ;;  %v13453_v47 = vld [vmem:[#allocation36_spill] sm:$0xff] }
 0x7ec   : > { %v5207_v50 = vadd.f32 %v5206_v55, %v12334_v63  ;;  %v5295_v43 = vpop.f32.mrf.mxu3  ;;  %v6689_v18 = vmax.f32 %v5472_v38, 0.0 }
 0x7ed   : > { %v5387_v58 = vpop.f32.mrf.mxu0  ;;  %6144 = vmatpush.bf16.msrb.mxu1 %v9783_v20 }
 0x7ee   : > { %v5296_v7 = vadd.f32 %v5295_v43, %v5207_v50  ;;  %v5476_v62 = vpop.f32.mrf.mxu1 }
 0x7f0   : > { %v5385_v27 = vadd.f32 %v5384_v9, %v5296_v7  ;;  %5248 = vmatmul.bf16.gmra.mxu2 %v11614_v16  ;;  %5426 = vmatmul.bf16.gmra.mxu0 %v11810_v4 }
 0x7f1   : > { %5337 = vmatmul.bf16.gmra.mxu3 %v11604_v40  ;;  %5515 = vmatmul.bf16.gmra.mxu1 %v11798_v60 }
 0x7f2   : > { %v5474_v25 = vadd.f32 %v5473_v36, %v5385_v27 }
 0x7f3   : > { %v5209_v57 = vpop.f32.mrf.mxu2 }
 0x7f4   : > { %v5210_v31 = vadd.f32 %v5209_v57, %v12334_v63  ;;  %v5298_v54 = vpop.f32.mrf.mxu3  ;;  %v6697_v10 = vmax.f32 %v5474_v25, 0.0  ;;  %v13452_v25 = vld [vmem:[#allocation23_spill] sm:$0xff]  ;;  %v8982_v57 = vld [vmem:[#allocation11 + $0x198] sm:$0xf] }
 0x7f5   : > { %v5389_v49 = vpop.f32.mrf.mxu0 }
 0x7f6   : > { %v5299_v7 = vadd.f32 %v5298_v54, %v5210_v31  ;;  %v5478_v9 = vpop.f32.mrf.mxu1  ;;  %v12395_v37 = vpack.c.bf16 %v6697_v10, %v6689_v18  ;;  %v10249_v31 = vld [vmem:[#allocation11 + $0x3b4] sm:$0xf0] }
 0x7f8   : > { %13451 = vst [vmem:[#allocation120_spill] sm:$0xff] %v12395_v37  ;;  %v5388_v55 = vadd.f32 %v5387_v58, %v5299_v7  ;;  %v10185_v58 = vld [vmem:[#allocation11 + $0x1b4] sm:$0xf0] }
 0x7f9   : > { %v8983_v18 = vor.u32 %v10185_v58, %v8982_v57  ;;  %v9494_v58 = vld [vmem:[#allocation11 + $0x598] sm:$0xf] }
 0x7fa   : > { %v5477_v50 = vadd.f32 %v5476_v62, %v5388_v55  ;;  %v9238_v62 = vld [vmem:[#allocation11 + $0x398] sm:$0xf] }
 0x7fb   : > { %v5211_v43 = vpop.f32.mrf.mxu2  ;;  %5878 = vmatpush.bf16.msrb.mxu2 %v8983_v18 }
 0x7fc   : > { %v5212_v36 = vadd.f32 %v5211_v43, %v12334_v63  ;;  %v5300_v33 = vpop.f32.mrf.mxu3  ;;  %v6705_v54 = vmax.f32 %v5477_v50, 0.0  ;;  %v10313_v50 = vld [vmem:[#allocation11 + $0x5b4] sm:$0xf0] }
 0x7fd   : > { %v5392_v11 = vpop.f32.mrf.mxu0 }
 0x7fe   : > { %v5301_v21 = vadd.f32 %v5300_v33, %v5212_v36  ;;  %v5481_v27 = vpop.f32.mrf.mxu1 }
 0x800   : > { %v5390_v38 = vadd.f32 %v5389_v49, %v5301_v21  ;;  %5529 = vmatmul.bf16.vlgmr.msra.gmra.mxu2 %v11430_v3  ;;  %5707 = vmatmul.bf16.vlgmr.msra.gmra.mxu0 %v11626_v24  ;;  %v9239_v49 = vor.u32 %v10249_v31, %v9238_v62 }
 0x801   : > { %5618 = vmatmul.bf16.vlgmr.msra.gmra.mxu3 %v13452_v25  ;;  %5796 = vmatmul.bf16.vlgmr.msra.gmra.mxu1 %v13453_v47 }
 0x802   : > { %v5479_v5 = vadd.f32 %v5478_v9, %v5390_v38  ;;  %5967 = vmatpush.bf16.msrb.mxu3 %v9239_v49 }
 0x803   : > { %v5214_v20 = vpop.f32.mrf.mxu2 }
 0x804   : > { %v5215_v10 = vadd.f32 %v5214_v20, %v12334_v63  ;;  %v5303_v7 = vpop.f32.mrf.mxu3  ;;  %v6713_v55 = vmax.f32 %v5479_v5, 0.0  ;;  %v9495_v20 = vor.u32 %v10313_v50, %v9494_v58 }
 0x805   : > { %v5394_v43 = vpop.f32.mrf.mxu0 }
 0x806   : > { %v5304_v36 = vadd.f32 %v5303_v7, %v5215_v10  ;;  %v5483_v33 = vpop.f32.mrf.mxu1  ;;  %v12403_v21 = vpack.c.bf16 %v6713_v55, %v6705_v54  ;;  %6056 = vmatpush.bf16.msrb.mxu0 %v9495_v20 }
 0x808   : > { %13454 = vst [vmem:[#allocation121_spill] sm:$0xff] %v12403_v21  ;;  %v5393_v9 = vadd.f32 %v5392_v11, %v5304_v36 }
 0x80a   : > { %v5482_v38 = vadd.f32 %v5481_v27, %v5393_v9  ;;  %v9750_v27 = vld [vmem:[#allocation11 + $0x798] sm:$0xf] }
 0x80b   : > { %v5216_v37 = vpop.f32.mrf.mxu2 }
 0x80c   : > { %v5217_v46 = vadd.f32 %v5216_v37, %v12334_v63  ;;  %v5305_v57 = vpop.f32.mrf.mxu3  ;;  %v10377_v37 = vld [vmem:[#allocation11 + $0x7b4] sm:$0xf0]  ;;  %v6721_v54 = vmax.f32 %v5482_v38, 0.0 }
 0x80d   : > { %v5397_v47 = vpop.f32.mrf.mxu0  ;;  %v9751_v31 = vor.u32 %v10377_v37, %v9750_v27  ;;  %v13456_v27 = vld [vmem:[#allocation25_spill] sm:$0xff]  ;;  %v13457_v37 = vld [vmem:[#allocation39_spill] sm:$0xff] }
 0x80e   : > { %v5306_v25 = vadd.f32 %v5305_v57, %v5217_v46  ;;  %v5486_v62 = vpop.f32.mrf.mxu1 }
 0x80f   : > { %6145 = vmatpush.bf16.msrb.mxu1 %v9751_v31 }
 0x810   : > { %v5395_v5 = vadd.f32 %v5394_v43, %v5306_v25  ;;  %5534 = vmatmul.bf16.gmra.mxu2 %v11442_v61  ;;  %5712 = vmatmul.bf16.gmra.mxu0 %v11638_v51 }
 0x811   : > { %5623 = vmatmul.bf16.gmra.mxu3 %v11434_v35  ;;  %5801 = vmatmul.bf16.gmra.mxu1 %v13283_v53 }
 0x812   : > { %v5484_v11 = vadd.f32 %v5483_v33, %v5395_v5 }
 0x813   : > { %v5219_v18 = vpop.f32.mrf.mxu2 }
 0x814   : > { %v5220_v10 = vadd.f32 %v5219_v18, %v12334_v63  ;;  %v5308_v46 = vpop.f32.mrf.mxu3  ;;  %v6729_v7 = vmax.f32 %v5484_v11, 0.0  ;;  %v13458_v11 = vld [vmem:[#allocation24_spill] sm:$0xff]  ;;  %v13459_v18 = vld [vmem:[#allocation38_spill] sm:$0xff] }
 0x815   : > { %v5399_v49 = vpop.f32.mrf.mxu0 }
 0x816   : > { %v5309_v25 = vadd.f32 %v5308_v46, %v5220_v10  ;;  %v5488_v55 = vpop.f32.mrf.mxu1  ;;  %v12411_v43 = vpack.c.bf16 %v6729_v7, %v6721_v54  ;;  %v8950_v54 = vld [vmem:[#allocation11 + $0x158] sm:$0xf] }
 0x817   : > { %v10241_v7 = vld [vmem:[#allocation11 + $0x374] sm:$0xf0] }
 0x818   : > { %13455 = vst [vmem:[#allocation122_spill] sm:$0xff] %v12411_v43  ;;  %v5398_v36 = vadd.f32 %v5397_v47, %v5309_v25  ;;  %v10177_v47 = vld [vmem:[#allocation11 + $0x174] sm:$0xf0] }
 0x819   : > { %v8951_v46 = vor.u32 %v10177_v47, %v8950_v54  ;;  %v9462_v47 = vld [vmem:[#allocation11 + $0x558] sm:$0xf] }
 0x81a   : > { %v5487_v9 = vadd.f32 %v5486_v62, %v5398_v36  ;;  %v9206_v62 = vld [vmem:[#allocation11 + $0x358] sm:$0xf] }
 0x81b   : > { %v5221_v57 = vpop.f32.mrf.mxu2  ;;  %5879 = vmatpush.bf16.msrb.mxu2 %v8951_v46  ;;  %v9718_v46 = vld [vmem:[#allocation11 + $0x758] sm:$0xf] }
 0x81c   : > { %v5222_v33 = vadd.f32 %v5221_v57, %v12334_v63  ;;  %v5310_v58 = vpop.f32.mrf.mxu3  ;;  %v6737_v25 = vmax.f32 %v5487_v9, 0.0  ;;  %v10305_v9 = vld [vmem:[#allocation11 + $0x574] sm:$0xf0] }
 0x81d   : > { %v5402_v50 = vpop.f32.mrf.mxu0 }
 0x81e   : > { %v5311_v20 = vadd.f32 %v5310_v58, %v5222_v33  ;;  %v5491_v5 = vpop.f32.mrf.mxu1 }
 0x820   : > { %v5400_v38 = vadd.f32 %v5399_v49, %v5311_v20  ;;  %5539 = vmatmul.bf16.gmra.mxu2 %v13456_v27  ;;  %5717 = vmatmul.bf16.gmra.mxu0 %v13457_v37  ;;  %v9207_v49 = vor.u32 %v10241_v7, %v9206_v62 }
 0x821   : > { %5628 = vmatmul.bf16.gmra.mxu3 %v13458_v11  ;;  %5806 = vmatmul.bf16.gmra.mxu1 %v13459_v18 }
 0x822   : > { %v5489_v31 = vadd.f32 %v5488_v55, %v5400_v38  ;;  %5968 = vmatpush.bf16.msrb.mxu3 %v9207_v49 }
 0x823   : > { %v5224_v10 = vpop.f32.mrf.mxu2 }
 0x824   : > { %v5225_v36 = vadd.f32 %v5224_v10, %v12334_v63  ;;  %v5313_v57 = vpop.f32.mrf.mxu3  ;;  %v6745_v33 = vmax.f32 %v5489_v31, 0.0  ;;  %v9463_v10 = vor.u32 %v10305_v9, %v9462_v47 }
 0x825   : > { %v5404_v58 = vpop.f32.mrf.mxu0 }
 0x826   : > { %v5314_v20 = vadd.f32 %v5313_v57, %v5225_v36  ;;  %v5493_v43 = vpop.f32.mrf.mxu1  ;;  %v12419_v21 = vpack.c.bf16 %v6745_v33, %v6737_v25  ;;  %6057 = vmatpush.bf16.msrb.mxu0 %v9463_v10 }
 0x828   : > { %13460 = vst [vmem:[#allocation123_spill] sm:$0xff] %v12419_v21  ;;  %v5403_v55 = vadd.f32 %v5402_v50, %v5314_v20  ;;  %v13461_v50 = vld [vmem:[#allocation40_spill] sm:$0xff] }
 0x82a   : > { %v5492_v38 = vadd.f32 %v5491_v5, %v5403_v55 }
 0x82b   : > { %v5226_v18 = vpop.f32.mrf.mxu2 }
 0x82c   : > { %v5227_v11 = vadd.f32 %v5226_v18, %v12334_v63  ;;  %v5315_v54 = vpop.f32.mrf.mxu3  ;;  %v10369_v18 = vld [vmem:[#allocation11 + $0x774] sm:$0xf0]  ;;  %v6753_v36 = vmax.f32 %v5492_v38, 0.0 }
 0x82d   : > { %v5407_v37 = vpop.f32.mrf.mxu0  ;;  %v9719_v25 = vor.u32 %v10369_v18, %v9718_v46  ;;  %v13463_v18 = vld [vmem:[#allocation27_spill] sm:$0xff] }
 0x82e   : > { %v5316_v27 = vadd.f32 %v5315_v54, %v5227_v11  ;;  %v5496_v62 = vpop.f32.mrf.mxu1 }
 0x82f   : > { %6146 = vmatpush.bf16.msrb.mxu1 %v9719_v25  ;;  %v13466_v25 = vld [vmem:[#allocation41_spill] sm:$0xff] }
 0x830   : > { %v5405_v31 = vadd.f32 %v5404_v58, %v5316_v27  ;;  %5544 = vmatmul.bf16.gmra.mxu2 %v11466_v8  ;;  %5722 = vmatmul.bf16.gmra.mxu0 %v11662_v28 }
 0x831   : > { %5633 = vmatmul.bf16.gmra.mxu3 %v11458_v48  ;;  %5811 = vmatmul.bf16.gmra.mxu1 %v13461_v50 }
 0x832   : > { %v5494_v5 = vadd.f32 %v5493_v43, %v5405_v31 }
 0x833   : > { %v5229_v7 = vpop.f32.mrf.mxu2 }
 0x834   : > { %v5230_v57 = vadd.f32 %v5229_v7, %v12334_v63  ;;  %v5318_v11 = vpop.f32.mrf.mxu3  ;;  %v6761_v49 = vmax.f32 %v5494_v5, 0.0  ;;  %v13464_v7 = vld [vmem:[#allocation42_spill] sm:$0xff] }
 0x835   : > { %v5409_v33 = vpop.f32.mrf.mxu0  ;;  %v13465_v5 = vld [vmem:[#allocation26_spill] sm:$0xff] }
 0x836   : > { %v5319_v27 = vadd.f32 %v5318_v11, %v5230_v57  ;;  %v5498_v58 = vpop.f32.mrf.mxu1  ;;  %v12427_v20 = vpack.c.bf16 %v6761_v49, %v6753_v36  ;;  %v8918_v57 = vld [vmem:[#allocation11 + $0x118] sm:$0xf] }
 0x838   : > { %13462 = vst [vmem:[#allocation124_spill] sm:$0xff] %v12427_v20  ;;  %v5408_v55 = vadd.f32 %v5407_v37, %v5319_v27  ;;  %v10169_v37 = vld [vmem:[#allocation11 + $0x134] sm:$0xf0] }
 0x839   : > { %v8919_v49 = vor.u32 %v10169_v37, %v8918_v57  ;;  %v10233_v27 = vld [vmem:[#allocation11 + $0x334] sm:$0xf0] }
 0x83a   : > { %v5497_v54 = vadd.f32 %v5496_v62, %v5408_v55  ;;  %v9174_v62 = vld [vmem:[#allocation11 + $0x318] sm:$0xf] }
 0x83b   : > { %v5231_v47 = vpop.f32.mrf.mxu2  ;;  %5880 = vmatpush.bf16.msrb.mxu2 %v8919_v49  ;;  %v9430_v37 = vld [vmem:[#allocation11 + $0x518] sm:$0xf]  ;;  %v13468_v49 = vld [vmem:[#allocation44_spill] sm:$0xff] }
 0x83c   : > { %v5232_v43 = vadd.f32 %v5231_v47, %v12334_v63  ;;  %v5320_v9 = vpop.f32.mrf.mxu3  ;;  %v6769_v55 = vmax.f32 %v5497_v54, 0.0  ;;  %v10297_v54 = vld [vmem:[#allocation11 + $0x534] sm:$0xf0] }
 0x83d   : > { %v5412_v10 = vpop.f32.mrf.mxu0 }
 0x83e   : > { %v5321_v31 = vadd.f32 %v5320_v9, %v5232_v43  ;;  %v5501_v46 = vpop.f32.mrf.mxu1 }
 0x840   : > { %v5410_v38 = vadd.f32 %v5409_v33, %v5321_v31  ;;  %5549 = vmatmul.bf16.gmra.mxu2 %v13463_v18  ;;  %5727 = vmatmul.bf16.gmra.mxu0 %v13464_v7  ;;  %v9175_v33 = vor.u32 %v10233_v27, %v9174_v62  ;;  %v13469_v27 = vld [vmem:[#allocation28_spill] sm:$0xff] }
 0x841   : > { %5638 = vmatmul.bf16.gmra.mxu3 %v13465_v5  ;;  %5816 = vmatmul.bf16.gmra.mxu1 %v13466_v25 }
 0x842   : > { %v5499_v36 = vadd.f32 %v5498_v58, %v5410_v38  ;;  %5969 = vmatpush.bf16.msrb.mxu3 %v9175_v33 }
 0x843   : > { %v5234_v11 = vpop.f32.mrf.mxu2 }
 0x844   : > { %v5235_v47 = vadd.f32 %v5234_v11, %v12334_v63  ;;  %v5323_v43 = vpop.f32.mrf.mxu3  ;;  %v6777_v9 = vmax.f32 %v5499_v36, 0.0  ;;  %v9431_v11 = vor.u32 %v10297_v54, %v9430_v37 }
 0x845   : > { %v5414_v31 = vpop.f32.mrf.mxu0 }
 0x846   : > { %v5324_v20 = vadd.f32 %v5323_v43, %v5235_v47  ;;  %v5503_v21 = vpop.f32.mrf.mxu1  ;;  %v12435_v5 = vpack.c.bf16 %v6777_v9, %v6769_v55  ;;  %6058 = vmatpush.bf16.msrb.mxu0 %v9431_v11 }
 0x848   : > { %13467 = vst [vmem:[#allocation125_spill] sm:$0xff] %v12435_v5  ;;  %v5413_v58 = vadd.f32 %v5412_v10, %v5324_v20  ;;  %v13470_v20 = vld [vmem:[#allocation43_spill] sm:$0xff] }
 0x84a   : > { %v5502_v38 = vadd.f32 %v5501_v46, %v5413_v58  ;;  %v9686_v46 = vld [vmem:[#allocation11 + $0x718] sm:$0xf] }
 0x84b   : > { %v5236_v25 = vpop.f32.mrf.mxu2 }
 0x84c   : > { %v5237_v7 = vadd.f32 %v5236_v25, %v12334_v63  ;;  %v5325_v57 = vpop.f32.mrf.mxu3  ;;  %v10361_v25 = vld [vmem:[#allocation11 + $0x734] sm:$0xf0]  ;;  %v6785_v43 = vmax.f32 %v5502_v38, 0.0 }
 0x84d   : > { %v5417_v18 = vpop.f32.mrf.mxu0  ;;  %v9687_v47 = vor.u32 %v10361_v25, %v9686_v46  ;;  %v13472_v25 = vld [vmem:[#allocation31_spill] sm:$0xff] }
 0x84e   : > { %v5326_v50 = vadd.f32 %v5325_v57, %v5237_v7  ;;  %v5506_v62 = vpop.f32.mrf.mxu1 }
 0x84f   : > { %6147 = vmatpush.bf16.msrb.mxu1 %v9687_v47  ;;  %v13475_v47 = vld [vmem:[#allocation45_spill] sm:$0xff] }
 0x850   : > { %v5415_v36 = vadd.f32 %v5414_v31, %v5326_v50  ;;  %5554 = vmatmul.bf16.gmra.mxu2 %v13268_v0  ;;  %5732 = vmatmul.bf16.gmra.mxu0 %v13468_v49 }
 0x851   : > { %5643 = vmatmul.bf16.gmra.mxu3 %v13469_v27  ;;  %5821 = vmatmul.bf16.gmra.mxu1 %v13470_v20 }
 0x852   : > { %v5504_v10 = vadd.f32 %v5503_v21, %v5415_v36 }
 0x853   : > { %v5239_v55 = vpop.f32.mrf.mxu2 }
 0x854   : > { %v5240_v33 = vadd.f32 %v5239_v55, %v12334_v63  ;;  %v5328_v7 = vpop.f32.mrf.mxu3  ;;  %v6793_v9 = vmax.f32 %v5504_v10, 0.0  ;;  %v13473_v55 = vld [vmem:[#allocation46_spill] sm:$0xff] }
 0x855   : > { %v5419_v58 = vpop.f32.mrf.mxu0  ;;  %v13474_v10 = vld [vmem:[#allocation30_spill] sm:$0xff] }
 0x856   : > { %v5329_v50 = vadd.f32 %v5328_v7, %v5240_v33  ;;  %v5508_v31 = vpop.f32.mrf.mxu1  ;;  %v12443_v57 = vpack.c.bf16 %v6793_v9, %v6785_v43  ;;  %v8886_v33 = vld [vmem:[#allocation11 + $0xd8] sm:$0xf] }
 0x858   : > { %13471 = vst [vmem:[#allocation126_spill] sm:$0xff] %v12443_v57  ;;  %v5418_v37 = vadd.f32 %v5417_v18, %v5329_v50  ;;  %v10161_v18 = vld [vmem:[#allocation11 + $0xf4] sm:$0xf0] }
 0x859   : > { %v8887_v9 = vor.u32 %v10161_v18, %v8886_v33  ;;  %v10225_v50 = vld [vmem:[#allocation11 + $0x2f4] sm:$0xf0] }
 0x85a   : > { %v5507_v54 = vadd.f32 %v5506_v62, %v5418_v37  ;;  %v9142_v62 = vld [vmem:[#allocation11 + $0x2d8] sm:$0xf] }
 0x85b   : > { %v5241_v11 = vpop.f32.mrf.mxu2  ;;  %5881 = vmatpush.bf16.msrb.mxu2 %v8887_v9  ;;  %v9398_v18 = vld [vmem:[#allocation11 + $0x4d8] sm:$0xf]  ;;  %v13477_v9 = vld [vmem:[#allocation32_spill] sm:$0xff] }
 0x85c   : > { %v5242_v21 = vadd.f32 %v5241_v11, %v12334_v63  ;;  %v5330_v36 = vpop.f32.mrf.mxu3  ;;  %v6801_v37 = vmax.f32 %v5507_v54, 0.0  ;;  %v10289_v54 = vld [vmem:[#allocation11 + $0x4f4] sm:$0xf0] }
 0x85d   : > { %v5422_v5 = vpop.f32.mrf.mxu0 }
 0x85e   : > { %v5331_v20 = vadd.f32 %v5330_v36, %v5242_v21  ;;  %v5511_v46 = vpop.f32.mrf.mxu1 }
 0x860   : > { %v5420_v38 = vadd.f32 %v5419_v58, %v5331_v20  ;;  %5559 = vmatmul.bf16.gmra.mxu2 %v13472_v25  ;;  %5737 = vmatmul.bf16.gmra.mxu0 %v13473_v55  ;;  %v9143_v20 = vor.u32 %v10225_v50, %v9142_v62 }
 0x861   : > { %5648 = vmatmul.bf16.gmra.mxu3 %v13474_v10  ;;  %5826 = vmatmul.bf16.gmra.mxu1 %v13475_v47 }
 0x862   : > { %v5509_v43 = vadd.f32 %v5508_v31, %v5420_v38  ;;  %5970 = vmatpush.bf16.msrb.mxu3 %v9143_v20 }
 0x863   : > { %v5244_v7 = vpop.f32.mrf.mxu2 }
 0x864   : > { %v5245_v11 = vadd.f32 %v5244_v7, %v12334_v63  ;;  %v5333_v21 = vpop.f32.mrf.mxu3  ;;  %v6809_v58 = vmax.f32 %v5509_v43, 0.0  ;;  %v9399_v7 = vor.u32 %v10289_v54, %v9398_v18 }
 0x865   : > { %v5424_v36 = vpop.f32.mrf.mxu0 }
 0x866   : > { %v5334_v57 = vadd.f32 %v5333_v21, %v5245_v11  ;;  %v5513_v55 = vpop.f32.mrf.mxu1  ;;  %v12451_v10 = vpack.c.bf16 %v6809_v58, %v6801_v37  ;;  %6059 = vmatpush.bf16.msrb.mxu0 %v9399_v7  ;;  %v9654_v58 = vld [vmem:[#allocation11 + $0x6d8] sm:$0xf] }
 0x868   : > { %13476 = vst [vmem:[#allocation127_spill] sm:$0xff] %v12451_v10  ;;  %v5423_v31 = vadd.f32 %v5422_v5, %v5334_v57  ;;  %v13478_v5 = vld [vmem:[#allocation47_spill] sm:$0xff] }
 0x86a   : > { %v5512_v38 = vadd.f32 %v5511_v46, %v5423_v31 }
 0x86b   : > { %v5246_v47 = vpop.f32.mrf.mxu2 }
 0x86c   : > { %v5247_v25 = vadd.f32 %v5246_v47, %v12334_v63  ;;  %v5335_v33 = vpop.f32.mrf.mxu3  ;;  %v6817_v47 = vmax.f32 %v5512_v38, 0.0 }
 0x86d   : > { %v5427_v27 = vpop.f32.mrf.mxu0 }
 0x86e   : > { %v5336_v49 = vadd.f32 %v5335_v33, %v5247_v25  ;;  %v5516_v62 = vpop.f32.mrf.mxu1 }
 0x870   : > { %v5425_v43 = vadd.f32 %v5424_v36, %v5336_v49  ;;  %5564 = vmatmul.bf16.gmra.mxu2 %v11514_v19  ;;  %5742 = vmatmul.bf16.gmra.mxu0 %v11710_v29  ;;  %v10353_v49 = vld [vmem:[#allocation11 + $0x6f4] sm:$0xf0] }
 0x871   : > { %5653 = vmatmul.bf16.gmra.mxu3 %v13477_v9  ;;  %5831 = vmatmul.bf16.gmra.mxu1 %v13478_v5  ;;  %v9655_v31 = vor.u32 %v10353_v49, %v9654_v58 }
 0x872   : > { %v5514_v57 = vadd.f32 %v5513_v55, %v5425_v43 }
 0x873   : > { %v5249_v46 = vpop.f32.mrf.mxu2  ;;  %6148 = vmatpush.bf16.msrb.mxu1 %v9655_v31  ;;  %v10217_v31 = vld [vmem:[#allocation11 + $0x2b4] sm:$0xf0] }
 0x874   : > { %v5250_v50 = vadd.f32 %v5249_v46, %v12334_v63  ;;  %v5338_v37 = vpop.f32.mrf.mxu3  ;;  %v6825_v11 = vmax.f32 %v5514_v57, 0.0  ;;  %v13480_v57 = vld [vmem:[#allocation34_spill] sm:$0xff] }
 0x875   : > { %v5429_v21 = vpop.f32.mrf.mxu0 }
 0x876   : > { %v5339_v25 = vadd.f32 %v5338_v37, %v5250_v50  ;;  %v5518_v20 = vpop.f32.mrf.mxu1  ;;  %v12459_v36 = vpack.c.bf16 %v6825_v11, %v6817_v47  ;;  %v13481_v50 = vld [vmem:[#allocation49_spill] sm:$0xff]  ;;  %v13482_v37 = vld [vmem:[#allocation112_spill] sm:$0xff] }
 0x877   : > { %v12465_v5 = vperm.slane %v13482_v37, 5  ;;  %v13483_v47 = vld [vmem:[#allocation33_spill] sm:$0xff] }
 0x878   : > { %13479 = vst [vmem:[#allocation128_spill] sm:$0xff] %v12459_v36  ;;  %v5428_v33 = vadd.f32 %v5427_v27, %v5339_v25  ;;  %v13484_v27 = vld [vmem:[#allocation48_spill] sm:$0xff]  ;;  %v8854_v11 = vld [vmem:[#allocation11 + $0x98] sm:$0xf] }
 0x879   : > { %v10153_v25 = vld [vmem:[#allocation11 + $0xb4] sm:$0xf0] }
 0x87a   : > { %v5517_v18 = vadd.f32 %v5516_v62, %v5428_v33  ;;  %v8855_v49 = vor.u32 %v10153_v25, %v8854_v11  ;;  %v9366_v25 = vld [vmem:[#allocation11 + $0x498] sm:$0xf] }
 0x87b   : > { %v5251_v54 = vpop.f32.mrf.mxu2 }
 0x87c   : > { %v5252_v55 = vadd.f32 %v5251_v54, %v12334_v63  ;;  %v5340_v7 = vpop.f32.mrf.mxu3  ;;  %v9110_v63 = vld [vmem:[#allocation11 + $0x298] sm:$0xf]  ;;  %v6833_v33 = vmax.f32 %v5517_v18, 0.0  ;;  %5882 = vmatpush.bf16.msrb.mxu2 %v8855_v49 }
 0x87d   : > { %v5708_v38 = vpop.f32.mrf.mxu0  ;;  %v10281_v18 = vld [vmem:[#allocation11 + $0x4b4] sm:$0xf0] }
 0x87e   : > { %v5341_v43 = vadd.f32 %v5340_v7, %v5252_v55  ;;  %v5797_v46 = vpop.f32.mrf.mxu1  ;;  %v9111_v55 = vor.u32 %v10217_v31, %v9110_v63 }
 0x880   : > { %v5430_v10 = vadd.f32 %v5429_v21, %v5341_v43  ;;  %5569 = vmatmul.bf16.gmra.mxu2 %v13480_v57  ;;  %5747 = vmatmul.bf16.gmra.mxu0 %v13481_v50 }
 0x881   : > { %5658 = vmatmul.bf16.gmra.mxu3 %v13483_v47  ;;  %5836 = vmatmul.bf16.gmra.mxu1 %v13484_v27 }
 0x882   : > { %v5519_v62 = vadd.f32 %v5518_v20, %v5430_v10  ;;  %5971 = vmatpush.bf16.msrb.mxu3 %v9111_v55 }
 0x883   : > { %v5530_v58 = vpop.f32.mrf.mxu2 }
 0x884   : > { %v5531_v21 = vadd.f32 %v5530_v58, %v12465_v5  ;;  %v5619_v54 = vpop.f32.mrf.mxu3  ;;  %v6841_v7 = vmax.f32 %v5519_v62, 0.0  ;;  %v9367_v58 = vor.u32 %v10281_v18, %v9366_v25 }
 0x885   : > { %v5710_v43 = vpop.f32.mrf.mxu0 }
 0x886   : > { %v5620_v37 = vadd.f32 %v5619_v54, %v5531_v21  ;;  %v5799_v36 = vpop.f32.mrf.mxu1  ;;  %v12470_v47 = vpack.c.bf16 %v6841_v7, %v6833_v33  ;;  %6060 = vmatpush.bf16.msrb.mxu0 %v9367_v58 }
 0x888   : > { %13485 = vst [vmem:[#allocation112_spill] sm:$0xff] %v12470_v47  ;;  %v5709_v10 = vadd.f32 %v5708_v38, %v5620_v37 }
 0x88a   : > { %v5798_v20 = vadd.f32 %v5797_v46, %v5709_v10  ;;  %v9622_v46 = vld [vmem:[#allocation11 + $0x698] sm:$0xf] }
 0x88b   : > { %v5532_v27 = vpop.f32.mrf.mxu2 }
 0x88c   : > { %v5533_v50 = vadd.f32 %v5532_v27, %v12465_v5  ;;  %v5621_v11 = vpop.f32.mrf.mxu3  ;;  %v10345_v27 = vld [vmem:[#allocation11 + $0x6b4] sm:$0xf0]  ;;  %v6594_v33 = vmax.f32 %v5798_v20, 0.0 }
 0x88d   : > { %v5713_v57 = vpop.f32.mrf.mxu0  ;;  %v9623_v31 = vor.u32 %v10345_v27, %v9622_v46  ;;  %v13488_v46 = vld [vmem:[#allocation50_spill] sm:$0xff] }
 0x88e   : > { %v5622_v9 = vadd.f32 %v5621_v11, %v5533_v50  ;;  %v5802_v63 = vpop.f32.mrf.mxu1 }
 0x88f   : > { %6149 = vmatpush.bf16.msrb.mxu1 %v9623_v31 }
 0x890   : > { %v5711_v62 = vadd.f32 %v5710_v43, %v5622_v9  ;;  %5574 = vmatmul.bf16.gmra.mxu2 %v11538_v52  ;;  %5752 = vmatmul.bf16.gmra.mxu0 %v11734_v1 }
 0x891   : > { %5663 = vmatmul.bf16.gmra.mxu3 %v11530_v2  ;;  %5841 = vmatmul.bf16.gmra.mxu1 %v11726_v17 }
 0x892   : > { %v5800_v38 = vadd.f32 %v5799_v36, %v5711_v62 }
 0x893   : > { %v5535_v49 = vpop.f32.mrf.mxu2 }
 0x894   : > { %v6602_v21 = vmax.f32 %v5800_v38, 0.0  ;;  %v5536_v50 = vadd.f32 %v5535_v49, %v12465_v5  ;;  %v5624_v54 = vpop.f32.mrf.mxu3  ;;  %v13487_v38 = vld [vmem:[#allocation35_spill] sm:$0xff]  ;;  %v8822_v49 = vld [vmem:[#allocation11 + $0x58] sm:$0xf] }
 0x895   : > { %v5715_v55 = vpop.f32.mrf.mxu0 }
 0x896   : > { %v12478_v9 = vpack.c.bf16 %v6602_v21, %v6594_v33  ;;  %v5625_v7 = vadd.f32 %v5624_v54, %v5536_v50  ;;  %v5804_v43 = vpop.f32.mrf.mxu1  ;;  %v10209_v21 = vld [vmem:[#allocation11 + $0x274] sm:$0xf0] }
 0x898   : > { %13486 = vst [vmem:[#allocation129_spill] sm:$0xff] %v12478_v9  ;;  %v5714_v37 = vadd.f32 %v5713_v57, %v5625_v7  ;;  %v10145_v57 = vld [vmem:[#allocation11 + $0x74] sm:$0xf0] }
 0x899   : > { %v8823_v33 = vor.u32 %v10145_v57, %v8822_v49  ;;  %v9334_v57 = vld [vmem:[#allocation11 + $0x458] sm:$0xf] }
 0x89a   : > { %v5803_v10 = vadd.f32 %v5802_v63, %v5714_v37  ;;  %v9078_v63 = vld [vmem:[#allocation11 + $0x258] sm:$0xf] }
 0x89b   : > { %v5537_v11 = vpop.f32.mrf.mxu2  ;;  %5883 = vmatpush.bf16.msrb.mxu2 %v8823_v33 }
 0x89c   : > { %v5538_v36 = vadd.f32 %v5537_v11, %v12465_v5  ;;  %v5626_v25 = vpop.f32.mrf.mxu3  ;;  %v6610_v50 = vmax.f32 %v5803_v10, 0.0  ;;  %v10273_v10 = vld [vmem:[#allocation11 + $0x474] sm:$0xf0] }
 0x89d   : > { %v5718_v18 = vpop.f32.mrf.mxu0 }
 0x89e   : > { %v5627_v58 = vadd.f32 %v5626_v25, %v5538_v36  ;;  %v5807_v62 = vpop.f32.mrf.mxu1 }
 0x8a0   : > { %v5716_v20 = vadd.f32 %v5715_v55, %v5627_v58  ;;  %5579 = vmatmul.bf16.gmra.mxu2 %v11550_v23  ;;  %5757 = vmatmul.bf16.gmra.mxu0 %v11746_v41  ;;  %v9079_v55 = vor.u32 %v10209_v21, %v9078_v63 }
 0x8a1   : > { %5668 = vmatmul.bf16.gmra.mxu3 %v13487_v38  ;;  %5846 = vmatmul.bf16.gmra.mxu1 %v13488_v46 }
 0x8a2   : > { %v5805_v27 = vadd.f32 %v5804_v43, %v5716_v20  ;;  %5972 = vmatpush.bf16.msrb.mxu3 %v9079_v55 }
 0x8a3   : > { %v5540_v31 = vpop.f32.mrf.mxu2 }
 0x8a4   : > { %v5541_v54 = vadd.f32 %v5540_v31, %v12465_v5  ;;  %v5629_v7 = vpop.f32.mrf.mxu3  ;;  %v6618_v37 = vmax.f32 %v5805_v27, 0.0  ;;  %v9335_v31 = vor.u32 %v10273_v10, %v9334_v57 }
 0x8a5   : > { %v5720_v11 = vpop.f32.mrf.mxu0 }
 0x8a6   : > { %v5630_v36 = vadd.f32 %v5629_v7, %v5541_v54  ;;  %v5809_v25 = vpop.f32.mrf.mxu1  ;;  %v12486_v58 = vpack.c.bf16 %v6618_v37, %v6610_v50  ;;  %6061 = vmatpush.bf16.msrb.mxu0 %v9335_v31 }
 0x8a8   : > { %13489 = vst [vmem:[#allocation130_spill] sm:$0xff] %v12486_v58  ;;  %v5719_v43 = vadd.f32 %v5718_v18, %v5630_v36 }
 0x8aa   : > { %v5808_v20 = vadd.f32 %v5807_v62, %v5719_v43  ;;  %v9590_v62 = vld [vmem:[#allocation11 + $0x658] sm:$0xf] }
 0x8ab   : > { %v5542_v47 = vpop.f32.mrf.mxu2 }
 0x8ac   : > { %v5543_v9 = vadd.f32 %v5542_v47, %v12465_v5  ;;  %v5631_v49 = vpop.f32.mrf.mxu3  ;;  %v10337_v47 = vld [vmem:[#allocation11 + $0x674] sm:$0xf0]  ;;  %v6626_v50 = vmax.f32 %v5808_v20, 0.0 }
 0x8ad   : > { %v5723_v46 = vpop.f32.mrf.mxu0  ;;  %v9591_v21 = vor.u32 %v10337_v47, %v9590_v62  ;;  %v8790_v62 = vld [vmem:[#allocation11 + $0x18] sm:$0xf] }
 0x8ae   : > { %v5632_v38 = vadd.f32 %v5631_v49, %v5543_v9  ;;  %v5812_v63 = vpop.f32.mrf.mxu1 }
 0x8af   : > { %6150 = vmatpush.bf16.msrb.mxu1 %v9591_v21  ;;  %v10201_v21 = vld [vmem:[#allocation11 + $0x234] sm:$0xf0] }
 0x8b0   : > { %v5721_v27 = vadd.f32 %v5720_v11, %v5632_v38  ;;  %5584 = vmatmul.bf16.gmra.mxu2 %v11562_v34  ;;  %5762 = vmatmul.bf16.gmra.mxu0 %v11758_v22 }
 0x8b1   : > { %5673 = vmatmul.bf16.gmra.mxu3 %v11554_v14  ;;  %5851 = vmatmul.bf16.gmra.mxu1 %v11750_v32 }
 0x8b2   : > { %v5810_v18 = vadd.f32 %v5809_v25, %v5721_v27 }
 0x8b3   : > { %v5545_v33 = vpop.f32.mrf.mxu2 }
 0x8b4   : > { %v5546_v54 = vadd.f32 %v5545_v33, %v12465_v5  ;;  %v5634_v9 = vpop.f32.mrf.mxu3  ;;  %v6634_v7 = vmax.f32 %v5810_v18, 0.0 }
 0x8b5   : > { %v5725_v55 = vpop.f32.mrf.mxu0 }
 0x8b6   : > { %v5635_v38 = vadd.f32 %v5634_v9, %v5546_v54  ;;  %v5814_v37 = vpop.f32.mrf.mxu1  ;;  %v12494_v11 = vpack.c.bf16 %v6634_v7, %v6626_v50 }
 0x8b8   : > { %13490 = vst [vmem:[#allocation131_spill] sm:$0xff] %v12494_v11  ;;  %v5724_v36 = vadd.f32 %v5723_v46, %v5635_v38  ;;  %v10137_v46 = vld [vmem:[#allocation11 + $0x34] sm:$0xf0] }
 0x8b9   : > { %v8791_v33 = vor.u32 %v10137_v46, %v8790_v62  ;;  %v9302_v46 = vld [vmem:[#allocation11 + $0x418] sm:$0xf] }
 0x8ba   : > { %v5813_v43 = vadd.f32 %v5812_v63, %v5724_v36  ;;  %v9046_v63 = vld [vmem:[#allocation11 + $0x218] sm:$0xf] }
 0x8bb   : > { %v5547_v49 = vpop.f32.mrf.mxu2  ;;  %v9047_v7 = vor.u32 %v10201_v21, %v9046_v63  ;;  %5884 = vmatpush.bf16.msrb.mxu2 %v8791_v33  ;;  %v10329_v33 = vld [vmem:[#allocation11 + $0x634] sm:$0xf0] }
 0x8bc   : > { %v5548_v25 = vadd.f32 %v5547_v49, %v12465_v5  ;;  %v5636_v57 = vpop.f32.mrf.mxu3  ;;  %v6642_v50 = vmax.f32 %v5813_v43, 0.0  ;;  %v10265_v43 = vld [vmem:[#allocation11 + $0x434] sm:$0xf0] }
 0x8bd   : > { %v5728_v10 = vpop.f32.mrf.mxu0  ;;  %5973 = vmatpush.bf16.msrb.mxu3 %v9047_v7 }
 0x8be   : > { %v5637_v31 = vadd.f32 %v5636_v57, %v5548_v25  ;;  %v5817_v27 = vpop.f32.mrf.mxu1 }
 0x8c0   : > { %v5726_v20 = vadd.f32 %v5725_v55, %v5637_v31  ;;  %5589 = vmatmul.bf16.gmra.mxu2 %v11574_v45  ;;  %5767 = vmatmul.bf16.gmra.mxu0 %v11770_v56 }
 0x8c1   : > { %5678 = vmatmul.bf16.gmra.mxu3 %v11566_v39  ;;  %5856 = vmatmul.bf16.gmra.mxu1 %v11762_v15 }
 0x8c2   : > { %v5815_v18 = vadd.f32 %v5814_v37, %v5726_v20 }
 0x8c3   : > { %v5550_v47 = vpop.f32.mrf.mxu2 }
 0x8c4   : > { %v5551_v54 = vadd.f32 %v5550_v47, %v12465_v5  ;;  %v5639_v9 = vpop.f32.mrf.mxu3  ;;  %v6650_v55 = vmax.f32 %v5815_v18, 0.0  ;;  %v9303_v47 = vor.u32 %v10265_v43, %v9302_v46 }
 0x8c5   : > { %v5730_v38 = vpop.f32.mrf.mxu0 }
 0x8c6   : > { %v5640_v36 = vadd.f32 %v5639_v9, %v5551_v54  ;;  %v5819_v49 = vpop.f32.mrf.mxu1  ;;  %v12502_v25 = vpack.c.bf16 %v6650_v55, %v6642_v50  ;;  %6062 = vmatpush.bf16.msrb.mxu0 %v9303_v47 }
 0x8c8   : > { %13491 = vst [vmem:[#allocation132_spill] sm:$0xff] %v12502_v25  ;;  %v5729_v37 = vadd.f32 %v5728_v10, %v5640_v36 }
 0x8ca   : > { %v5818_v57 = vadd.f32 %v5817_v27, %v5729_v37  ;;  %v9558_v27 = vld [vmem:[#allocation11 + $0x618] sm:$0xf] }
 0x8cb   : > { %v5552_v31 = vpop.f32.mrf.mxu2  ;;  %v9559_v50 = vor.u32 %v10329_v33, %v9558_v27  ;;  %v10189_v27 = vld [vmem:[#allocation11 + $0x1dc] sm:$0xf] }
 0x8cc   : > { %v5553_v20 = vadd.f32 %v5552_v31, %v12465_v5  ;;  %v5641_v62 = vpop.f32.mrf.mxu3  ;;  %v6658_v54 = vmax.f32 %v5818_v57, 0.0 }
 0x8cd   : > { %v5733_v11 = vpop.f32.mrf.mxu0  ;;  %6151 = vmatpush.bf16.msrb.mxu1 %v9559_v50  ;;  %v9272_v50 = vld [vmem:[#allocation11 + $0x3f8] sm:$0xf0] }
 0x8ce   : > { %v5642_v58 = vadd.f32 %v5641_v62, %v5553_v20  ;;  %v5822_v63 = vpop.f32.mrf.mxu1 }
 0x8d0   : > { %v5731_v18 = vadd.f32 %v5730_v38, %v5642_v58  ;;  %5594 = vmatmul.bf16.gmra.mxu2 %v11586_v42  ;;  %5772 = vmatmul.bf16.gmra.mxu0 %v11782_v30 }
 0x8d1   : > { %5683 = vmatmul.bf16.gmra.mxu3 %v11578_v44  ;;  %5861 = vmatmul.bf16.gmra.mxu1 %v11774_v6 }
 0x8d2   : > { %v5820_v10 = vadd.f32 %v5819_v49, %v5731_v18 }
 0x8d3   : > { %v5555_v21 = vpop.f32.mrf.mxu2 }
 0x8d4   : > { %v5556_v9 = vadd.f32 %v5555_v21, %v12465_v5  ;;  %v5644_v7 = vpop.f32.mrf.mxu3  ;;  %v6666_v55 = vmax.f32 %v5820_v10, 0.0 }
 0x8d5   : > { %v5735_v36 = vpop.f32.mrf.mxu0 }
 0x8d6   : > { %v5645_v58 = vadd.f32 %v5644_v7, %v5556_v9  ;;  %v5824_v38 = vpop.f32.mrf.mxu1  ;;  %v12510_v37 = vpack.c.bf16 %v6666_v55, %v6658_v54 }
 0x8d8   : > { %13492 = vst [vmem:[#allocation133_spill] sm:$0xff] %v12510_v37  ;;  %v5734_v31 = vadd.f32 %v5733_v11, %v5645_v58  ;;  %v9016_v11 = vld [vmem:[#allocation11 + $0x1f8] sm:$0xf0] }
 0x8d9   : > { %v9019_v21 = vor.u32 %v10189_v27, %v9016_v11  ;;  %v10317_v11 = vld [vmem:[#allocation11 + $0x5dc] sm:$0xf] }
 0x8da   : > { %v5823_v20 = vadd.f32 %v5822_v63, %v5734_v31  ;;  %v10253_v63 = vld [vmem:[#allocation11 + $0x3dc] sm:$0xf] }
 0x8db   : > { %v5557_v62 = vpop.f32.mrf.mxu2  ;;  %v9275_v55 = vor.u32 %v10253_v63, %v9272_v50  ;;  %6233 = vmatpush.bf16.msra.mxu2 %v9019_v21  ;;  %v9784_v21 = vld [vmem:[#allocation11 + $0x7f8] sm:$0xf0] }
 0x8dc   : > { %v5558_v49 = vadd.f32 %v5557_v62, %v12465_v5  ;;  %v5646_v46 = vpop.f32.mrf.mxu3  ;;  %v6674_v54 = vmax.f32 %v5823_v20, 0.0  ;;  %v9528_v20 = vld [vmem:[#allocation11 + $0x5f8] sm:$0xf0] }
 0x8dd   : > { %v5738_v43 = vpop.f32.mrf.mxu0  ;;  %6322 = vmatpush.bf16.msra.mxu3 %v9275_v55 }
 0x8de   : > { %v5647_v47 = vadd.f32 %v5646_v46, %v5558_v49  ;;  %v5827_v18 = vpop.f32.mrf.mxu1 }
 0x8e0   : > { %v5736_v57 = vadd.f32 %v5735_v36, %v5647_v47  ;;  %5599 = vmatmul.bf16.gmra.mxu2 %v11598_v26  ;;  %5777 = vmatmul.bf16.gmra.mxu0 %v11794_v12 }
 0x8e1   : > { %5688 = vmatmul.bf16.gmra.mxu3 %v11590_v59  ;;  %5866 = vmatmul.bf16.gmra.mxu1 %v11786_v13 }
 0x8e2   : > { %v5825_v10 = vadd.f32 %v5824_v38, %v5736_v57 }
 0x8e3   : > { %v5560_v33 = vpop.f32.mrf.mxu2 }
 0x8e4   : > { %v5561_v9 = vadd.f32 %v5560_v33, %v12465_v5  ;;  %v5649_v7 = vpop.f32.mrf.mxu3  ;;  %v6682_v36 = vmax.f32 %v5825_v10, 0.0  ;;  %v9531_v33 = vor.u32 %v10317_v11, %v9528_v20 }
 0x8e5   : > { %v5740_v58 = vpop.f32.mrf.mxu0 }
 0x8e6   : > { %v5650_v31 = vadd.f32 %v5649_v7, %v5561_v9  ;;  %v5829_v62 = vpop.f32.mrf.mxu1  ;;  %v12518_v49 = vpack.c.bf16 %v6682_v36, %v6674_v54  ;;  %6411 = vmatpush.bf16.msra.mxu0 %v9531_v33 }
 0x8e8   : > { %13493 = vst [vmem:[#allocation134_spill] sm:$0xff] %v12518_v49  ;;  %v5739_v38 = vadd.f32 %v5738_v43, %v5650_v31 }
 0x8ea   : > { %v5828_v46 = vadd.f32 %v5827_v18, %v5739_v38  ;;  %v10381_v18 = vld [vmem:[#allocation11 + $0x7dc] sm:$0xf] }
 0x8eb   : > { %v5562_v47 = vpop.f32.mrf.mxu2  ;;  %v9787_v54 = vor.u32 %v10381_v18, %v9784_v21  ;;  %v13496_v18 = vld [vmem:[#allocation36_spill] sm:$0xff] }
 0x8ec   : > { %v5563_v57 = vadd.f32 %v5562_v47, %v12465_v5  ;;  %v5651_v27 = vpop.f32.mrf.mxu3  ;;  %v6690_v9 = vmax.f32 %v5828_v46, 0.0 }
 0x8ed   : > { %v5743_v37 = vpop.f32.mrf.mxu0  ;;  %6500 = vmatpush.bf16.msra.mxu1 %v9787_v54 }
 0x8ee   : > { %v5652_v25 = vadd.f32 %v5651_v27, %v5563_v57  ;;  %v5832_v63 = vpop.f32.mrf.mxu1 }
 0x8f0   : > { %v5741_v10 = vadd.f32 %v5740_v58, %v5652_v25  ;;  %5604 = vmatmul.bf16.gmra.mxu2 %v11614_v16  ;;  %5782 = vmatmul.bf16.gmra.mxu0 %v11810_v4 }
 0x8f1   : > { %5693 = vmatmul.bf16.gmra.mxu3 %v11604_v40  ;;  %5871 = vmatmul.bf16.gmra.mxu1 %v11798_v60 }
 0x8f2   : > { %v5830_v43 = vadd.f32 %v5829_v62, %v5741_v10 }
 0x8f3   : > { %v5565_v50 = vpop.f32.mrf.mxu2 }
 0x8f4   : > { %v5566_v7 = vadd.f32 %v5565_v50, %v12465_v5  ;;  %v5654_v55 = vpop.f32.mrf.mxu3  ;;  %v6698_v36 = vmax.f32 %v5830_v43, 0.0  ;;  %v13495_v43 = vld [vmem:[#allocation23_spill] sm:$0xff]  ;;  %v10181_v50 = vld [vmem:[#allocation11 + $0x19c] sm:$0xf] }
 0x8f5   : > { %v5745_v31 = vpop.f32.mrf.mxu0 }
 0x8f6   : > { %v5655_v25 = vadd.f32 %v5654_v55, %v5566_v7  ;;  %v5834_v58 = vpop.f32.mrf.mxu1  ;;  %v12526_v38 = vpack.c.bf16 %v6698_v36, %v6690_v9  ;;  %v9240_v7 = vld [vmem:[#allocation11 + $0x3b8] sm:$0xf0] }
 0x8f8   : > { %13494 = vst [vmem:[#allocation135_spill] sm:$0xff] %v12526_v38  ;;  %v5744_v47 = vadd.f32 %v5743_v37, %v5655_v25  ;;  %v8984_v37 = vld [vmem:[#allocation11 + $0x1b8] sm:$0xf0] }
 0x8f9   : > { %v8987_v9 = vor.u32 %v10181_v50, %v8984_v37  ;;  %v10309_v37 = vld [vmem:[#allocation11 + $0x59c] sm:$0xf] }
 0x8fa   : > { %v5833_v57 = vadd.f32 %v5832_v63, %v5744_v47  ;;  %v10245_v63 = vld [vmem:[#allocation11 + $0x39c] sm:$0xf] }
 0x8fb   : > { %v5567_v27 = vpop.f32.mrf.mxu2  ;;  %6234 = vmatpush.bf16.msra.mxu2 %v8987_v9 }
 0x8fc   : > { %v5568_v62 = vadd.f32 %v5567_v27, %v12465_v5  ;;  %v5656_v11 = vpop.f32.mrf.mxu3  ;;  %v6706_v55 = vmax.f32 %v5833_v57, 0.0  ;;  %v9496_v57 = vld [vmem:[#allocation11 + $0x5b8] sm:$0xf0] }
 0x8fd   : > { %v5748_v20 = vpop.f32.mrf.mxu0 }
 0x8fe   : > { %v5657_v33 = vadd.f32 %v5656_v11, %v5568_v62  ;;  %v5837_v10 = vpop.f32.mrf.mxu1 }
 0x900   : > { %v5746_v46 = vadd.f32 %v5745_v31, %v5657_v33  ;;  %5885 = vmatmul.bf16.vlgmr.msrb.gmra.mxu2 %v11430_v3  ;;  %6063 = vmatmul.bf16.vlgmr.msrb.gmra.mxu0 %v11626_v24  ;;  %v9243_v31 = vor.u32 %v10245_v63, %v9240_v7 }
 0x901   : > { %5974 = vmatmul.bf16.vlgmr.msrb.gmra.mxu3 %v13495_v43  ;;  %6152 = vmatmul.bf16.vlgmr.msrb.gmra.mxu1 %v13496_v18 }
 0x902   : > { %v5835_v21 = vadd.f32 %v5834_v58, %v5746_v46  ;;  %6323 = vmatpush.bf16.msra.mxu3 %v9243_v31 }
 0x903   : > { %v5570_v54 = vpop.f32.mrf.mxu2 }
 0x904   : > { %v5571_v36 = vadd.f32 %v5570_v54, %v12465_v5  ;;  %v5659_v25 = vpop.f32.mrf.mxu3  ;;  %v6714_v47 = vmax.f32 %v5835_v21, 0.0  ;;  %v9499_v54 = vor.u32 %v10309_v37, %v9496_v57 }
 0x905   : > { %v5750_v27 = vpop.f32.mrf.mxu0 }
 0x906   : > { %v5660_v62 = vadd.f32 %v5659_v25, %v5571_v36  ;;  %v5839_v11 = vpop.f32.mrf.mxu1  ;;  %v12534_v33 = vpack.c.bf16 %v6714_v47, %v6706_v55  ;;  %6412 = vmatpush.bf16.msra.mxu0 %v9499_v54 }
 0x908   : > { %13497 = vst [vmem:[#allocation136_spill] sm:$0xff] %v12534_v33  ;;  %v5749_v58 = vadd.f32 %v5748_v20, %v5660_v62 }
 0x90a   : > { %v5838_v46 = vadd.f32 %v5837_v10, %v5749_v58  ;;  %v10373_v10 = vld [vmem:[#allocation11 + $0x79c] sm:$0xf] }
 0x90b   : > { %v5572_v38 = vpop.f32.mrf.mxu2 }
 0x90c   : > { %v5573_v49 = vadd.f32 %v5572_v38, %v12465_v5  ;;  %v5661_v50 = vpop.f32.mrf.mxu3  ;;  %v9752_v38 = vld [vmem:[#allocation11 + $0x7b8] sm:$0xf0]  ;;  %v6722_v55 = vmax.f32 %v5838_v46, 0.0 }
 0x90d   : > { %v5753_v18 = vpop.f32.mrf.mxu0  ;;  %v9755_v7 = vor.u32 %v10373_v10, %v9752_v38  ;;  %v13499_v10 = vld [vmem:[#allocation25_spill] sm:$0xff]  ;;  %v13500_v38 = vld [vmem:[#allocation39_spill] sm:$0xff] }
 0x90e   : > { %v5662_v43 = vadd.f32 %v5661_v50, %v5573_v49  ;;  %v5842_v63 = vpop.f32.mrf.mxu1 }
 0x90f   : > { %6501 = vmatpush.bf16.msra.mxu1 %v9755_v7 }
 0x910   : > { %v5751_v21 = vadd.f32 %v5750_v27, %v5662_v43  ;;  %5890 = vmatmul.bf16.gmra.mxu2 %v11442_v61  ;;  %6068 = vmatmul.bf16.gmra.mxu0 %v11638_v51 }
 0x911   : > { %5979 = vmatmul.bf16.gmra.mxu3 %v11434_v35  ;;  %6157 = vmatmul.bf16.gmra.mxu1 %v13283_v53 }
 0x912   : > { %v5840_v20 = vadd.f32 %v5839_v11, %v5751_v21 }
 0x913   : > { %v5575_v9 = vpop.f32.mrf.mxu2 }
 0x914   : > { %v5576_v36 = vadd.f32 %v5575_v9, %v12465_v5  ;;  %v5664_v49 = vpop.f32.mrf.mxu3  ;;  %v6730_v25 = vmax.f32 %v5840_v20, 0.0  ;;  %v13501_v20 = vld [vmem:[#allocation24_spill] sm:$0xff]  ;;  %v13502_v9 = vld [vmem:[#allocation38_spill] sm:$0xff] }
 0x915   : > { %v5755_v31 = vpop.f32.mrf.mxu0 }
 0x916   : > { %v5665_v43 = vadd.f32 %v5664_v49, %v5576_v36  ;;  %v5844_v47 = vpop.f32.mrf.mxu1  ;;  %v12542_v27 = vpack.c.bf16 %v6730_v25, %v6722_v55  ;;  %v10173_v55 = vld [vmem:[#allocation11 + $0x15c] sm:$0xf] }
 0x917   : > { %v9208_v25 = vld [vmem:[#allocation11 + $0x378] sm:$0xf0] }
 0x918   : > { %13498 = vst [vmem:[#allocation137_spill] sm:$0xff] %v12542_v27  ;;  %v5754_v62 = vadd.f32 %v5753_v18, %v5665_v43  ;;  %v8952_v18 = vld [vmem:[#allocation11 + $0x178] sm:$0xf0] }
 0x919   : > { %v8955_v49 = vor.u32 %v10173_v55, %v8952_v18  ;;  %v10301_v18 = vld [vmem:[#allocation11 + $0x55c] sm:$0xf] }
 0x91a   : > { %v5843_v58 = vadd.f32 %v5842_v63, %v5754_v62  ;;  %v10237_v63 = vld [vmem:[#allocation11 + $0x35c] sm:$0xf] }
 0x91b   : > { %v5577_v50 = vpop.f32.mrf.mxu2  ;;  %6235 = vmatpush.bf16.msra.mxu2 %v8955_v49  ;;  %v10365_v49 = vld [vmem:[#allocation11 + $0x75c] sm:$0xf] }
 0x91c   : > { %v5578_v11 = vadd.f32 %v5577_v50, %v12465_v5  ;;  %v5666_v37 = vpop.f32.mrf.mxu3  ;;  %v6738_v43 = vmax.f32 %v5843_v58, 0.0  ;;  %v9464_v58 = vld [vmem:[#allocation11 + $0x578] sm:$0xf0] }
 0x91d   : > { %v5758_v57 = vpop.f32.mrf.mxu0 }
 0x91e   : > { %v5667_v54 = vadd.f32 %v5666_v37, %v5578_v11  ;;  %v5847_v21 = vpop.f32.mrf.mxu1 }
 0x920   : > { %v5756_v46 = vadd.f32 %v5755_v31, %v5667_v54  ;;  %5895 = vmatmul.bf16.gmra.mxu2 %v13499_v10  ;;  %6073 = vmatmul.bf16.gmra.mxu0 %v13500_v38  ;;  %v9211_v31 = vor.u32 %v10237_v63, %v9208_v25 }
 0x921   : > { %5984 = vmatmul.bf16.gmra.mxu3 %v13501_v20  ;;  %6162 = vmatmul.bf16.gmra.mxu1 %v13502_v9 }
 0x922   : > { %v5845_v7 = vadd.f32 %v5844_v47, %v5756_v46  ;;  %6324 = vmatpush.bf16.msra.mxu3 %v9211_v31 }
 0x923   : > { %v5580_v36 = vpop.f32.mrf.mxu2 }
 0x924   : > { %v5581_v62 = vadd.f32 %v5580_v36, %v12465_v5  ;;  %v5669_v50 = vpop.f32.mrf.mxu3  ;;  %v6746_v11 = vmax.f32 %v5845_v7, 0.0  ;;  %v9467_v36 = vor.u32 %v10301_v18, %v9464_v58 }
 0x925   : > { %v5760_v37 = vpop.f32.mrf.mxu0 }
 0x926   : > { %v5670_v54 = vadd.f32 %v5669_v50, %v5581_v62  ;;  %v5849_v27 = vpop.f32.mrf.mxu1  ;;  %v12550_v33 = vpack.c.bf16 %v6746_v11, %v6738_v43  ;;  %6413 = vmatpush.bf16.msra.mxu0 %v9467_v36 }
 0x928   : > { %13503 = vst [vmem:[#allocation138_spill] sm:$0xff] %v12550_v33  ;;  %v5759_v47 = vadd.f32 %v5758_v57, %v5670_v54  ;;  %v13504_v57 = vld [vmem:[#allocation40_spill] sm:$0xff] }
 0x92a   : > { %v5848_v46 = vadd.f32 %v5847_v21, %v5759_v47 }
 0x92b   : > { %v5582_v9 = vpop.f32.mrf.mxu2 }
 0x92c   : > { %v5583_v20 = vadd.f32 %v5582_v9, %v12465_v5  ;;  %v5671_v55 = vpop.f32.mrf.mxu3  ;;  %v9720_v9 = vld [vmem:[#allocation11 + $0x778] sm:$0xf0]  ;;  %v6754_v62 = vmax.f32 %v5848_v46, 0.0 }
 0x92d   : > { %v5763_v38 = vpop.f32.mrf.mxu0  ;;  %v9723_v43 = vor.u32 %v10365_v49, %v9720_v9  ;;  %v13506_v9 = vld [vmem:[#allocation27_spill] sm:$0xff] }
 0x92e   : > { %v5672_v10 = vadd.f32 %v5671_v55, %v5583_v20  ;;  %v5852_v63 = vpop.f32.mrf.mxu1 }
 0x92f   : > { %6502 = vmatpush.bf16.msra.mxu1 %v9723_v43  ;;  %v13509_v43 = vld [vmem:[#allocation41_spill] sm:$0xff] }
 0x930   : > { %v5761_v7 = vadd.f32 %v5760_v37, %v5672_v10  ;;  %5900 = vmatmul.bf16.gmra.mxu2 %v11466_v8  ;;  %6078 = vmatmul.bf16.gmra.mxu0 %v11662_v28 }
 0x931   : > { %5989 = vmatmul.bf16.gmra.mxu3 %v11458_v48  ;;  %6167 = vmatmul.bf16.gmra.mxu1 %v13504_v57 }
 0x932   : > { %v5850_v21 = vadd.f32 %v5849_v27, %v5761_v7 }
 0x933   : > { %v5585_v25 = vpop.f32.mrf.mxu2 }
 0x934   : > { %v5586_v50 = vadd.f32 %v5585_v25, %v12465_v5  ;;  %v5674_v20 = vpop.f32.mrf.mxu3  ;;  %v6762_v31 = vmax.f32 %v5850_v21, 0.0  ;;  %v13507_v25 = vld [vmem:[#allocation42_spill] sm:$0xff] }
 0x935   : > { %v5765_v11 = vpop.f32.mrf.mxu0  ;;  %v13508_v21 = vld [vmem:[#allocation26_spill] sm:$0xff] }
 0x936   : > { %v5675_v10 = vadd.f32 %v5674_v20, %v5586_v50  ;;  %v5854_v37 = vpop.f32.mrf.mxu1  ;;  %v12558_v54 = vpack.c.bf16 %v6762_v31, %v6754_v62  ;;  %v10165_v50 = vld [vmem:[#allocation11 + $0x11c] sm:$0xf] }
 0x938   : > { %13505 = vst [vmem:[#allocation139_spill] sm:$0xff] %v12558_v54  ;;  %v5764_v47 = vadd.f32 %v5763_v38, %v5675_v10  ;;  %v8920_v38 = vld [vmem:[#allocation11 + $0x138] sm:$0xf0] }
 0x939   : > { %v8923_v31 = vor.u32 %v10165_v50, %v8920_v38  ;;  %v9176_v10 = vld [vmem:[#allocation11 + $0x338] sm:$0xf0] }
 0x93a   : > { %v5853_v55 = vadd.f32 %v5852_v63, %v5764_v47  ;;  %v10229_v63 = vld [vmem:[#allocation11 + $0x31c] sm:$0xf] }
 0x93b   : > { %v5587_v18 = vpop.f32.mrf.mxu2  ;;  %6236 = vmatpush.bf16.msra.mxu2 %v8923_v31  ;;  %v10293_v38 = vld [vmem:[#allocation11 + $0x51c] sm:$0xf]  ;;  %v13511_v31 = vld [vmem:[#allocation44_spill] sm:$0xff] }
 0x93c   : > { %v5588_v27 = vadd.f32 %v5587_v18, %v12465_v5  ;;  %v5676_v58 = vpop.f32.mrf.mxu3  ;;  %v6770_v47 = vmax.f32 %v5853_v55, 0.0  ;;  %v9432_v55 = vld [vmem:[#allocation11 + $0x538] sm:$0xf0] }
 0x93d   : > { %v5768_v36 = vpop.f32.mrf.mxu0 }
 0x93e   : > { %v5677_v7 = vadd.f32 %v5676_v58, %v5588_v27  ;;  %v5857_v49 = vpop.f32.mrf.mxu1 }
 0x940   : > { %v5766_v46 = vadd.f32 %v5765_v11, %v5677_v7  ;;  %5905 = vmatmul.bf16.gmra.mxu2 %v13506_v9  ;;  %6083 = vmatmul.bf16.gmra.mxu0 %v13507_v25  ;;  %v9179_v11 = vor.u32 %v10229_v63, %v9176_v10  ;;  %v13512_v10 = vld [vmem:[#allocation28_spill] sm:$0xff] }
 0x941   : > { %5994 = vmatmul.bf16.gmra.mxu3 %v13508_v21  ;;  %6172 = vmatmul.bf16.gmra.mxu1 %v13509_v43 }
 0x942   : > { %v5855_v62 = vadd.f32 %v5854_v37, %v5766_v46  ;;  %6325 = vmatpush.bf16.msra.mxu3 %v9179_v11 }
 0x943   : > { %v5590_v20 = vpop.f32.mrf.mxu2 }
 0x944   : > { %v5591_v18 = vadd.f32 %v5590_v20, %v12465_v5  ;;  %v5679_v27 = vpop.f32.mrf.mxu3  ;;  %v6778_v58 = vmax.f32 %v5855_v62, 0.0  ;;  %v9435_v20 = vor.u32 %v10293_v38, %v9432_v55 }
 0x945   : > { %v5770_v7 = vpop.f32.mrf.mxu0 }
 0x946   : > { %v5680_v54 = vadd.f32 %v5679_v27, %v5591_v18  ;;  %v5859_v33 = vpop.f32.mrf.mxu1  ;;  %v12566_v21 = vpack.c.bf16 %v6778_v58, %v6770_v47  ;;  %6414 = vmatpush.bf16.msra.mxu0 %v9435_v20 }
 0x948   : > { %13510 = vst [vmem:[#allocation140_spill] sm:$0xff] %v12566_v21  ;;  %v5769_v37 = vadd.f32 %v5768_v36, %v5680_v54  ;;  %v13513_v54 = vld [vmem:[#allocation43_spill] sm:$0xff] }
 0x94a   : > { %v5858_v46 = vadd.f32 %v5857_v49, %v5769_v37  ;;  %v10357_v49 = vld [vmem:[#allocation11 + $0x71c] sm:$0xf] }
 0x94b   : > { %v5592_v43 = vpop.f32.mrf.mxu2 }
 0x94c   : > { %v5593_v25 = vadd.f32 %v5592_v43, %v12465_v5  ;;  %v5681_v50 = vpop.f32.mrf.mxu3  ;;  %v9688_v43 = vld [vmem:[#allocation11 + $0x738] sm:$0xf0]  ;;  %v6786_v27 = vmax.f32 %v5858_v46, 0.0 }
 0x94d   : > { %v5773_v9 = vpop.f32.mrf.mxu0  ;;  %v9691_v18 = vor.u32 %v10357_v49, %v9688_v43  ;;  %v13515_v43 = vld [vmem:[#allocation31_spill] sm:$0xff] }
 0x94e   : > { %v5682_v57 = vadd.f32 %v5681_v50, %v5593_v25  ;;  %v5862_v63 = vpop.f32.mrf.mxu1 }
 0x94f   : > { %6503 = vmatpush.bf16.msra.mxu1 %v9691_v18  ;;  %v13518_v18 = vld [vmem:[#allocation45_spill] sm:$0xff] }
 0x950   : > { %v5771_v62 = vadd.f32 %v5770_v7, %v5682_v57  ;;  %5910 = vmatmul.bf16.gmra.mxu2 %v13268_v0  ;;  %6088 = vmatmul.bf16.gmra.mxu0 %v13511_v31 }
 0x951   : > { %5999 = vmatmul.bf16.gmra.mxu3 %v13512_v10  ;;  %6177 = vmatmul.bf16.gmra.mxu1 %v13513_v54 }
 0x952   : > { %v5860_v36 = vadd.f32 %v5859_v33, %v5771_v62 }
 0x953   : > { %v5595_v47 = vpop.f32.mrf.mxu2 }
 0x954   : > { %v5596_v11 = vadd.f32 %v5595_v47, %v12465_v5  ;;  %v5684_v25 = vpop.f32.mrf.mxu3  ;;  %v6794_v58 = vmax.f32 %v5860_v36, 0.0  ;;  %v13516_v47 = vld [vmem:[#allocation46_spill] sm:$0xff] }
 0x955   : > { %v5775_v37 = vpop.f32.mrf.mxu0  ;;  %v13517_v36 = vld [vmem:[#allocation30_spill] sm:$0xff] }
 0x956   : > { %v5685_v57 = vadd.f32 %v5684_v25, %v5596_v11  ;;  %v5864_v7 = vpop.f32.mrf.mxu1  ;;  %v12574_v50 = vpack.c.bf16 %v6794_v58, %v6786_v27  ;;  %v10157_v11 = vld [vmem:[#allocation11 + $0xdc] sm:$0xf] }
 0x958   : > { %13514 = vst [vmem:[#allocation141_spill] sm:$0xff] %v12574_v50  ;;  %v5774_v38 = vadd.f32 %v5773_v9, %v5685_v57  ;;  %v8888_v9 = vld [vmem:[#allocation11 + $0xf8] sm:$0xf0] }
 0x959   : > { %v8891_v58 = vor.u32 %v10157_v11, %v8888_v9  ;;  %v9144_v57 = vld [vmem:[#allocation11 + $0x2f8] sm:$0xf0] }
 0x95a   : > { %v5863_v55 = vadd.f32 %v5862_v63, %v5774_v38  ;;  %v10221_v63 = vld [vmem:[#allocation11 + $0x2dc] sm:$0xf] }
 0x95b   : > { %v5597_v20 = vpop.f32.mrf.mxu2  ;;  %6237 = vmatpush.bf16.msra.mxu2 %v8891_v58  ;;  %v10285_v9 = vld [vmem:[#allocation11 + $0x4dc] sm:$0xf]  ;;  %v13520_v58 = vld [vmem:[#allocation32_spill] sm:$0xff] }
 0x95c   : > { %v5598_v33 = vadd.f32 %v5597_v20, %v12465_v5  ;;  %v5686_v62 = vpop.f32.mrf.mxu3  ;;  %v6802_v38 = vmax.f32 %v5863_v55, 0.0  ;;  %v9400_v55 = vld [vmem:[#allocation11 + $0x4f8] sm:$0xf0] }
 0x95d   : > { %v5778_v21 = vpop.f32.mrf.mxu0 }
 0x95e   : > { %v5687_v54 = vadd.f32 %v5686_v62, %v5598_v33  ;;  %v5867_v49 = vpop.f32.mrf.mxu1 }
 0x960   : > { %v5776_v46 = vadd.f32 %v5775_v37, %v5687_v54  ;;  %5915 = vmatmul.bf16.gmra.mxu2 %v13515_v43  ;;  %6093 = vmatmul.bf16.gmra.mxu0 %v13516_v47  ;;  %v9147_v54 = vor.u32 %v10221_v63, %v9144_v57 }
 0x961   : > { %6004 = vmatmul.bf16.gmra.mxu3 %v13517_v36  ;;  %6182 = vmatmul.bf16.gmra.mxu1 %v13518_v18 }
 0x962   : > { %v5865_v27 = vadd.f32 %v5864_v7, %v5776_v46  ;;  %6326 = vmatpush.bf16.msra.mxu3 %v9147_v54 }
 0x963   : > { %v5600_v25 = vpop.f32.mrf.mxu2 }
 0x964   : > { %v5601_v20 = vadd.f32 %v5600_v25, %v12465_v5  ;;  %v5689_v33 = vpop.f32.mrf.mxu3  ;;  %v6810_v37 = vmax.f32 %v5865_v27, 0.0  ;;  %v9403_v25 = vor.u32 %v10285_v9, %v9400_v55 }
 0x965   : > { %v5780_v62 = vpop.f32.mrf.mxu0 }
 0x966   : > { %v5690_v50 = vadd.f32 %v5689_v33, %v5601_v20  ;;  %v5869_v47 = vpop.f32.mrf.mxu1  ;;  %v12582_v36 = vpack.c.bf16 %v6810_v37, %v6802_v38  ;;  %6415 = vmatpush.bf16.msra.mxu0 %v9403_v25  ;;  %v10349_v37 = vld [vmem:[#allocation11 + $0x6dc] sm:$0xf] }
 0x968   : > { %13519 = vst [vmem:[#allocation142_spill] sm:$0xff] %v12582_v36  ;;  %v5779_v7 = vadd.f32 %v5778_v21, %v5690_v50  ;;  %v13521_v21 = vld [vmem:[#allocation47_spill] sm:$0xff] }
 0x96a   : > { %v5868_v46 = vadd.f32 %v5867_v49, %v5779_v7 }
 0x96b   : > { %v5602_v18 = vpop.f32.mrf.mxu2 }
 0x96c   : > { %v5603_v43 = vadd.f32 %v5602_v18, %v12465_v5  ;;  %v5691_v11 = vpop.f32.mrf.mxu3  ;;  %v6818_v18 = vmax.f32 %v5868_v46, 0.0 }
 0x96d   : > { %v5783_v10 = vpop.f32.mrf.mxu0 }
 0x96e   : > { %v5692_v31 = vadd.f32 %v5691_v11, %v5603_v43  ;;  %v5872_v63 = vpop.f32.mrf.mxu1 }
 0x970   : > { %v5781_v27 = vadd.f32 %v5780_v62, %v5692_v31  ;;  %5920 = vmatmul.bf16.gmra.mxu2 %v11514_v19  ;;  %6098 = vmatmul.bf16.gmra.mxu0 %v11710_v29  ;;  %v9656_v31 = vld [vmem:[#allocation11 + $0x6f8] sm:$0xf0] }
 0x971   : > { %6009 = vmatmul.bf16.gmra.mxu3 %v13520_v58  ;;  %6187 = vmatmul.bf16.gmra.mxu1 %v13521_v21  ;;  %v9659_v7 = vor.u32 %v10349_v37, %v9656_v31  ;;  %v10213_v37 = vld [vmem:[#allocation11 + $0x29c] sm:$0xf] }
 0x972   : > { %v5870_v50 = vadd.f32 %v5869_v47, %v5781_v27 }
 0x973   : > { %v5605_v49 = vpop.f32.mrf.mxu2  ;;  %6504 = vmatpush.bf16.msra.mxu1 %v9659_v7 }
 0x974   : > { %v5606_v57 = vadd.f32 %v5605_v49, %v12465_v5  ;;  %v5694_v38 = vpop.f32.mrf.mxu3  ;;  %v6826_v20 = vmax.f32 %v5870_v50, 0.0  ;;  %v13523_v50 = vld [vmem:[#allocation34_spill] sm:$0xff] }
 0x975   : > { %v5785_v33 = vpop.f32.mrf.mxu0 }
 0x976   : > { %v5695_v43 = vadd.f32 %v5694_v38, %v5606_v57  ;;  %v5874_v54 = vpop.f32.mrf.mxu1  ;;  %v12590_v62 = vpack.c.bf16 %v6826_v20, %v6818_v18  ;;  %v13524_v57 = vld [vmem:[#allocation49_spill] sm:$0xff]  ;;  %v12595_v38 = vld [vmem:[#allocation13] sm:$0xff] }
 0x977   : > { %13525 = vst [vmem:[#allocation144_spill] sm:$0xff] %v12595_v38  ;;  %v12598_v18 = vperm.slane %v12595_v38, 6 }
 0x978   : > { %13522 = vst [vmem:[#allocation143_spill] sm:$0xff] %v12590_v62  ;;  %v5784_v11 = vadd.f32 %v5783_v10, %v5695_v43  ;;  %v13526_v10 = vld [vmem:[#allocation33_spill] sm:$0xff] }
 0x979   : > { %v8856_v43 = vld [vmem:[#allocation11 + $0xb8] sm:$0xf0] }
 0x97a   : > { %v5873_v9 = vadd.f32 %v5872_v63, %v5784_v11  ;;  %v13527_v63 = vld [vmem:[#allocation48_spill] sm:$0xff] }
 0x97b   : > { %v5607_v55 = vpop.f32.mrf.mxu2 }
 0x97c   : > { %v5608_v47 = vadd.f32 %v5607_v55, %v12465_v5  ;;  %v5696_v25 = vpop.f32.mrf.mxu3  ;;  %v10149_v5 = vld [vmem:[#allocation11 + $0x9c] sm:$0xf]  ;;  %v6834_v11 = vmax.f32 %v5873_v9, 0.0 }
 0x97d   : > { %v6064_v46 = vpop.f32.mrf.mxu0  ;;  %v8859_v7 = vor.u32 %v10149_v5, %v8856_v43  ;;  %v10277_v43 = vld [vmem:[#allocation11 + $0x49c] sm:$0xf] }
 0x97e   : > { %v5697_v27 = vadd.f32 %v5696_v25, %v5608_v47  ;;  %v6153_v49 = vpop.f32.mrf.mxu1  ;;  %v9368_v9 = vld [vmem:[#allocation11 + $0x4b8] sm:$0xf0] }
 0x97f   : > { %6238 = vmatpush.bf16.msra.mxu2 %v8859_v7 }
 0x980   : > { %v5786_v36 = vadd.f32 %v5785_v33, %v5697_v27  ;;  %5925 = vmatmul.bf16.gmra.mxu2 %v13523_v50  ;;  %6103 = vmatmul.bf16.gmra.mxu0 %v13524_v57  ;;  %v9112_v33 = vld [vmem:[#allocation11 + $0x2b8] sm:$0xf0] }
 0x981   : > { %6014 = vmatmul.bf16.gmra.mxu3 %v13526_v10  ;;  %6192 = vmatmul.bf16.gmra.mxu1 %v13527_v63  ;;  %v9115_v25 = vor.u32 %v10213_v37, %v9112_v33 }
 0x982   : > { %v5875_v20 = vadd.f32 %v5874_v54, %v5786_v36 }
 0x983   : > { %v5886_v31 = vpop.f32.mrf.mxu2  ;;  %6327 = vmatpush.bf16.msra.mxu3 %v9115_v25 }
 0x984   : > { %v5887_v55 = vadd.f32 %v5886_v31, %v12598_v18  ;;  %v5975_v47 = vpop.f32.mrf.mxu3  ;;  %v6842_v27 = vmax.f32 %v5875_v20, 0.0  ;;  %v9371_v31 = vor.u32 %v10277_v43, %v9368_v9 }
 0x985   : > { %v6066_v62 = vpop.f32.mrf.mxu0 }
 0x986   : > { %v5976_v38 = vadd.f32 %v5975_v47, %v5887_v55  ;;  %v6155_v57 = vpop.f32.mrf.mxu1  ;;  %v12603_v10 = vpack.c.bf16 %v6842_v27, %v6834_v11  ;;  %6416 = vmatpush.bf16.msra.mxu0 %v9371_v31 }
 0x988   : > { %13528 = vst [vmem:[#allocation145_spill] sm:$0xff] %v12603_v10  ;;  %v6065_v36 = vadd.f32 %v6064_v46, %v5976_v38  ;;  %v9624_v38 = vld [vmem:[#allocation11 + $0x6b8] sm:$0xf0] }
 0x98a   : > { %v6154_v54 = vadd.f32 %v6153_v49, %v6065_v36  ;;  %v10341_v49 = vld [vmem:[#allocation11 + $0x69c] sm:$0xf] }
 0x98b   : > { %v5888_v63 = vpop.f32.mrf.mxu2  ;;  %v9627_v7 = vor.u32 %v10341_v49, %v9624_v38  ;;  %v13531_v49 = vld [vmem:[#allocation50_spill] sm:$0xff] }
 0x98c   : > { %v5889_v50 = vadd.f32 %v5888_v63, %v12598_v18  ;;  %v5977_v5 = vpop.f32.mrf.mxu3  ;;  %v6595_v33 = vmax.f32 %v6154_v54, 0.0 }
 0x98d   : > { %v6069_v21 = vpop.f32.mrf.mxu0  ;;  %6505 = vmatpush.bf16.msra.mxu1 %v9627_v7 }
 0x98e   : > { %v5978_v58 = vadd.f32 %v5977_v5, %v5889_v50  ;;  %v6158_v37 = vpop.f32.mrf.mxu1 }
 0x990   : > { %v6067_v20 = vadd.f32 %v6066_v62, %v5978_v58  ;;  %5930 = vmatmul.bf16.gmra.mxu2 %v11538_v52  ;;  %6108 = vmatmul.bf16.gmra.mxu0 %v11734_v1 }
 0x991   : > { %6019 = vmatmul.bf16.gmra.mxu3 %v11530_v2  ;;  %6197 = vmatmul.bf16.gmra.mxu1 %v11726_v17 }
 0x992   : > { %v6156_v46 = vadd.f32 %v6155_v57, %v6067_v20 }
 0x993   : > { %v5891_v63 = vpop.f32.mrf.mxu2 }
 0x994   : > { %v6603_v11 = vmax.f32 %v6156_v46, 0.0  ;;  %v5892_v50 = vadd.f32 %v5891_v63, %v12598_v18  ;;  %v5980_v55 = vpop.f32.mrf.mxu3  ;;  %v13530_v46 = vld [vmem:[#allocation35_spill] sm:$0xff]  ;;  %v10141_v63 = vld [vmem:[#allocation11 + $0x5c] sm:$0xf] }
 0x995   : > { %v6071_v47 = vpop.f32.mrf.mxu0 }
 0x996   : > { %v12611_v58 = vpack.c.bf16 %v6603_v11, %v6595_v33  ;;  %v5981_v62 = vadd.f32 %v5980_v55, %v5892_v50  ;;  %v6160_v25 = vpop.f32.mrf.mxu1  ;;  %v9080_v11 = vld [vmem:[#allocation11 + $0x278] sm:$0xf0] }
 0x998   : > { %13529 = vst [vmem:[#allocation146_spill] sm:$0xff] %v12611_v58  ;;  %v6070_v27 = vadd.f32 %v6069_v21, %v5981_v62  ;;  %v8824_v21 = vld [vmem:[#allocation11 + $0x78] sm:$0xf0] }
 0x999   : > { %v8827_v33 = vor.u32 %v10141_v63, %v8824_v21  ;;  %v10269_v21 = vld [vmem:[#allocation11 + $0x45c] sm:$0xf] }
 0x99a   : > { %v6159_v36 = vadd.f32 %v6158_v37, %v6070_v27  ;;  %v10205_v37 = vld [vmem:[#allocation11 + $0x25c] sm:$0xf] }
 0x99b   : > { %v5893_v5 = vpop.f32.mrf.mxu2  ;;  %6239 = vmatpush.bf16.msra.mxu2 %v8827_v33 }
 0x99c   : > { %v5894_v57 = vadd.f32 %v5893_v5, %v12598_v18  ;;  %v5982_v43 = vpop.f32.mrf.mxu3  ;;  %v6611_v50 = vmax.f32 %v6159_v36, 0.0  ;;  %v9336_v36 = vld [vmem:[#allocation11 + $0x478] sm:$0xf0] }
 0x99d   : > { %v6074_v9 = vpop.f32.mrf.mxu0 }
 0x99e   : > { %v5983_v31 = vadd.f32 %v5982_v43, %v5894_v57  ;;  %v6163_v20 = vpop.f32.mrf.mxu1 }
 0x9a0   : > { %v6072_v54 = vadd.f32 %v6071_v47, %v5983_v31  ;;  %5935 = vmatmul.bf16.gmra.mxu2 %v11550_v23  ;;  %6113 = vmatmul.bf16.gmra.mxu0 %v11746_v41  ;;  %v9083_v47 = vor.u32 %v10205_v37, %v9080_v11 }
 0x9a1   : > { %6024 = vmatmul.bf16.gmra.mxu3 %v13530_v46  ;;  %6202 = vmatmul.bf16.gmra.mxu1 %v13531_v49 }
 0x9a2   : > { %v6161_v38 = vadd.f32 %v6160_v25, %v6072_v54  ;;  %6328 = vmatpush.bf16.msra.mxu3 %v9083_v47 }
 0x9a3   : > { %v5896_v7 = vpop.f32.mrf.mxu2 }
 0x9a4   : > { %v5897_v55 = vadd.f32 %v5896_v7, %v12598_v18  ;;  %v5985_v62 = vpop.f32.mrf.mxu3  ;;  %v6619_v27 = vmax.f32 %v6161_v38, 0.0  ;;  %v9339_v7 = vor.u32 %v10269_v21, %v9336_v36 }
 0x9a5   : > { %v6076_v5 = vpop.f32.mrf.mxu0 }
 0x9a6   : > { %v5986_v57 = vadd.f32 %v5985_v62, %v5897_v55  ;;  %v6165_v43 = vpop.f32.mrf.mxu1  ;;  %v12619_v31 = vpack.c.bf16 %v6619_v27, %v6611_v50  ;;  %6417 = vmatpush.bf16.msra.mxu0 %v9339_v7 }
 0x9a8   : > { %13532 = vst [vmem:[#allocation147_spill] sm:$0xff] %v12619_v31  ;;  %v6075_v25 = vadd.f32 %v6074_v9, %v5986_v57 }
 0x9aa   : > { %v6164_v54 = vadd.f32 %v6163_v20, %v6075_v25  ;;  %v10333_v20 = vld [vmem:[#allocation11 + $0x65c] sm:$0xf] }
 0x9ab   : > { %v5898_v10 = vpop.f32.mrf.mxu2 }
 0x9ac   : > { %v5899_v58 = vadd.f32 %v5898_v10, %v12598_v18  ;;  %v5987_v63 = vpop.f32.mrf.mxu3  ;;  %v9592_v10 = vld [vmem:[#allocation11 + $0x678] sm:$0xf0]  ;;  %v6627_v50 = vmax.f32 %v6164_v54, 0.0 }
 0x9ad   : > { %v6079_v49 = vpop.f32.mrf.mxu0  ;;  %v9595_v11 = vor.u32 %v10333_v20, %v9592_v10  ;;  %v10133_v20 = vld [vmem:[#allocation11 + $0x1c] sm:$0xf] }
 0x9ae   : > { %v5988_v46 = vadd.f32 %v5987_v63, %v5899_v58  ;;  %v6168_v37 = vpop.f32.mrf.mxu1 }
 0x9af   : > { %6506 = vmatpush.bf16.msra.mxu1 %v9595_v11  ;;  %v9048_v11 = vld [vmem:[#allocation11 + $0x238] sm:$0xf0] }
 0x9b0   : > { %v6077_v38 = vadd.f32 %v6076_v5, %v5988_v46  ;;  %5940 = vmatmul.bf16.gmra.mxu2 %v11562_v34  ;;  %6118 = vmatmul.bf16.gmra.mxu0 %v11758_v22 }
 0x9b1   : > { %6029 = vmatmul.bf16.gmra.mxu3 %v11554_v14  ;;  %6207 = vmatmul.bf16.gmra.mxu1 %v11750_v32 }
 0x9b2   : > { %v6166_v9 = vadd.f32 %v6165_v43, %v6077_v38 }
 0x9b3   : > { %v5901_v33 = vpop.f32.mrf.mxu2 }
 0x9b4   : > { %v5902_v55 = vadd.f32 %v5901_v33, %v12598_v18  ;;  %v5990_v58 = vpop.f32.mrf.mxu3  ;;  %v6635_v62 = vmax.f32 %v6166_v9, 0.0 }
 0x9b5   : > { %v6081_v47 = vpop.f32.mrf.mxu0 }
 0x9b6   : > { %v5991_v46 = vadd.f32 %v5990_v58, %v5902_v55  ;;  %v6170_v27 = vpop.f32.mrf.mxu1  ;;  %v12627_v5 = vpack.c.bf16 %v6635_v62, %v6627_v50 }
 0x9b8   : > { %13533 = vst [vmem:[#allocation148_spill] sm:$0xff] %v12627_v5  ;;  %v6080_v57 = vadd.f32 %v6079_v49, %v5991_v46  ;;  %v8792_v49 = vld [vmem:[#allocation11 + $0x38] sm:$0xf0] }
 0x9b9   : > { %v8795_v33 = vor.u32 %v10133_v20, %v8792_v49  ;;  %v10261_v49 = vld [vmem:[#allocation11 + $0x41c] sm:$0xf] }
 0x9ba   : > { %v6169_v25 = vadd.f32 %v6168_v37, %v6080_v57  ;;  %v10197_v37 = vld [vmem:[#allocation11 + $0x21c] sm:$0xf] }
 0x9bb   : > { %v5903_v63 = vpop.f32.mrf.mxu2  ;;  %v9051_v62 = vor.u32 %v10197_v37, %v9048_v11  ;;  %6240 = vmatpush.bf16.msra.mxu2 %v8795_v33  ;;  %v9560_v33 = vld [vmem:[#allocation11 + $0x638] sm:$0xf0] }
 0x9bc   : > { %v5904_v43 = vadd.f32 %v5903_v63, %v12598_v18  ;;  %v5992_v21 = vpop.f32.mrf.mxu3  ;;  %v6643_v50 = vmax.f32 %v6169_v25, 0.0  ;;  %v9304_v25 = vld [vmem:[#allocation11 + $0x438] sm:$0xf0] }
 0x9bd   : > { %v6084_v36 = vpop.f32.mrf.mxu0  ;;  %6329 = vmatpush.bf16.msra.mxu3 %v9051_v62 }
 0x9be   : > { %v5993_v7 = vadd.f32 %v5992_v21, %v5904_v43  ;;  %v6173_v38 = vpop.f32.mrf.mxu1 }
 0x9c0   : > { %v6082_v54 = vadd.f32 %v6081_v47, %v5993_v7  ;;  %5945 = vmatmul.bf16.gmra.mxu2 %v11574_v45  ;;  %6123 = vmatmul.bf16.gmra.mxu0 %v11770_v56 }
 0x9c1   : > { %6034 = vmatmul.bf16.gmra.mxu3 %v11566_v39  ;;  %6212 = vmatmul.bf16.gmra.mxu1 %v11762_v15 }
 0x9c2   : > { %v6171_v9 = vadd.f32 %v6170_v27, %v6082_v54 }
 0x9c3   : > { %v5906_v10 = vpop.f32.mrf.mxu2 }
 0x9c4   : > { %v5907_v55 = vadd.f32 %v5906_v10, %v12598_v18  ;;  %v5995_v58 = vpop.f32.mrf.mxu3  ;;  %v6651_v47 = vmax.f32 %v6171_v9, 0.0  ;;  %v9307_v10 = vor.u32 %v10261_v49, %v9304_v25 }
 0x9c5   : > { %v6086_v46 = vpop.f32.mrf.mxu0 }
 0x9c6   : > { %v5996_v57 = vadd.f32 %v5995_v58, %v5907_v55  ;;  %v6175_v63 = vpop.f32.mrf.mxu1  ;;  %v12635_v43 = vpack.c.bf16 %v6651_v47, %v6643_v50  ;;  %6418 = vmatpush.bf16.msra.mxu0 %v9307_v10 }
 0x9c8   : > { %v6085_v27 = vadd.f32 %v6084_v36, %v5996_v57 }
 0x9ca   : > { %v6174_v21 = vadd.f32 %v6173_v38, %v6085_v27  ;;  %v10325_v38 = vld [vmem:[#allocation11 + $0x61c] sm:$0xf] }
 0x9cb   : > { %v5908_v7 = vpop.f32.mrf.mxu2  ;;  %v9563_v50 = vor.u32 %v10325_v38, %v9560_v33  ;;  %v10393_v38 = vld [vmem:[#allocation14 + $0x38] sm:$0xff] }
 0x9cc   : > { %v5909_v54 = vadd.f32 %v5908_v7, %v12598_v18  ;;  %v5997_v20 = vpop.f32.mrf.mxu3  ;;  %v6659_v55 = vmax.f32 %v6174_v21, 0.0  ;;  %7489 = vmatpush.bf16.msrb.mxu2 %v10393_v38 }
 0x9cd   : > { %v6089_v5 = vpop.f32.mrf.mxu0  ;;  %6507 = vmatpush.bf16.msra.mxu1 %v9563_v50 }
 0x9ce   : > { %v5998_v31 = vadd.f32 %v5997_v20, %v5909_v54  ;;  %v6178_v37 = vpop.f32.mrf.mxu1 }
 0x9d0   : > { %v6087_v9 = vadd.f32 %v6086_v46, %v5998_v31  ;;  %5950 = vmatmul.bf16.gmra.mxu2 %v11586_v42  ;;  %6128 = vmatmul.bf16.gmra.mxu0 %v11782_v30 }
 0x9d1   : > { %6039 = vmatmul.bf16.gmra.mxu3 %v11578_v44  ;;  %6217 = vmatmul.bf16.gmra.mxu1 %v11774_v6 }
 0x9d2   : > { %v6176_v36 = vadd.f32 %v6175_v63, %v6087_v9 }
 0x9d3   : > { %v5911_v11 = vpop.f32.mrf.mxu2 }
 0x9d4   : > { %v5912_v58 = vadd.f32 %v5911_v11, %v12598_v18  ;;  %v6000_v62 = vpop.f32.mrf.mxu3  ;;  %v6667_v47 = vmax.f32 %v6176_v36, 0.0 }
 0x9d5   : > { %v6091_v57 = vpop.f32.mrf.mxu0 }
 0x9d6   : > { %v6001_v31 = vadd.f32 %v6000_v62, %v5912_v58  ;;  %v6180_v46 = vpop.f32.mrf.mxu1  ;;  %v12643_v27 = vpack.c.bf16 %v6667_v47, %v6659_v55 }
 0x9d8   : > { %v6090_v7 = vadd.f32 %v6089_v5, %v6001_v31  ;;  %v10401_v5 = vld [vmem:[#allocation14 + $0x78] sm:$0xff] }
 0x9d9   : > { %7578 = vmatpush.bf16.msrb.mxu3 %v10401_v5 }
 0x9da   : > { %v6179_v54 = vadd.f32 %v6178_v37, %v6090_v7 }
 0x9db   : > { %v5913_v20 = vpop.f32.mrf.mxu2 }
 0x9dc   : > { %v5914_v63 = vadd.f32 %v5913_v20, %v12598_v18  ;;  %v6002_v49 = vpop.f32.mrf.mxu3  ;;  %v6675_v33 = vmax.f32 %v6179_v54, 0.0 }
 0x9dd   : > { %v6094_v25 = vpop.f32.mrf.mxu0 }
 0x9de   : > { %v6003_v10 = vadd.f32 %v6002_v49, %v5914_v63  ;;  %v6183_v9 = vpop.f32.mrf.mxu1  ;;  %v10409_v49 = vld [vmem:[#allocation14 + $0xb8] sm:$0xff] }
 0x9df   : > { %7667 = vmatpush.bf16.msrb.mxu0 %v10409_v49 }
 0x9e0   : > { %v6092_v21 = vadd.f32 %v6091_v57, %v6003_v10  ;;  %5955 = vmatmul.bf16.gmra.mxu2 %v11598_v26  ;;  %6133 = vmatmul.bf16.gmra.mxu0 %v11794_v12 }
 0x9e1   : > { %6044 = vmatmul.bf16.gmra.mxu3 %v11590_v59  ;;  %6222 = vmatmul.bf16.gmra.mxu1 %v11786_v13 }
 0x9e2   : > { %v6181_v36 = vadd.f32 %v6180_v46, %v6092_v21 }
 0x9e3   : > { %v5916_v37 = vpop.f32.mrf.mxu2 }
 0x9e4   : > { %v5917_v11 = vadd.f32 %v5916_v37, %v12598_v18  ;;  %v6005_v50 = vpop.f32.mrf.mxu3  ;;  %v6683_v55 = vmax.f32 %v6181_v36, 0.0 }
 0x9e5   : > { %v6096_v58 = vpop.f32.mrf.mxu0 }
 0x9e6   : > { %v6006_v62 = vadd.f32 %v6005_v50, %v5917_v11  ;;  %v6185_v47 = vpop.f32.mrf.mxu1  ;;  %v12651_v57 = vpack.c.bf16 %v6683_v55, %v6675_v33 }
 0x9e8   : > { %v6095_v31 = vadd.f32 %v6094_v25, %v6006_v62 }
 0x9ea   : > { %v6184_v7 = vadd.f32 %v6183_v9, %v6095_v31  ;;  %v10417_v9 = vld [vmem:[#allocation14 + $0xf8] sm:$0xff] }
 0x9eb   : > { %v5918_v20 = vpop.f32.mrf.mxu2  ;;  %7756 = vmatpush.bf16.msrb.mxu1 %v10417_v9  ;;  %v13535_v9 = vld [vmem:[#allocation36_spill] sm:$0xff] }
 0x9ec   : > { %v5919_v46 = vadd.f32 %v5918_v20, %v12598_v18  ;;  %v6007_v63 = vpop.f32.mrf.mxu3  ;;  %v6691_v38 = vmax.f32 %v6184_v7, 0.0 }
 0x9ed   : > { %v6099_v10 = vpop.f32.mrf.mxu0 }
 0x9ee   : > { %v6008_v54 = vadd.f32 %v6007_v63, %v5919_v46  ;;  %v6188_v21 = vpop.f32.mrf.mxu1 }
 0x9f0   : > { %v6097_v37 = vadd.f32 %v6096_v58, %v6008_v54  ;;  %5960 = vmatmul.bf16.gmra.mxu2 %v11614_v16  ;;  %6138 = vmatmul.bf16.gmra.mxu0 %v11810_v4 }
 0x9f1   : > { %6049 = vmatmul.bf16.gmra.mxu3 %v11604_v40  ;;  %6227 = vmatmul.bf16.gmra.mxu1 %v11798_v60 }
 0x9f2   : > { %v6186_v25 = vadd.f32 %v6185_v47, %v6097_v37 }
 0x9f3   : > { %v5921_v36 = vpop.f32.mrf.mxu2 }
 0x9f4   : > { %v5922_v5 = vadd.f32 %v5921_v36, %v12598_v18  ;;  %v6010_v33 = vpop.f32.mrf.mxu3  ;;  %v6699_v11 = vmax.f32 %v6186_v25, 0.0  ;;  %v13534_v25 = vld [vmem:[#allocation23_spill] sm:$0xff] }
 0x9f5   : > { %v6101_v50 = vpop.f32.mrf.mxu0 }
 0x9f6   : > { %v6011_v55 = vadd.f32 %v6010_v33, %v5922_v5  ;;  %v6190_v58 = vpop.f32.mrf.mxu1  ;;  %v12659_v62 = vpack.c.bf16 %v6699_v11, %v6691_v38  ;;  %v10392_v38 = vld [vmem:[#allocation14 + $0x30] sm:$0xff] }
 0x9f7   : > { %7490 = vmatpush.bf16.msrb.mxu2 %v10392_v38 }
 0x9f8   : > { %v6100_v31 = vadd.f32 %v6099_v10, %v6011_v55  ;;  %v10400_v10 = vld [vmem:[#allocation14 + $0x70] sm:$0xff] }
 0x9f9   : > { %7579 = vmatpush.bf16.msrb.mxu3 %v10400_v10 }
 0x9fa   : > { %v6189_v20 = vadd.f32 %v6188_v21, %v6100_v31 }
 0x9fb   : > { %v5923_v46 = vpop.f32.mrf.mxu2 }
 0x9fc   : > { %v5924_v63 = vadd.f32 %v5923_v46, %v12598_v18  ;;  %v6012_v49 = vpop.f32.mrf.mxu3  ;;  %v6707_v5 = vmax.f32 %v6189_v20, 0.0 }
 0x9fd   : > { %v6104_v47 = vpop.f32.mrf.mxu0 }
 0x9fe   : > { %v6013_v54 = vadd.f32 %v6012_v49, %v5924_v63  ;;  %v6193_v37 = vpop.f32.mrf.mxu1 }
 0xa00   : > { %v6102_v7 = vadd.f32 %v6101_v50, %v6013_v54  ;;  %6241 = vmatmul.bf16.vlgmr.msra.gmra.mxu2 %v11430_v3  ;;  %6419 = vmatmul.bf16.vlgmr.msra.gmra.mxu0 %v11626_v24 }
 0xa01   : > { %6330 = vmatmul.bf16.vlgmr.msra.gmra.mxu3 %v13534_v25  ;;  %6508 = vmatmul.bf16.vlgmr.msra.gmra.mxu1 %v13535_v9 }
 0xa02   : > { %v6191_v36 = vadd.f32 %v6190_v58, %v6102_v7  ;;  %v10408_v7 = vld [vmem:[#allocation14 + $0xb0] sm:$0xff] }
 0xa03   : > { %v5926_v21 = vpop.f32.mrf.mxu2  ;;  %7668 = vmatpush.bf16.msrb.mxu0 %v10408_v7  ;;  %v13537_v7 = vld [vmem:[#allocation39_spill] sm:$0xff] }
 0xa04   : > { %v5927_v33 = vadd.f32 %v5926_v21, %v12598_v18  ;;  %v6015_v11 = vpop.f32.mrf.mxu3  ;;  %v6715_v55 = vmax.f32 %v6191_v36, 0.0 }
 0xa05   : > { %v6106_v50 = vpop.f32.mrf.mxu0 }
 0xa06   : > { %v6016_v31 = vadd.f32 %v6015_v11, %v5927_v33  ;;  %v6195_v3 = vpop.f32.mrf.mxu1  ;;  %v12667_v46 = vpack.c.bf16 %v6715_v55, %v6707_v5 }
 0xa08   : > { %v6105_v24 = vadd.f32 %v6104_v47, %v6016_v31 }
 0xa0a   : > { %v6194_v63 = vadd.f32 %v6193_v37, %v6105_v24  ;;  %v10416_v37 = vld [vmem:[#allocation14 + $0xf0] sm:$0xff] }
 0xa0b   : > { %v5928_v49 = vpop.f32.mrf.mxu2  ;;  %7757 = vmatpush.bf16.msrb.mxu1 %v10416_v37  ;;  %v10391_v37 = vld [vmem:[#allocation14 + $0x28] sm:$0xff] }
 0xa0c   : > { %v5929_v58 = vadd.f32 %v5928_v49, %v12598_v18  ;;  %v6017_v54 = vpop.f32.mrf.mxu3  ;;  %v6723_v38 = vmax.f32 %v6194_v63, 0.0  ;;  %7491 = vmatpush.bf16.msrb.mxu2 %v10391_v37 }
 0xa0d   : > { %v6109_v25 = vpop.f32.mrf.mxu0 }
 0xa0e   : > { %v6018_v20 = vadd.f32 %v6017_v54, %v5929_v58  ;;  %v6198_v9 = vpop.f32.mrf.mxu1  ;;  %v13536_v54 = vld [vmem:[#allocation25_spill] sm:$0xff] }
 0xa10   : > { %v6107_v21 = vadd.f32 %v6106_v50, %v6018_v20  ;;  %6246 = vmatmul.bf16.gmra.mxu2 %v11442_v61  ;;  %6424 = vmatmul.bf16.gmra.mxu0 %v11638_v51  ;;  %v13538_v20 = vld [vmem:[#allocation24_spill] sm:$0xff] }
 0xa11   : > { %6335 = vmatmul.bf16.gmra.mxu3 %v11434_v35  ;;  %6513 = vmatmul.bf16.gmra.mxu1 %v13283_v53 }
 0xa12   : > { %v6196_v47 = vadd.f32 %v6195_v3, %v6107_v21  ;;  %v13539_v21 = vld [vmem:[#allocation38_spill] sm:$0xff] }
 0xa13   : > { %v5931_v36 = vpop.f32.mrf.mxu2 }
 0xa14   : > { %v5932_v10 = vadd.f32 %v5931_v36, %v12598_v18  ;;  %v6020_v5 = vpop.f32.mrf.mxu3  ;;  %v6731_v33 = vmax.f32 %v6196_v47, 0.0 }
 0xa15   : > { %v6111_v11 = vpop.f32.mrf.mxu0 }
 0xa16   : > { %v6021_v55 = vadd.f32 %v6020_v5, %v5932_v10  ;;  %v6200_v50 = vpop.f32.mrf.mxu1  ;;  %v12675_v31 = vpack.c.bf16 %v6731_v33, %v6723_v38 }
 0xa18   : > { %v6110_v61 = vadd.f32 %v6109_v25, %v6021_v55  ;;  %v10399_v25 = vld [vmem:[#allocation14 + $0x68] sm:$0xff] }
 0xa19   : > { %7580 = vmatpush.bf16.msrb.mxu3 %v10399_v25 }
 0xa1a   : > { %v6199_v51 = vadd.f32 %v6198_v9, %v6110_v61 }
 0xa1b   : > { %v5933_v24 = vpop.f32.mrf.mxu2 }
 0xa1c   : > { %v5934_v35 = vadd.f32 %v5933_v24, %v12598_v18  ;;  %v6022_v53 = vpop.f32.mrf.mxu3  ;;  %v6739_v36 = vmax.f32 %v6199_v51, 0.0 }
 0xa1d   : > { %v6114_v3 = vpop.f32.mrf.mxu0 }
 0xa1e   : > { %v6023_v49 = vadd.f32 %v6022_v53, %v5934_v35  ;;  %v6203_v58 = vpop.f32.mrf.mxu1 }
 0xa20   : > { %v6112_v63 = vadd.f32 %v6111_v11, %v6023_v49  ;;  %6251 = vmatmul.bf16.gmra.mxu2 %v13536_v54  ;;  %6429 = vmatmul.bf16.gmra.mxu0 %v13537_v7 }
 0xa21   : > { %6340 = vmatmul.bf16.gmra.mxu3 %v13538_v20  ;;  %6518 = vmatmul.bf16.gmra.mxu1 %v13539_v21  ;;  %v13540_v21 = vld [vmem:[#allocation40_spill] sm:$0xff] }
 0xa22   : > { %v6201_v47 = vadd.f32 %v6200_v50, %v6112_v63  ;;  %v10407_v63 = vld [vmem:[#allocation14 + $0xa8] sm:$0xff] }
 0xa23   : > { %v5936_v9 = vpop.f32.mrf.mxu2  ;;  %7669 = vmatpush.bf16.msrb.mxu0 %v10407_v63  ;;  %v13542_v63 = vld [vmem:[#allocation42_spill] sm:$0xff] }
 0xa24   : > { %v5937_v38 = vadd.f32 %v5936_v9, %v12598_v18  ;;  %v6025_v10 = vpop.f32.mrf.mxu3  ;;  %v6747_v5 = vmax.f32 %v6201_v47, 0.0 }
 0xa25   : > { %v6116_v33 = vpop.f32.mrf.mxu0 }
 0xa26   : > { %v6026_v11 = vadd.f32 %v6025_v10, %v5937_v38  ;;  %v6205_v55 = vpop.f32.mrf.mxu1  ;;  %v12683_v61 = vpack.c.bf16 %v6747_v5, %v6739_v36 }
 0xa28   : > { %v6115_v24 = vadd.f32 %v6114_v3, %v6026_v11 }
 0xa2a   : > { %v6204_v35 = vadd.f32 %v6203_v58, %v6115_v24  ;;  %v10415_v58 = vld [vmem:[#allocation14 + $0xe8] sm:$0xff] }
 0xa2b   : > { %v5938_v53 = vpop.f32.mrf.mxu2  ;;  %7758 = vmatpush.bf16.msrb.mxu1 %v10415_v58 }
 0xa2c   : > { %v5939_v50 = vadd.f32 %v5938_v53, %v12598_v18  ;;  %v6027_v49 = vpop.f32.mrf.mxu3  ;;  %v6755_v37 = vmax.f32 %v6204_v35, 0.0 }
 0xa2d   : > { %v6119_v54 = vpop.f32.mrf.mxu0 }
 0xa2e   : > { %v6028_v51 = vadd.f32 %v6027_v49, %v5939_v50  ;;  %v6208_v7 = vpop.f32.mrf.mxu1  ;;  %v13541_v49 = vld [vmem:[#allocation27_spill] sm:$0xff] }
 0xa30   : > { %v6117_v20 = vadd.f32 %v6116_v33, %v6028_v51  ;;  %6256 = vmatmul.bf16.gmra.mxu2 %v11466_v8  ;;  %6434 = vmatmul.bf16.gmra.mxu0 %v11662_v28  ;;  %v13543_v51 = vld [vmem:[#allocation26_spill] sm:$0xff] }
 0xa31   : > { %6345 = vmatmul.bf16.gmra.mxu3 %v11458_v48  ;;  %6523 = vmatmul.bf16.gmra.mxu1 %v13540_v21 }
 0xa32   : > { %v6206_v3 = vadd.f32 %v6205_v55, %v6117_v20  ;;  %v13544_v20 = vld [vmem:[#allocation41_spill] sm:$0xff] }
 0xa33   : > { %v5941_v47 = vpop.f32.mrf.mxu2 }
 0xa34   : > { %v5942_v25 = vadd.f32 %v5941_v47, %v12598_v18  ;;  %v6030_v9 = vpop.f32.mrf.mxu3  ;;  %v6763_v36 = vmax.f32 %v6206_v3, 0.0  ;;  %v10390_v3 = vld [vmem:[#allocation14 + $0x20] sm:$0xff] }
 0xa35   : > { %v6121_v38 = vpop.f32.mrf.mxu0  ;;  %7492 = vmatpush.bf16.msrb.mxu2 %v10390_v3 }
 0xa36   : > { %v6031_v10 = vadd.f32 %v6030_v9, %v5942_v25  ;;  %v6210_v5 = vpop.f32.mrf.mxu1  ;;  %v12691_v33 = vpack.c.bf16 %v6763_v36, %v6755_v37 }
 0xa38   : > { %v6120_v8 = vadd.f32 %v6119_v54, %v6031_v10  ;;  %v10398_v54 = vld [vmem:[#allocation14 + $0x60] sm:$0xff] }
 0xa39   : > { %7581 = vmatpush.bf16.msrb.mxu3 %v10398_v54 }
 0xa3a   : > { %v6209_v28 = vadd.f32 %v6208_v7, %v6120_v8 }
 0xa3b   : > { %v5943_v11 = vpop.f32.mrf.mxu2 }
 0xa3c   : > { %v5944_v48 = vadd.f32 %v5943_v11, %v12598_v18  ;;  %v6032_v24 = vpop.f32.mrf.mxu3  ;;  %v6771_v58 = vmax.f32 %v6209_v28, 0.0 }
 0xa3d   : > { %v6124_v55 = vpop.f32.mrf.mxu0 }
 0xa3e   : > { %v6033_v53 = vadd.f32 %v6032_v24, %v5944_v48  ;;  %v6213_v50 = vpop.f32.mrf.mxu1 }
 0xa40   : > { %v6122_v35 = vadd.f32 %v6121_v38, %v6033_v53  ;;  %6261 = vmatmul.bf16.gmra.mxu2 %v13541_v49  ;;  %6439 = vmatmul.bf16.gmra.mxu0 %v13542_v63  ;;  %v10406_v53 = vld [vmem:[#allocation14 + $0xa0] sm:$0xff] }
 0xa41   : > { %6350 = vmatmul.bf16.gmra.mxu3 %v13543_v51  ;;  %6528 = vmatmul.bf16.gmra.mxu1 %v13544_v20  ;;  %v13545_v51 = vld [vmem:[#allocation44_spill] sm:$0xff] }
 0xa42   : > { %v6211_v21 = vadd.f32 %v6210_v5, %v6122_v35  ;;  %7670 = vmatpush.bf16.msrb.mxu0 %v10406_v53  ;;  %v13546_v20 = vld [vmem:[#allocation28_spill] sm:$0xff] }
 0xa43   : > { %v5946_v7 = vpop.f32.mrf.mxu2 }
 0xa44   : > { %v5947_v47 = vadd.f32 %v5946_v7, %v12598_v18  ;;  %v6035_v37 = vpop.f32.mrf.mxu3  ;;  %v6779_v25 = vmax.f32 %v6211_v21, 0.0  ;;  %v13547_v21 = vld [vmem:[#allocation43_spill] sm:$0xff] }
 0xa45   : > { %v6126_v9 = vpop.f32.mrf.mxu0 }
 0xa46   : > { %v6036_v36 = vadd.f32 %v6035_v37, %v5947_v47  ;;  %v6215_v38 = vpop.f32.mrf.mxu1  ;;  %v12699_v10 = vpack.c.bf16 %v6779_v25, %v6771_v58 }
 0xa48   : > { %v6125_v8 = vadd.f32 %v6124_v55, %v6036_v36 }
 0xa4a   : > { %v6214_v11 = vadd.f32 %v6213_v50, %v6125_v8  ;;  %v10414_v50 = vld [vmem:[#allocation14 + $0xe0] sm:$0xff] }
 0xa4b   : > { %v5948_v48 = vpop.f32.mrf.mxu2  ;;  %7759 = vmatpush.bf16.msrb.mxu1 %v10414_v50  ;;  %v10389_v50 = vld [vmem:[#allocation14 + $0x18] sm:$0xff] }
 0xa4c   : > { %v5949_v5 = vadd.f32 %v5948_v48, %v12598_v18  ;;  %v6037_v24 = vpop.f32.mrf.mxu3  ;;  %v6787_v54 = vmax.f32 %v6214_v11, 0.0  ;;  %7493 = vmatpush.bf16.msrb.mxu2 %v10389_v50 }
 0xa4d   : > { %v6129_v35 = vpop.f32.mrf.mxu0 }
 0xa4e   : > { %v6038_v28 = vadd.f32 %v6037_v24, %v5949_v5  ;;  %v6218_v49 = vpop.f32.mrf.mxu1 }
 0xa50   : > { %v6127_v63 = vadd.f32 %v6126_v9, %v6038_v28  ;;  %6266 = vmatmul.bf16.gmra.mxu2 %v13268_v0  ;;  %6444 = vmatmul.bf16.gmra.mxu0 %v13545_v51  ;;  %v13549_v51 = vld [vmem:[#allocation46_spill] sm:$0xff] }
 0xa51   : > { %6355 = vmatmul.bf16.gmra.mxu3 %v13546_v20  ;;  %6533 = vmatmul.bf16.gmra.mxu1 %v13547_v21  ;;  %v13550_v20 = vld [vmem:[#allocation30_spill] sm:$0xff]  ;;  %v13551_v21 = vld [vmem:[#allocation45_spill] sm:$0xff] }
 0xa52   : > { %v6216_v55 = vadd.f32 %v6215_v38, %v6127_v63  ;;  %v13548_v63 = vld [vmem:[#allocation31_spill] sm:$0xff] }
 0xa53   : > { %v5951_v3 = vpop.f32.mrf.mxu2 }
 0xa54   : > { %v5952_v7 = vadd.f32 %v5951_v3, %v12598_v18  ;;  %v6040_v58 = vpop.f32.mrf.mxu3  ;;  %v6795_v47 = vmax.f32 %v6216_v55, 0.0 }
 0xa55   : > { %v6131_v37 = vpop.f32.mrf.mxu0 }
 0xa56   : > { %v6041_v25 = vadd.f32 %v6040_v58, %v5952_v7  ;;  %v6220_v9 = vpop.f32.mrf.mxu1  ;;  %v12707_v36 = vpack.c.bf16 %v6795_v47, %v6787_v54 }
 0xa58   : > { %v6130_v0 = vadd.f32 %v6129_v35, %v6041_v25  ;;  %v10397_v35 = vld [vmem:[#allocation14 + $0x58] sm:$0xff] }
 0xa59   : > { %7582 = vmatpush.bf16.msrb.mxu3 %v10397_v35 }
 0xa5a   : > { %v6219_v8 = vadd.f32 %v6218_v49, %v6130_v0 }
 0xa5b   : > { %v5953_v48 = vpop.f32.mrf.mxu2 }
 0xa5c   : > { %v5954_v5 = vadd.f32 %v5953_v48, %v12598_v18  ;;  %v6042_v24 = vpop.f32.mrf.mxu3  ;;  %v6803_v3 = vmax.f32 %v6219_v8, 0.0 }
 0xa5d   : > { %v6134_v38 = vpop.f32.mrf.mxu0 }
 0xa5e   : > { %v6043_v53 = vadd.f32 %v6042_v24, %v5954_v5  ;;  %v6223_v28 = vpop.f32.mrf.mxu1 }
 0xa60   : > { %v6132_v11 = vadd.f32 %v6131_v37, %v6043_v53  ;;  %6271 = vmatmul.bf16.gmra.mxu2 %v13548_v63  ;;  %6449 = vmatmul.bf16.gmra.mxu0 %v13549_v51 }
 0xa61   : > { %6360 = vmatmul.bf16.gmra.mxu3 %v13550_v20  ;;  %6538 = vmatmul.bf16.gmra.mxu1 %v13551_v21  ;;  %v13552_v21 = vld [vmem:[#allocation32_spill] sm:$0xff] }
 0xa62   : > { %v6221_v55 = vadd.f32 %v6220_v9, %v6132_v11  ;;  %v10405_v11 = vld [vmem:[#allocation14 + $0x98] sm:$0xff] }
 0xa63   : > { %v5956_v49 = vpop.f32.mrf.mxu2  ;;  %7671 = vmatpush.bf16.msrb.mxu0 %v10405_v11 }
 0xa64   : > { %v5957_v54 = vadd.f32 %v5956_v49, %v12598_v18  ;;  %v6045_v7 = vpop.f32.mrf.mxu3  ;;  %v6811_v58 = vmax.f32 %v6221_v55, 0.0  ;;  %v13553_v55 = vld [vmem:[#allocation47_spill] sm:$0xff] }
 0xa65   : > { %v6136_v47 = vpop.f32.mrf.mxu0 }
 0xa66   : > { %v6046_v37 = vadd.f32 %v6045_v7, %v5957_v54  ;;  %v6225_v25 = vpop.f32.mrf.mxu1  ;;  %v12715_v0 = vpack.c.bf16 %v6811_v58, %v6803_v3 }
 0xa68   : > { %v6135_v48 = vadd.f32 %v6134_v38, %v6046_v37  ;;  %v10413_v37 = vld [vmem:[#allocation14 + $0xd8] sm:$0xff] }
 0xa69   : > { %7760 = vmatpush.bf16.msrb.mxu1 %v10413_v37 }
 0xa6a   : > { %v6224_v5 = vadd.f32 %v6223_v28, %v6135_v48 }
 0xa6b   : > { %v5958_v24 = vpop.f32.mrf.mxu2 }
 0xa6c   : > { %v5959_v9 = vadd.f32 %v5958_v24, %v12598_v18  ;;  %v6047_v53 = vpop.f32.mrf.mxu3  ;;  %v6819_v50 = vmax.f32 %v6224_v5, 0.0 }
 0xa6d   : > { %v6139_v63 = vpop.f32.mrf.mxu0 }
 0xa6e   : > { %v6048_v8 = vadd.f32 %v6047_v53, %v5959_v9  ;;  %v6228_v51 = vpop.f32.mrf.mxu1 }
 0xa70   : > { %v6137_v20 = vadd.f32 %v6136_v47, %v6048_v8  ;;  %6276 = vmatmul.bf16.gmra.mxu2 %v11514_v19  ;;  %6454 = vmatmul.bf16.gmra.mxu0 %v11710_v29  ;;  %v13554_v8 = vld [vmem:[#allocation34_spill] sm:$0xff] }
 0xa71   : > { %6365 = vmatmul.bf16.gmra.mxu3 %v13552_v21  ;;  %6543 = vmatmul.bf16.gmra.mxu1 %v13553_v55  ;;  %v13556_v21 = vld [vmem:[#allocation144_spill] sm:$0xff] }
 0xa72   : > { %v6226_v38 = vadd.f32 %v6225_v25, %v6137_v20  ;;  %v13555_v20 = vld [vmem:[#allocation49_spill] sm:$0xff]  ;;  %v12729_v55 = vperm.slane %v13556_v21, 7 }
 0xa73   : > { %v5961_v28 = vpop.f32.mrf.mxu2 }
 0xa74   : > { %v5962_v35 = vadd.f32 %v5961_v28, %v12598_v18  ;;  %v6050_v49 = vpop.f32.mrf.mxu3  ;;  %v6827_v3 = vmax.f32 %v6226_v38, 0.0  ;;  %v13557_v38 = vld [vmem:[#allocation33_spill] sm:$0xff] }
 0xa75   : > { %v6141_v54 = vpop.f32.mrf.mxu0  ;;  %v10388_v28 = vld [vmem:[#allocation14 + $0x10] sm:$0xff] }
 0xa76   : > { %v6051_v7 = vadd.f32 %v6050_v49, %v5962_v35  ;;  %v6230_v58 = vpop.f32.mrf.mxu1  ;;  %v12723_v47 = vpack.c.bf16 %v6827_v3, %v6819_v50  ;;  %v10396_v50 = vld [vmem:[#allocation14 + $0x50] sm:$0xff]  ;;  %7494 = vmatpush.bf16.msrb.mxu2 %v10388_v28 }
 0xa77   : > { %7583 = vmatpush.bf16.msrb.mxu3 %v10396_v50 }
 0xa78   : > { %v6140_v19 = vadd.f32 %v6139_v63, %v6051_v7  ;;  %v13558_v63 = vld [vmem:[#allocation48_spill] sm:$0xff] }
 0xa7a   : > { %v6229_v29 = vadd.f32 %v6228_v51, %v6140_v19 }
 0xa7b   : > { %v5963_v48 = vpop.f32.mrf.mxu2 }
 0xa7c   : > { %v5964_v24 = vadd.f32 %v5963_v48, %v12598_v18  ;;  %v6052_v9 = vpop.f32.mrf.mxu3  ;;  %v6835_v35 = vmax.f32 %v6229_v29, 0.0 }
 0xa7d   : > { %v6420_v25 = vpop.f32.mrf.mxu0 }
 0xa7e   : > { %v6053_v53 = vadd.f32 %v6052_v9, %v5964_v24  ;;  %v6509_v5 = vpop.f32.mrf.mxu1 }
 0xa80   : > { %v6142_v11 = vadd.f32 %v6141_v54, %v6053_v53  ;;  %6281 = vmatmul.bf16.gmra.mxu2 %v13554_v8  ;;  %6459 = vmatmul.bf16.gmra.mxu0 %v13555_v20  ;;  %v10404_v8 = vld [vmem:[#allocation14 + $0x90] sm:$0xff] }
 0xa81   : > { %6370 = vmatmul.bf16.gmra.mxu3 %v13557_v38  ;;  %6548 = vmatmul.bf16.gmra.mxu1 %v13558_v63 }
 0xa82   : > { %v6231_v51 = vadd.f32 %v6230_v58, %v6142_v11  ;;  %7672 = vmatpush.bf16.msrb.mxu0 %v10404_v8  ;;  %v10387_v8 = vld [vmem:[#allocation14 + $0x8] sm:$0xff] }
 0xa83   : > { %v6242_v18 = vpop.f32.mrf.mxu2  ;;  %7495 = vmatpush.bf16.msrb.mxu2 %v10387_v8 }
 0xa84   : > { %v6243_v49 = vadd.f32 %v6242_v18, %v12729_v55  ;;  %v6331_v3 = vpop.f32.mrf.mxu3  ;;  %v6843_v54 = vmax.f32 %v6231_v51, 0.0 }
 0xa85   : > { %v6422_v7 = vpop.f32.mrf.mxu0 }
 0xa86   : > { %v6332_v37 = vadd.f32 %v6331_v3, %v6243_v49  ;;  %v6511_v19 = vpop.f32.mrf.mxu1  ;;  %v12734_v48 = vpack.c.bf16 %v6843_v54, %v6835_v35 }
 0xa88   : > { %v6421_v24 = vadd.f32 %v6420_v25, %v6332_v37 }
 0xa8a   : > { %v6510_v9 = vadd.f32 %v6509_v5, %v6421_v24  ;;  %v10412_v5 = vld [vmem:[#allocation14 + $0xd0] sm:$0xff] }
 0xa8b   : > { %v6244_v53 = vpop.f32.mrf.mxu2  ;;  %7761 = vmatpush.bf16.msrb.mxu1 %v10412_v5 }
 0xa8c   : > { %v6245_v58 = vadd.f32 %v6244_v53, %v12729_v55  ;;  %v6333_v11 = vpop.f32.mrf.mxu3  ;;  %v6596_v51 = vmax.f32 %v6510_v9, 0.0  ;;  %v13559_v53 = vld [vmem:[#allocation35_spill] sm:$0xff] }
 0xa8d   : > { %v6425_v20 = vpop.f32.mrf.mxu0 }
 0xa8e   : > { %v6334_v29 = vadd.f32 %v6333_v11, %v6245_v58  ;;  %v6514_v21 = vpop.f32.mrf.mxu1  ;;  %v13560_v58 = vld [vmem:[#allocation50_spill] sm:$0xff] }
 0xa90   : > { %v6423_v38 = vadd.f32 %v6422_v7, %v6334_v29  ;;  %6286 = vmatmul.bf16.gmra.mxu2 %v11538_v52  ;;  %6464 = vmatmul.bf16.gmra.mxu0 %v11734_v1 }
 0xa91   : > { %6375 = vmatmul.bf16.gmra.mxu3 %v11530_v2  ;;  %6553 = vmatmul.bf16.gmra.mxu1 %v11726_v17 }
 0xa92   : > { %v6512_v25 = vadd.f32 %v6511_v19, %v6423_v38 }
 0xa93   : > { %v6247_v63 = vpop.f32.mrf.mxu2 }
 0xa94   : > { %v6604_v28 = vmax.f32 %v6512_v25, 0.0  ;;  %v6248_v50 = vadd.f32 %v6247_v63, %v12729_v55  ;;  %v6336_v18 = vpop.f32.mrf.mxu3 }
 0xa95   : > { %v6427_v35 = vpop.f32.mrf.mxu0 }
 0xa96   : > { %v12742_v49 = vpack.c.bf16 %v6604_v28, %v6596_v51  ;;  %v6337_v3 = vadd.f32 %v6336_v18, %v6248_v50  ;;  %v6516_v52 = vpop.f32.mrf.mxu1 }
 0xa98   : > { %v6426_v54 = vadd.f32 %v6425_v20, %v6337_v3  ;;  %v10395_v20 = vld [vmem:[#allocation14 + $0x48] sm:$0xff] }
 0xa99   : > { %7584 = vmatpush.bf16.msrb.mxu3 %v10395_v20 }
 0xa9a   : > { %v6515_v1 = vadd.f32 %v6514_v21, %v6426_v54 }
 0xa9b   : > { %v6249_v7 = vpop.f32.mrf.mxu2 }
 0xa9c   : > { %v6250_v2 = vadd.f32 %v6249_v7, %v12729_v55  ;;  %v6338_v17 = vpop.f32.mrf.mxu3  ;;  %v6612_v21 = vmax.f32 %v6515_v1, 0.0 }
 0xa9d   : > { %v6430_v37 = vpop.f32.mrf.mxu0 }
 0xa9e   : > { %v6339_v19 = vadd.f32 %v6338_v17, %v6250_v2  ;;  %v6519_v24 = vpop.f32.mrf.mxu1 }
 0xaa0   : > { %v6428_v9 = vadd.f32 %v6427_v35, %v6339_v19  ;;  %6291 = vmatmul.bf16.gmra.mxu2 %v11550_v23  ;;  %6469 = vmatmul.bf16.gmra.mxu0 %v11746_v41 }
 0xaa1   : > { %6380 = vmatmul.bf16.gmra.mxu3 %v13559_v53  ;;  %6558 = vmatmul.bf16.gmra.mxu1 %v13560_v58 }
 0xaa2   : > { %v6517_v11 = vadd.f32 %v6516_v52, %v6428_v9  ;;  %v10403_v52 = vld [vmem:[#allocation14 + $0x88] sm:$0xff] }
 0xaa3   : > { %v6252_v29 = vpop.f32.mrf.mxu2  ;;  %7673 = vmatpush.bf16.msrb.mxu0 %v10403_v52 }
 0xaa4   : > { %v6253_v38 = vadd.f32 %v6252_v29, %v12729_v55  ;;  %v6341_v25 = vpop.f32.mrf.mxu3  ;;  %v6620_v5 = vmax.f32 %v6517_v11, 0.0 }
 0xaa5   : > { %v6432_v63 = vpop.f32.mrf.mxu0 }
 0xaa6   : > { %v6342_v51 = vadd.f32 %v6341_v25, %v6253_v38  ;;  %v6521_v23 = vpop.f32.mrf.mxu1  ;;  %v12750_v28 = vpack.c.bf16 %v6620_v5, %v6612_v21 }
 0xaa8   : > { %v6431_v41 = vadd.f32 %v6430_v37, %v6342_v51  ;;  %v10411_v37 = vld [vmem:[#allocation14 + $0xc8] sm:$0xff] }
 0xaa9   : > { %7762 = vmatpush.bf16.msrb.mxu1 %v10411_v37  ;;  %v10402_v37 = vld [vmem:[#allocation14 + $0x80] sm:$0xff] }
 0xaaa   : > { %v6520_v50 = vadd.f32 %v6519_v24, %v6431_v41  ;;  %v10394_v41 = vld [vmem:[#allocation14 + $0x40] sm:$0xff]  ;;  %7674 = vmatpush.bf16.msrb.mxu0 %v10402_v37  ;;  %v10441_v37 = vld [vmem:[#allocation14 + $0x1b8] sm:$0xff] }
 0xaab   : > { %v6254_v18 = vpop.f32.mrf.mxu2  ;;  %7585 = vmatpush.bf16.msrb.mxu3 %v10394_v41 }
 0xaac   : > { %v6255_v35 = vadd.f32 %v6254_v18, %v12729_v55  ;;  %v6343_v3 = vpop.f32.mrf.mxu3  ;;  %v6628_v24 = vmax.f32 %v6520_v50, 0.0 }
 0xaad   : > { %v6435_v54 = vpop.f32.mrf.mxu0 }
 0xaae   : > { %v6344_v1 = vadd.f32 %v6343_v3, %v6255_v35  ;;  %v6524_v7 = vpop.f32.mrf.mxu1  ;;  %8023 = vmatpush.bf16.msra.mxu0 %v10441_v37 }
 0xab0   : > { %v6433_v2 = vadd.f32 %v6432_v63, %v6344_v1  ;;  %6296 = vmatmul.bf16.gmra.mxu2 %v11562_v34  ;;  %6474 = vmatmul.bf16.gmra.mxu0 %v11758_v22 }
 0xab1   : > { %6385 = vmatmul.bf16.gmra.mxu3 %v11554_v14  ;;  %6563 = vmatmul.bf16.gmra.mxu1 %v11750_v32 }
 0xab2   : > { %v6522_v17 = vadd.f32 %v6521_v23, %v6433_v2  ;;  %v10386_v23 = vld [vmem:[#allocation14] sm:$0xff] }
 0xab3   : > { %v6257_v19 = vpop.f32.mrf.mxu2  ;;  %7496 = vmatpush.bf16.msrb.mxu2 %v10386_v23 }
 0xab4   : > { %v6258_v9 = vadd.f32 %v6257_v19, %v12729_v55  ;;  %v6346_v53 = vpop.f32.mrf.mxu3  ;;  %v6636_v58 = vmax.f32 %v6522_v17, 0.0 }
 0xab5   : > { %v6437_v11 = vpop.f32.mrf.mxu0 }
 0xab6   : > { %v6347_v8 = vadd.f32 %v6346_v53, %v6258_v9  ;;  %v6526_v20 = vpop.f32.mrf.mxu1  ;;  %v12758_v29 = vpack.c.bf16 %v6636_v58, %v6628_v24 }
 0xab8   : > { %v6436_v34 = vadd.f32 %v6435_v54, %v6347_v8 }
 0xaba   : > { %v6525_v22 = vadd.f32 %v6524_v7, %v6436_v34 }
 0xabb   : > { %v6259_v21 = vpop.f32.mrf.mxu2 }
 0xabc   : > { %v6260_v14 = vadd.f32 %v6259_v21, %v12729_v55  ;;  %v6348_v32 = vpop.f32.mrf.mxu3  ;;  %v6644_v18 = vmax.f32 %v6525_v22, 0.0 }
 0xabd   : > { %v6440_v38 = vpop.f32.mrf.mxu0 }
 0xabe   : > { %v6349_v25 = vadd.f32 %v6348_v32, %v6260_v14  ;;  %v6529_v5 = vpop.f32.mrf.mxu1 }
 0xac0   : > { %v6438_v63 = vadd.f32 %v6437_v11, %v6349_v25  ;;  %6301 = vmatmul.bf16.gmra.mxu2 %v11574_v45  ;;  %6479 = vmatmul.bf16.gmra.mxu0 %v11770_v56  ;;  %v10410_v11 = vld [vmem:[#allocation14 + $0xc0] sm:$0xff] }
 0xac1   : > { %6390 = vmatmul.bf16.gmra.mxu3 %v11566_v39  ;;  %6568 = vmatmul.bf16.gmra.mxu1 %v11762_v15 }
 0xac2   : > { %v6527_v51 = vadd.f32 %v6526_v20, %v6438_v63  ;;  %7763 = vmatpush.bf16.msrb.mxu1 %v10410_v11  ;;  %v10449_v11 = vld [vmem:[#allocation14 + $0x1f8] sm:$0xff] }
 0xac3   : > { %v6262_v50 = vpop.f32.mrf.mxu2 }
 0xac4   : > { %v6263_v35 = vadd.f32 %v6262_v50, %v12729_v55  ;;  %v6351_v3 = vpop.f32.mrf.mxu3  ;;  %v6652_v52 = vmax.f32 %v6527_v51, 0.0 }
 0xac5   : > { %v6442_v54 = vpop.f32.mrf.mxu0 }
 0xac6   : > { %v6352_v1 = vadd.f32 %v6351_v3, %v6263_v35  ;;  %v6531_v45 = vpop.f32.mrf.mxu1  ;;  %v12766_v7 = vpack.c.bf16 %v6652_v52, %v6644_v18  ;;  %v10425_v18 = vld [vmem:[#allocation14 + $0x138] sm:$0xff]  ;;  %8112 = vmatpush.bf16.msra.mxu1 %v10449_v11 }
 0xac7   : > { %v10433_v35 = vld [vmem:[#allocation14 + $0x178] sm:$0xff]  ;;  %7845 = vmatpush.bf16.msra.mxu2 %v10425_v18 }
 0xac8   : > { %v6441_v56 = vadd.f32 %v6440_v38, %v6352_v1  ;;  %7934 = vmatpush.bf16.msra.mxu3 %v10433_v35  ;;  %v10424_v35 = vld [vmem:[#allocation14 + $0x130] sm:$0xff] }
 0xaca   : > { %v6530_v39 = vadd.f32 %v6529_v5, %v6441_v56 }
 0xacb   : > { %v6264_v2 = vpop.f32.mrf.mxu2  ;;  %7846 = vmatpush.bf16.msra.mxu2 %v10424_v35 }
 0xacc   : > { %v6265_v15 = vadd.f32 %v6264_v2, %v12729_v55  ;;  %v6353_v17 = vpop.f32.mrf.mxu3  ;;  %v6660_v20 = vmax.f32 %v6530_v39, 0.0 }
 0xacd   : > { %v6445_v19 = vpop.f32.mrf.mxu0 }
 0xace   : > { %v6354_v24 = vadd.f32 %v6353_v17, %v6265_v15  ;;  %v6534_v9 = vpop.f32.mrf.mxu1 }
 0xad0   : > { %v6443_v53 = vadd.f32 %v6442_v54, %v6354_v24  ;;  %6306 = vmatmul.bf16.gmra.mxu2 %v11586_v42  ;;  %6484 = vmatmul.bf16.gmra.mxu0 %v11782_v30 }
 0xad1   : > { %6395 = vmatmul.bf16.gmra.mxu3 %v11578_v44  ;;  %6573 = vmatmul.bf16.gmra.mxu1 %v11774_v6 }
 0xad2   : > { %v6532_v58 = vadd.f32 %v6531_v45, %v6443_v53 }
 0xad3   : > { %v6267_v8 = vpop.f32.mrf.mxu2 }
 0xad4   : > { %v6268_v34 = vadd.f32 %v6267_v8, %v12729_v55  ;;  %v6356_v22 = vpop.f32.mrf.mxu3  ;;  %v6668_v21 = vmax.f32 %v6532_v58, 0.0 }
 0xad5   : > { %v6447_v14 = vpop.f32.mrf.mxu0 }
 0xad6   : > { %v6357_v32 = vadd.f32 %v6356_v22, %v6268_v34  ;;  %v6536_v38 = vpop.f32.mrf.mxu1  ;;  %v12774_v25 = vpack.c.bf16 %v6668_v21, %v6660_v20 }
 0xad8   : > { %v6446_v42 = vadd.f32 %v6445_v19, %v6357_v32 }
 0xada   : > { %v6535_v30 = vadd.f32 %v6534_v9, %v6446_v42 }
 0xadb   : > { %v6269_v5 = vpop.f32.mrf.mxu2 }
 0xadc   : > { %v6270_v44 = vadd.f32 %v6269_v5, %v12729_v55  ;;  %v6358_v6 = vpop.f32.mrf.mxu3  ;;  %v6676_v52 = vmax.f32 %v6535_v30, 0.0 }
 0xadd   : > { %v6450_v63 = vpop.f32.mrf.mxu0 }
 0xade   : > { %v6359_v51 = vadd.f32 %v6358_v6, %v6270_v44  ;;  %v6539_v23 = vpop.f32.mrf.mxu1 }
 0xae0   : > { %v6448_v41 = vadd.f32 %v6447_v14, %v6359_v51  ;;  %6311 = vmatmul.bf16.gmra.mxu2 %v11598_v26  ;;  %6489 = vmatmul.bf16.gmra.mxu0 %v11794_v12  ;;  %v13561_v51 = vld [vmem:[#allocation51_spill] sm:$0xff] }
 0xae1   : > { %6400 = vmatmul.bf16.gmra.mxu3 %v11590_v59  ;;  %6578 = vmatmul.bf16.gmra.mxu1 %v11786_v13 }
 0xae2   : > { %v6537_v50 = vadd.f32 %v6536_v38, %v6448_v41  ;;  %v13563_v41 = vld [vmem:[#allocation65_spill] sm:$0xff] }
 0xae3   : > { %v6272_v3 = vpop.f32.mrf.mxu2 }
 0xae4   : > { %v6273_v54 = vadd.f32 %v6272_v3, %v12729_v55  ;;  %v6361_v1 = vpop.f32.mrf.mxu3  ;;  %v6684_v45 = vmax.f32 %v6537_v50, 0.0  ;;  %v13564_v50 = vld [vmem:[#allocation97_spill] sm:$0xff] }
 0xae5   : > { %v6452_v56 = vpop.f32.mrf.mxu0  ;;  %v10432_v3 = vld [vmem:[#allocation14 + $0x170] sm:$0xff] }
 0xae6   : > { %v6362_v39 = vadd.f32 %v6361_v1, %v6273_v54  ;;  %v6541_v26 = vpop.f32.mrf.mxu1  ;;  %v12782_v2 = vpack.c.bf16 %v6684_v45, %v6676_v52  ;;  %7935 = vmatpush.bf16.msra.mxu3 %v10432_v3 }
 0xae8   : > { %v6451_v12 = vadd.f32 %v6450_v63, %v6362_v39 }
 0xaea   : > { %v6540_v59 = vadd.f32 %v6539_v23, %v6451_v12  ;;  %v13562_v23 = vld [vmem:[#allocation82_spill] sm:$0xff] }
 0xaeb   : > { %v6274_v15 = vpop.f32.mrf.mxu2 }
 0xaec   : > { %v6275_v13 = vadd.f32 %v6274_v15, %v12729_v55  ;;  %v6363_v17 = vpop.f32.mrf.mxu3  ;;  %v6692_v20 = vmax.f32 %v6540_v59, 0.0 }
 0xaed   : > { %v6455_v19 = vpop.f32.mrf.mxu0 }
 0xaee   : > { %v6364_v24 = vadd.f32 %v6363_v17, %v6275_v13  ;;  %v6544_v9 = vpop.f32.mrf.mxu1 }
 0xaf0   : > { %v6453_v53 = vadd.f32 %v6452_v56, %v6364_v24  ;;  %6316 = vmatmul.bf16.gmra.mxu2 %v11614_v16  ;;  %6494 = vmatmul.bf16.gmra.mxu0 %v11810_v4  ;;  %v10440_v24 = vld [vmem:[#allocation14 + $0x1b0] sm:$0xff] }
 0xaf1   : > { %6405 = vmatmul.bf16.gmra.mxu3 %v11604_v40  ;;  %6583 = vmatmul.bf16.gmra.mxu1 %v11798_v60 }
 0xaf2   : > { %v6542_v58 = vadd.f32 %v6541_v26, %v6453_v53  ;;  %8024 = vmatpush.bf16.msra.mxu0 %v10440_v24 }
 0xaf3   : > { %v6277_v8 = vpop.f32.mrf.mxu2 }
 0xaf4   : > { %v6278_v34 = vadd.f32 %v6277_v8, %v12729_v55  ;;  %v6366_v22 = vpop.f32.mrf.mxu3  ;;  %v6700_v21 = vmax.f32 %v6542_v58, 0.0  ;;  %v13565_v8 = vld [vmem:[#allocation52_spill] sm:$0xff] }
 0xaf5   : > { %v6457_v14 = vpop.f32.mrf.mxu0 }
 0xaf6   : > { %v6367_v32 = vadd.f32 %v6366_v22, %v6278_v34  ;;  %v6546_v38 = vpop.f32.mrf.mxu1  ;;  %v12790_v42 = vpack.c.bf16 %v6700_v21, %v6692_v20  ;;  %v13566_v20 = vld [vmem:[#allocation83_spill] sm:$0xff]  ;;  %v13567_v34 = vld [vmem:[#allocation66_spill] sm:$0xff] }
 0xaf7   : > { %v13568_v22 = vld [vmem:[#allocation98_spill] sm:$0xff] }
 0xaf8   : > { %v6456_v16 = vadd.f32 %v6455_v19, %v6367_v32 }
 0xafa   : > { %v6545_v4 = vadd.f32 %v6544_v9, %v6456_v16 }
 0xafb   : > { %v6279_v30 = vpop.f32.mrf.mxu2 }
 0xafc   : > { %v6280_v40 = vadd.f32 %v6279_v30, %v12729_v55  ;;  %v6368_v60 = vpop.f32.mrf.mxu3  ;;  %v6708_v54 = vmax.f32 %v6545_v4, 0.0 }
 0xafd   : > { %v6460_v5 = vpop.f32.mrf.mxu0 }
 0xafe   : > { %v6369_v44 = vadd.f32 %v6368_v60, %v6280_v40  ;;  %v6549_v6 = vpop.f32.mrf.mxu1 }
 0xb00   : > { %v6458_v63 = vadd.f32 %v6457_v14, %v6369_v44  ;;  %7497 = vmatmul.bf16.vlgmr.msrb.gmra.mxu2 %v13561_v51  ;;  %7675 = vmatmul.bf16.vlgmr.msrb.gmra.mxu0 %v13562_v23  ;;  %v10448_v14 = vld [vmem:[#allocation14 + $0x1f0] sm:$0xff] }
 0xb01   : > { %7586 = vmatmul.bf16.vlgmr.msrb.gmra.mxu3 %v13563_v41  ;;  %7764 = vmatmul.bf16.vlgmr.msrb.gmra.mxu1 %v13564_v50 }
 0xb02   : > { %v6547_v18 = vadd.f32 %v6546_v38, %v6458_v63  ;;  %8113 = vmatpush.bf16.msra.mxu1 %v10448_v14 }
 0xb03   : > { %v6282_v52 = vpop.f32.mrf.mxu2 }
 0xb04   : > { %v6283_v1 = vadd.f32 %v6282_v52, %v12729_v55  ;;  %v6371_v45 = vpop.f32.mrf.mxu3  ;;  %v6716_v56 = vmax.f32 %v6547_v18, 0.0  ;;  %v13569_v52 = vld [vmem:[#allocation53_spill] sm:$0xff] }
 0xb05   : > { %v6462_v39 = vpop.f32.mrf.mxu0 }
 0xb06   : > { %v6372_v26 = vadd.f32 %v6371_v45, %v6283_v1  ;;  %v6551_v12 = vpop.f32.mrf.mxu1  ;;  %v12798_v59 = vpack.c.bf16 %v6716_v56, %v6708_v54  ;;  %v13570_v54 = vld [vmem:[#allocation84_spill] sm:$0xff]  ;;  %v13571_v1 = vld [vmem:[#allocation67_spill] sm:$0xff] }
 0xb07   : > { %v13572_v45 = vld [vmem:[#allocation99_spill] sm:$0xff] }
 0xb08   : > { %v6461_v15 = vadd.f32 %v6460_v5, %v6372_v26  ;;  %v10431_v26 = vld [vmem:[#allocation14 + $0x168] sm:$0xff] }
 0xb09   : > { %7936 = vmatpush.bf16.msra.mxu3 %v10431_v26 }
 0xb0a   : > { %v6550_v13 = vadd.f32 %v6549_v6, %v6461_v15 }
 0xb0b   : > { %v6284_v17 = vpop.f32.mrf.mxu2 }
 0xb0c   : > { %v6285_v37 = vadd.f32 %v6284_v17, %v12729_v55  ;;  %v6373_v19 = vpop.f32.mrf.mxu3  ;;  %v6724_v38 = vmax.f32 %v6550_v13, 0.0 }
 0xb0d   : > { %v6465_v9 = vpop.f32.mrf.mxu0 }
 0xb0e   : > { %v6374_v53 = vadd.f32 %v6373_v19, %v6285_v37  ;;  %v6554_v58 = vpop.f32.mrf.mxu1 }
 0xb10   : > { %v6463_v11 = vadd.f32 %v6462_v39, %v6374_v53  ;;  %7502 = vmatmul.bf16.gmra.mxu2 %v13565_v8  ;;  %7680 = vmatmul.bf16.gmra.mxu0 %v13566_v20  ;;  %v10423_v39 = vld [vmem:[#allocation14 + $0x128] sm:$0xff] }
 0xb11   : > { %7591 = vmatmul.bf16.gmra.mxu3 %v13567_v34  ;;  %7769 = vmatmul.bf16.gmra.mxu1 %v13568_v22  ;;  %v10439_v22 = vld [vmem:[#allocation14 + $0x1a8] sm:$0xff] }
 0xb12   : > { %v6552_v21 = vadd.f32 %v6551_v12, %v6463_v11  ;;  %7847 = vmatpush.bf16.msra.mxu2 %v10423_v39  ;;  %8025 = vmatpush.bf16.msra.mxu0 %v10439_v22 }
 0xb13   : > { %v6287_v32 = vpop.f32.mrf.mxu2 }
 0xb14   : > { %v6288_v16 = vadd.f32 %v6287_v32, %v12729_v55  ;;  %v6376_v4 = vpop.f32.mrf.mxu3  ;;  %v6732_v30 = vmax.f32 %v6552_v21, 0.0 }
 0xb15   : > { %v6467_v40 = vpop.f32.mrf.mxu0 }
 0xb16   : > { %v6377_v60 = vadd.f32 %v6376_v4, %v6288_v16  ;;  %v6556_v5 = vpop.f32.mrf.mxu1  ;;  %v12806_v44 = vpack.c.bf16 %v6732_v30, %v6724_v38  ;;  %v13573_v16 = vld [vmem:[#allocation54_spill] sm:$0xff]  ;;  %v13574_v4 = vld [vmem:[#allocation85_spill] sm:$0xff]  ;;  %v13575_v30 = vld [vmem:[#allocation68_spill] sm:$0xff] }
 0xb18   : > { %v6466_v6 = vadd.f32 %v6465_v9, %v6377_v60 }
 0xb1a   : > { %v6555_v63 = vadd.f32 %v6554_v58, %v6466_v6 }
 0xb1b   : > { %v6289_v51 = vpop.f32.mrf.mxu2 }
 0xb1c   : > { %v6290_v23 = vadd.f32 %v6289_v51, %v12729_v55  ;;  %v6378_v41 = vpop.f32.mrf.mxu3  ;;  %v6740_v15 = vmax.f32 %v6555_v63, 0.0 }
 0xb1d   : > { %v6470_v50 = vpop.f32.mrf.mxu0 }
 0xb1e   : > { %v6379_v18 = vadd.f32 %v6378_v41, %v6290_v23  ;;  %v6559_v35 = vpop.f32.mrf.mxu1 }
 0xb20   : > { %v6468_v3 = vadd.f32 %v6467_v40, %v6379_v18  ;;  %7507 = vmatmul.bf16.gmra.mxu2 %v13569_v52  ;;  %7685 = vmatmul.bf16.gmra.mxu0 %v13570_v54  ;;  %v13576_v40 = vld [vmem:[#allocation100_spill] sm:$0xff] }
 0xb21   : > { %7596 = vmatmul.bf16.gmra.mxu3 %v13571_v1  ;;  %7774 = vmatmul.bf16.gmra.mxu1 %v13572_v45 }
 0xb22   : > { %v6557_v56 = vadd.f32 %v6556_v5, %v6468_v3  ;;  %v10447_v5 = vld [vmem:[#allocation14 + $0x1e8] sm:$0xff] }
 0xb23   : > { %v6292_v12 = vpop.f32.mrf.mxu2  ;;  %8114 = vmatpush.bf16.msra.mxu1 %v10447_v5  ;;  %v10438_v5 = vld [vmem:[#allocation14 + $0x1a0] sm:$0xff] }
 0xb24   : > { %v6293_v13 = vadd.f32 %v6292_v12, %v12729_v55  ;;  %v6381_v17 = vpop.f32.mrf.mxu3  ;;  %v6748_v37 = vmax.f32 %v6557_v56, 0.0  ;;  %8026 = vmatpush.bf16.msra.mxu0 %v10438_v5 }
 0xb25   : > { %v6472_v19 = vpop.f32.mrf.mxu0 }
 0xb26   : > { %v6382_v24 = vadd.f32 %v6381_v17, %v6293_v13  ;;  %v6561_v9 = vpop.f32.mrf.mxu1  ;;  %v12814_v53 = vpack.c.bf16 %v6748_v37, %v6740_v15  ;;  %v13577_v13 = vld [vmem:[#allocation55_spill] sm:$0xff]  ;;  %v13578_v17 = vld [vmem:[#allocation86_spill] sm:$0xff]  ;;  %v13579_v37 = vld [vmem:[#allocation69_spill] sm:$0xff] }
 0xb28   : > { %v6471_v58 = vadd.f32 %v6470_v50, %v6382_v24 }
 0xb2a   : > { %v6560_v11 = vadd.f32 %v6559_v35, %v6471_v58  ;;  %v10430_v58 = vld [vmem:[#allocation14 + $0x160] sm:$0xff] }
 0xb2b   : > { %v6294_v8 = vpop.f32.mrf.mxu2  ;;  %7937 = vmatpush.bf16.msra.mxu3 %v10430_v58 }
 0xb2c   : > { %v6295_v20 = vadd.f32 %v6294_v8, %v12729_v55  ;;  %v6383_v34 = vpop.f32.mrf.mxu3  ;;  %v6756_v63 = vmax.f32 %v6560_v11, 0.0 }
 0xb2d   : > { %v6475_v21 = vpop.f32.mrf.mxu0 }
 0xb2e   : > { %v6384_v14 = vadd.f32 %v6383_v34, %v6295_v20  ;;  %v6564_v32 = vpop.f32.mrf.mxu1 }
 0xb30   : > { %v6473_v38 = vadd.f32 %v6472_v19, %v6384_v14  ;;  %7512 = vmatmul.bf16.gmra.mxu2 %v13573_v16  ;;  %7690 = vmatmul.bf16.gmra.mxu0 %v13574_v4  ;;  %v13580_v19 = vld [vmem:[#allocation101_spill] sm:$0xff] }
 0xb31   : > { %7601 = vmatmul.bf16.gmra.mxu3 %v13575_v30  ;;  %7779 = vmatmul.bf16.gmra.mxu1 %v13576_v40 }
 0xb32   : > { %v6562_v60 = vadd.f32 %v6561_v9, %v6473_v38  ;;  %v10422_v9 = vld [vmem:[#allocation14 + $0x120] sm:$0xff] }
 0xb33   : > { %v6297_v6 = vpop.f32.mrf.mxu2  ;;  %7848 = vmatpush.bf16.msra.mxu2 %v10422_v9 }
 0xb34   : > { %v6298_v51 = vadd.f32 %v6297_v6, %v12729_v55  ;;  %v6386_v23 = vpop.f32.mrf.mxu3  ;;  %v6764_v41 = vmax.f32 %v6562_v60, 0.0 }
 0xb35   : > { %v6477_v50 = vpop.f32.mrf.mxu0 }
 0xb36   : > { %v6387_v18 = vadd.f32 %v6386_v23, %v6298_v51  ;;  %v6566_v35 = vpop.f32.mrf.mxu1  ;;  %v12822_v3 = vpack.c.bf16 %v6764_v41, %v6756_v63  ;;  %v13581_v41 = vld [vmem:[#allocation56_spill] sm:$0xff] }
 0xb38   : > { %v6476_v52 = vadd.f32 %v6475_v21, %v6387_v18  ;;  %v13583_v18 = vld [vmem:[#allocation70_spill] sm:$0xff] }
 0xb3a   : > { %v6565_v54 = vadd.f32 %v6564_v32, %v6476_v52 }
 0xb3b   : > { %v6299_v1 = vpop.f32.mrf.mxu2 }
 0xb3c   : > { %v6300_v45 = vadd.f32 %v6299_v1, %v12729_v55  ;;  %v6388_v56 = vpop.f32.mrf.mxu3  ;;  %v6772_v8 = vmax.f32 %v6565_v54, 0.0  ;;  %v10446_v54 = vld [vmem:[#allocation14 + $0x1e0] sm:$0xff] }
 0xb3d   : > { %v6480_v39 = vpop.f32.mrf.mxu0  ;;  %8115 = vmatpush.bf16.msra.mxu1 %v10446_v54 }
 0xb3e   : > { %v6389_v26 = vadd.f32 %v6388_v56, %v6300_v45  ;;  %v6569_v12 = vpop.f32.mrf.mxu1 }
 0xb40   : > { %v6478_v15 = vadd.f32 %v6477_v50, %v6389_v26  ;;  %7517 = vmatmul.bf16.gmra.mxu2 %v13577_v13  ;;  %7695 = vmatmul.bf16.gmra.mxu0 %v13578_v17  ;;  %v13582_v50 = vld [vmem:[#allocation87_spill] sm:$0xff] }
 0xb41   : > { %7606 = vmatmul.bf16.gmra.mxu3 %v13579_v37  ;;  %7784 = vmatmul.bf16.gmra.mxu1 %v13580_v19 }
 0xb42   : > { %v6567_v24 = vadd.f32 %v6566_v35, %v6478_v15  ;;  %v13584_v35 = vld [vmem:[#allocation102_spill] sm:$0xff] }
 0xb43   : > { %v6302_v11 = vpop.f32.mrf.mxu2 }
 0xb44   : > { %v6303_v20 = vadd.f32 %v6302_v11, %v12729_v55  ;;  %v6391_v34 = vpop.f32.mrf.mxu3  ;;  %v6780_v22 = vmax.f32 %v6567_v24, 0.0 }
 0xb45   : > { %v6482_v21 = vpop.f32.mrf.mxu0 }
 0xb46   : > { %v6392_v14 = vadd.f32 %v6391_v34, %v6303_v20  ;;  %v6571_v32 = vpop.f32.mrf.mxu1  ;;  %v12830_v38 = vpack.c.bf16 %v6780_v22, %v6772_v8  ;;  %v13585_v22 = vld [vmem:[#allocation57_spill] sm:$0xff] }
 0xb48   : > { %v6481_v16 = vadd.f32 %v6480_v39, %v6392_v14  ;;  %v13587_v14 = vld [vmem:[#allocation71_spill] sm:$0xff] }
 0xb4a   : > { %v6570_v4 = vadd.f32 %v6569_v12, %v6481_v16 }
 0xb4b   : > { %v6304_v30 = vpop.f32.mrf.mxu2 }
 0xb4c   : > { %v6305_v40 = vadd.f32 %v6304_v30, %v12729_v55  ;;  %v6393_v60 = vpop.f32.mrf.mxu3  ;;  %v6788_v45 = vmax.f32 %v6570_v4, 0.0  ;;  %v10421_v4 = vld [vmem:[#allocation14 + $0x118] sm:$0xff] }
 0xb4d   : > { %v6485_v6 = vpop.f32.mrf.mxu0  ;;  %v10429_v30 = vld [vmem:[#allocation14 + $0x158] sm:$0xff]  ;;  %7849 = vmatpush.bf16.msra.mxu2 %v10421_v4 }
 0xb4e   : > { %v6394_v63 = vadd.f32 %v6393_v60, %v6305_v40  ;;  %v6574_v51 = vpop.f32.mrf.mxu1  ;;  %7938 = vmatpush.bf16.msra.mxu3 %v10429_v30 }
 0xb50   : > { %v6483_v23 = vadd.f32 %v6482_v21, %v6394_v63  ;;  %7522 = vmatmul.bf16.gmra.mxu2 %v13581_v41  ;;  %7700 = vmatmul.bf16.gmra.mxu0 %v13582_v50  ;;  %v13586_v21 = vld [vmem:[#allocation88_spill] sm:$0xff] }
 0xb51   : > { %7611 = vmatmul.bf16.gmra.mxu3 %v13583_v18  ;;  %7789 = vmatmul.bf16.gmra.mxu1 %v13584_v35  ;;  %v10437_v35 = vld [vmem:[#allocation14 + $0x198] sm:$0xff] }
 0xb52   : > { %v6572_v52 = vadd.f32 %v6571_v32, %v6483_v23  ;;  %v13588_v32 = vld [vmem:[#allocation103_spill] sm:$0xff]  ;;  %8027 = vmatpush.bf16.msra.mxu0 %v10437_v35  ;;  %v13595_v35 = vld [vmem:[#allocation73_spill] sm:$0xff] }
 0xb53   : > { %v6307_v1 = vpop.f32.mrf.mxu2 }
 0xb54   : > { %v6308_v56 = vadd.f32 %v6307_v1, %v12729_v55  ;;  %v6396_v39 = vpop.f32.mrf.mxu3  ;;  %v6796_v26 = vmax.f32 %v6572_v52, 0.0 }
 0xb55   : > { %v6487_v12 = vpop.f32.mrf.mxu0 }
 0xb56   : > { %v6397_v15 = vadd.f32 %v6396_v39, %v6308_v56  ;;  %v6576_v13 = vpop.f32.mrf.mxu1  ;;  %v12838_v17 = vpack.c.bf16 %v6796_v26, %v6788_v45 }
 0xb58   : > { %v6486_v37 = vadd.f32 %v6485_v6, %v6397_v15  ;;  %v13589_v15 = vld [vmem:[#allocation58_spill] sm:$0xff] }
 0xb5a   : > { %v6575_v19 = vadd.f32 %v6574_v51, %v6486_v37  ;;  %v10445_v37 = vld [vmem:[#allocation14 + $0x1d8] sm:$0xff] }
 0xb5b   : > { %v6309_v24 = vpop.f32.mrf.mxu2  ;;  %8116 = vmatpush.bf16.msra.mxu1 %v10445_v37 }
 0xb5c   : > { %v6310_v9 = vadd.f32 %v6309_v24, %v12729_v55  ;;  %v6398_v58 = vpop.f32.mrf.mxu3  ;;  %v6804_v60 = vmax.f32 %v6575_v19, 0.0  ;;  %v13591_v19 = vld [vmem:[#allocation72_spill] sm:$0xff] }
 0xb5d   : > { %v6490_v11 = vpop.f32.mrf.mxu0  ;;  %v13592_v24 = vld [vmem:[#allocation104_spill] sm:$0xff] }
 0xb5e   : > { %v6399_v8 = vadd.f32 %v6398_v58, %v6310_v9  ;;  %v6579_v20 = vpop.f32.mrf.mxu1 }
 0xb60   : > { %v6488_v34 = vadd.f32 %v6487_v12, %v6399_v8  ;;  %7527 = vmatmul.bf16.gmra.mxu2 %v13585_v22  ;;  %7705 = vmatmul.bf16.gmra.mxu0 %v13586_v21 }
 0xb61   : > { %7616 = vmatmul.bf16.gmra.mxu3 %v13587_v14  ;;  %7794 = vmatmul.bf16.gmra.mxu1 %v13588_v32 }
 0xb62   : > { %v6577_v16 = vadd.f32 %v6576_v13, %v6488_v34  ;;  %v13590_v13 = vld [vmem:[#allocation89_spill] sm:$0xff] }
 0xb63   : > { %v6312_v40 = vpop.f32.mrf.mxu2 }
 0xb64   : > { %v6313_v5 = vadd.f32 %v6312_v40, %v12729_v55  ;;  %v6401_v6 = vpop.f32.mrf.mxu3  ;;  %v6812_v63 = vmax.f32 %v6577_v16, 0.0 }
 0xb65   : > { %v6492_v51 = vpop.f32.mrf.mxu0 }
 0xb66   : > { %v6402_v23 = vadd.f32 %v6401_v6, %v6313_v5  ;;  %v6581_v41 = vpop.f32.mrf.mxu1  ;;  %v12846_v50 = vpack.c.bf16 %v6812_v63, %v6804_v60 }
 0xb68   : > { %v6491_v18 = vadd.f32 %v6490_v11, %v6402_v23  ;;  %v13593_v23 = vld [vmem:[#allocation37_spill] sm:$0xff] }
 0xb6a   : > { %v6580_v52 = vadd.f32 %v6579_v20, %v6491_v18  ;;  %v12862_v18 = vld [vmem:[%s13166_s8] ss:$0 sm:$0xff] }
 0xb6b   : > { %v6314_v54 = vpop.f32.mrf.mxu2 }
 0xb6c   : > { %v6315_v1 = vadd.f32 %v6314_v54, %v12729_v55  ;;  %v6403_v45 = vpop.f32.mrf.mxu3  ;;  %v6820_v11 = vmax.f32 %v6580_v52, 0.0  ;;  %v13596_v52 = vld [vmem:[#allocation105_spill] sm:$0xff] }
 0xb6d   : > { %v6495_v56 = vpop.f32.mrf.mxu0  ;;  %v10420_v54 = vld [vmem:[#allocation14 + $0x110] sm:$0xff] }
 0xb6e   : > { %v6404_v39 = vadd.f32 %v6403_v45, %v6315_v1  ;;  %v6584_v26 = vpop.f32.mrf.mxu1  ;;  %7850 = vmatpush.bf16.msra.mxu2 %v10420_v54 }
 0xb70   : > { %v6493_v12 = vadd.f32 %v6492_v51, %v6404_v39  ;;  %7532 = vmatmul.bf16.gmra.mxu2 %v13589_v15  ;;  %7710 = vmatmul.bf16.gmra.mxu0 %v13590_v13 }
 0xb71   : > { %7621 = vmatmul.bf16.gmra.mxu3 %v13591_v19  ;;  %7799 = vmatmul.bf16.gmra.mxu1 %v13592_v24 }
 0xb72   : > { %v6582_v9 = vadd.f32 %v6581_v41, %v6493_v12  ;;  %v13594_v41 = vld [vmem:[#allocation90_spill] sm:$0xff] }
 0xb73   : > { %v6317_v58 = vpop.f32.mrf.mxu2 }
 0xb74   : > { %v6318_v8 = vadd.f32 %v6317_v58, %v12729_v55  ;;  %v6406_v20 = vpop.f32.mrf.mxu3  ;;  %v6828_v34 = vmax.f32 %v6582_v9, 0.0  ;;  %v10436_v9 = vld [vmem:[#allocation14 + $0x190] sm:$0xff] }
 0xb75   : > { %v6497_v22 = vpop.f32.mrf.mxu0  ;;  %8028 = vmatpush.bf16.msra.mxu0 %v10436_v9  ;;  %v10419_v9 = vld [vmem:[#allocation14 + $0x108] sm:$0xff] }
 0xb76   : > { %v6407_v21 = vadd.f32 %v6406_v20, %v6318_v8  ;;  %v6586_v14 = vpop.f32.mrf.mxu1  ;;  %v12854_v32 = vpack.c.bf16 %v6828_v34, %v6820_v11  ;;  %7851 = vmatpush.bf16.msra.mxu2 %v10419_v9 }
 0xb78   : > { %v6496_v16 = vadd.f32 %v6495_v56, %v6407_v21 }
 0xb7a   : > { %v6585_v4 = vadd.f32 %v6584_v26, %v6496_v16  ;;  %v13597_v16 = vld [vmem:[#allocation59_spill] sm:$0xff] }
 0xb7b   : > { %v6319_v30 = vpop.f32.mrf.mxu2 }
 0xb7c   : > { %v6320_v40 = vadd.f32 %v6319_v30, %v12729_v55  ;;  %v6408_v60 = vpop.f32.mrf.mxu3  ;;  %v10428_v55 = vld [vmem:[#allocation14 + $0x150] sm:$0xff]  ;;  %v6836_v56 = vmax.f32 %v6585_v4, 0.0  ;;  %v13598_v4 = vld [vmem:[#allocation91_spill] sm:$0xff] }
 0xb7d   : > { %v7676_v5 = vpop.f32.mrf.mxu0  ;;  %7939 = vmatpush.bf16.msra.mxu3 %v10428_v55  ;;  %v10444_v30 = vld [vmem:[#allocation14 + $0x1d0] sm:$0xff] }
 0xb7e   : > { %v6409_v6 = vadd.f32 %v6408_v60, %v6320_v40  ;;  %v7765_v63 = vpop.f32.mrf.mxu1  ;;  %v13599_v40 = vld [vmem:[#allocation74_spill] sm:$0xff]  ;;  %8117 = vmatpush.bf16.msra.mxu1 %v10444_v30  ;;  %v10435_v30 = vld [vmem:[#allocation14 + $0x188] sm:$0xff] }
 0xb7f   : > { %v13600_v60 = vld [vmem:[#allocation106_spill] sm:$0xff]  ;;  %8029 = vmatpush.bf16.msra.mxu0 %v10435_v30 }
 0xb80   : > { %v6498_v51 = vadd.f32 %v6497_v22, %v6409_v6  ;;  %7537 = vmatmul.bf16.gmra.mxu2 %v13593_v23  ;;  %7715 = vmatmul.bf16.gmra.mxu0 %v13594_v41 }
 0xb81   : > { %7626 = vmatmul.bf16.gmra.mxu3 %v13595_v35  ;;  %7804 = vmatmul.bf16.gmra.mxu1 %v13596_v52 }
 0xb82   : > { %v6587_v1 = vadd.f32 %v6586_v14, %v6498_v51 }
 0xb83   : > { %v7498_v45 = vpop.f32.mrf.mxu2 }
 0xb84   : > { %v7499_v39 = vadd.f32 %v12862_v18, %v7498_v45  ;;  %v7587_v26 = vpop.f32.mrf.mxu3  ;;  %v6844_v12 = vmax.f32 %v6587_v1, 0.0 }
 0xb85   : > { %v7678_v15 = vpop.f32.mrf.mxu0 }
 0xb86   : > { %v7588_v13 = vadd.f32 %v7587_v26, %v7499_v39  ;;  %v7767_v37 = vpop.f32.mrf.mxu1  ;;  %v12867_v19 = vpack.c.bf16 %v6844_v12, %v6836_v56 }
 0xb88   : > { %v7677_v24 = vadd.f32 %v7676_v5, %v7588_v13  ;;  %v13602_v13 = vld [vmem:[#allocation92_spill] sm:$0xff] }
 0xb8a   : > { %v12869_v58 = vadd.f32 %v7765_v63, %v7677_v24  ;;  %v13604_v24 = vld [vmem:[#allocation107_spill] sm:$0xff] }
 0xb8b   : > { %v7500_v11 = vpop.f32.mrf.mxu2 }
 0xb8c   : > { %v7501_v8 = vadd.f32 %v12862_v18, %v7500_v11  ;;  %v7589_v20 = vpop.f32.mrf.mxu3  ;;  %v10427_v11 = vld [vmem:[#allocation14 + $0x148] sm:$0xff] }
 0xb8d   : > { %v7681_v34 = vpop.f32.mrf.mxu0  ;;  %7940 = vmatpush.bf16.msra.mxu3 %v10427_v11 }
 0xb8e   : > { %v7590_v22 = vadd.f32 %v7589_v20, %v7501_v8  ;;  %v7770_v21 = vpop.f32.mrf.mxu1 }
 0xb90   : > { %v7679_v14 = vadd.f32 %v7678_v15, %v7590_v22  ;;  %7542 = vmatmul.bf16.gmra.mxu2 %v13597_v16  ;;  %7720 = vmatmul.bf16.gmra.mxu0 %v13598_v4  ;;  %v13601_v15 = vld [vmem:[#allocation60_spill] sm:$0xff] }
 0xb91   : > { %7631 = vmatmul.bf16.gmra.mxu3 %v13599_v40  ;;  %7809 = vmatmul.bf16.gmra.mxu1 %v13600_v60 }
 0xb92   : > { %v12876_v5 = vadd.f32 %v7767_v37, %v7679_v14  ;;  %v13603_v37 = vld [vmem:[#allocation75_spill] sm:$0xff] }
 0xb93   : > { %v7503_v6 = vpop.f32.mrf.mxu2 }
 0xb94   : > { %v7504_v63 = vadd.f32 %v12862_v18, %v7503_v6  ;;  %v7592_v51 = vpop.f32.mrf.mxu3 }
 0xb95   : > { %v7683_v23 = vpop.f32.mrf.mxu0 }
 0xb96   : > { %v7593_v41 = vadd.f32 %v7592_v51, %v7504_v63  ;;  %v7772_v35 = vpop.f32.mrf.mxu1 }
 0xb98   : > { %v7682_v52 = vadd.f32 %v7681_v34, %v7593_v41 }
 0xb9a   : > { %v12879_v54 = vadd.f32 %v7770_v21, %v7682_v52  ;;  %v13605_v52 = vld [vmem:[#allocation61_spill] sm:$0xff] }
 0xb9b   : > { %v7505_v55 = vpop.f32.mrf.mxu2 }
 0xb9c   : > { %v7506_v1 = vadd.f32 %v12862_v18, %v7505_v55  ;;  %v7594_v45 = vpop.f32.mrf.mxu3  ;;  %v13606_v55 = vld [vmem:[#allocation93_spill] sm:$0xff] }
 0xb9d   : > { %v7686_v56 = vpop.f32.mrf.mxu0 }
 0xb9e   : > { %v7595_v39 = vadd.f32 %v7594_v45, %v7506_v1  ;;  %v7775_v26 = vpop.f32.mrf.mxu1  ;;  %v10443_v1 = vld [vmem:[#allocation14 + $0x1c8] sm:$0xff] }
 0xb9f   : > { %v13607_v45 = vld [vmem:[#allocation76_spill] sm:$0xff]  ;;  %8118 = vmatpush.bf16.msra.mxu1 %v10443_v1 }
 0xba0   : > { %v7684_v12 = vadd.f32 %v7683_v23, %v7595_v39  ;;  %7547 = vmatmul.bf16.gmra.mxu2 %v13601_v15  ;;  %7725 = vmatmul.bf16.gmra.mxu0 %v13602_v13 }
 0xba1   : > { %7636 = vmatmul.bf16.gmra.mxu3 %v13603_v37  ;;  %7814 = vmatmul.bf16.gmra.mxu1 %v13604_v24 }
 0xba2   : > { %v12886_v8 = vadd.f32 %v7772_v35, %v7684_v12 }
 0xba3   : > { %v7508_v20 = vpop.f32.mrf.mxu2 }
 0xba4   : > { %v7509_v34 = vadd.f32 %v12862_v18, %v7508_v20  ;;  %v7597_v22 = vpop.f32.mrf.mxu3 }
 0xba5   : > { %v7688_v21 = vpop.f32.mrf.mxu0 }
 0xba6   : > { %v7598_v14 = vadd.f32 %v7597_v22, %v7509_v34  ;;  %v7777_v16 = vpop.f32.mrf.mxu1 }
 0xba8   : > { %v7687_v4 = vadd.f32 %v7686_v56, %v7598_v14  ;;  %v13608_v56 = vld [vmem:[#allocation108_spill] sm:$0xff] }
 0xbaa   : > { %v12889_v40 = vadd.f32 %v7775_v26, %v7687_v4 }
 0xbab   : > { %v7510_v60 = vpop.f32.mrf.mxu2 }
 0xbac   : > { %v7511_v6 = vadd.f32 %v12862_v18, %v7510_v60  ;;  %v7599_v63 = vpop.f32.mrf.mxu3  ;;  %v13610_v60 = vld [vmem:[#allocation94_spill] sm:$0xff] }
 0xbad   : > { %v7691_v51 = vpop.f32.mrf.mxu0 }
 0xbae   : > { %v7600_v23 = vadd.f32 %v7599_v63, %v7511_v6  ;;  %v7780_v41 = vpop.f32.mrf.mxu1  ;;  %v13611_v6 = vld [vmem:[#allocation77_spill] sm:$0xff] }
 0xbaf   : > { %v13612_v63 = vld [vmem:[#allocation109_spill] sm:$0xff] }
 0xbb0   : > { %v7689_v35 = vadd.f32 %v7688_v21, %v7600_v23  ;;  %7552 = vmatmul.bf16.gmra.mxu2 %v13605_v52  ;;  %7730 = vmatmul.bf16.gmra.mxu0 %v13606_v55  ;;  %v10418_v23 = vld [vmem:[#allocation14 + $0x100] sm:$0xff] }
 0xbb1   : > { %7641 = vmatmul.bf16.gmra.mxu3 %v13607_v45  ;;  %7819 = vmatmul.bf16.gmra.mxu1 %v13608_v56 }
 0xbb2   : > { %v12896_v39 = vadd.f32 %v7777_v16, %v7689_v35  ;;  %v13609_v16 = vld [vmem:[#allocation62_spill] sm:$0xff]  ;;  %7852 = vmatpush.bf16.msra.mxu2 %v10418_v23 }
 0xbb3   : > { %v7513_v26 = vpop.f32.mrf.mxu2 }
 0xbb4   : > { %v7514_v12 = vadd.f32 %v12862_v18, %v7513_v26  ;;  %v7602_v15 = vpop.f32.mrf.mxu3 }
 0xbb5   : > { %v7693_v13 = vpop.f32.mrf.mxu0 }
 0xbb6   : > { %v7603_v37 = vadd.f32 %v7602_v15, %v7514_v12  ;;  %v7782_v24 = vpop.f32.mrf.mxu1  ;;  %v10434_v12 = vld [vmem:[#allocation14 + $0x180] sm:$0xff] }
 0xbb7   : > { %8030 = vmatpush.bf16.msra.mxu0 %v10434_v12 }
 0xbb8   : > { %v7692_v9 = vadd.f32 %v7691_v51, %v7603_v37  ;;  %v10426_v51 = vld [vmem:[#allocation14 + $0x140] sm:$0xff] }
 0xbb9   : > { %7941 = vmatpush.bf16.msra.mxu3 %v10426_v51 }
 0xbba   : > { %v12899_v11 = vadd.f32 %v7780_v41, %v7692_v9 }
 0xbbb   : > { %v7515_v20 = vpop.f32.mrf.mxu2 }
 0xbbc   : > { %v7516_v34 = vadd.f32 %v12862_v18, %v7515_v20  ;;  %v7604_v22 = vpop.f32.mrf.mxu3 }
 0xbbd   : > { %v7696_v21 = vpop.f32.mrf.mxu0 }
 0xbbe   : > { %v7605_v14 = vadd.f32 %v7604_v22, %v7516_v34  ;;  %v7785_v4 = vpop.f32.mrf.mxu1 }
 0xbc0   : > { %v7694_v30 = vadd.f32 %v7693_v13, %v7605_v14  ;;  %7557 = vmatmul.bf16.gmra.mxu2 %v13609_v16  ;;  %7735 = vmatmul.bf16.gmra.mxu0 %v13610_v60  ;;  %v13613_v14 = vld [vmem:[#allocation63_spill] sm:$0xff]  ;;  %v13615_v60 = vld [vmem:[#allocation78_spill] sm:$0xff] }
 0xbc1   : > { %7646 = vmatmul.bf16.gmra.mxu3 %v13611_v6  ;;  %7824 = vmatmul.bf16.gmra.mxu1 %v13612_v63  ;;  %v10442_v16 = vld [vmem:[#allocation14 + $0x1c0] sm:$0xff] }
 0xbc2   : > { %v12906_v41 = vadd.f32 %v7782_v24, %v7694_v30  ;;  %v13614_v30 = vld [vmem:[#allocation95_spill] sm:$0xff]  ;;  %8119 = vmatpush.bf16.msra.mxu1 %v10442_v16 }
 0xbc3   : > { %v7518_v35 = vpop.f32.mrf.mxu2 }
 0xbc4   : > { %v7519_v52 = vadd.f32 %v12862_v18, %v7518_v35  ;;  %v7607_v55 = vpop.f32.mrf.mxu3 }
 0xbc5   : > { %v7698_v1 = vpop.f32.mrf.mxu0 }
 0xbc6   : > { %v7608_v45 = vadd.f32 %v7607_v55, %v7519_v52  ;;  %v7787_v56 = vpop.f32.mrf.mxu1 }
 0xbc8   : > { %v7697_v26 = vadd.f32 %v7696_v21, %v7608_v45  ;;  %v13616_v21 = vld [vmem:[#allocation110_spill] sm:$0xff] }
 0xbca   : > { %v12909_v15 = vadd.f32 %v7785_v4, %v7697_v26 }
 0xbcb   : > { %v7520_v13 = vpop.f32.mrf.mxu2 }
 0xbcc   : > { %v7521_v37 = vadd.f32 %v12862_v18, %v7520_v13  ;;  %v7609_v9 = vpop.f32.mrf.mxu3 }
 0xbcd   : > { %v7701_v24 = vpop.f32.mrf.mxu0 }
 0xbce   : > { %v7610_v20 = vadd.f32 %v7609_v9, %v7521_v37  ;;  %v7790_v34 = vpop.f32.mrf.mxu1 }
 0xbd0   : > { %v7699_v22 = vadd.f32 %v7698_v1, %v7610_v20  ;;  %7562 = vmatmul.bf16.gmra.mxu2 %v13613_v14  ;;  %7740 = vmatmul.bf16.gmra.mxu0 %v13614_v30  ;;  %v13619_v14 = vld [vmem:[#allocation79_spill] sm:$0xff] }
 0xbd1   : > { %7651 = vmatmul.bf16.gmra.mxu3 %v13615_v60  ;;  %7829 = vmatmul.bf16.gmra.mxu1 %v13616_v21  ;;  %v13620_v30 = vld [vmem:[#allocation111_spill] sm:$0xff] }
 0xbd2   : > { %v12916_v4 = vadd.f32 %v7787_v56, %v7699_v22  ;;  %v13617_v56 = vld [vmem:[#allocation64_spill] sm:$0xff] }
 0xbd3   : > { %v7523_v6 = vpop.f32.mrf.mxu2  ;;  %v13618_v22 = vld [vmem:[#allocation96_spill] sm:$0xff] }
 0xbd4   : > { %v7524_v63 = vadd.f32 %v12862_v18, %v7523_v6  ;;  %v7612_v23 = vpop.f32.mrf.mxu3 }
 0xbd5   : > { %v7703_v51 = vpop.f32.mrf.mxu0 }
 0xbd6   : > { %v7613_v35 = vadd.f32 %v7612_v23, %v7524_v63  ;;  %v7792_v52 = vpop.f32.mrf.mxu1 }
 0xbd8   : > { %v7702_v55 = vadd.f32 %v7701_v24, %v7613_v35 }
 0xbda   : > { %v12919_v1 = vadd.f32 %v7790_v34, %v7702_v55 }
 0xbdb   : > { %v7525_v45 = vpop.f32.mrf.mxu2 }
 0xbdc   : > { %v7526_v26 = vadd.f32 %v12862_v18, %v7525_v45  ;;  %v7614_v12 = vpop.f32.mrf.mxu3 }
 0xbdd   : > { %v7706_v13 = vpop.f32.mrf.mxu0 }
 0xbde   : > { %v7615_v37 = vadd.f32 %v7614_v12, %v7526_v26  ;;  %v7795_v9 = vpop.f32.mrf.mxu1 }
 0xbe0   : > { %v7704_v20 = vadd.f32 %v7703_v51, %v7615_v37  ;;  %7567 = vmatmul.bf16.gmra.mxu2 %v13617_v56  ;;  %7745 = vmatmul.bf16.gmra.mxu0 %v13618_v22  ;;  %v13623_v22 = vld [vmem:[#allocation81_spill] sm:$0xff] }
 0xbe1   : > { %7656 = vmatmul.bf16.gmra.mxu3 %v13619_v14  ;;  %7834 = vmatmul.bf16.gmra.mxu1 %v13620_v30  ;;  %v13624_v14 = vld [vmem:[#allocation113_spill] sm:$0xff] }
 0xbe2   : > { %v12926_v16 = vadd.f32 %v7792_v52, %v7704_v20  ;;  %v13621_v52 = vld [vmem:[#allocation29_spill] sm:$0xff]  ;;  %v13622_v20 = vld [vmem:[#allocation80_spill] sm:$0xff] }
 0xbe3   : > { %v7528_v24 = vpop.f32.mrf.mxu2 }
 0xbe4   : > { %v7529_v34 = vadd.f32 %v12862_v18, %v7528_v24  ;;  %v7617_v60 = vpop.f32.mrf.mxu3 }
 0xbe5   : > { %v7708_v21 = vpop.f32.mrf.mxu0 }
 0xbe6   : > { %v7618_v6 = vadd.f32 %v7617_v60, %v7529_v34  ;;  %v7797_v63 = vpop.f32.mrf.mxu1 }
 0xbe8   : > { %v7707_v23 = vadd.f32 %v7706_v13, %v7618_v6 }
 0xbea   : > { %v12929_v35 = vadd.f32 %v7795_v9, %v7707_v23 }
 0xbeb   : > { %v7530_v51 = vpop.f32.mrf.mxu2 }
 0xbec   : > { %v7531_v55 = vadd.f32 %v12862_v18, %v7530_v51  ;;  %v7619_v45 = vpop.f32.mrf.mxu3 }
 0xbed   : > { %v7711_v26 = vpop.f32.mrf.mxu0 }
 0xbee   : > { %v7620_v12 = vadd.f32 %v7619_v45, %v7531_v55  ;;  %v7800_v37 = vpop.f32.mrf.mxu1 }
 0xbf0   : > { %v7709_v56 = vadd.f32 %v7708_v21, %v7620_v12  ;;  %7572 = vmatmul.bf16.gmra.mxu2 %v13621_v52  ;;  %7750 = vmatmul.bf16.gmra.mxu0 %v13622_v20 }
 0xbf1   : > { %7661 = vmatmul.bf16.gmra.mxu3 %v13623_v22  ;;  %7839 = vmatmul.bf16.gmra.mxu1 %v13624_v14  ;;  %v13627_v14 = vld [vmem:[#allocation129_spill] sm:$0xff] }
 0xbf2   : > { %v12936_v30 = vadd.f32 %v7797_v63, %v7709_v56  ;;  %v13625_v63 = vld [vmem:[#allocation114_spill] sm:$0xff] }
 0xbf3   : > { %v7533_v13 = vpop.f32.mrf.mxu2  ;;  %v13626_v56 = vld [vmem:[#allocation146_spill] sm:$0xff] }
 0xbf4   : > { %v7534_v9 = vadd.f32 %v12862_v18, %v7533_v13  ;;  %v7622_v24 = vpop.f32.mrf.mxu3 }
 0xbf5   : > { %v7713_v34 = vpop.f32.mrf.mxu0 }
 0xbf6   : > { %v7623_v60 = vadd.f32 %v7622_v24, %v7534_v9  ;;  %v7802_v6 = vpop.f32.mrf.mxu1 }
 0xbf8   : > { %v7712_v23 = vadd.f32 %v7711_v26, %v7623_v60 }
 0xbfa   : > { %v12939_v51 = vadd.f32 %v7800_v37, %v7712_v23 }
 0xbfb   : > { %v7535_v21 = vpop.f32.mrf.mxu2 }
 0xbfc   : > { %v7536_v55 = vadd.f32 %v12862_v18, %v7535_v21  ;;  %v7624_v45 = vpop.f32.mrf.mxu3 }
 0xbfd   : > { %v7716_v12 = vpop.f32.mrf.mxu0 }
 0xbfe   : > { %v7625_v52 = vadd.f32 %v7624_v45, %v7536_v55  ;;  %v7805_v20 = vpop.f32.mrf.mxu1 }
 0xc00   : > { %v7714_v22 = vadd.f32 %v7713_v34, %v7625_v52  ;;  %7853 = vmatmul.bf16.vlgmr.msra.gmra.mxu2 %v13625_v63  ;;  %8031 = vmatmul.bf16.vlgmr.msra.gmra.mxu0 %v13626_v56 }
 0xc01   : > { %7942 = vmatmul.bf16.vlgmr.msra.gmra.mxu3 %v13627_v14  ;;  %8120 = vmatmul.bf16.vlgmr.msra.gmra.mxu1 %v12742_v49 }
 0xc02   : > { %v12946_v13 = vadd.f32 %v7802_v6, %v7714_v22  ;;  %v13629_v6 = vld [vmem:[#allocation115_spill] sm:$0xff] }
 0xc03   : > { %v7538_v26 = vpop.f32.mrf.mxu2  ;;  %v13630_v22 = vld [vmem:[#allocation147_spill] sm:$0xff] }
 0xc04   : > { %v7539_v37 = vadd.f32 %v12862_v18, %v7538_v26  ;;  %v7627_v9 = vpop.f32.mrf.mxu3  ;;  %v13631_v26 = vld [vmem:[#allocation130_spill] sm:$0xff] }
 0xc05   : > { %v7718_v24 = vpop.f32.mrf.mxu0 }
 0xc06   : > { %v7628_v60 = vadd.f32 %v7627_v9, %v7539_v37  ;;  %v7807_v23 = vpop.f32.mrf.mxu1 }
 0xc08   : > { %v7717_v21 = vadd.f32 %v7716_v12, %v7628_v60 }
 0xc0a   : > { %v12949_v55 = vadd.f32 %v7805_v20, %v7717_v21 }
 0xc0b   : > { %v7540_v34 = vpop.f32.mrf.mxu2 }
 0xc0c   : > { %13628 = vst [vmem:[#allocation23_spill] sm:$0xff] %v12949_v55  ;;  %v7541_v45 = vadd.f32 %v12862_v18, %v7540_v34  ;;  %v7629_v52 = vpop.f32.mrf.mxu3 }
 0xc0d   : > { %v7721_v63 = vpop.f32.mrf.mxu0 }
 0xc0e   : > { %v7630_v56 = vadd.f32 %v7629_v52, %v7541_v45  ;;  %v7810_v14 = vpop.f32.mrf.mxu1 }
 0xc10   : > { %v7719_v49 = vadd.f32 %v7718_v24, %v7630_v56  ;;  %7858 = vmatmul.bf16.gmra.mxu2 %v13629_v6  ;;  %8036 = vmatmul.bf16.gmra.mxu0 %v13630_v22 }
 0xc11   : > { %7947 = vmatmul.bf16.gmra.mxu3 %v13631_v26  ;;  %8125 = vmatmul.bf16.gmra.mxu1 %v12750_v28 }
 0xc12   : > { %v12956_v37 = vadd.f32 %v7807_v23, %v7719_v49  ;;  %v13633_v23 = vld [vmem:[#allocation116_spill] sm:$0xff] }
 0xc13   : > { %v7543_v12 = vpop.f32.mrf.mxu2  ;;  %v13634_v49 = vld [vmem:[#allocation148_spill] sm:$0xff] }
 0xc14   : > { %v7544_v20 = vadd.f32 %v12862_v18, %v7543_v12  ;;  %v7632_v9 = vpop.f32.mrf.mxu3  ;;  %v13635_v12 = vld [vmem:[#allocation131_spill] sm:$0xff] }
 0xc15   : > { %v7723_v60 = vpop.f32.mrf.mxu0 }
 0xc16   : > { %v7633_v21 = vadd.f32 %v7632_v9, %v7544_v20  ;;  %v7812_v34 = vpop.f32.mrf.mxu1 }
 0xc18   : > { %v7722_v45 = vadd.f32 %v7721_v63, %v7633_v21 }
 0xc1a   : > { %v12959_v52 = vadd.f32 %v7810_v14, %v7722_v45 }
 0xc1b   : > { %v7545_v24 = vpop.f32.mrf.mxu2 }
 0xc1c   : > { %13632 = vst [vmem:[#allocation36_spill] sm:$0xff] %v12959_v52  ;;  %v7546_v56 = vadd.f32 %v12862_v18, %v7545_v24  ;;  %v7634_v6 = vpop.f32.mrf.mxu3 }
 0xc1d   : > { %v7726_v22 = vpop.f32.mrf.mxu0 }
 0xc1e   : > { %v7635_v26 = vadd.f32 %v7634_v6, %v7546_v56  ;;  %v7815_v55 = vpop.f32.mrf.mxu1 }
 0xc20   : > { %v7724_v28 = vadd.f32 %v7723_v60, %v7635_v26  ;;  %7863 = vmatmul.bf16.gmra.mxu2 %v13633_v23  ;;  %8041 = vmatmul.bf16.gmra.mxu0 %v13634_v49 }
 0xc21   : > { %7952 = vmatmul.bf16.gmra.mxu3 %v13635_v12  ;;  %8130 = vmatmul.bf16.gmra.mxu1 %v12758_v29 }
 0xc22   : > { %v12966_v20 = vadd.f32 %v7812_v34, %v7724_v28  ;;  %v13636_v34 = vld [vmem:[#allocation117_spill] sm:$0xff]  ;;  %v13637_v28 = vld [vmem:[#allocation132_spill] sm:$0xff] }
 0xc23   : > { %v7548_v63 = vpop.f32.mrf.mxu2 }
 0xc24   : > { %v7549_v14 = vadd.f32 %v12862_v18, %v7548_v63  ;;  %v7637_v9 = vpop.f32.mrf.mxu3 }
 0xc25   : > { %v7728_v21 = vpop.f32.mrf.mxu0 }
 0xc26   : > { %v7638_v45 = vadd.f32 %v7637_v9, %v7549_v14  ;;  %v7817_v24 = vpop.f32.mrf.mxu1 }
 0xc28   : > { %v7727_v56 = vadd.f32 %v7726_v22, %v7638_v45 }
 0xc2a   : > { %v12969_v6 = vadd.f32 %v7815_v55, %v7727_v56 }
 0xc2b   : > { %v7550_v60 = vpop.f32.mrf.mxu2 }
 0xc2c   : > { %v7551_v26 = vadd.f32 %v12862_v18, %v7550_v60  ;;  %v7639_v23 = vpop.f32.mrf.mxu3 }
 0xc2d   : > { %v7731_v49 = vpop.f32.mrf.mxu0 }
 0xc2e   : > { %v7640_v12 = vadd.f32 %v7639_v23, %v7551_v26  ;;  %v7820_v52 = vpop.f32.mrf.mxu1 }
 0xc30   : > { %v7729_v29 = vadd.f32 %v7728_v21, %v7640_v12  ;;  %7868 = vmatmul.bf16.gmra.mxu2 %v13636_v34  ;;  %8046 = vmatmul.bf16.gmra.mxu0 %v12635_v43 }
 0xc31   : > { %7957 = vmatmul.bf16.gmra.mxu3 %v13637_v28  ;;  %8135 = vmatmul.bf16.gmra.mxu1 %v12766_v7 }
 0xc32   : > { %v12976_v63 = vadd.f32 %v7817_v24, %v7729_v29  ;;  %v13638_v24 = vld [vmem:[#allocation118_spill] sm:$0xff]  ;;  %v13639_v29 = vld [vmem:[#allocation133_spill] sm:$0xff] }
 0xc33   : > { %v7553_v55 = vpop.f32.mrf.mxu2 }
 0xc34   : > { %v7554_v22 = vadd.f32 %v12862_v18, %v7553_v55  ;;  %v7642_v14 = vpop.f32.mrf.mxu3 }
 0xc35   : > { %v7733_v9 = vpop.f32.mrf.mxu0 }
 0xc36   : > { %v7643_v45 = vadd.f32 %v7642_v14, %v7554_v22  ;;  %v7822_v56 = vpop.f32.mrf.mxu1 }
 0xc38   : > { %v7732_v60 = vadd.f32 %v7731_v49, %v7643_v45 }
 0xc3a   : > { %v12979_v26 = vadd.f32 %v7820_v52, %v7732_v60 }
 0xc3b   : > { %v7555_v21 = vpop.f32.mrf.mxu2 }
 0xc3c   : > { %v7556_v23 = vadd.f32 %v12862_v18, %v7555_v21  ;;  %v7644_v43 = vpop.f32.mrf.mxu3 }
 0xc3d   : > { %v7736_v12 = vpop.f32.mrf.mxu0 }
 0xc3e   : > { %v7645_v34 = vadd.f32 %v7644_v43, %v7556_v23  ;;  %v7825_v28 = vpop.f32.mrf.mxu1 }
 0xc40   : > { %v7734_v7 = vadd.f32 %v7733_v9, %v7645_v34  ;;  %7873 = vmatmul.bf16.gmra.mxu2 %v13638_v24  ;;  %8051 = vmatmul.bf16.gmra.mxu0 %v12643_v27 }
 0xc41   : > { %7962 = vmatmul.bf16.gmra.mxu3 %v13639_v29  ;;  %8140 = vmatmul.bf16.gmra.mxu1 %v12774_v25 }
 0xc42   : > { %v12986_v55 = vadd.f32 %v7822_v56, %v7734_v7  ;;  %v13640_v56 = vld [vmem:[#allocation119_spill] sm:$0xff]  ;;  %v13641_v7 = vld [vmem:[#allocation134_spill] sm:$0xff] }
 0xc43   : > { %v7558_v52 = vpop.f32.mrf.mxu2 }
 0xc44   : > { %v7559_v49 = vadd.f32 %v12862_v18, %v7558_v52  ;;  %v7647_v22 = vpop.f32.mrf.mxu3 }
 0xc45   : > { %v7738_v14 = vpop.f32.mrf.mxu0 }
 0xc46   : > { %v7648_v45 = vadd.f32 %v7647_v22, %v7559_v49  ;;  %v7827_v60 = vpop.f32.mrf.mxu1 }
 0xc48   : > { %v7737_v21 = vadd.f32 %v7736_v12, %v7648_v45 }
 0xc4a   : > { %v12989_v23 = vadd.f32 %v7825_v28, %v7737_v21 }
 0xc4b   : > { %v7560_v9 = vpop.f32.mrf.mxu2 }
 0xc4c   : > { %v7561_v43 = vadd.f32 %v12862_v18, %v7560_v9  ;;  %v7649_v27 = vpop.f32.mrf.mxu3 }
 0xc4d   : > { %v7741_v34 = vpop.f32.mrf.mxu0 }
 0xc4e   : > { %v7650_v24 = vadd.f32 %v7649_v27, %v7561_v43  ;;  %v7830_v29 = vpop.f32.mrf.mxu1 }
 0xc50   : > { %v7739_v25 = vadd.f32 %v7738_v14, %v7650_v24  ;;  %7878 = vmatmul.bf16.gmra.mxu2 %v13640_v56  ;;  %8056 = vmatmul.bf16.gmra.mxu0 %v12651_v57 }
 0xc51   : > { %7967 = vmatmul.bf16.gmra.mxu3 %v13641_v7  ;;  %8145 = vmatmul.bf16.gmra.mxu1 %v12782_v2 }
 0xc52   : > { %v12996_v52 = vadd.f32 %v7827_v60, %v7739_v25  ;;  %v13642_v60 = vld [vmem:[#allocation120_spill] sm:$0xff]  ;;  %v13643_v25 = vld [vmem:[#allocation135_spill] sm:$0xff] }
 0xc53   : > { %v7563_v12 = vpop.f32.mrf.mxu2 }
 0xc54   : > { %v7564_v28 = vadd.f32 %v12862_v18, %v7563_v12  ;;  %v7652_v49 = vpop.f32.mrf.mxu3 }
 0xc55   : > { %v7743_v22 = vpop.f32.mrf.mxu0 }
 0xc56   : > { %v7653_v45 = vadd.f32 %v7652_v49, %v7564_v28  ;;  %v7832_v21 = vpop.f32.mrf.mxu1 }
 0xc58   : > { %v7742_v9 = vadd.f32 %v7741_v34, %v7653_v45 }
 0xc5a   : > { %v12999_v43 = vadd.f32 %v7830_v29, %v7742_v9 }
 0xc5b   : > { %v7565_v14 = vpop.f32.mrf.mxu2 }
 0xc5c   : > { %v7566_v27 = vadd.f32 %v12862_v18, %v7565_v14  ;;  %v7654_v57 = vpop.f32.mrf.mxu3 }
 0xc5d   : > { %v7746_v24 = vpop.f32.mrf.mxu0 }
 0xc5e   : > { %v7655_v56 = vadd.f32 %v7654_v57, %v7566_v27  ;;  %v7835_v7 = vpop.f32.mrf.mxu1 }
 0xc60   : > { %v7744_v2 = vadd.f32 %v7743_v22, %v7655_v56  ;;  %7883 = vmatmul.bf16.gmra.mxu2 %v13642_v60  ;;  %8061 = vmatmul.bf16.gmra.mxu0 %v12659_v62 }
 0xc61   : > { %7972 = vmatmul.bf16.gmra.mxu3 %v13643_v25  ;;  %8150 = vmatmul.bf16.gmra.mxu1 %v12790_v42 }
 0xc62   : > { %v13006_v12 = vadd.f32 %v7832_v21, %v7744_v2  ;;  %v13644_v21 = vld [vmem:[#allocation121_spill] sm:$0xff]  ;;  %v13645_v2 = vld [vmem:[#allocation136_spill] sm:$0xff] }
 0xc63   : > { %v7568_v34 = vpop.f32.mrf.mxu2 }
 0xc64   : > { %v7569_v29 = vadd.f32 %v12862_v18, %v7568_v34  ;;  %v7657_v28 = vpop.f32.mrf.mxu3 }
 0xc65   : > { %v7748_v49 = vpop.f32.mrf.mxu0 }
 0xc66   : > { %v7658_v45 = vadd.f32 %v7657_v28, %v7569_v29  ;;  %v7837_v9 = vpop.f32.mrf.mxu1 }
 0xc68   : > { %v7747_v14 = vadd.f32 %v7746_v24, %v7658_v45 }
 0xc6a   : > { %v13009_v27 = vadd.f32 %v7835_v7, %v7747_v14 }
 0xc6b   : > { %v7570_v22 = vpop.f32.mrf.mxu2 }
 0xc6c   : > { %v7571_v57 = vadd.f32 %v12862_v18, %v7570_v22  ;;  %v7659_v62 = vpop.f32.mrf.mxu3 }
 0xc6d   : > { %v7751_v56 = vpop.f32.mrf.mxu0 }
 0xc6e   : > { %v7660_v60 = vadd.f32 %v7659_v62, %v7571_v57  ;;  %v7840_v25 = vpop.f32.mrf.mxu1 }
 0xc70   : > { %v7749_v42 = vadd.f32 %v7748_v49, %v7660_v60  ;;  %7888 = vmatmul.bf16.gmra.mxu2 %v13644_v21  ;;  %8066 = vmatmul.bf16.gmra.mxu0 %v12667_v46 }
 0xc71   : > { %7977 = vmatmul.bf16.gmra.mxu3 %v13645_v2  ;;  %8155 = vmatmul.bf16.gmra.mxu1 %v12798_v59 }
 0xc72   : > { %v13016_v34 = vadd.f32 %v7837_v9, %v7749_v42  ;;  %v13646_v9 = vld [vmem:[#allocation122_spill] sm:$0xff]  ;;  %v13647_v42 = vld [vmem:[#allocation137_spill] sm:$0xff] }
 0xc73   : > { %v7573_v24 = vpop.f32.mrf.mxu2 }
 0xc74   : > { %v7574_v7 = vadd.f32 %v12862_v18, %v7573_v24  ;;  %v7662_v29 = vpop.f32.mrf.mxu3 }
 0xc75   : > { %v7753_v28 = vpop.f32.mrf.mxu0 }
 0xc76   : > { %v7663_v45 = vadd.f32 %v7662_v29, %v7574_v7  ;;  %v7842_v14 = vpop.f32.mrf.mxu1 }
 0xc78   : > { %v7752_v22 = vadd.f32 %v7751_v56, %v7663_v45 }
 0xc7a   : > { %v13019_v57 = vadd.f32 %v7840_v25, %v7752_v22 }
 0xc7b   : > { %v7575_v49 = vpop.f32.mrf.mxu2 }
 0xc7c   : > { %v7576_v62 = vadd.f32 %v12862_v18, %v7575_v49  ;;  %v7664_v46 = vpop.f32.mrf.mxu3 }
 0xc7d   : > { %v8032_v60 = vpop.f32.mrf.mxu0 }
 0xc7e   : > { %v7665_v21 = vadd.f32 %v7664_v46, %v7576_v62  ;;  %v8121_v2 = vpop.f32.mrf.mxu1 }
 0xc80   : > { %v7754_v59 = vadd.f32 %v7753_v28, %v7665_v21  ;;  %7893 = vmatmul.bf16.gmra.mxu2 %v13646_v9  ;;  %8071 = vmatmul.bf16.gmra.mxu0 %v12675_v31 }
 0xc81   : > { %7982 = vmatmul.bf16.gmra.mxu3 %v13647_v42  ;;  %8160 = vmatmul.bf16.gmra.mxu1 %v12806_v44 }
 0xc82   : > { %v13026_v24 = vadd.f32 %v7842_v14, %v7754_v59  ;;  %v13648_v59 = vld [vmem:[#allocation123_spill] sm:$0xff] }
 0xc83   : > { %v7854_v56 = vpop.f32.mrf.mxu2 }
 0xc84   : > { %v7855_v25 = vadd.f32 %v7854_v56, %v12869_v58  ;;  %v7943_v7 = vpop.f32.mrf.mxu3  ;;  %v13649_v58 = vld [vmem:[#allocation138_spill] sm:$0xff] }
 0xc85   : > { %v8034_v18 = vpop.f32.mrf.mxu0 }
 0xc86   : > { %v7944_v29 = vadd.f32 %v7943_v7, %v7855_v25  ;;  %v8123_v45 = vpop.f32.mrf.mxu1 }
 0xc88   : > { %v8033_v22 = vadd.f32 %v8032_v60, %v7944_v29 }
 0xc8a   : > { %v8122_v28 = vadd.f32 %v8121_v2, %v8033_v22 }
 0xc8b   : > { %v7856_v49 = vpop.f32.mrf.mxu2 }
 0xc8c   : > { %10595 = vtanh.f32 %v8122_v28  ;;  %v7857_v31 = vadd.f32 %v7856_v49, %v12876_v5  ;;  %v7945_v62 = vpop.f32.mrf.mxu3 }
 0xc8d   : > { %v8037_v46 = vpop.f32.mrf.mxu0 }
 0xc8e   : > { %v7946_v21 = vadd.f32 %v7945_v62, %v7857_v31  ;;  %v8126_v44 = vpop.f32.mrf.mxu1 }
 0xc90   : > { %v8035_v14 = vadd.f32 %v8034_v18, %v7946_v21  ;;  %7898 = vmatmul.bf16.gmra.mxu2 %v13648_v59  ;;  %8076 = vmatmul.bf16.gmra.mxu0 %v12683_v61  ;;  %v13650_v21 = vld [vmem:[#allocation124_spill] sm:$0xff] }
 0xc91   : > { %7987 = vmatmul.bf16.gmra.mxu3 %v13649_v58  ;;  %8165 = vmatmul.bf16.gmra.mxu1 %v12814_v53 }
 0xc92   : > { %v10596_v60 = vpop.eup %10595  ;;  %v8124_v9 = vadd.f32 %v8123_v45, %v8035_v14 }
 0xc93   : > { %8233 = vst [vmem:[%s13036_s25] sm:$0xff] %v10596_v60  ;;  %v7859_v5 = vpop.f32.mrf.mxu2 }
 0xc94   : > { %10597 = vtanh.f32 %v8124_v9  ;;  %v7860_v2 = vadd.f32 %v7859_v5, %v12879_v54  ;;  %v7948_v42 = vpop.f32.mrf.mxu3  ;;  %v13651_v54 = vld [vmem:[#allocation139_spill] sm:$0xff] }
 0xc95   : > { %v8039_v56 = vpop.f32.mrf.mxu0 }
 0xc96   : > { %v7949_v25 = vadd.f32 %v7948_v42, %v7860_v2  ;;  %v8128_v61 = vpop.f32.mrf.mxu1 }
 0xc98   : > { %v8038_v7 = vadd.f32 %v8037_v46, %v7949_v25 }
 0xc9a   : > { %v10598_v18 = vpop.eup %10597  ;;  %v8127_v29 = vadd.f32 %v8126_v44, %v8038_v7 }
 0xc9b   : > { %8234 = vst [vmem:[%s13036_s25 + $0x8] sm:$0xff] %v10598_v18  ;;  %v7861_v53 = vpop.f32.mrf.mxu2 }
 0xc9c   : > { %10599 = vtanh.f32 %v8127_v29  ;;  %v7862_v45 = vadd.f32 %v7861_v53, %v12886_v8  ;;  %v7950_v22 = vpop.f32.mrf.mxu3  ;;  %v13652_v29 = vld [vmem:[#allocation125_spill] sm:$0xff] }
 0xc9d   : > { %v8042_v28 = vpop.f32.mrf.mxu0 }
 0xc9e   : > { %v7951_v49 = vadd.f32 %v7950_v22, %v7862_v45  ;;  %v8131_v31 = vpop.f32.mrf.mxu1 }
 0xca0   : > { %v8040_v62 = vadd.f32 %v8039_v56, %v7951_v49  ;;  %7903 = vmatmul.bf16.gmra.mxu2 %v13650_v21  ;;  %8081 = vmatmul.bf16.gmra.mxu0 %v12691_v33 }
 0xca1   : > { %7992 = vmatmul.bf16.gmra.mxu3 %v13651_v54  ;;  %8170 = vmatmul.bf16.gmra.mxu1 %v12822_v3 }
 0xca2   : > { %v10600_v46 = vpop.eup %10599  ;;  %v8129_v44 = vadd.f32 %v8128_v61, %v8040_v62 }
 0xca3   : > { %8235 = vst [vmem:[%s13036_s25 + $0x10] sm:$0xff] %v10600_v46  ;;  %v7864_v14 = vpop.f32.mrf.mxu2 }
 0xca4   : > { %10601 = vtanh.f32 %v8129_v44  ;;  %v7865_v8 = vadd.f32 %v7864_v14, %v12889_v40  ;;  %v7953_v59 = vpop.f32.mrf.mxu3  ;;  %v13653_v40 = vld [vmem:[#allocation140_spill] sm:$0xff] }
 0xca5   : > { %v8044_v58 = vpop.f32.mrf.mxu0 }
 0xca6   : > { %v7954_v60 = vadd.f32 %v7953_v59, %v7865_v8  ;;  %v8133_v9 = vpop.f32.mrf.mxu1 }
 0xca8   : > { %v8043_v5 = vadd.f32 %v8042_v28, %v7954_v60  ;;  %v13654_v60 = vld [vmem:[#allocation126_spill] sm:$0xff] }
 0xcaa   : > { %v10602_v2 = vpop.eup %10601  ;;  %v8132_v42 = vadd.f32 %v8131_v31, %v8043_v5 }
 0xcab   : > { %8236 = vst [vmem:[%s13036_s25 + $0x18] sm:$0xff] %v10602_v2  ;;  %v7866_v33 = vpop.f32.mrf.mxu2 }
 0xcac   : > { %10603 = vtanh.f32 %v8132_v42  ;;  %v7867_v3 = vadd.f32 %v7866_v33, %v12896_v39  ;;  %v7955_v56 = vpop.f32.mrf.mxu3 }
 0xcad   : > { %v8047_v25 = vpop.f32.mrf.mxu0 }
 0xcae   : > { %v7956_v61 = vadd.f32 %v7955_v56, %v7867_v3  ;;  %v8136_v7 = vpop.f32.mrf.mxu1 }
 0xcb0   : > { %v8045_v18 = vadd.f32 %v8044_v58, %v7956_v61  ;;  %7908 = vmatmul.bf16.gmra.mxu2 %v13652_v29  ;;  %8086 = vmatmul.bf16.gmra.mxu0 %v12699_v10 }
 0xcb1   : > { %7997 = vmatmul.bf16.gmra.mxu3 %v13653_v40  ;;  %8175 = vmatmul.bf16.gmra.mxu1 %v12830_v38 }
 0xcb2   : > { %v10604_v53 = vpop.eup %10603  ;;  %v8134_v45 = vadd.f32 %v8133_v9, %v8045_v18 }
 0xcb3   : > { %8237 = vst [vmem:[%s13036_s25 + $0x20] sm:$0xff] %v10604_v53  ;;  %v7869_v22 = vpop.f32.mrf.mxu2 }
 0xcb4   : > { %10605 = vtanh.f32 %v8134_v45  ;;  %v7870_v39 = vadd.f32 %v7869_v22, %v12899_v11  ;;  %v7958_v28 = vpop.f32.mrf.mxu3  ;;  %v13655_v11 = vld [vmem:[#allocation141_spill] sm:$0xff]  ;;  %v13656_v22 = vld [vmem:[#allocation127_spill] sm:$0xff] }
 0xcb5   : > { %v8049_v49 = vpop.f32.mrf.mxu0 }
 0xcb6   : > { %v7959_v31 = vadd.f32 %v7958_v28, %v7870_v39  ;;  %v8138_v62 = vpop.f32.mrf.mxu1 }
 0xcb8   : > { %v8048_v21 = vadd.f32 %v8047_v25, %v7959_v31 }
 0xcba   : > { %v10606_v54 = vpop.eup %10605  ;;  %v8137_v46 = vadd.f32 %v8136_v7, %v8048_v21 }
 0xcbb   : > { %8238 = vst [vmem:[%s13036_s25 + $0x28] sm:$0xff] %v10606_v54  ;;  %v7871_v10 = vpop.f32.mrf.mxu2 }
 0xcbc   : > { %10607 = vtanh.f32 %v8137_v46  ;;  %v7872_v38 = vadd.f32 %v7871_v10, %v12906_v41  ;;  %v7960_v44 = vpop.f32.mrf.mxu3 }
 0xcbd   : > { %v8052_v14 = vpop.f32.mrf.mxu0 }
 0xcbe   : > { %v7961_v8 = vadd.f32 %v7960_v44, %v7872_v38  ;;  %v8141_v59 = vpop.f32.mrf.mxu1 }
 0xcc0   : > { %v8050_v58 = vadd.f32 %v8049_v49, %v7961_v8  ;;  %7913 = vmatmul.bf16.gmra.mxu2 %v13654_v60  ;;  %8091 = vmatmul.bf16.gmra.mxu0 %v12707_v36  ;;  %v13658_v60 = vld [vmem:[#allocation128_spill] sm:$0xff] }
 0xcc1   : > { %8002 = vmatmul.bf16.gmra.mxu3 %v13655_v11  ;;  %8180 = vmatmul.bf16.gmra.mxu1 %v12838_v17 }
 0xcc2   : > { %v10608_v9 = vpop.eup %10607  ;;  %v8139_v5 = vadd.f32 %v8138_v62, %v8050_v58 }
 0xcc3   : > { %8239 = vst [vmem:[%s13036_s25 + $0x30] sm:$0xff] %v10608_v9  ;;  %v7874_v2 = vpop.f32.mrf.mxu2 }
 0xcc4   : > { %10609 = vtanh.f32 %v8139_v5  ;;  %v7875_v41 = vadd.f32 %v7874_v2, %v12909_v15  ;;  %v7963_v42 = vpop.f32.mrf.mxu3  ;;  %v13657_v15 = vld [vmem:[#allocation142_spill] sm:$0xff] }
 0xcc5   : > { %v8054_v33 = vpop.f32.mrf.mxu0 }
 0xcc6   : > { %v7964_v3 = vadd.f32 %v7963_v42, %v7875_v41  ;;  %v8143_v56 = vpop.f32.mrf.mxu1 }
 0xcc8   : > { %v8053_v25 = vadd.f32 %v8052_v14, %v7964_v3 }
 0xcca   : > { %v10610_v61 = vpop.eup %10609  ;;  %v8142_v7 = vadd.f32 %v8141_v59, %v8053_v25 }
 0xccb   : > { %8240 = vst [vmem:[%s13036_s25 + $0x38] sm:$0xff] %v10610_v61  ;;  %v7876_v36 = vpop.f32.mrf.mxu2 }
 0xccc   : > { %10611 = vtanh.f32 %v8142_v7  ;;  %v7877_v17 = vadd.f32 %v7876_v36, %v12916_v4  ;;  %v7965_v18 = vpop.f32.mrf.mxu3 }
 0xccd   : > { %v8057_v29 = vpop.f32.mrf.mxu0 }
 0xcce   : > { %v7966_v40 = vadd.f32 %v7965_v18, %v7877_v17  ;;  %v8146_v53 = vpop.f32.mrf.mxu1 }
 0xcd0   : > { %v8055_v45 = vadd.f32 %v8054_v33, %v7966_v40  ;;  %7918 = vmatmul.bf16.gmra.mxu2 %v13656_v22  ;;  %8096 = vmatmul.bf16.gmra.mxu0 %v12715_v0 }
 0xcd1   : > { %8007 = vmatmul.bf16.gmra.mxu3 %v13657_v15  ;;  %8185 = vmatmul.bf16.gmra.mxu1 %v12846_v50 }
 0xcd2   : > { %v10612_v39 = vpop.eup %10611  ;;  %v8144_v28 = vadd.f32 %v8143_v56, %v8055_v45 }
 0xcd3   : > { %8241 = vst [vmem:[%s13036_s25 + $0x40] sm:$0xff] %v10612_v39  ;;  %v7879_v49 = vpop.f32.mrf.mxu2 }
 0xcd4   : > { %10613 = vtanh.f32 %v8144_v28  ;;  %v7880_v4 = vadd.f32 %v7879_v49, %v12919_v1  ;;  %v7968_v31 = vpop.f32.mrf.mxu3  ;;  %v13659_v1 = vld [vmem:[#allocation143_spill] sm:$0xff] }
 0xcd5   : > { %v8059_v62 = vpop.f32.mrf.mxu0 }
 0xcd6   : > { %v7969_v21 = vadd.f32 %v7968_v31, %v7880_v4  ;;  %v8148_v54 = vpop.f32.mrf.mxu1 }
 0xcd8   : > { %v8058_v46 = vadd.f32 %v8057_v29, %v7969_v21  ;;  %v13660_v29 = vld [vmem:[#allocation112_spill] sm:$0xff] }
 0xcda   : > { %v10614_v10 = vpop.eup %10613  ;;  %v8147_v38 = vadd.f32 %v8146_v53, %v8058_v46 }
 0xcdb   : > { %8242 = vst [vmem:[%s13036_s25 + $0x48] sm:$0xff] %v10614_v10  ;;  %v7881_v0 = vpop.f32.mrf.mxu2 }
 0xcdc   : > { %10615 = vtanh.f32 %v8147_v38  ;;  %v7882_v50 = vadd.f32 %v7881_v0, %v12926_v16  ;;  %v7970_v44 = vpop.f32.mrf.mxu3 }
 0xcdd   : > { %v8062_v14 = vpop.f32.mrf.mxu0 }
 0xcde   : > { %v7971_v8 = vadd.f32 %v7970_v44, %v7882_v50  ;;  %v8151_v59 = vpop.f32.mrf.mxu1  ;;  %v13662_v50 = vld [vmem:[#allocation23_spill] sm:$0xff] }
 0xce0   : > { %v8060_v58 = vadd.f32 %v8059_v62, %v7971_v8  ;;  %7923 = vmatmul.bf16.gmra.mxu2 %v13658_v60  ;;  %8101 = vmatmul.bf16.gmra.mxu0 %v12723_v47 }
 0xce1   : > { %8012 = vmatmul.bf16.gmra.mxu3 %v13659_v1  ;;  %8190 = vmatmul.bf16.gmra.mxu1 %v12854_v32 }
 0xce2   : > { %v10616_v11 = vpop.eup %10615  ;;  %v8149_v9 = vadd.f32 %v8148_v54, %v8060_v58 }
 0xce3   : > { %8243 = vst [vmem:[%s13036_s25 + $0x50] sm:$0xff] %v10616_v11  ;;  %v7884_v5 = vpop.f32.mrf.mxu2 }
 0xce4   : > { %10617 = vtanh.f32 %v8149_v9  ;;  %v7885_v16 = vadd.f32 %v7884_v5, %v12929_v35  ;;  %v7973_v2 = vpop.f32.mrf.mxu3  ;;  %v13661_v35 = vld [vmem:[#allocation145_spill] sm:$0xff] }
 0xce5   : > { %v8064_v41 = vpop.f32.mrf.mxu0 }
 0xce6   : > { %v7974_v42 = vadd.f32 %v7973_v2, %v7885_v16  ;;  %v8153_v33 = vpop.f32.mrf.mxu1 }
 0xce8   : > { %v8063_v3 = vadd.f32 %v8062_v14, %v7974_v42 }
 0xcea   : > { %v10618_v56 = vpop.eup %10617  ;;  %v8152_v25 = vadd.f32 %v8151_v59, %v8063_v3 }
 0xceb   : > { %8244 = vst [vmem:[%s13036_s25 + $0x58] sm:$0xff] %v10618_v56  ;;  %v7886_v47 = vpop.f32.mrf.mxu2 }
 0xcec   : > { %10619 = vtanh.f32 %v8152_v25  ;;  %v7887_v32 = vadd.f32 %v7886_v47, %v12936_v30  ;;  %v7975_v61 = vpop.f32.mrf.mxu3  ;;  %v13663_v25 = vld [vmem:[#allocation36_spill] sm:$0xff] }
 0xced   : > { %v8067_v7 = vpop.f32.mrf.mxu0 }
 0xcee   : > { %v7976_v36 = vadd.f32 %v7975_v61, %v7887_v32  ;;  %v8156_v17 = vpop.f32.mrf.mxu1 }
 0xcf0   : > { %v8065_v18 = vadd.f32 %v8064_v41, %v7976_v36  ;;  %7928 = vmatmul.bf16.gmra.mxu2 %v13660_v29  ;;  %8106 = vmatmul.bf16.gmra.mxu0 %v12734_v48 }
 0xcf1   : > { %8017 = vmatmul.bf16.gmra.mxu3 %v13661_v35  ;;  %8195 = vmatmul.bf16.gmra.mxu1 %v12867_v19 }
 0xcf2   : > { %v10620_v40 = vpop.eup %10619  ;;  %v8154_v53 = vadd.f32 %v8153_v33, %v8065_v18 }
 0xcf3   : > { %8245 = vst [vmem:[%s13036_s25 + $0x60] sm:$0xff] %v10620_v40  ;;  %v7889_v45 = vpop.f32.mrf.mxu2 }
 0xcf4   : > { %10621 = vtanh.f32 %v8154_v53  ;;  %v7890_v30 = vadd.f32 %v7889_v45, %v12939_v51  ;;  %v7978_v22 = vpop.f32.mrf.mxu3 }
 0xcf5   : > { %v8069_v15 = vpop.f32.mrf.mxu0 }
 0xcf6   : > { %v7979_v39 = vadd.f32 %v7978_v22, %v7890_v30  ;;  %v8158_v28 = vpop.f32.mrf.mxu1 }
 0xcf8   : > { %v8068_v49 = vadd.f32 %v8067_v7, %v7979_v39 }
 0xcfa   : > { %v10622_v4 = vpop.eup %10621  ;;  %v8157_v48 = vadd.f32 %v8156_v17, %v8068_v49 }
 0xcfb   : > { %8246 = vst [vmem:[%s13036_s25 + $0x68] sm:$0xff] %v10622_v4  ;;  %v7891_v31 = vpop.f32.mrf.mxu2 }
 0xcfc   : > { %10623 = vtanh.f32 %v8157_v48  ;;  %v7892_v19 = vadd.f32 %v7891_v31, %v12946_v13  ;;  %v7980_v62 = vpop.f32.mrf.mxu3 }
 0xcfd   : > { %v8072_v21 = vpop.f32.mrf.mxu0 }
 0xcfe   : > { %v7981_v54 = vadd.f32 %v7980_v62, %v7892_v19  ;;  %v8161_v46 = vpop.f32.mrf.mxu1 }
 0xd00   : > { %v8070_v10 = vadd.f32 %v8069_v15, %v7981_v54 }
 0xd02   : > { %v10624_v51 = vpop.eup %10623  ;;  %v8159_v38 = vadd.f32 %v8158_v28, %v8070_v10 }
 0xd03   : > { %8247 = vst [vmem:[%s13036_s25 + $0x70] sm:$0xff] %v10624_v51  ;;  %v7894_v0 = vpop.f32.mrf.mxu2 }
 0xd04   : > { %10625 = vtanh.f32 %v8159_v38  ;;  %v7895_v44 = vadd.f32 %v7894_v0, %v13662_v50  ;;  %v7983_v14 = vpop.f32.mrf.mxu3 }
 0xd05   : > { %v8074_v8 = vpop.f32.mrf.mxu0 }
 0xd06   : > { %v7984_v59 = vadd.f32 %v7983_v14, %v7895_v44  ;;  %v8163_v58 = vpop.f32.mrf.mxu1 }
 0xd08   : > { %v8073_v60 = vadd.f32 %v8072_v21, %v7984_v59 }
 0xd0a   : > { %v10626_v13 = vpop.eup %10625  ;;  %v8162_v1 = vadd.f32 %v8161_v46, %v8073_v60 }
 0xd0b   : > { %8248 = vst [vmem:[%s13036_s25 + $0x78] sm:$0xff] %v10626_v13  ;;  %v7896_v11 = vpop.f32.mrf.mxu2 }
 0xd0c   : > { %10627 = vtanh.f32 %v8162_v1  ;;  %v7897_v9 = vadd.f32 %v7896_v11, %v12956_v37  ;;  %v7985_v5 = vpop.f32.mrf.mxu3 }
 0xd0d   : > { %v8077_v16 = vpop.f32.mrf.mxu0 }
 0xd0e   : > { %v7986_v2 = vadd.f32 %v7985_v5, %v7897_v9  ;;  %v8166_v41 = vpop.f32.mrf.mxu1 }
 0xd10   : > { %v8075_v42 = vadd.f32 %v8074_v8, %v7986_v2 }
 0xd12   : > { %v10628_v33 = vpop.eup %10627  ;;  %v8164_v3 = vadd.f32 %v8163_v58, %v8075_v42 }
 0xd13   : > { %8249 = vst [vmem:[%s13036_s25 + $0x80] sm:$0xff] %v10628_v33  ;;  %v7899_v56 = vpop.f32.mrf.mxu2 }
 0xd14   : > { %10629 = vtanh.f32 %v8164_v3  ;;  %v7900_v47 = vadd.f32 %v7899_v56, %v13663_v25  ;;  %v7988_v32 = vpop.f32.mrf.mxu3 }
 0xd15   : > { %v8079_v61 = vpop.f32.mrf.mxu0 }
 0xd16   : > { %v7989_v7 = vadd.f32 %v7988_v32, %v7900_v47  ;;  %v8168_v36 = vpop.f32.mrf.mxu1 }
 0xd18   : > { %v8078_v17 = vadd.f32 %v8077_v16, %v7989_v7 }
 0xd1a   : > { %v10630_v37 = vpop.eup %10629  ;;  %v8167_v18 = vadd.f32 %v8166_v41, %v8078_v17 }
 0xd1b   : > { %8250 = vst [vmem:[%s13036_s25 + $0x88] sm:$0xff] %v10630_v37  ;;  %v7901_v29 = vpop.f32.mrf.mxu2 }
 0xd1c   : > { %10631 = vtanh.f32 %v8167_v18  ;;  %v7902_v35 = vadd.f32 %v7901_v29, %v12966_v20  ;;  %v7990_v40 = vpop.f32.mrf.mxu3 }
 0xd1d   : > { %v8082_v53 = vpop.f32.mrf.mxu0 }
 0xd1e   : > { %v7991_v45 = vadd.f32 %v7990_v40, %v7902_v35  ;;  %v8171_v30 = vpop.f32.mrf.mxu1 }
 0xd20   : > { %v8080_v22 = vadd.f32 %v8079_v61, %v7991_v45 }
 0xd22   : > { %v10632_v15 = vpop.eup %10631  ;;  %v8169_v39 = vadd.f32 %v8168_v36, %v8080_v22 }
 0xd23   : > { %8251 = vst [vmem:[%s13036_s25 + $0x90] sm:$0xff] %v10632_v15  ;;  %v7904_v28 = vpop.f32.mrf.mxu2 }
 0xd24   : > { %10633 = vtanh.f32 %v8169_v39  ;;  %v7905_v49 = vadd.f32 %v7904_v28, %v12969_v6  ;;  %v7993_v4 = vpop.f32.mrf.mxu3 }
 0xd25   : > { %v8084_v48 = vpop.f32.mrf.mxu0 }
 0xd26   : > { %v7994_v31 = vadd.f32 %v7993_v4, %v7905_v49  ;;  %v8173_v19 = vpop.f32.mrf.mxu1 }
 0xd28   : > { %v8083_v62 = vadd.f32 %v8082_v53, %v7994_v31 }
 0xd2a   : > { %v10634_v20 = vpop.eup %10633  ;;  %v8172_v21 = vadd.f32 %v8171_v30, %v8083_v62 }
 0xd2b   : > { %8252 = vst [vmem:[%s13036_s25 + $0x98] sm:$0xff] %v10634_v20  ;;  %v7906_v54 = vpop.f32.mrf.mxu2 }
 0xd2c   : > { %10635 = vtanh.f32 %v8172_v21  ;;  %v7907_v46 = vadd.f32 %v7906_v54, %v12976_v63  ;;  %v7995_v10 = vpop.f32.mrf.mxu3 }
 0xd2d   : > { %v8087_v51 = vpop.f32.mrf.mxu0 }
 0xd2e   : > { %v7996_v38 = vadd.f32 %v7995_v10, %v7907_v46  ;;  %v8176_v0 = vpop.f32.mrf.mxu1 }
 0xd30   : > { %v8085_v50 = vadd.f32 %v8084_v48, %v7996_v38 }
 0xd32   : > { %v10636_v6 = vpop.eup %10635  ;;  %v8174_v44 = vadd.f32 %v8173_v19, %v8085_v50 }
 0xd33   : > { %8253 = vst [vmem:[%s13036_s25 + $0xa0] sm:$0xff] %v10636_v6  ;;  %v7909_v14 = vpop.f32.mrf.mxu2 }
 0xd34   : > { %10637 = vtanh.f32 %v8174_v44  ;;  %v7910_v8 = vadd.f32 %v7909_v14, %v12979_v26  ;;  %v7998_v59 = vpop.f32.mrf.mxu3 }
 0xd35   : > { %v8089_v58 = vpop.f32.mrf.mxu0 }
 0xd36   : > { %v7999_v60 = vadd.f32 %v7998_v59, %v7910_v8  ;;  %v8178_v13 = vpop.f32.mrf.mxu1 }
 0xd38   : > { %v8088_v1 = vadd.f32 %v8087_v51, %v7999_v60 }
 0xd3a   : > { %v10638_v63 = vpop.eup %10637  ;;  %v8177_v11 = vadd.f32 %v8176_v0, %v8088_v1 }
 0xd3b   : > { %8254 = vst [vmem:[%s13036_s25 + $0xa8] sm:$0xff] %v10638_v63  ;;  %v7911_v9 = vpop.f32.mrf.mxu2 }
 0xd3c   : > { %10639 = vtanh.f32 %v8177_v11  ;;  %v7912_v5 = vadd.f32 %v7911_v9, %v12986_v55  ;;  %v8000_v16 = vpop.f32.mrf.mxu3 }
 0xd3d   : > { %v8092_v2 = vpop.f32.mrf.mxu0 }
 0xd3e   : > { %v8001_v41 = vadd.f32 %v8000_v16, %v7912_v5  ;;  %v8181_v42 = vpop.f32.mrf.mxu1 }
 0xd40   : > { %v8090_v33 = vadd.f32 %v8089_v58, %v8001_v41 }
 0xd42   : > { %v10640_v26 = vpop.eup %10639  ;;  %v8179_v3 = vadd.f32 %v8178_v13, %v8090_v33 }
 0xd43   : > { %8255 = vst [vmem:[%s13036_s25 + $0xb0] sm:$0xff] %v10640_v26  ;;  %v7914_v56 = vpop.f32.mrf.mxu2 }
 0xd44   : > { %10641 = vtanh.f32 %v8179_v3  ;;  %v7915_v25 = vadd.f32 %v7914_v56, %v12989_v23  ;;  %v8003_v47 = vpop.f32.mrf.mxu3 }
 0xd45   : > { %v8094_v32 = vpop.f32.mrf.mxu0 }
 0xd46   : > { %v8004_v61 = vadd.f32 %v8003_v47, %v7915_v25  ;;  %v8183_v7 = vpop.f32.mrf.mxu1 }
 0xd48   : > { %v8093_v36 = vadd.f32 %v8092_v2, %v8004_v61 }
 0xd4a   : > { %v10642_v55 = vpop.eup %10641  ;;  %v8182_v17 = vadd.f32 %v8181_v42, %v8093_v36 }
 0xd4b   : > { %8256 = vst [vmem:[%s13036_s25 + $0xb8] sm:$0xff] %v10642_v55  ;;  %v7916_v37 = vpop.f32.mrf.mxu2 }
 0xd4c   : > { %10643 = vtanh.f32 %v8182_v17  ;;  %v7917_v18 = vadd.f32 %v7916_v37, %v12996_v52  ;;  %v8005_v29 = vpop.f32.mrf.mxu3 }
 0xd4d   : > { %v8097_v35 = vpop.f32.mrf.mxu0 }
 0xd4e   : > { %v8006_v40 = vadd.f32 %v8005_v29, %v7917_v18  ;;  %v8186_v53 = vpop.f32.mrf.mxu1 }
 0xd50   : > { %v8095_v45 = vadd.f32 %v8094_v32, %v8006_v40 }
 0xd52   : > { %v10644_v23 = vpop.eup %10643  ;;  %v8184_v30 = vadd.f32 %v8183_v7, %v8095_v45 }
 0xd53   : > { %8257 = vst [vmem:[%s13036_s25 + $0xc0] sm:$0xff] %v10644_v23  ;;  %v7919_v22 = vpop.f32.mrf.mxu2 }
 0xd54   : > { %10645 = vtanh.f32 %v8184_v30  ;;  %v7920_v15 = vadd.f32 %v7919_v22, %v12999_v43  ;;  %v8008_v39 = vpop.f32.mrf.mxu3 }
 0xd55   : > { %v8099_v49 = vpop.f32.mrf.mxu0 }
 0xd56   : > { %v8009_v28 = vadd.f32 %v8008_v39, %v7920_v15  ;;  %v8188_v48 = vpop.f32.mrf.mxu1 }
 0xd58   : > { %v8098_v4 = vadd.f32 %v8097_v35, %v8009_v28 }
 0xd5a   : > { %v10646_v52 = vpop.eup %10645  ;;  %v8187_v31 = vadd.f32 %v8186_v53, %v8098_v4 }
 0xd5b   : > { %8258 = vst [vmem:[%s13036_s25 + $0xc8] sm:$0xff] %v10646_v52  ;;  %v7921_v19 = vpop.f32.mrf.mxu2 }
 0xd5c   : > { %10647 = vtanh.f32 %v8187_v31  ;;  %v7922_v62 = vadd.f32 %v7921_v19, %v13006_v12  ;;  %v8010_v20 = vpop.f32.mrf.mxu3 }
 0xd5d   : > { %v8102_v46 = vpop.f32.mrf.mxu0 }
 0xd5e   : > { %v8011_v21 = vadd.f32 %v8010_v20, %v7922_v62  ;;  %v8191_v51 = vpop.f32.mrf.mxu1 }
 0xd60   : > { %v8100_v54 = vadd.f32 %v8099_v49, %v8011_v21 }
 0xd62   : > { %v10648_v10 = vpop.eup %10647  ;;  %v8189_v43 = vadd.f32 %v8188_v48, %v8100_v54 }
 0xd63   : > { %8259 = vst [vmem:[%s13036_s25 + $0xd0] sm:$0xff] %v10648_v10  ;;  %v7924_v38 = vpop.f32.mrf.mxu2 }
 0xd64   : > { %10649 = vtanh.f32 %v8189_v43  ;;  %v7925_v0 = vadd.f32 %v7924_v38, %v13009_v27  ;;  %v8013_v50 = vpop.f32.mrf.mxu3 }
 0xd65   : > { %v8104_v12 = vpop.f32.mrf.mxu0 }
 0xd66   : > { %v8014_v6 = vadd.f32 %v8013_v50, %v7925_v0  ;;  %v8193_v13 = vpop.f32.mrf.mxu1 }
 0xd68   : > { %v8103_v44 = vadd.f32 %v8102_v46, %v8014_v6 }
 0xd6a   : > { %v10650_v14 = vpop.eup %10649  ;;  %v8192_v8 = vadd.f32 %v8191_v51, %v8103_v44 }
 0xd6b   : > { %8260 = vst [vmem:[%s13036_s25 + $0xd8] sm:$0xff] %v10650_v14  ;;  %v7926_v59 = vpop.f32.mrf.mxu2 }
 0xd6c   : > { %10651 = vtanh.f32 %v8192_v8  ;;  %v7927_v58 = vadd.f32 %v7926_v59, %v13016_v34  ;;  %v8015_v60 = vpop.f32.mrf.mxu3 }
 0xd6d   : > { %v8107_v2 = vpop.f32.mrf.mxu0 }
 0xd6e   : > { %v8016_v1 = vadd.f32 %v8015_v60, %v7927_v58  ;;  %v8196_v42 = vpop.f32.mrf.mxu1 }
 0xd70   : > { %v8105_v63 = vadd.f32 %v8104_v12, %v8016_v1 }
 0xd72   : > { %v10652_v11 = vpop.eup %10651  ;;  %v8194_v9 = vadd.f32 %v8193_v13, %v8105_v63 }
 0xd73   : > { %8261 = vst [vmem:[%s13036_s25 + $0xe0] sm:$0xff] %v10652_v11  ;;  %v7929_v27 = vpop.f32.mrf.mxu2 }
 0xd74   : > { %10653 = vtanh.f32 %v8194_v9  ;;  %v7930_v5 = vadd.f32 %v7929_v27, %v13019_v57  ;;  %v8018_v16 = vpop.f32.mrf.mxu3 }
 0xd75   : > { %v8109_v32 = vpop.f32.mrf.mxu0 }
 0xd76   : > { %v8019_v41 = vadd.f32 %v8018_v16, %v7930_v5  ;;  %v8198_v61 = vpop.f32.mrf.mxu1 }
 0xd78   : > { %v8108_v33 = vadd.f32 %v8107_v2, %v8019_v41 }
 0xd7a   : > { %v10654_v34 = vpop.eup %10653  ;;  %v8197_v26 = vadd.f32 %v8196_v42, %v8108_v33 }
 0xd7b   : > { %8262 = vst [vmem:[%s13036_s25 + $0xe8] sm:$0xff] %v10654_v34  ;;  %v7931_v3 = vpop.f32.mrf.mxu2 }
 0xd7c   : > { %10655 = vtanh.f32 %v8197_v26  ;;  %v7932_v56 = vadd.f32 %v7931_v3, %v13026_v24  ;;  %v8020_v25 = vpop.f32.mrf.mxu3 }
 0xd7e   : > { %v8021_v47 = vadd.f32 %v8020_v25, %v7932_v56 }
 0xd80   : > { %v8110_v57 = vadd.f32 %v8109_v32, %v8021_v47 }
 0xd82   : > { %v10656_v7 = vpop.eup %10655  ;;  %v8199_v36 = vadd.f32 %v8198_v61, %v8110_v57 }
 0xd83   : > { %8263 = vst [vmem:[%s13036_s25 + $0xf0] sm:$0xff] %v10656_v7 }
 0xd84   : > { %10657 = vtanh.f32 %v8199_v36 }
 0xd8a   : > { %v10658_v24 = vpop.eup %10657 }
 0xd8b   : > { %8264 = vst [vmem:[%s13036_s25 + $0xf8] sm:$0xff] %v10658_v24 }
 0xd8c   : > { %10930 = shalt.err (!%p10927_p9)
}
 0xd8d   : > { %s11002_s15 = smov 128   ;;  %s11003_s25 = smov 8  }
 0xd8e   : > { %10497 = dma.vmem_to_hbm [thread:$0]  (%p11153_p13), %s8279_s22, 4096, %s8281_s26, %s8266_s18, %s11002_s15, %s11002_s15, %s11003_s25  }
 0xd8f PF: > { %s8295_s14 = sand.u32 1, %s10973_s30   ;;  %p13664_p10 = scmp.ge.s32.totalorder %s10985_s12, 2 }
 0xd90   : > { %s8296_s29 = scalar_lea.sflag [#allocation4], %s8295_s14 }
 0xd91   : > { %p10526_p11 = pnand %p13664_p10, %p11158_p4 }
 0xd93   : > { %p10527_p0 = pneg %p10526_p11 }
 0xd95   : > { %10968 = dma.done.wait (%p10527_p0), %s8296_s29, 4096  }
 0xd96   : > { %10970 = vsyncadd (%p10527_p0), %s8296_s29, 4294963200  ;;  %p26_p2 = scmp.ge.s32.totalorder %s11133_s13, 4   ;;  %s13665_s30 = smov %s10977_s10 }
 0xd97   : > { %s13666_s10 = smov %s10981_s11  ;;  %s13667_s11 = smov %s11145_s20 }
 0xd98   : > { %s13668_s12 = smov %s11133_s13  ;;  %28 = sbr.rel (!%p26_p2) target bundleno = 13 (0xd), region = 129 }
 0xd9d   :  { %8302 = vsyncpa [#allocation3], 1 }
 0xd9e   :  { %8304 = vsyncpa [#allocation3 + $0x1], 1 }
 0xd9f   :  { %8305 = vsyncpa [#allocation6], 1 }
 0xda0   :  { %8306 = vsyncpa [#allocation9], 1 }
 0xda1   :  { %8307 = vsyncpa [#allocation12], 1 }
 0xda2   :  { %8308 = vsyncpa [#allocation15], 1 }
 0xda3   :  { %8309 = vsyncpa [#allocation4], 1 }
 0xda4   :  { %8311 = vsyncpa [#allocation4 + $0x1], 1 }

</bundles_post_ra>
